<compile_context>
chip_gen: v6e
topology: v6e:2x2x1
jax: 0.10.0
libtpu: 0.0.40
codegen_flags: <defaults>
</compile_context>

<pallas_src>
import functools
import math

import numpy as np
import jax
import jax.numpy as jnp
from jax import lax
from jax.experimental import pallas as pl
from jax.experimental.pallas import tpu as pltpu


# -----------------------------------------------------------------------------
# Static hierarchy / selector structure (mirrors SequoiaAttention with mask=True).
# -----------------------------------------------------------------------------
def build_sequoia_structure(n, k):
    L = math.ceil(math.log(n) / math.log(k)) + 1
    L_rel = [0] + [math.ceil(n / k ** i) for i in range(L)]
    L_idx = np.cumsum(np.array(L_rel)).tolist()
    n_tot = int(L_idx[-1])

    def get_selectors(l):
        queries = range(L_rel[l + 1])
        ancestors = None
        children = None

        def get_ancestor(j, i):  # masked branch (mask is hardcoded True in forward)
            if (j + 1) / L_rel[l + 2] <= i / L_rel[l + 1]:
                return L_idx[l + 1] + j
            return 0

        def get_sibling(s, i):
            rel = min(i // k * k + s, L_rel[l + 1] - 1)
            if rel / L_rel[l + 1] <= i / L_rel[l + 1]:
                return L_idx[l] + rel
            return 0

        def get_child(c, i):
            rel = min(i * k + c, L_rel[l] - 1)
            if rel / L_rel[l] <= i / L_rel[l + 1]:
                return L_idx[l - 1] + rel
            return 0

        if l < L - 1:
            ancestors = np.array(
                [[get_ancestor(j, i) for j in range(L_rel[l + 2])] for i in queries],
                dtype=np.int64)
        siblings = np.array(
            [[get_sibling(s, i) for s in range(k)] for i in queries], dtype=np.int64)
        if l >= 1:
            children = np.array(
                [[get_child(c, i) for c in range(k)] for i in queries], dtype=np.int64)
        return ancestors, siblings, children

    return L, L_rel, L_idx, n_tot, get_selectors


def build_count_tables(n, k):
    """Per (level, relation) slot: a dense count matrix over the relation's
    contiguous key-level span [ks, ks+nk) and a (n_l, 1) count column for the
    masked key 0.  Softmax over duplicated selector entries is identical to
    exp(score) weighted by these multiplicities."""
    L, L_rel, L_idx, n_tot, get_selectors = build_sequoia_structure(n, k)
    cnt_list, cnt0_list = [], []
    level_meta = []                       # (q_start, n_l, ((ks, nk, idx), ...))
    for l in range(L):                    # bottom-up order
        ancestors, siblings, children = get_selectors(l)
        n_l = int(L_rel[l + 1])
        rels = []
        if ancestors is not None:
            rels.append((ancestors, int(L_idx[l + 1]), int(L_rel[l + 2])))
        rels.append((siblings, int(L_idx[l]), int(L_rel[l + 1])))
        if children is not None:
            rels.append((children, int(L_idx[l - 1]), int(L_rel[l])))
        slots = []
        for sel, ks, nk in rels:
            cnt = np.zeros((n_l, nk), np.float32)
            cnt0 = np.zeros((n_l, 1), np.float32)
            for i in range(n_l):
                for g in sel[i]:
                    g = int(g)
                    if g == 0:            # masked (or legit) selection of global key 0
                        cnt0[i, 0] += 1.0
                    else:
                        cnt[i, g - ks] += 1.0
            slots.append((ks, nk, len(cnt_list)))
            cnt_list.append(cnt)
            cnt0_list.append(cnt0)
        level_meta.append((int(L_idx[l]), n_l, tuple(slots)))
    return n_tot, cnt_list, cnt0_list, tuple(level_meta)


# -----------------------------------------------------------------------------
# Fused Pallas kernel: fused QKV projection -> per-level sequoia attention -> ff.
# Grid = (batch,); one batch element per grid step.
# -----------------------------------------------------------------------------
def _attention_kernel(*refs, level_meta, num_head, head_dim, n_slots, hd):
    x_ref, wqkv_ref, bqkv_ref, wo_ref, bo_ref = refs[:5]
    cnt_refs = refs[5:5 + n_slots]
    cnt0_refs = refs[5 + n_slots:5 + 2 * n_slots]
    out_ref = refs[5 + 2 * n_slots]
    v_buf = refs[6 + 2 * n_slots]

    x = x_ref[0]                                                # (n_tot, dim)

    # Fused Q|K|V projection.  1/sqrt(head_dim) is already folded into W_q / b_q.
    qkv = jnp.dot(x, wqkv_ref[...], preferred_element_type=jnp.float32) + bqkv_ref[...]
    q = qkv[:, :hd]
    k = qkv[:, hd:2 * hd]
    v_buf[...] = qkv[:, 2 * hd:3 * hd]        # V updated in place, bottom-up

    # Heads are independent (disjoint v_buf column slices) -> head-outer loop,
    # per-head K slice hoisted out of the level loop.
    for h in range(num_head):
        hs = h * head_dim
        q_h = q[:, hs:hs + head_dim]                            # (n_tot, d)
        k_h = k[:, hs:hs + head_dim]                            # (n_tot, d)
        k0 = k_h[0:1, :]                                        # key 0 (masked target)

        for (q_start, n_l, slots) in level_meta:                # bottom-up levels
            q_lh = q_h[q_start:q_start + n_l, :]                # (n_l, d)
            # score vs global key 0 (VPU+XLU; avoids a degenerate N=1 matmul)
            s0 = jnp.sum(q_lh * k0, axis=-1, keepdims=True)     # (n_l, 1)
            v0 = v_buf[0:1, hs:hs + head_dim]                   # (1, d) current V[0]

            acc = jnp.zeros((n_l, head_dim), jnp.float32)
            for (ks, nk, idx) in slots:                         # <=3 active relations
                k_slot = k_h[ks:ks + nk, :]                     # (nk, d) key-level span
                if nk == 1:
                    s = jnp.sum(q_lh * k_slot, axis=-1, keepdims=True)
                else:
                    s = lax.dot_general(q_lh, k_slot, (((1,), (1,)), ((), ())),
                                        preferred_element_type=jnp.float32)
                m = jnp.maximum(jnp.max(s, axis=-1, keepdims=True), s0)
                # softmax over duplicated selector slots == exp * multiplicity
                w = jnp.exp(s - m) * cnt_refs[idx][...]         # (n_l, nk)
                w0 = jnp.exp(s0 - m) * cnt0_refs[idx][...]      # (n_l, 1)
                denom = jnp.sum(w, axis=-1, keepdims=True) + w0
                v_slot = v_buf[ks:ks + nk, hs:hs + head_dim]    # (nk, d)
                if nk == 1:
                    numer = w * v_slot + w0 * v0
                else:
                    numer = jnp.dot(w, v_slot,
                                    preferred_element_type=jnp.float32) + w0 * v0
                # normalize AFTER the PV matmul; constant /3 folded into the
                # (n_l,1) approximate reciprocal (EUP slot has slack)
                acc = acc + numer * pl.reciprocal(denom * 3.0, approx=True)

            v_buf[q_start:q_start + n_l, hs:hs + head_dim] = acc

    # combine_heads is the identity in this flat column layout; output Linear.
    o = jnp.dot(v_buf[...], wo_ref[...], preferred_element_type=jnp.float32) + bo_ref[...]
    out_ref[0] = o.astype(out_ref.dtype)


def sequoia_attention_forward(x, params, *, n, k, num_head, head_dim):
    """x: (B, n_tot, dim) f32.  params: (wq, bq, wk, bk, wv, bv, wo, bo) with weights
    pre-transposed to (in, out).  Returns (B, n_tot, dim) f32.  The `mask` argument
    of the torch module is ignored: SequoiaAttention hardcodes mask=True."""
    wq, bq, wk, bk, wv, bv, wo, bo = params
    B, n_tot_in, dim = x.shape
    hd = num_head * head_dim

    n_tot, cnt_np, cnt0_np, level_meta = build_count_tables(n, k)
    assert n_tot_in == n_tot, (n_tot_in, n_tot)
    n_slots = len(cnt_np)

    # Fold the attention scale into W_q / b_q; fuse QKV into one wide matmul.
    scale = 1.0 / math.sqrt(head_dim)
    wqkv = jnp.concatenate([wq * scale, wk, wv], axis=1)        # (dim, 3*hd)
    bqkv = jnp.concatenate([bq * scale, bk, bv], axis=1)        # (1, 3*hd)

    cnt = [jnp.asarray(c) for c in cnt_np]
    cnt0 = [jnp.asarray(c) for c in cnt0_np]

    kernel = functools.partial(_attention_kernel, level_meta=level_meta,
                               num_head=num_head, head_dim=head_dim,
                               n_slots=n_slots, hd=hd)

    def fixed(a):   # weights / count tables stay VMEM-resident across grid steps
        return pl.BlockSpec(a.shape, lambda b, _nd=a.ndim: (0,) * _nd)

    in_specs = ([pl.BlockSpec((1, n_tot, dim), lambda b: (b, 0, 0)),   # X
                 fixed(wqkv), fixed(bqkv), fixed(wo), fixed(bo)]
                + [fixed(c) for c in cnt]
                + [fixed(c) for c in cnt0])

    return pl.pallas_call(
        kernel,
        out_shape=jax.ShapeDtypeStruct((B, n_tot, dim), jnp.float32),
        grid_spec=pltpu.PrefetchScalarGridSpec(
            num_scalar_prefetch=0,
            grid=(B,),
            in_specs=in_specs,
            out_specs=pl.BlockSpec((1, n_tot, dim), lambda b: (b, 0, 0)),
            scratch_shapes=[pltpu.VMEM((n_tot, hd), jnp.float32)],     # in-place V
        ),
        compiler_params=pltpu.CompilerParams(
            dimension_semantics=("parallel",),        # batch axis -> both TCs on v7x
            vmem_limit_bytes=48 * 1024 * 1024,        # > v5e's 16 MiB default scope
        ),
    )(x, wqkv, bqkv, wo, bo, *cnt, *cnt0)
    # TODO(synk): only seq_mode='bottom-up' and the masked (mask=True) path are
    # implemented — that is what the given config / forward actually exercises.


# -----------------------------------------------------------------------------
# Pure-JAX reference (direct port of the PyTorch module) for correctness check.
# -----------------------------------------------------------------------------
def reference_attention(x, params, *, n, k, num_head, head_dim):
    wq, bq, wk, bk, wv, bv, wo, bo = params
    B, n_tot, dim = x.shape
    hd = num_head * head_dim
    PREC = jax.lax.Precision.HIGHEST
    L, L_rel, L_idx, n_tot2, get_selectors = build_sequoia_structure(n, k)
    assert n_tot == n_tot2

    def split(t):
        return t.reshape(B, n_tot, num_head, head_dim).transpose(0, 2, 1, 3)

    Q = split(jnp.dot(x, wq, precision=PREC) + bq)
    K = split(jnp.dot(x, wk, precision=PREC) + bk)
    V = split(jnp.dot(x, wv, precision=PREC) + bv)

    for l in range(L):                                   # bottom-up
        ancestors, siblings, children = get_selectors(l)
        qs, qe = L_idx[l], L_idx[l + 1]
        Ql = Q[:, :, qs:qe, :]

        def sdp(sel):
            keys = K[:, :, sel, :]
            vals = V[:, :, sel, :]
            inter = jnp.einsum('bhnd,bhnkd->bhnk', Ql, keys,
                               precision=PREC) / (head_dim ** 0.5)
            w = jax.nn.softmax(inter, axis=-1)
            return jnp.einsum('bhnk,bhnkd->bhnd', w, vals, precision=PREC)

        out = jnp.zeros_like(Ql)
        for sel in (ancestors, siblings, children):
            if sel is not None:
                out = out + sdp(sel)
        V = V.at[:, :, qs:qe, :].set(out / 3.0)

    attn = V.transpose(0, 2, 1, 3).reshape(B, n_tot, hd)
    return jnp.dot(attn, wo, precision=PREC) + bo


if __name__ == "__main__":
    # Shapes implied by config: transformer_dim=128, head_dim=128, num_head=4, k=8.
    # Small base sequence n=64 -> 3-level hierarchy, n_tot = 64 + 8 + 1 = 73,
    # exercising ancestors / siblings / children relations and the masked key-0 path.
    B, dim, num_head, head_dim, k_branch, n = 2, 128, 4, 128, 8, 64
    hd = num_head * head_dim
    _, _, _, n_tot, _ = build_sequoia_structure(n, k_branch)

    key = jax.random.PRNGKey(0)
    kx, kq, kk, kv, ko = jax.random.split(key, 5)

    def linear_init(rng, fan_in, fan_out):
        # torch.nn.Linear default init; weight stored transposed to (in, out).
        rw, rb = jax.random.split(rng)
        bound = 1.0 / math.sqrt(fan_in)
        w = jax.random.uniform(rw, (fan_in, fan_out), jnp.float32, -bound, bound)
        b = jax.random.uniform(rb, (1, fan_out), jnp.float32, -bound, bound)
        return w, b

    x = jax.random.normal(kx, (B, n_tot, dim), dtype=jnp.float32)
    wq, bq = linear_init(kq, dim, hd)
    wk_, bk_ = linear_init(kk, dim, hd)
    wv, bv = linear_init(kv, dim, hd)
    wo, bo = linear_init(ko, hd, dim)
    params = (wq, bq, wk_, bk_, wv, bv, wo, bo)

    out = sequoia_attention_forward(x, params, n=n, k=k_branch,
                                    num_head=num_head, head_dim=head_dim)
    out = jax.block_until_ready(out)

    ref = jax.block_until_ready(
        reference_attention(x, params, n=n, k=k_branch,
                            num_head=num_head, head_dim=head_dim))

    assert out.shape == (B, n_tot, dim)
    assert jnp.allclose(out, ref, atol=1e-2, rtol=1e-2)

    print("KERNEL_OK")
</pallas_src>

<mosaic_0001>
module attributes {stable_mosaic.version = 11 : i64} {
  func.func @_attention_kernel(%arg0: i32, %arg1: memref<1x73x128xf32, #tpu.memory_space<vmem>>, %arg2: memref<128x1536xf32, #tpu.memory_space<vmem>>, %arg3: memref<1x1536xf32, #tpu.memory_space<vmem>>, %arg4: memref<512x128xf32, #tpu.memory_space<vmem>>, %arg5: memref<1x128xf32, #tpu.memory_space<vmem>>, %arg6: memref<64x8xf32, #tpu.memory_space<vmem>>, %arg7: memref<64x64xf32, #tpu.memory_space<vmem>>, %arg8: memref<8x1xf32, #tpu.memory_space<vmem>>, %arg9: memref<8x8xf32, #tpu.memory_space<vmem>>, %arg10: memref<8x64xf32, #tpu.memory_space<vmem>>, %arg11: memref<1x1xf32, #tpu.memory_space<vmem>>, %arg12: memref<1x8xf32, #tpu.memory_space<vmem>>, %arg13: memref<64x1xf32, #tpu.memory_space<vmem>>, %arg14: memref<64x1xf32, #tpu.memory_space<vmem>>, %arg15: memref<8x1xf32, #tpu.memory_space<vmem>>, %arg16: memref<8x1xf32, #tpu.memory_space<vmem>>, %arg17: memref<8x1xf32, #tpu.memory_space<vmem>>, %arg18: memref<1x1xf32, #tpu.memory_space<vmem>>, %arg19: memref<1x1xf32, #tpu.memory_space<vmem>>, %arg20: memref<1x73x128xf32, #tpu.memory_space<vmem>>, %arg21: memref<73x512xf32, #tpu.memory_space<vmem>>) attributes {dimension_semantics = [#tpu.dimension_semantics<parallel>], iteration_bounds = array<i64: 2>, scalar_prefetch = 0 : i64, scratch_operands = 1 : i64, tpu.core_type = #tpu.core_type<tc>, window_params = [{transform_indices = @transform_0, window_bounds = array<i64: 1, 73, 128>}, {pipeline_mode = #tpu.pipeline_mode<synchronous>, transform_indices = @transform_1, window_bounds = array<i64: 128, 1536>}, {pipeline_mode = #tpu.pipeline_mode<synchronous>, transform_indices = @transform_2, window_bounds = array<i64: 1, 1536>}, {pipeline_mode = #tpu.pipeline_mode<synchronous>, transform_indices = @transform_3, window_bounds = array<i64: 512, 128>}, {pipeline_mode = #tpu.pipeline_mode<synchronous>, transform_indices = @transform_4, window_bounds = array<i64: 1, 128>}, {pipeline_mode = #tpu.pipeline_mode<synchronous>, transform_indices = @transform_5, window_bounds = array<i64: 64, 8>}, {pipeline_mode = #tpu.pipeline_mode<synchronous>, transform_indices = @transform_6, window_bounds = array<i64: 64, 64>}, {pipeline_mode = #tpu.pipeline_mode<synchronous>, transform_indices = @transform_7, window_bounds = array<i64: 8, 1>}, {pipeline_mode = #tpu.pipeline_mode<synchronous>, transform_indices = @transform_8, window_bounds = array<i64: 8, 8>}, {pipeline_mode = #tpu.pipeline_mode<synchronous>, transform_indices = @transform_9, window_bounds = array<i64: 8, 64>}, {pipeline_mode = #tpu.pipeline_mode<synchronous>, transform_indices = @transform_10, window_bounds = array<i64: 1, 1>}, {pipeline_mode = #tpu.pipeline_mode<synchronous>, transform_indices = @transform_11, window_bounds = array<i64: 1, 8>}, {pipeline_mode = #tpu.pipeline_mode<synchronous>, transform_indices = @transform_12, window_bounds = array<i64: 64, 1>}, {pipeline_mode = #tpu.pipeline_mode<synchronous>, transform_indices = @transform_13, window_bounds = array<i64: 64, 1>}, {pipeline_mode = #tpu.pipeline_mode<synchronous>, transform_indices = @transform_14, window_bounds = array<i64: 8, 1>}, {pipeline_mode = #tpu.pipeline_mode<synchronous>, transform_indices = @transform_15, window_bounds = array<i64: 8, 1>}, {pipeline_mode = #tpu.pipeline_mode<synchronous>, transform_indices = @transform_16, window_bounds = array<i64: 8, 1>}, {pipeline_mode = #tpu.pipeline_mode<synchronous>, transform_indices = @transform_17, window_bounds = array<i64: 1, 1>}, {pipeline_mode = #tpu.pipeline_mode<synchronous>, transform_indices = @transform_18, window_bounds = array<i64: 1, 1>}, {transform_indices = @transform_19, window_bounds = array<i64: 1, 73, 128>}]} {
    %c0 = arith.constant 0 : index
    %c0_0 = arith.constant 0 : index
    %c0_1 = arith.constant 0 : index
    %0 = vector.load %arg1[%c0, %c0_0, %c0_1] : memref<1x73x128xf32, #tpu.memory_space<vmem>>, vector<1x73x128xf32>
    %1 = vector.shape_cast %0 : vector<1x73x128xf32> to vector<73x128xf32>
    %c0_2 = arith.constant 0 : index
    %c0_3 = arith.constant 0 : index
    %2 = vector.load %arg2[%c0_2, %c0_3] : memref<128x1536xf32, #tpu.memory_space<vmem>>, vector<128x1536xf32>
    %cst = arith.constant dense<0.000000e+00> : vector<73x1536xf32>
    %3 = tpu.matmul %1, %2, %cst {dimension_numbers = #tpu.dot_dimension_numbers<[1], [0], [0], [1], [0, 0, 1, 1], [], []>} : vector<73x128xf32>, vector<128x1536xf32>, vector<73x1536xf32> -> vector<73x1536xf32>
    %c0_4 = arith.constant 0 : index
    %c0_5 = arith.constant 0 : index
    %4 = vector.load %arg3[%c0_4, %c0_5] : memref<1x1536xf32, #tpu.memory_space<vmem>>, vector<1x1536xf32>
    %5 = vector.broadcast %4 : vector<1x1536xf32> to vector<73x1536xf32>
    %6 = arith.addf %3, %5 : vector<73x1536xf32>
    %7 = vector.extract_strided_slice %6 {offsets = [0, 0], sizes = [73, 512], strides = [1, 1]} : vector<73x1536xf32> to vector<73x512xf32>
    %8 = vector.extract_strided_slice %6 {offsets = [0, 512], sizes = [73, 512], strides = [1, 1]} : vector<73x1536xf32> to vector<73x512xf32>
    %9 = vector.extract_strided_slice %6 {offsets = [0, 1024], sizes = [73, 512], strides = [1, 1]} : vector<73x1536xf32> to vector<73x512xf32>
    %c0_6 = arith.constant 0 : index
    %c0_7 = arith.constant 0 : index
    %10 = vector.load %arg21[%c0_6, %c0_7] : memref<73x512xf32, #tpu.memory_space<vmem>>, vector<73x512xf32>
    tpu.vector_store %arg21[%c0_6, %c0_7], %9 {strides = array<i32>} : memref<73x512xf32, #tpu.memory_space<vmem>>, vector<73x512xf32>,
    %11 = vector.extract_strided_slice %7 {offsets = [0, 0], sizes = [73, 128], strides = [1, 1]} : vector<73x512xf32> to vector<73x128xf32>
    %12 = vector.extract_strided_slice %8 {offsets = [0, 0], sizes = [73, 128], strides = [1, 1]} : vector<73x512xf32> to vector<73x128xf32>
    %13 = vector.extract_strided_slice %12 {offsets = [0, 0], sizes = [1, 128], strides = [1, 1]} : vector<73x128xf32> to vector<1x128xf32>
    %14 = vector.extract_strided_slice %11 {offsets = [0, 0], sizes = [64, 128], strides = [1, 1]} : vector<73x128xf32> to vector<64x128xf32>
    %15 = vector.broadcast %13 : vector<1x128xf32> to vector<64x128xf32>
    %16 = arith.mulf %14, %15 : vector<64x128xf32>
    %cst_8 = arith.constant dense<0.000000e+00> : vector<64xf32>
    %17 = vector.multi_reduction <add>, %16, %cst_8 [1] : vector<64x128xf32> to vector<64xf32>
    %18 = vector.shape_cast %17 : vector<64xf32> to vector<64x1xf32>
    %c0_9 = arith.constant 0 : index
    %c0_10 = arith.constant 0 : index
    %19 = vector.load %arg21[%c0_9, %c0_10] : memref<73x512xf32, #tpu.memory_space<vmem>>, vector<1x128xf32>
    %cst_11 = arith.constant 0.000000e+00 : f32
    %20 = vector.broadcast %cst_11 : f32 to vector<64x128xf32>
    %21 = vector.extract_strided_slice %12 {offsets = [64, 0], sizes = [8, 128], strides = [1, 1]} : vector<73x128xf32> to vector<8x128xf32>
    %cst_12 = arith.constant dense<0.000000e+00> : vector<64x8xf32>
    %22 = tpu.matmul %14, %21, %cst_12 {dimension_numbers = #tpu.dot_dimension_numbers<[1], [1], [0], [0], [0, 0, 1, 0], [], []>} : vector<64x128xf32>, vector<8x128xf32>, vector<64x8xf32> -> vector<64x8xf32>
    %cst_13 = arith.constant dense<0xFF800000> : vector<64xf32>
    %23 = vector.multi_reduction <maximumf>, %22, %cst_13 [1] : vector<64x8xf32> to vector<64xf32>
    %24 = vector.shape_cast %23 : vector<64xf32> to vector<64x1xf32>
    %25 = arith.maximumf %24, %18 : vector<64x1xf32>
    %26 = vector.broadcast %25 : vector<64x1xf32> to vector<64x8xf32>
    %27 = arith.subf %22, %26 : vector<64x8xf32>
    %28 = math.exp %27 : vector<64x8xf32>
    %c0_14 = arith.constant 0 : index
    %c0_15 = arith.constant 0 : index
    %29 = vector.load %arg6[%c0_14, %c0_15] : memref<64x8xf32, #tpu.memory_space<vmem>>, vector<64x8xf32>
    %30 = arith.mulf %28, %29 : vector<64x8xf32>
    %31 = arith.subf %18, %25 : vector<64x1xf32>
    %32 = math.exp %31 : vector<64x1xf32>
    %c0_16 = arith.constant 0 : index
    %c0_17 = arith.constant 0 : index
    %33 = vector.load %arg13[%c0_16, %c0_17] : memref<64x1xf32, #tpu.memory_space<vmem>>, vector<64x1xf32>
    %34 = arith.mulf %32, %33 : vector<64x1xf32>
    %cst_18 = arith.constant dense<0.000000e+00> : vector<64xf32>
    %35 = vector.multi_reduction <add>, %30, %cst_18 [1] : vector<64x8xf32> to vector<64xf32>
    %36 = vector.shape_cast %35 : vector<64xf32> to vector<64x1xf32>
    %37 = arith.addf %36, %34 : vector<64x1xf32>
    %c64 = arith.constant 64 : index
    %c0_19 = arith.constant 0 : index
    %38 = vector.load %arg21[%c64, %c0_19] : memref<73x512xf32, #tpu.memory_space<vmem>>, vector<8x128xf32>
    %cst_20 = arith.constant dense<0.000000e+00> : vector<64x128xf32>
    %39 = tpu.matmul %30, %38, %cst_20 {dimension_numbers = #tpu.dot_dimension_numbers<[1], [0], [0], [1], [0, 0, 1, 1], [], []>} : vector<64x8xf32>, vector<8x128xf32>, vector<64x128xf32> -> vector<64x128xf32>
    %40 = vector.broadcast %34 : vector<64x1xf32> to vector<64x128xf32>
    %41 = vector.broadcast %19 : vector<1x128xf32> to vector<64x128xf32>
    %42 = arith.mulf %40, %41 : vector<64x128xf32>
    %43 = arith.addf %39, %42 : vector<64x128xf32>
    %cst_21 = arith.constant 3.000000e+00 : f32
    %44 = vector.broadcast %cst_21 : f32 to vector<64x1xf32>
    %45 = arith.mulf %37, %44 : vector<64x1xf32>
    %46 = tpu.reciprocal %45 {approx = true} : vector<64x1xf32> -> vector<64x1xf32>
    %47 = vector.broadcast %46 : vector<64x1xf32> to vector<64x128xf32>
    %48 = arith.mulf %43, %47 : vector<64x128xf32>
    %49 = arith.addf %20, %48 : vector<64x128xf32>
    %50 = vector.extract_strided_slice %12 {offsets = [0, 0], sizes = [64, 128], strides = [1, 1]} : vector<73x128xf32> to vector<64x128xf32>
    %cst_22 = arith.constant dense<0.000000e+00> : vector<64x64xf32>
    %51 = tpu.matmul %14, %50, %cst_22 {dimension_numbers = #tpu.dot_dimension_numbers<[1], [1], [0], [0], [0, 0, 1, 0], [], []>} : vector<64x128xf32>, vector<64x128xf32>, vector<64x64xf32> -> vector<64x64xf32>
    %cst_23 = arith.constant dense<0xFF800000> : vector<64xf32>
    %52 = vector.multi_reduction <maximumf>, %51, %cst_23 [1] : vector<64x64xf32> to vector<64xf32>
    %53 = vector.shape_cast %52 : vector<64xf32> to vector<64x1xf32>
    %54 = arith.maximumf %53, %18 : vector<64x1xf32>
    %55 = vector.broadcast %54 : vector<64x1xf32> to vector<64x64xf32>
    %56 = arith.subf %51, %55 : vector<64x64xf32>
    %57 = math.exp %56 : vector<64x64xf32>
    %c0_24 = arith.constant 0 : index
    %c0_25 = arith.constant 0 : index
    %58 = vector.load %arg7[%c0_24, %c0_25] : memref<64x64xf32, #tpu.memory_space<vmem>>, vector<64x64xf32>
    %59 = arith.mulf %57, %58 : vector<64x64xf32>
    %60 = arith.subf %18, %54 : vector<64x1xf32>
    %61 = math.exp %60 : vector<64x1xf32>
    %c0_26 = arith.constant 0 : index
    %c0_27 = arith.constant 0 : index
    %62 = vector.load %arg14[%c0_26, %c0_27] : memref<64x1xf32, #tpu.memory_space<vmem>>, vector<64x1xf32>
    %63 = arith.mulf %61, %62 : vector<64x1xf32>
    %cst_28 = arith.constant dense<0.000000e+00> : vector<64xf32>
    %64 = vector.multi_reduction <add>, %59, %cst_28 [1] : vector<64x64xf32> to vector<64xf32>
    %65 = vector.shape_cast %64 : vector<64xf32> to vector<64x1xf32>
    %66 = arith.addf %65, %63 : vector<64x1xf32>
    %c0_29 = arith.constant 0 : index
    %c0_30 = arith.constant 0 : index
    %67 = vector.load %arg21[%c0_29, %c0_30] : memref<73x512xf32, #tpu.memory_space<vmem>>, vector<64x128xf32>
    %cst_31 = arith.constant dense<0.000000e+00> : vector<64x128xf32>
    %68 = tpu.matmul %59, %67, %cst_31 {dimension_numbers = #tpu.dot_dimension_numbers<[1], [0], [0], [1], [0, 0, 1, 1], [], []>} : vector<64x64xf32>, vector<64x128xf32>, vector<64x128xf32> -> vector<64x128xf32>
    %69 = vector.broadcast %63 : vector<64x1xf32> to vector<64x128xf32>
    %70 = vector.broadcast %19 : vector<1x128xf32> to vector<64x128xf32>
    %71 = arith.mulf %69, %70 : vector<64x128xf32>
    %72 = arith.addf %68, %71 : vector<64x128xf32>
    %cst_32 = arith.constant 3.000000e+00 : f32
    %73 = vector.broadcast %cst_32 : f32 to vector<64x1xf32>
    %74 = arith.mulf %66, %73 : vector<64x1xf32>
    %75 = tpu.reciprocal %74 {approx = true} : vector<64x1xf32> -> vector<64x1xf32>
    %76 = vector.broadcast %75 : vector<64x1xf32> to vector<64x128xf32>
    %77 = arith.mulf %72, %76 : vector<64x128xf32>
    %78 = arith.addf %49, %77 : vector<64x128xf32>
    %c0_33 = arith.constant 0 : index
    %c0_34 = arith.constant 0 : index
    %79 = vector.load %arg21[%c0_33, %c0_34] : memref<73x512xf32, #tpu.memory_space<vmem>>, vector<64x128xf32>
    tpu.vector_store %arg21[%c0_33, %c0_34], %78 {strides = array<i32>} : memref<73x512xf32, #tpu.memory_space<vmem>>, vector<64x128xf32>,
    %80 = vector.extract_strided_slice %11 {offsets = [64, 0], sizes = [8, 128], strides = [1, 1]} : vector<73x128xf32> to vector<8x128xf32>
    %81 = vector.broadcast %13 : vector<1x128xf32> to vector<8x128xf32>
    %82 = arith.mulf %80, %81 : vector<8x128xf32>
    %cst_35 = arith.constant dense<0.000000e+00> : vector<8xf32>
    %83 = vector.multi_reduction <add>, %82, %cst_35 [1] : vector<8x128xf32> to vector<8xf32>
    %84 = vector.shape_cast %83 : vector<8xf32> to vector<8x1xf32>
    %c0_36 = arith.constant 0 : index
    %c0_37 = arith.constant 0 : index
    %85 = vector.load %arg21[%c0_36, %c0_37] : memref<73x512xf32, #tpu.memory_space<vmem>>, vector<1x128xf32>
    %cst_38 = arith.constant 0.000000e+00 : f32
    %86 = vector.broadcast %cst_38 : f32 to vector<8x128xf32>
    %87 = vector.extract_strided_slice %12 {offsets = [72, 0], sizes = [1, 128], strides = [1, 1]} : vector<73x128xf32> to vector<1x128xf32>
    %88 = vector.broadcast %87 : vector<1x128xf32> to vector<8x128xf32>
    %89 = arith.mulf %80, %88 : vector<8x128xf32>
    %cst_39 = arith.constant dense<0.000000e+00> : vector<8xf32>
    %90 = vector.multi_reduction <add>, %89, %cst_39 [1] : vector<8x128xf32> to vector<8xf32>
    %91 = vector.shape_cast %90 : vector<8xf32> to vector<8x1xf32>
    %cst_40 = arith.constant dense<0xFF800000> : vector<8xf32>
    %92 = vector.multi_reduction <maximumf>, %91, %cst_40 [1] : vector<8x1xf32> to vector<8xf32>
    %93 = vector.shape_cast %92 : vector<8xf32> to vector<8x1xf32>
    %94 = arith.maximumf %93, %84 : vector<8x1xf32>
    %95 = arith.subf %91, %94 : vector<8x1xf32>
    %96 = math.exp %95 : vector<8x1xf32>
    %c0_41 = arith.constant 0 : index
    %c0_42 = arith.constant 0 : index
    %97 = vector.load %arg8[%c0_41, %c0_42] : memref<8x1xf32, #tpu.memory_space<vmem>>, vector<8x1xf32>
    %98 = arith.mulf %96, %97 : vector<8x1xf32>
    %99 = arith.subf %84, %94 : vector<8x1xf32>
    %100 = math.exp %99 : vector<8x1xf32>
    %c0_43 = arith.constant 0 : index
    %c0_44 = arith.constant 0 : index
    %101 = vector.load %arg15[%c0_43, %c0_44] : memref<8x1xf32, #tpu.memory_space<vmem>>, vector<8x1xf32>
    %102 = arith.mulf %100, %101 : vector<8x1xf32>
    %cst_45 = arith.constant dense<0.000000e+00> : vector<8xf32>
    %103 = vector.multi_reduction <add>, %98, %cst_45 [1] : vector<8x1xf32> to vector<8xf32>
    %104 = vector.shape_cast %103 : vector<8xf32> to vector<8x1xf32>
    %105 = arith.addf %104, %102 : vector<8x1xf32>
    %c72 = arith.constant 72 : index
    %c0_46 = arith.constant 0 : index
    %106 = vector.load %arg21[%c72, %c0_46] : memref<73x512xf32, #tpu.memory_space<vmem>>, vector<1x128xf32>
    %107 = vector.broadcast %98 : vector<8x1xf32> to vector<8x128xf32>
    %108 = vector.broadcast %106 : vector<1x128xf32> to vector<8x128xf32>
    %109 = arith.mulf %107, %108 : vector<8x128xf32>
    %110 = vector.broadcast %102 : vector<8x1xf32> to vector<8x128xf32>
    %111 = vector.broadcast %85 : vector<1x128xf32> to vector<8x128xf32>
    %112 = arith.mulf %110, %111 : vector<8x128xf32>
    %113 = arith.addf %109, %112 : vector<8x128xf32>
    %cst_47 = arith.constant 3.000000e+00 : f32
    %114 = vector.broadcast %cst_47 : f32 to vector<8x1xf32>
    %115 = arith.mulf %105, %114 : vector<8x1xf32>
    %116 = tpu.reciprocal %115 {approx = true} : vector<8x1xf32> -> vector<8x1xf32>
    %117 = vector.broadcast %116 : vector<8x1xf32> to vector<8x128xf32>
    %118 = arith.mulf %113, %117 : vector<8x128xf32>
    %119 = arith.addf %86, %118 : vector<8x128xf32>
    %120 = vector.extract_strided_slice %12 {offsets = [64, 0], sizes = [8, 128], strides = [1, 1]} : vector<73x128xf32> to vector<8x128xf32>
    %cst_48 = arith.constant dense<0.000000e+00> : vector<8x8xf32>
    %121 = tpu.matmul %80, %120, %cst_48 {dimension_numbers = #tpu.dot_dimension_numbers<[1], [1], [0], [0], [0, 0, 1, 0], [], []>} : vector<8x128xf32>, vector<8x128xf32>, vector<8x8xf32> -> vector<8x8xf32>
    %cst_49 = arith.constant dense<0xFF800000> : vector<8xf32>
    %122 = vector.multi_reduction <maximumf>, %121, %cst_49 [1] : vector<8x8xf32> to vector<8xf32>
    %123 = vector.shape_cast %122 : vector<8xf32> to vector<8x1xf32>
    %124 = arith.maximumf %123, %84 : vector<8x1xf32>
    %125 = vector.broadcast %124 : vector<8x1xf32> to vector<8x8xf32>
    %126 = arith.subf %121, %125 : vector<8x8xf32>
    %127 = math.exp %126 : vector<8x8xf32>
    %c0_50 = arith.constant 0 : index
    %c0_51 = arith.constant 0 : index
    %128 = vector.load %arg9[%c0_50, %c0_51] : memref<8x8xf32, #tpu.memory_space<vmem>>, vector<8x8xf32>
    %129 = arith.mulf %127, %128 : vector<8x8xf32>
    %130 = arith.subf %84, %124 : vector<8x1xf32>
    %131 = math.exp %130 : vector<8x1xf32>
    %c0_52 = arith.constant 0 : index
    %c0_53 = arith.constant 0 : index
    %132 = vector.load %arg16[%c0_52, %c0_53] : memref<8x1xf32, #tpu.memory_space<vmem>>, vector<8x1xf32>
    %133 = arith.mulf %131, %132 : vector<8x1xf32>
    %cst_54 = arith.constant dense<0.000000e+00> : vector<8xf32>
    %134 = vector.multi_reduction <add>, %129, %cst_54 [1] : vector<8x8xf32> to vector<8xf32>
    %135 = vector.shape_cast %134 : vector<8xf32> to vector<8x1xf32>
    %136 = arith.addf %135, %133 : vector<8x1xf32>
    %c64_55 = arith.constant 64 : index
    %c0_56 = arith.constant 0 : index
    %137 = vector.load %arg21[%c64_55, %c0_56] : memref<73x512xf32, #tpu.memory_space<vmem>>, vector<8x128xf32>
    %cst_57 = arith.constant dense<0.000000e+00> : vector<8x128xf32>
    %138 = tpu.matmul %129, %137, %cst_57 {dimension_numbers = #tpu.dot_dimension_numbers<[1], [0], [0], [1], [0, 0, 1, 1], [], []>} : vector<8x8xf32>, vector<8x128xf32>, vector<8x128xf32> -> vector<8x128xf32>
    %139 = vector.broadcast %133 : vector<8x1xf32> to vector<8x128xf32>
    %140 = vector.broadcast %85 : vector<1x128xf32> to vector<8x128xf32>
    %141 = arith.mulf %139, %140 : vector<8x128xf32>
    %142 = arith.addf %138, %141 : vector<8x128xf32>
    %cst_58 = arith.constant 3.000000e+00 : f32
    %143 = vector.broadcast %cst_58 : f32 to vector<8x1xf32>
    %144 = arith.mulf %136, %143 : vector<8x1xf32>
    %145 = tpu.reciprocal %144 {approx = true} : vector<8x1xf32> -> vector<8x1xf32>
    %146 = vector.broadcast %145 : vector<8x1xf32> to vector<8x128xf32>
    %147 = arith.mulf %142, %146 : vector<8x128xf32>
    %148 = arith.addf %119, %147 : vector<8x128xf32>
    %149 = vector.extract_strided_slice %12 {offsets = [0, 0], sizes = [64, 128], strides = [1, 1]} : vector<73x128xf32> to vector<64x128xf32>
    %cst_59 = arith.constant dense<0.000000e+00> : vector<8x64xf32>
    %150 = tpu.matmul %80, %149, %cst_59 {dimension_numbers = #tpu.dot_dimension_numbers<[1], [1], [0], [0], [0, 0, 1, 0], [], []>} : vector<8x128xf32>, vector<64x128xf32>, vector<8x64xf32> -> vector<8x64xf32>
    %cst_60 = arith.constant dense<0xFF800000> : vector<8xf32>
    %151 = vector.multi_reduction <maximumf>, %150, %cst_60 [1] : vector<8x64xf32> to vector<8xf32>
    %152 = vector.shape_cast %151 : vector<8xf32> to vector<8x1xf32>
    %153 = arith.maximumf %152, %84 : vector<8x1xf32>
    %154 = vector.broadcast %153 : vector<8x1xf32> to vector<8x64xf32>
    %155 = arith.subf %150, %154 : vector<8x64xf32>
    %156 = math.exp %155 : vector<8x64xf32>
    %c0_61 = arith.constant 0 : index
    %c0_62 = arith.constant 0 : index
    %157 = vector.load %arg10[%c0_61, %c0_62] : memref<8x64xf32, #tpu.memory_space<vmem>>, vector<8x64xf32>
    %158 = arith.mulf %156, %157 : vector<8x64xf32>
    %159 = arith.subf %84, %153 : vector<8x1xf32>
    %160 = math.exp %159 : vector<8x1xf32>
    %c0_63 = arith.constant 0 : index
    %c0_64 = arith.constant 0 : index
    %161 = vector.load %arg17[%c0_63, %c0_64] : memref<8x1xf32, #tpu.memory_space<vmem>>, vector<8x1xf32>
    %162 = arith.mulf %160, %161 : vector<8x1xf32>
    %cst_65 = arith.constant dense<0.000000e+00> : vector<8xf32>
    %163 = vector.multi_reduction <add>, %158, %cst_65 [1] : vector<8x64xf32> to vector<8xf32>
    %164 = vector.shape_cast %163 : vector<8xf32> to vector<8x1xf32>
    %165 = arith.addf %164, %162 : vector<8x1xf32>
    %c0_66 = arith.constant 0 : index
    %c0_67 = arith.constant 0 : index
    %166 = vector.load %arg21[%c0_66, %c0_67] : memref<73x512xf32, #tpu.memory_space<vmem>>, vector<64x128xf32>
    %cst_68 = arith.constant dense<0.000000e+00> : vector<8x128xf32>
    %167 = tpu.matmul %158, %166, %cst_68 {dimension_numbers = #tpu.dot_dimension_numbers<[1], [0], [0], [1], [0, 0, 1, 1], [], []>} : vector<8x64xf32>, vector<64x128xf32>, vector<8x128xf32> -> vector<8x128xf32>
    %168 = vector.broadcast %162 : vector<8x1xf32> to vector<8x128xf32>
    %169 = vector.broadcast %85 : vector<1x128xf32> to vector<8x128xf32>
    %170 = arith.mulf %168, %169 : vector<8x128xf32>
    %171 = arith.addf %167, %170 : vector<8x128xf32>
    %cst_69 = arith.constant 3.000000e+00 : f32
    %172 = vector.broadcast %cst_69 : f32 to vector<8x1xf32>
    %173 = arith.mulf %165, %172 : vector<8x1xf32>
    %174 = tpu.reciprocal %173 {approx = true} : vector<8x1xf32> -> vector<8x1xf32>
    %175 = vector.broadcast %174 : vector<8x1xf32> to vector<8x128xf32>
    %176 = arith.mulf %171, %175 : vector<8x128xf32>
    %177 = arith.addf %148, %176 : vector<8x128xf32>
    %c64_70 = arith.constant 64 : index
    %c0_71 = arith.constant 0 : index
    %178 = vector.load %arg21[%c64_70, %c0_71] : memref<73x512xf32, #tpu.memory_space<vmem>>, vector<8x128xf32>
    tpu.vector_store %arg21[%c64_70, %c0_71], %177 {strides = array<i32>} : memref<73x512xf32, #tpu.memory_space<vmem>>, vector<8x128xf32>,
    %179 = vector.extract_strided_slice %11 {offsets = [72, 0], sizes = [1, 128], strides = [1, 1]} : vector<73x128xf32> to vector<1x128xf32>
    %180 = arith.mulf %179, %13 : vector<1x128xf32>
    %cst_72 = arith.constant dense<0.000000e+00> : vector<1xf32>
    %181 = vector.multi_reduction <add>, %180, %cst_72 [1] : vector<1x128xf32> to vector<1xf32>
    %182 = vector.shape_cast %181 : vector<1xf32> to vector<1x1xf32>
    %c0_73 = arith.constant 0 : index
    %c0_74 = arith.constant 0 : index
    %183 = vector.load %arg21[%c0_73, %c0_74] : memref<73x512xf32, #tpu.memory_space<vmem>>, vector<1x128xf32>
    %cst_75 = arith.constant 0.000000e+00 : f32
    %184 = vector.broadcast %cst_75 : f32 to vector<1x128xf32>
    %185 = vector.extract_strided_slice %12 {offsets = [72, 0], sizes = [1, 128], strides = [1, 1]} : vector<73x128xf32> to vector<1x128xf32>
    %186 = arith.mulf %179, %185 : vector<1x128xf32>
    %cst_76 = arith.constant dense<0.000000e+00> : vector<1xf32>
    %187 = vector.multi_reduction <add>, %186, %cst_76 [1] : vector<1x128xf32> to vector<1xf32>
    %188 = vector.shape_cast %187 : vector<1xf32> to vector<1x1xf32>
    %cst_77 = arith.constant dense<0xFF800000> : vector<1xf32>
    %189 = vector.multi_reduction <maximumf>, %188, %cst_77 [1] : vector<1x1xf32> to vector<1xf32>
    %190 = vector.shape_cast %189 : vector<1xf32> to vector<1x1xf32>
    %191 = arith.maximumf %190, %182 : vector<1x1xf32>
    %192 = arith.subf %188, %191 : vector<1x1xf32>
    %193 = math.exp %192 : vector<1x1xf32>
    %c0_78 = arith.constant 0 : index
    %c0_79 = arith.constant 0 : index
    %194 = vector.load %arg11[%c0_78, %c0_79] : memref<1x1xf32, #tpu.memory_space<vmem>>, vector<1x1xf32>
    %195 = arith.mulf %193, %194 : vector<1x1xf32>
    %196 = arith.subf %182, %191 : vector<1x1xf32>
    %197 = math.exp %196 : vector<1x1xf32>
    %c0_80 = arith.constant 0 : index
    %c0_81 = arith.constant 0 : index
    %198 = vector.load %arg18[%c0_80, %c0_81] : memref<1x1xf32, #tpu.memory_space<vmem>>, vector<1x1xf32>
    %199 = arith.mulf %197, %198 : vector<1x1xf32>
    %cst_82 = arith.constant dense<0.000000e+00> : vector<1xf32>
    %200 = vector.multi_reduction <add>, %195, %cst_82 [1] : vector<1x1xf32> to vector<1xf32>
    %201 = vector.shape_cast %200 : vector<1xf32> to vector<1x1xf32>
    %202 = arith.addf %201, %199 : vector<1x1xf32>
    %c72_83 = arith.constant 72 : index
    %c0_84 = arith.constant 0 : index
    %203 = vector.load %arg21[%c72_83, %c0_84] : memref<73x512xf32, #tpu.memory_space<vmem>>, vector<1x128xf32>
    %204 = vector.broadcast %195 : vector<1x1xf32> to vector<1x128xf32>
    %205 = arith.mulf %204, %203 : vector<1x128xf32>
    %206 = vector.broadcast %199 : vector<1x1xf32> to vector<1x128xf32>
    %207 = arith.mulf %206, %183 : vector<1x128xf32>
    %208 = arith.addf %205, %207 : vector<1x128xf32>
    %cst_85 = arith.constant 3.000000e+00 : f32
    %209 = vector.broadcast %cst_85 : f32 to vector<1x1xf32>
    %210 = arith.mulf %202, %209 : vector<1x1xf32>
    %211 = tpu.reciprocal %210 {approx = true} : vector<1x1xf32> -> vector<1x1xf32>
    %212 = vector.broadcast %211 : vector<1x1xf32> to vector<1x128xf32>
    %213 = arith.mulf %208, %212 : vector<1x128xf32>
    %214 = arith.addf %184, %213 : vector<1x128xf32>
    %215 = vector.extract_strided_slice %12 {offsets = [64, 0], sizes = [8, 128], strides = [1, 1]} : vector<73x128xf32> to vector<8x128xf32>
    %cst_86 = arith.constant dense<0.000000e+00> : vector<1x8xf32>
    %216 = tpu.matmul %179, %215, %cst_86 {dimension_numbers = #tpu.dot_dimension_numbers<[1], [1], [0], [0], [0, 0, 1, 0], [], []>} : vector<1x128xf32>, vector<8x128xf32>, vector<1x8xf32> -> vector<1x8xf32>
    %cst_87 = arith.constant dense<0xFF800000> : vector<1xf32>
    %217 = vector.multi_reduction <maximumf>, %216, %cst_87 [1] : vector<1x8xf32> to vector<1xf32>
    %218 = vector.shape_cast %217 : vector<1xf32> to vector<1x1xf32>
    %219 = arith.maximumf %218, %182 : vector<1x1xf32>
    %220 = vector.broadcast %219 : vector<1x1xf32> to vector<1x8xf32>
    %221 = arith.subf %216, %220 : vector<1x8xf32>
    %222 = math.exp %221 : vector<1x8xf32>
    %c0_88 = arith.constant 0 : index
    %c0_89 = arith.constant 0 : index
    %223 = vector.load %arg12[%c0_88, %c0_89] : memref<1x8xf32, #tpu.memory_space<vmem>>, vector<1x8xf32>
    %224 = arith.mulf %222, %223 : vector<1x8xf32>
    %225 = arith.subf %182, %219 : vector<1x1xf32>
    %226 = math.exp %225 : vector<1x1xf32>
    %c0_90 = arith.constant 0 : index
    %c0_91 = arith.constant 0 : index
    %227 = vector.load %arg19[%c0_90, %c0_91] : memref<1x1xf32, #tpu.memory_space<vmem>>, vector<1x1xf32>
    %228 = arith.mulf %226, %227 : vector<1x1xf32>
    %cst_92 = arith.constant dense<0.000000e+00> : vector<1xf32>
    %229 = vector.multi_reduction <add>, %224, %cst_92 [1] : vector<1x8xf32> to vector<1xf32>
    %230 = vector.shape_cast %229 : vector<1xf32> to vector<1x1xf32>
    %231 = arith.addf %230, %228 : vector<1x1xf32>
    %c64_93 = arith.constant 64 : index
    %c0_94 = arith.constant 0 : index
    %232 = vector.load %arg21[%c64_93, %c0_94] : memref<73x512xf32, #tpu.memory_space<vmem>>, vector<8x128xf32>
    %cst_95 = arith.constant dense<0.000000e+00> : vector<1x128xf32>
    %233 = tpu.matmul %224, %232, %cst_95 {dimension_numbers = #tpu.dot_dimension_numbers<[1], [0], [0], [1], [0, 0, 1, 1], [], []>} : vector<1x8xf32>, vector<8x128xf32>, vector<1x128xf32> -> vector<1x128xf32>
    %234 = vector.broadcast %228 : vector<1x1xf32> to vector<1x128xf32>
    %235 = arith.mulf %234, %183 : vector<1x128xf32>
    %236 = arith.addf %233, %235 : vector<1x128xf32>
    %cst_96 = arith.constant 3.000000e+00 : f32
    %237 = vector.broadcast %cst_96 : f32 to vector<1x1xf32>
    %238 = arith.mulf %231, %237 : vector<1x1xf32>
    %239 = tpu.reciprocal %238 {approx = true} : vector<1x1xf32> -> vector<1x1xf32>
    %240 = vector.broadcast %239 : vector<1x1xf32> to vector<1x128xf32>
    %241 = arith.mulf %236, %240 : vector<1x128xf32>
    %242 = arith.addf %214, %241 : vector<1x128xf32>
    %c72_97 = arith.constant 72 : index
    %c0_98 = arith.constant 0 : index
    %243 = vector.load %arg21[%c72_97, %c0_98] : memref<73x512xf32, #tpu.memory_space<vmem>>, vector<1x128xf32>
    tpu.vector_store %arg21[%c72_97, %c0_98], %242 {strides = array<i32>} : memref<73x512xf32, #tpu.memory_space<vmem>>, vector<1x128xf32>,
    %244 = vector.extract_strided_slice %7 {offsets = [0, 128], sizes = [73, 128], strides = [1, 1]} : vector<73x512xf32> to vector<73x128xf32>
    %245 = vector.extract_strided_slice %8 {offsets = [0, 128], sizes = [73, 128], strides = [1, 1]} : vector<73x512xf32> to vector<73x128xf32>
    %246 = vector.extract_strided_slice %245 {offsets = [0, 0], sizes = [1, 128], strides = [1, 1]} : vector<73x128xf32> to vector<1x128xf32>
    %247 = vector.extract_strided_slice %244 {offsets = [0, 0], sizes = [64, 128], strides = [1, 1]} : vector<73x128xf32> to vector<64x128xf32>
    %248 = vector.broadcast %246 : vector<1x128xf32> to vector<64x128xf32>
    %249 = arith.mulf %247, %248 : vector<64x128xf32>
    %cst_99 = arith.constant dense<0.000000e+00> : vector<64xf32>
    %250 = vector.multi_reduction <add>, %249, %cst_99 [1] : vector<64x128xf32> to vector<64xf32>
    %251 = vector.shape_cast %250 : vector<64xf32> to vector<64x1xf32>
    %c0_100 = arith.constant 0 : index
    %c128 = arith.constant 128 : index
    %252 = vector.load %arg21[%c0_100, %c128] : memref<73x512xf32, #tpu.memory_space<vmem>>, vector<1x128xf32>
    %cst_101 = arith.constant 0.000000e+00 : f32
    %253 = vector.broadcast %cst_101 : f32 to vector<64x128xf32>
    %254 = vector.extract_strided_slice %245 {offsets = [64, 0], sizes = [8, 128], strides = [1, 1]} : vector<73x128xf32> to vector<8x128xf32>
    %cst_102 = arith.constant dense<0.000000e+00> : vector<64x8xf32>
    %255 = tpu.matmul %247, %254, %cst_102 {dimension_numbers = #tpu.dot_dimension_numbers<[1], [1], [0], [0], [0, 0, 1, 0], [], []>} : vector<64x128xf32>, vector<8x128xf32>, vector<64x8xf32> -> vector<64x8xf32>
    %cst_103 = arith.constant dense<0xFF800000> : vector<64xf32>
    %256 = vector.multi_reduction <maximumf>, %255, %cst_103 [1] : vector<64x8xf32> to vector<64xf32>
    %257 = vector.shape_cast %256 : vector<64xf32> to vector<64x1xf32>
    %258 = arith.maximumf %257, %251 : vector<64x1xf32>
    %259 = vector.broadcast %258 : vector<64x1xf32> to vector<64x8xf32>
    %260 = arith.subf %255, %259 : vector<64x8xf32>
    %261 = math.exp %260 : vector<64x8xf32>
    %c0_104 = arith.constant 0 : index
    %c0_105 = arith.constant 0 : index
    %262 = vector.load %arg6[%c0_104, %c0_105] : memref<64x8xf32, #tpu.memory_space<vmem>>, vector<64x8xf32>
    %263 = arith.mulf %261, %262 : vector<64x8xf32>
    %264 = arith.subf %251, %258 : vector<64x1xf32>
    %265 = math.exp %264 : vector<64x1xf32>
    %c0_106 = arith.constant 0 : index
    %c0_107 = arith.constant 0 : index
    %266 = vector.load %arg13[%c0_106, %c0_107] : memref<64x1xf32, #tpu.memory_space<vmem>>, vector<64x1xf32>
    %267 = arith.mulf %265, %266 : vector<64x1xf32>
    %cst_108 = arith.constant dense<0.000000e+00> : vector<64xf32>
    %268 = vector.multi_reduction <add>, %263, %cst_108 [1] : vector<64x8xf32> to vector<64xf32>
    %269 = vector.shape_cast %268 : vector<64xf32> to vector<64x1xf32>
    %270 = arith.addf %269, %267 : vector<64x1xf32>
    %c64_109 = arith.constant 64 : index
    %c128_110 = arith.constant 128 : index
    %271 = vector.load %arg21[%c64_109, %c128_110] : memref<73x512xf32, #tpu.memory_space<vmem>>, vector<8x128xf32>
    %cst_111 = arith.constant dense<0.000000e+00> : vector<64x128xf32>
    %272 = tpu.matmul %263, %271, %cst_111 {dimension_numbers = #tpu.dot_dimension_numbers<[1], [0], [0], [1], [0, 0, 1, 1], [], []>} : vector<64x8xf32>, vector<8x128xf32>, vector<64x128xf32> -> vector<64x128xf32>
    %273 = vector.broadcast %267 : vector<64x1xf32> to vector<64x128xf32>
    %274 = vector.broadcast %252 : vector<1x128xf32> to vector<64x128xf32>
    %275 = arith.mulf %273, %274 : vector<64x128xf32>
    %276 = arith.addf %272, %275 : vector<64x128xf32>
    %cst_112 = arith.constant 3.000000e+00 : f32
    %277 = vector.broadcast %cst_112 : f32 to vector<64x1xf32>
    %278 = arith.mulf %270, %277 : vector<64x1xf32>
    %279 = tpu.reciprocal %278 {approx = true} : vector<64x1xf32> -> vector<64x1xf32>
    %280 = vector.broadcast %279 : vector<64x1xf32> to vector<64x128xf32>
    %281 = arith.mulf %276, %280 : vector<64x128xf32>
    %282 = arith.addf %253, %281 : vector<64x128xf32>
    %283 = vector.extract_strided_slice %245 {offsets = [0, 0], sizes = [64, 128], strides = [1, 1]} : vector<73x128xf32> to vector<64x128xf32>
    %cst_113 = arith.constant dense<0.000000e+00> : vector<64x64xf32>
    %284 = tpu.matmul %247, %283, %cst_113 {dimension_numbers = #tpu.dot_dimension_numbers<[1], [1], [0], [0], [0, 0, 1, 0], [], []>} : vector<64x128xf32>, vector<64x128xf32>, vector<64x64xf32> -> vector<64x64xf32>
    %cst_114 = arith.constant dense<0xFF800000> : vector<64xf32>
    %285 = vector.multi_reduction <maximumf>, %284, %cst_114 [1] : vector<64x64xf32> to vector<64xf32>
    %286 = vector.shape_cast %285 : vector<64xf32> to vector<64x1xf32>
    %287 = arith.maximumf %286, %251 : vector<64x1xf32>
    %288 = vector.broadcast %287 : vector<64x1xf32> to vector<64x64xf32>
    %289 = arith.subf %284, %288 : vector<64x64xf32>
    %290 = math.exp %289 : vector<64x64xf32>
    %c0_115 = arith.constant 0 : index
    %c0_116 = arith.constant 0 : index
    %291 = vector.load %arg7[%c0_115, %c0_116] : memref<64x64xf32, #tpu.memory_space<vmem>>, vector<64x64xf32>
    %292 = arith.mulf %290, %291 : vector<64x64xf32>
    %293 = arith.subf %251, %287 : vector<64x1xf32>
    %294 = math.exp %293 : vector<64x1xf32>
    %c0_117 = arith.constant 0 : index
    %c0_118 = arith.constant 0 : index
    %295 = vector.load %arg14[%c0_117, %c0_118] : memref<64x1xf32, #tpu.memory_space<vmem>>, vector<64x1xf32>
    %296 = arith.mulf %294, %295 : vector<64x1xf32>
    %cst_119 = arith.constant dense<0.000000e+00> : vector<64xf32>
    %297 = vector.multi_reduction <add>, %292, %cst_119 [1] : vector<64x64xf32> to vector<64xf32>
    %298 = vector.shape_cast %297 : vector<64xf32> to vector<64x1xf32>
    %299 = arith.addf %298, %296 : vector<64x1xf32>
    %c0_120 = arith.constant 0 : index
    %c128_121 = arith.constant 128 : index
    %300 = vector.load %arg21[%c0_120, %c128_121] : memref<73x512xf32, #tpu.memory_space<vmem>>, vector<64x128xf32>
    %cst_122 = arith.constant dense<0.000000e+00> : vector<64x128xf32>
    %301 = tpu.matmul %292, %300, %cst_122 {dimension_numbers = #tpu.dot_dimension_numbers<[1], [0], [0], [1], [0, 0, 1, 1], [], []>} : vector<64x64xf32>, vector<64x128xf32>, vector<64x128xf32> -> vector<64x128xf32>
    %302 = vector.broadcast %296 : vector<64x1xf32> to vector<64x128xf32>
    %303 = vector.broadcast %252 : vector<1x128xf32> to vector<64x128xf32>
    %304 = arith.mulf %302, %303 : vector<64x128xf32>
    %305 = arith.addf %301, %304 : vector<64x128xf32>
    %cst_123 = arith.constant 3.000000e+00 : f32
    %306 = vector.broadcast %cst_123 : f32 to vector<64x1xf32>
    %307 = arith.mulf %299, %306 : vector<64x1xf32>
    %308 = tpu.reciprocal %307 {approx = true} : vector<64x1xf32> -> vector<64x1xf32>
    %309 = vector.broadcast %308 : vector<64x1xf32> to vector<64x128xf32>
    %310 = arith.mulf %305, %309 : vector<64x128xf32>
    %311 = arith.addf %282, %310 : vector<64x128xf32>
    %c0_124 = arith.constant 0 : index
    %c128_125 = arith.constant 128 : index
    %312 = vector.load %arg21[%c0_124, %c128_125] : memref<73x512xf32, #tpu.memory_space<vmem>>, vector<64x128xf32>
    tpu.vector_store %arg21[%c0_124, %c128_125], %311 {strides = array<i32>} : memref<73x512xf32, #tpu.memory_space<vmem>>, vector<64x128xf32>,
    %313 = vector.extract_strided_slice %244 {offsets = [64, 0], sizes = [8, 128], strides = [1, 1]} : vector<73x128xf32> to vector<8x128xf32>
    %314 = vector.broadcast %246 : vector<1x128xf32> to vector<8x128xf32>
    %315 = arith.mulf %313, %314 : vector<8x128xf32>
    %cst_126 = arith.constant dense<0.000000e+00> : vector<8xf32>
    %316 = vector.multi_reduction <add>, %315, %cst_126 [1] : vector<8x128xf32> to vector<8xf32>
    %317 = vector.shape_cast %316 : vector<8xf32> to vector<8x1xf32>
    %c0_127 = arith.constant 0 : index
    %c128_128 = arith.constant 128 : index
    %318 = vector.load %arg21[%c0_127, %c128_128] : memref<73x512xf32, #tpu.memory_space<vmem>>, vector<1x128xf32>
    %cst_129 = arith.constant 0.000000e+00 : f32
    %319 = vector.broadcast %cst_129 : f32 to vector<8x128xf32>
    %320 = vector.extract_strided_slice %245 {offsets = [72, 0], sizes = [1, 128], strides = [1, 1]} : vector<73x128xf32> to vector<1x128xf32>
    %321 = vector.broadcast %320 : vector<1x128xf32> to vector<8x128xf32>
    %322 = arith.mulf %313, %321 : vector<8x128xf32>
    %cst_130 = arith.constant dense<0.000000e+00> : vector<8xf32>
    %323 = vector.multi_reduction <add>, %322, %cst_130 [1] : vector<8x128xf32> to vector<8xf32>
    %324 = vector.shape_cast %323 : vector<8xf32> to vector<8x1xf32>
    %cst_131 = arith.constant dense<0xFF800000> : vector<8xf32>
    %325 = vector.multi_reduction <maximumf>, %324, %cst_131 [1] : vector<8x1xf32> to vector<8xf32>
    %326 = vector.shape_cast %325 : vector<8xf32> to vector<8x1xf32>
    %327 = arith.maximumf %326, %317 : vector<8x1xf32>
    %328 = arith.subf %324, %327 : vector<8x1xf32>
    %329 = math.exp %328 : vector<8x1xf32>
    %c0_132 = arith.constant 0 : index
    %c0_133 = arith.constant 0 : index
    %330 = vector.load %arg8[%c0_132, %c0_133] : memref<8x1xf32, #tpu.memory_space<vmem>>, vector<8x1xf32>
    %331 = arith.mulf %329, %330 : vector<8x1xf32>
    %332 = arith.subf %317, %327 : vector<8x1xf32>
    %333 = math.exp %332 : vector<8x1xf32>
    %c0_134 = arith.constant 0 : index
    %c0_135 = arith.constant 0 : index
    %334 = vector.load %arg15[%c0_134, %c0_135] : memref<8x1xf32, #tpu.memory_space<vmem>>, vector<8x1xf32>
    %335 = arith.mulf %333, %334 : vector<8x1xf32>
    %cst_136 = arith.constant dense<0.000000e+00> : vector<8xf32>
    %336 = vector.multi_reduction <add>, %331, %cst_136 [1] : vector<8x1xf32> to vector<8xf32>
    %337 = vector.shape_cast %336 : vector<8xf32> to vector<8x1xf32>
    %338 = arith.addf %337, %335 : vector<8x1xf32>
    %c72_137 = arith.constant 72 : index
    %c128_138 = arith.constant 128 : index
    %339 = vector.load %arg21[%c72_137, %c128_138] : memref<73x512xf32, #tpu.memory_space<vmem>>, vector<1x128xf32>
    %340 = vector.broadcast %331 : vector<8x1xf32> to vector<8x128xf32>
    %341 = vector.broadcast %339 : vector<1x128xf32> to vector<8x128xf32>
    %342 = arith.mulf %340, %341 : vector<8x128xf32>
    %343 = vector.broadcast %335 : vector<8x1xf32> to vector<8x128xf32>
    %344 = vector.broadcast %318 : vector<1x128xf32> to vector<8x128xf32>
    %345 = arith.mulf %343, %344 : vector<8x128xf32>
    %346 = arith.addf %342, %345 : vector<8x128xf32>
    %cst_139 = arith.constant 3.000000e+00 : f32
    %347 = vector.broadcast %cst_139 : f32 to vector<8x1xf32>
    %348 = arith.mulf %338, %347 : vector<8x1xf32>
    %349 = tpu.reciprocal %348 {approx = true} : vector<8x1xf32> -> vector<8x1xf32>
    %350 = vector.broadcast %349 : vector<8x1xf32> to vector<8x128xf32>
    %351 = arith.mulf %346, %350 : vector<8x128xf32>
    %352 = arith.addf %319, %351 : vector<8x128xf32>
    %353 = vector.extract_strided_slice %245 {offsets = [64, 0], sizes = [8, 128], strides = [1, 1]} : vector<73x128xf32> to vector<8x128xf32>
    %cst_140 = arith.constant dense<0.000000e+00> : vector<8x8xf32>
    %354 = tpu.matmul %313, %353, %cst_140 {dimension_numbers = #tpu.dot_dimension_numbers<[1], [1], [0], [0], [0, 0, 1, 0], [], []>} : vector<8x128xf32>, vector<8x128xf32>, vector<8x8xf32> -> vector<8x8xf32>
    %cst_141 = arith.constant dense<0xFF800000> : vector<8xf32>
    %355 = vector.multi_reduction <maximumf>, %354, %cst_141 [1] : vector<8x8xf32> to vector<8xf32>
    %356 = vector.shape_cast %355 : vector<8xf32> to vector<8x1xf32>
    %357 = arith.maximumf %356, %317 : vector<8x1xf32>
    %358 = vector.broadcast %357 : vector<8x1xf32> to vector<8x8xf32>
    %359 = arith.subf %354, %358 : vector<8x8xf32>
    %360 = math.exp %359 : vector<8x8xf32>
    %c0_142 = arith.constant 0 : index
    %c0_143 = arith.constant 0 : index
    %361 = vector.load %arg9[%c0_142, %c0_143] : memref<8x8xf32, #tpu.memory_space<vmem>>, vector<8x8xf32>
    %362 = arith.mulf %360, %361 : vector<8x8xf32>
    %363 = arith.subf %317, %357 : vector<8x1xf32>
    %364 = math.exp %363 : vector<8x1xf32>
    %c0_144 = arith.constant 0 : index
    %c0_145 = arith.constant 0 : index
    %365 = vector.load %arg16[%c0_144, %c0_145] : memref<8x1xf32, #tpu.memory_space<vmem>>, vector<8x1xf32>
    %366 = arith.mulf %364, %365 : vector<8x1xf32>
    %cst_146 = arith.constant dense<0.000000e+00> : vector<8xf32>
    %367 = vector.multi_reduction <add>, %362, %cst_146 [1] : vector<8x8xf32> to vector<8xf32>
    %368 = vector.shape_cast %367 : vector<8xf32> to vector<8x1xf32>
    %369 = arith.addf %368, %366 : vector<8x1xf32>
    %c64_147 = arith.constant 64 : index
    %c128_148 = arith.constant 128 : index
    %370 = vector.load %arg21[%c64_147, %c128_148] : memref<73x512xf32, #tpu.memory_space<vmem>>, vector<8x128xf32>
    %cst_149 = arith.constant dense<0.000000e+00> : vector<8x128xf32>
    %371 = tpu.matmul %362, %370, %cst_149 {dimension_numbers = #tpu.dot_dimension_numbers<[1], [0], [0], [1], [0, 0, 1, 1], [], []>} : vector<8x8xf32>, vector<8x128xf32>, vector<8x128xf32> -> vector<8x128xf32>
    %372 = vector.broadcast %366 : vector<8x1xf32> to vector<8x128xf32>
    %373 = vector.broadcast %318 : vector<1x128xf32> to vector<8x128xf32>
    %374 = arith.mulf %372, %373 : vector<8x128xf32>
    %375 = arith.addf %371, %374 : vector<8x128xf32>
    %cst_150 = arith.constant 3.000000e+00 : f32
    %376 = vector.broadcast %cst_150 : f32 to vector<8x1xf32>
    %377 = arith.mulf %369, %376 : vector<8x1xf32>
    %378 = tpu.reciprocal %377 {approx = true} : vector<8x1xf32> -> vector<8x1xf32>
    %379 = vector.broadcast %378 : vector<8x1xf32> to vector<8x128xf32>
    %380 = arith.mulf %375, %379 : vector<8x128xf32>
    %381 = arith.addf %352, %380 : vector<8x128xf32>
    %382 = vector.extract_strided_slice %245 {offsets = [0, 0], sizes = [64, 128], strides = [1, 1]} : vector<73x128xf32> to vector<64x128xf32>
    %cst_151 = arith.constant dense<0.000000e+00> : vector<8x64xf32>
    %383 = tpu.matmul %313, %382, %cst_151 {dimension_numbers = #tpu.dot_dimension_numbers<[1], [1], [0], [0], [0, 0, 1, 0], [], []>} : vector<8x128xf32>, vector<64x128xf32>, vector<8x64xf32> -> vector<8x64xf32>
    %cst_152 = arith.constant dense<0xFF800000> : vector<8xf32>
    %384 = vector.multi_reduction <maximumf>, %383, %cst_152 [1] : vector<8x64xf32> to vector<8xf32>
    %385 = vector.shape_cast %384 : vector<8xf32> to vector<8x1xf32>
    %386 = arith.maximumf %385, %317 : vector<8x1xf32>
    %387 = vector.broadcast %386 : vector<8x1xf32> to vector<8x64xf32>
    %388 = arith.subf %383, %387 : vector<8x64xf32>
    %389 = math.exp %388 : vector<8x64xf32>
    %c0_153 = arith.constant 0 : index
    %c0_154 = arith.constant 0 : index
    %390 = vector.load %arg10[%c0_153, %c0_154] : memref<8x64xf32, #tpu.memory_space<vmem>>, vector<8x64xf32>
    %391 = arith.mulf %389, %390 : vector<8x64xf32>
    %392 = arith.subf %317, %386 : vector<8x1xf32>
    %393 = math.exp %392 : vector<8x1xf32>
    %c0_155 = arith.constant 0 : index
    %c0_156 = arith.constant 0 : index
    %394 = vector.load %arg17[%c0_155, %c0_156] : memref<8x1xf32, #tpu.memory_space<vmem>>, vector<8x1xf32>
    %395 = arith.mulf %393, %394 : vector<8x1xf32>
    %cst_157 = arith.constant dense<0.000000e+00> : vector<8xf32>
    %396 = vector.multi_reduction <add>, %391, %cst_157 [1] : vector<8x64xf32> to vector<8xf32>
    %397 = vector.shape_cast %396 : vector<8xf32> to vector<8x1xf32>
    %398 = arith.addf %397, %395 : vector<8x1xf32>
    %c0_158 = arith.constant 0 : index
    %c128_159 = arith.constant 128 : index
    %399 = vector.load %arg21[%c0_158, %c128_159] : memref<73x512xf32, #tpu.memory_space<vmem>>, vector<64x128xf32>
    %cst_160 = arith.constant dense<0.000000e+00> : vector<8x128xf32>
    %400 = tpu.matmul %391, %399, %cst_160 {dimension_numbers = #tpu.dot_dimension_numbers<[1], [0], [0], [1], [0, 0, 1, 1], [], []>} : vector<8x64xf32>, vector<64x128xf32>, vector<8x128xf32> -> vector<8x128xf32>
    %401 = vector.broadcast %395 : vector<8x1xf32> to vector<8x128xf32>
    %402 = vector.broadcast %318 : vector<1x128xf32> to vector<8x128xf32>
    %403 = arith.mulf %401, %402 : vector<8x128xf32>
    %404 = arith.addf %400, %403 : vector<8x128xf32>
    %cst_161 = arith.constant 3.000000e+00 : f32
    %405 = vector.broadcast %cst_161 : f32 to vector<8x1xf32>
    %406 = arith.mulf %398, %405 : vector<8x1xf32>
    %407 = tpu.reciprocal %406 {approx = true} : vector<8x1xf32> -> vector<8x1xf32>
    %408 = vector.broadcast %407 : vector<8x1xf32> to vector<8x128xf32>
    %409 = arith.mulf %404, %408 : vector<8x128xf32>
    %410 = arith.addf %381, %409 : vector<8x128xf32>
    %c64_162 = arith.constant 64 : index
    %c128_163 = arith.constant 128 : index
    %411 = vector.load %arg21[%c64_162, %c128_163] : memref<73x512xf32, #tpu.memory_space<vmem>>, vector<8x128xf32>
    tpu.vector_store %arg21[%c64_162, %c128_163], %410 {strides = array<i32>} : memref<73x512xf32, #tpu.memory_space<vmem>>, vector<8x128xf32>,
    %412 = vector.extract_strided_slice %244 {offsets = [72, 0], sizes = [1, 128], strides = [1, 1]} : vector<73x128xf32> to vector<1x128xf32>
    %413 = arith.mulf %412, %246 : vector<1x128xf32>
    %cst_164 = arith.constant dense<0.000000e+00> : vector<1xf32>
    %414 = vector.multi_reduction <add>, %413, %cst_164 [1] : vector<1x128xf32> to vector<1xf32>
    %415 = vector.shape_cast %414 : vector<1xf32> to vector<1x1xf32>
    %c0_165 = arith.constant 0 : index
    %c128_166 = arith.constant 128 : index
    %416 = vector.load %arg21[%c0_165, %c128_166] : memref<73x512xf32, #tpu.memory_space<vmem>>, vector<1x128xf32>
    %cst_167 = arith.constant 0.000000e+00 : f32
    %417 = vector.broadcast %cst_167 : f32 to vector<1x128xf32>
    %418 = vector.extract_strided_slice %245 {offsets = [72, 0], sizes = [1, 128], strides = [1, 1]} : vector<73x128xf32> to vector<1x128xf32>
    %419 = arith.mulf %412, %418 : vector<1x128xf32>
    %cst_168 = arith.constant dense<0.000000e+00> : vector<1xf32>
    %420 = vector.multi_reduction <add>, %419, %cst_168 [1] : vector<1x128xf32> to vector<1xf32>
    %421 = vector.shape_cast %420 : vector<1xf32> to vector<1x1xf32>
    %cst_169 = arith.constant dense<0xFF800000> : vector<1xf32>
    %422 = vector.multi_reduction <maximumf>, %421, %cst_169 [1] : vector<1x1xf32> to vector<1xf32>
    %423 = vector.shape_cast %422 : vector<1xf32> to vector<1x1xf32>
    %424 = arith.maximumf %423, %415 : vector<1x1xf32>
    %425 = arith.subf %421, %424 : vector<1x1xf32>
    %426 = math.exp %425 : vector<1x1xf32>
    %c0_170 = arith.constant 0 : index
    %c0_171 = arith.constant 0 : index
    %427 = vector.load %arg11[%c0_170, %c0_171] : memref<1x1xf32, #tpu.memory_space<vmem>>, vector<1x1xf32>
    %428 = arith.mulf %426, %427 : vector<1x1xf32>
    %429 = arith.subf %415, %424 : vector<1x1xf32>
    %430 = math.exp %429 : vector<1x1xf32>
    %c0_172 = arith.constant 0 : index
    %c0_173 = arith.constant 0 : index
    %431 = vector.load %arg18[%c0_172, %c0_173] : memref<1x1xf32, #tpu.memory_space<vmem>>, vector<1x1xf32>
    %432 = arith.mulf %430, %431 : vector<1x1xf32>
    %cst_174 = arith.constant dense<0.000000e+00> : vector<1xf32>
    %433 = vector.multi_reduction <add>, %428, %cst_174 [1] : vector<1x1xf32> to vector<1xf32>
    %434 = vector.shape_cast %433 : vector<1xf32> to vector<1x1xf32>
    %435 = arith.addf %434, %432 : vector<1x1xf32>
    %c72_175 = arith.constant 72 : index
    %c128_176 = arith.constant 128 : index
    %436 = vector.load %arg21[%c72_175, %c128_176] : memref<73x512xf32, #tpu.memory_space<vmem>>, vector<1x128xf32>
    %437 = vector.broadcast %428 : vector<1x1xf32> to vector<1x128xf32>
    %438 = arith.mulf %437, %436 : vector<1x128xf32>
    %439 = vector.broadcast %432 : vector<1x1xf32> to vector<1x128xf32>
    %440 = arith.mulf %439, %416 : vector<1x128xf32>
    %441 = arith.addf %438, %440 : vector<1x128xf32>
    %cst_177 = arith.constant 3.000000e+00 : f32
    %442 = vector.broadcast %cst_177 : f32 to vector<1x1xf32>
    %443 = arith.mulf %435, %442 : vector<1x1xf32>
    %444 = tpu.reciprocal %443 {approx = true} : vector<1x1xf32> -> vector<1x1xf32>
    %445 = vector.broadcast %444 : vector<1x1xf32> to vector<1x128xf32>
    %446 = arith.mulf %441, %445 : vector<1x128xf32>
    %447 = arith.addf %417, %446 : vector<1x128xf32>
    %448 = vector.extract_strided_slice %245 {offsets = [64, 0], sizes = [8, 128], strides = [1, 1]} : vector<73x128xf32> to vector<8x128xf32>
    %cst_178 = arith.constant dense<0.000000e+00> : vector<1x8xf32>
    %449 = tpu.matmul %412, %448, %cst_178 {dimension_numbers = #tpu.dot_dimension_numbers<[1], [1], [0], [0], [0, 0, 1, 0], [], []>} : vector<1x128xf32>, vector<8x128xf32>, vector<1x8xf32> -> vector<1x8xf32>
    %cst_179 = arith.constant dense<0xFF800000> : vector<1xf32>
    %450 = vector.multi_reduction <maximumf>, %449, %cst_179 [1] : vector<1x8xf32> to vector<1xf32>
    %451 = vector.shape_cast %450 : vector<1xf32> to vector<1x1xf32>
    %452 = arith.maximumf %451, %415 : vector<1x1xf32>
    %453 = vector.broadcast %452 : vector<1x1xf32> to vector<1x8xf32>
    %454 = arith.subf %449, %453 : vector<1x8xf32>
    %455 = math.exp %454 : vector<1x8xf32>
    %c0_180 = arith.constant 0 : index
    %c0_181 = arith.constant 0 : index
    %456 = vector.load %arg12[%c0_180, %c0_181] : memref<1x8xf32, #tpu.memory_space<vmem>>, vector<1x8xf32>
    %457 = arith.mulf %455, %456 : vector<1x8xf32>
    %458 = arith.subf %415, %452 : vector<1x1xf32>
    %459 = math.exp %458 : vector<1x1xf32>
    %c0_182 = arith.constant 0 : index
    %c0_183 = arith.constant 0 : index
    %460 = vector.load %arg19[%c0_182, %c0_183] : memref<1x1xf32, #tpu.memory_space<vmem>>, vector<1x1xf32>
    %461 = arith.mulf %459, %460 : vector<1x1xf32>
    %cst_184 = arith.constant dense<0.000000e+00> : vector<1xf32>
    %462 = vector.multi_reduction <add>, %457, %cst_184 [1] : vector<1x8xf32> to vector<1xf32>
    %463 = vector.shape_cast %462 : vector<1xf32> to vector<1x1xf32>
    %464 = arith.addf %463, %461 : vector<1x1xf32>
    %c64_185 = arith.constant 64 : index
    %c128_186 = arith.constant 128 : index
    %465 = vector.load %arg21[%c64_185, %c128_186] : memref<73x512xf32, #tpu.memory_space<vmem>>, vector<8x128xf32>
    %cst_187 = arith.constant dense<0.000000e+00> : vector<1x128xf32>
    %466 = tpu.matmul %457, %465, %cst_187 {dimension_numbers = #tpu.dot_dimension_numbers<[1], [0], [0], [1], [0, 0, 1, 1], [], []>} : vector<1x8xf32>, vector<8x128xf32>, vector<1x128xf32> -> vector<1x128xf32>
    %467 = vector.broadcast %461 : vector<1x1xf32> to vector<1x128xf32>
    %468 = arith.mulf %467, %416 : vector<1x128xf32>
    %469 = arith.addf %466, %468 : vector<1x128xf32>
    %cst_188 = arith.constant 3.000000e+00 : f32
    %470 = vector.broadcast %cst_188 : f32 to vector<1x1xf32>
    %471 = arith.mulf %464, %470 : vector<1x1xf32>
    %472 = tpu.reciprocal %471 {approx = true} : vector<1x1xf32> -> vector<1x1xf32>
    %473 = vector.broadcast %472 : vector<1x1xf32> to vector<1x128xf32>
    %474 = arith.mulf %469, %473 : vector<1x128xf32>
    %475 = arith.addf %447, %474 : vector<1x128xf32>
    %c72_189 = arith.constant 72 : index
    %c128_190 = arith.constant 128 : index
    %476 = vector.load %arg21[%c72_189, %c128_190] : memref<73x512xf32, #tpu.memory_space<vmem>>, vector<1x128xf32>
    tpu.vector_store %arg21[%c72_189, %c128_190], %475 {strides = array<i32>} : memref<73x512xf32, #tpu.memory_space<vmem>>, vector<1x128xf32>,
    %477 = vector.extract_strided_slice %7 {offsets = [0, 256], sizes = [73, 128], strides = [1, 1]} : vector<73x512xf32> to vector<73x128xf32>
    %478 = vector.extract_strided_slice %8 {offsets = [0, 256], sizes = [73, 128], strides = [1, 1]} : vector<73x512xf32> to vector<73x128xf32>
    %479 = vector.extract_strided_slice %478 {offsets = [0, 0], sizes = [1, 128], strides = [1, 1]} : vector<73x128xf32> to vector<1x128xf32>
    %480 = vector.extract_strided_slice %477 {offsets = [0, 0], sizes = [64, 128], strides = [1, 1]} : vector<73x128xf32> to vector<64x128xf32>
    %481 = vector.broadcast %479 : vector<1x128xf32> to vector<64x128xf32>
    %482 = arith.mulf %480, %481 : vector<64x128xf32>
    %cst_191 = arith.constant dense<0.000000e+00> : vector<64xf32>
    %483 = vector.multi_reduction <add>, %482, %cst_191 [1] : vector<64x128xf32> to vector<64xf32>
    %484 = vector.shape_cast %483 : vector<64xf32> to vector<64x1xf32>
    %c0_192 = arith.constant 0 : index
    %c256 = arith.constant 256 : index
    %485 = vector.load %arg21[%c0_192, %c256] : memref<73x512xf32, #tpu.memory_space<vmem>>, vector<1x128xf32>
    %cst_193 = arith.constant 0.000000e+00 : f32
    %486 = vector.broadcast %cst_193 : f32 to vector<64x128xf32>
    %487 = vector.extract_strided_slice %478 {offsets = [64, 0], sizes = [8, 128], strides = [1, 1]} : vector<73x128xf32> to vector<8x128xf32>
    %cst_194 = arith.constant dense<0.000000e+00> : vector<64x8xf32>
    %488 = tpu.matmul %480, %487, %cst_194 {dimension_numbers = #tpu.dot_dimension_numbers<[1], [1], [0], [0], [0, 0, 1, 0], [], []>} : vector<64x128xf32>, vector<8x128xf32>, vector<64x8xf32> -> vector<64x8xf32>
    %cst_195 = arith.constant dense<0xFF800000> : vector<64xf32>
    %489 = vector.multi_reduction <maximumf>, %488, %cst_195 [1] : vector<64x8xf32> to vector<64xf32>
    %490 = vector.shape_cast %489 : vector<64xf32> to vector<64x1xf32>
    %491 = arith.maximumf %490, %484 : vector<64x1xf32>
    %492 = vector.broadcast %491 : vector<64x1xf32> to vector<64x8xf32>
    %493 = arith.subf %488, %492 : vector<64x8xf32>
    %494 = math.exp %493 : vector<64x8xf32>
    %c0_196 = arith.constant 0 : index
    %c0_197 = arith.constant 0 : index
    %495 = vector.load %arg6[%c0_196, %c0_197] : memref<64x8xf32, #tpu.memory_space<vmem>>, vector<64x8xf32>
    %496 = arith.mulf %494, %495 : vector<64x8xf32>
    %497 = arith.subf %484, %491 : vector<64x1xf32>
    %498 = math.exp %497 : vector<64x1xf32>
    %c0_198 = arith.constant 0 : index
    %c0_199 = arith.constant 0 : index
    %499 = vector.load %arg13[%c0_198, %c0_199] : memref<64x1xf32, #tpu.memory_space<vmem>>, vector<64x1xf32>
    %500 = arith.mulf %498, %499 : vector<64x1xf32>
    %cst_200 = arith.constant dense<0.000000e+00> : vector<64xf32>
    %501 = vector.multi_reduction <add>, %496, %cst_200 [1] : vector<64x8xf32> to vector<64xf32>
    %502 = vector.shape_cast %501 : vector<64xf32> to vector<64x1xf32>
    %503 = arith.addf %502, %500 : vector<64x1xf32>
    %c64_201 = arith.constant 64 : index
    %c256_202 = arith.constant 256 : index
    %504 = vector.load %arg21[%c64_201, %c256_202] : memref<73x512xf32, #tpu.memory_space<vmem>>, vector<8x128xf32>
    %cst_203 = arith.constant dense<0.000000e+00> : vector<64x128xf32>
    %505 = tpu.matmul %496, %504, %cst_203 {dimension_numbers = #tpu.dot_dimension_numbers<[1], [0], [0], [1], [0, 0, 1, 1], [], []>} : vector<64x8xf32>, vector<8x128xf32>, vector<64x128xf32> -> vector<64x128xf32>
    %506 = vector.broadcast %500 : vector<64x1xf32> to vector<64x128xf32>
    %507 = vector.broadcast %485 : vector<1x128xf32> to vector<64x128xf32>
    %508 = arith.mulf %506, %507 : vector<64x128xf32>
    %509 = arith.addf %505, %508 : vector<64x128xf32>
    %cst_204 = arith.constant 3.000000e+00 : f32
    %510 = vector.broadcast %cst_204 : f32 to vector<64x1xf32>
    %511 = arith.mulf %503, %510 : vector<64x1xf32>
    %512 = tpu.reciprocal %511 {approx = true} : vector<64x1xf32> -> vector<64x1xf32>
    %513 = vector.broadcast %512 : vector<64x1xf32> to vector<64x128xf32>
    %514 = arith.mulf %509, %513 : vector<64x128xf32>
    %515 = arith.addf %486, %514 : vector<64x128xf32>
    %516 = vector.extract_strided_slice %478 {offsets = [0, 0], sizes = [64, 128], strides = [1, 1]} : vector<73x128xf32> to vector<64x128xf32>
    %cst_205 = arith.constant dense<0.000000e+00> : vector<64x64xf32>
    %517 = tpu.matmul %480, %516, %cst_205 {dimension_numbers = #tpu.dot_dimension_numbers<[1], [1], [0], [0], [0, 0, 1, 0], [], []>} : vector<64x128xf32>, vector<64x128xf32>, vector<64x64xf32> -> vector<64x64xf32>
    %cst_206 = arith.constant dense<0xFF800000> : vector<64xf32>
    %518 = vector.multi_reduction <maximumf>, %517, %cst_206 [1] : vector<64x64xf32> to vector<64xf32>
    %519 = vector.shape_cast %518 : vector<64xf32> to vector<64x1xf32>
    %520 = arith.maximumf %519, %484 : vector<64x1xf32>
    %521 = vector.broadcast %520 : vector<64x1xf32> to vector<64x64xf32>
    %522 = arith.subf %517, %521 : vector<64x64xf32>
    %523 = math.exp %522 : vector<64x64xf32>
    %c0_207 = arith.constant 0 : index
    %c0_208 = arith.constant 0 : index
    %524 = vector.load %arg7[%c0_207, %c0_208] : memref<64x64xf32, #tpu.memory_space<vmem>>, vector<64x64xf32>
    %525 = arith.mulf %523, %524 : vector<64x64xf32>
    %526 = arith.subf %484, %520 : vector<64x1xf32>
    %527 = math.exp %526 : vector<64x1xf32>
    %c0_209 = arith.constant 0 : index
    %c0_210 = arith.constant 0 : index
    %528 = vector.load %arg14[%c0_209, %c0_210] : memref<64x1xf32, #tpu.memory_space<vmem>>, vector<64x1xf32>
    %529 = arith.mulf %527, %528 : vector<64x1xf32>
    %cst_211 = arith.constant dense<0.000000e+00> : vector<64xf32>
    %530 = vector.multi_reduction <add>, %525, %cst_211 [1] : vector<64x64xf32> to vector<64xf32>
    %531 = vector.shape_cast %530 : vector<64xf32> to vector<64x1xf32>
    %532 = arith.addf %531, %529 : vector<64x1xf32>
    %c0_212 = arith.constant 0 : index
    %c256_213 = arith.constant 256 : index
    %533 = vector.load %arg21[%c0_212, %c256_213] : memref<73x512xf32, #tpu.memory_space<vmem>>, vector<64x128xf32>
    %cst_214 = arith.constant dense<0.000000e+00> : vector<64x128xf32>
    %534 = tpu.matmul %525, %533, %cst_214 {dimension_numbers = #tpu.dot_dimension_numbers<[1], [0], [0], [1], [0, 0, 1, 1], [], []>} : vector<64x64xf32>, vector<64x128xf32>, vector<64x128xf32> -> vector<64x128xf32>
    %535 = vector.broadcast %529 : vector<64x1xf32> to vector<64x128xf32>
    %536 = vector.broadcast %485 : vector<1x128xf32> to vector<64x128xf32>
    %537 = arith.mulf %535, %536 : vector<64x128xf32>
    %538 = arith.addf %534, %537 : vector<64x128xf32>
    %cst_215 = arith.constant 3.000000e+00 : f32
    %539 = vector.broadcast %cst_215 : f32 to vector<64x1xf32>
    %540 = arith.mulf %532, %539 : vector<64x1xf32>
    %541 = tpu.reciprocal %540 {approx = true} : vector<64x1xf32> -> vector<64x1xf32>
    %542 = vector.broadcast %541 : vector<64x1xf32> to vector<64x128xf32>
    %543 = arith.mulf %538, %542 : vector<64x128xf32>
    %544 = arith.addf %515, %543 : vector<64x128xf32>
    %c0_216 = arith.constant 0 : index
    %c256_217 = arith.constant 256 : index
    %545 = vector.load %arg21[%c0_216, %c256_217] : memref<73x512xf32, #tpu.memory_space<vmem>>, vector<64x128xf32>
    tpu.vector_store %arg21[%c0_216, %c256_217], %544 {strides = array<i32>} : memref<73x512xf32, #tpu.memory_space<vmem>>, vector<64x128xf32>,
    %546 = vector.extract_strided_slice %477 {offsets = [64, 0], sizes = [8, 128], strides = [1, 1]} : vector<73x128xf32> to vector<8x128xf32>
    %547 = vector.broadcast %479 : vector<1x128xf32> to vector<8x128xf32>
    %548 = arith.mulf %546, %547 : vector<8x128xf32>
    %cst_218 = arith.constant dense<0.000000e+00> : vector<8xf32>
    %549 = vector.multi_reduction <add>, %548, %cst_218 [1] : vector<8x128xf32> to vector<8xf32>
    %550 = vector.shape_cast %549 : vector<8xf32> to vector<8x1xf32>
    %c0_219 = arith.constant 0 : index
    %c256_220 = arith.constant 256 : index
    %551 = vector.load %arg21[%c0_219, %c256_220] : memref<73x512xf32, #tpu.memory_space<vmem>>, vector<1x128xf32>
    %cst_221 = arith.constant 0.000000e+00 : f32
    %552 = vector.broadcast %cst_221 : f32 to vector<8x128xf32>
    %553 = vector.extract_strided_slice %478 {offsets = [72, 0], sizes = [1, 128], strides = [1, 1]} : vector<73x128xf32> to vector<1x128xf32>
    %554 = vector.broadcast %553 : vector<1x128xf32> to vector<8x128xf32>
    %555 = arith.mulf %546, %554 : vector<8x128xf32>
    %cst_222 = arith.constant dense<0.000000e+00> : vector<8xf32>
    %556 = vector.multi_reduction <add>, %555, %cst_222 [1] : vector<8x128xf32> to vector<8xf32>
    %557 = vector.shape_cast %556 : vector<8xf32> to vector<8x1xf32>
    %cst_223 = arith.constant dense<0xFF800000> : vector<8xf32>
    %558 = vector.multi_reduction <maximumf>, %557, %cst_223 [1] : vector<8x1xf32> to vector<8xf32>
    %559 = vector.shape_cast %558 : vector<8xf32> to vector<8x1xf32>
    %560 = arith.maximumf %559, %550 : vector<8x1xf32>
    %561 = arith.subf %557, %560 : vector<8x1xf32>
    %562 = math.exp %561 : vector<8x1xf32>
    %c0_224 = arith.constant 0 : index
    %c0_225 = arith.constant 0 : index
    %563 = vector.load %arg8[%c0_224, %c0_225] : memref<8x1xf32, #tpu.memory_space<vmem>>, vector<8x1xf32>
    %564 = arith.mulf %562, %563 : vector<8x1xf32>
    %565 = arith.subf %550, %560 : vector<8x1xf32>
    %566 = math.exp %565 : vector<8x1xf32>
    %c0_226 = arith.constant 0 : index
    %c0_227 = arith.constant 0 : index
    %567 = vector.load %arg15[%c0_226, %c0_227] : memref<8x1xf32, #tpu.memory_space<vmem>>, vector<8x1xf32>
    %568 = arith.mulf %566, %567 : vector<8x1xf32>
    %cst_228 = arith.constant dense<0.000000e+00> : vector<8xf32>
    %569 = vector.multi_reduction <add>, %564, %cst_228 [1] : vector<8x1xf32> to vector<8xf32>
    %570 = vector.shape_cast %569 : vector<8xf32> to vector<8x1xf32>
    %571 = arith.addf %570, %568 : vector<8x1xf32>
    %c72_229 = arith.constant 72 : index
    %c256_230 = arith.constant 256 : index
    %572 = vector.load %arg21[%c72_229, %c256_230] : memref<73x512xf32, #tpu.memory_space<vmem>>, vector<1x128xf32>
    %573 = vector.broadcast %564 : vector<8x1xf32> to vector<8x128xf32>
    %574 = vector.broadcast %572 : vector<1x128xf32> to vector<8x128xf32>
    %575 = arith.mulf %573, %574 : vector<8x128xf32>
    %576 = vector.broadcast %568 : vector<8x1xf32> to vector<8x128xf32>
    %577 = vector.broadcast %551 : vector<1x128xf32> to vector<8x128xf32>
    %578 = arith.mulf %576, %577 : vector<8x128xf32>
    %579 = arith.addf %575, %578 : vector<8x128xf32>
    %cst_231 = arith.constant 3.000000e+00 : f32
    %580 = vector.broadcast %cst_231 : f32 to vector<8x1xf32>
    %581 = arith.mulf %571, %580 : vector<8x1xf32>
    %582 = tpu.reciprocal %581 {approx = true} : vector<8x1xf32> -> vector<8x1xf32>
    %583 = vector.broadcast %582 : vector<8x1xf32> to vector<8x128xf32>
    %584 = arith.mulf %579, %583 : vector<8x128xf32>
    %585 = arith.addf %552, %584 : vector<8x128xf32>
    %586 = vector.extract_strided_slice %478 {offsets = [64, 0], sizes = [8, 128], strides = [1, 1]} : vector<73x128xf32> to vector<8x128xf32>
    %cst_232 = arith.constant dense<0.000000e+00> : vector<8x8xf32>
    %587 = tpu.matmul %546, %586, %cst_232 {dimension_numbers = #tpu.dot_dimension_numbers<[1], [1], [0], [0], [0, 0, 1, 0], [], []>} : vector<8x128xf32>, vector<8x128xf32>, vector<8x8xf32> -> vector<8x8xf32>
    %cst_233 = arith.constant dense<0xFF800000> : vector<8xf32>
    %588 = vector.multi_reduction <maximumf>, %587, %cst_233 [1] : vector<8x8xf32> to vector<8xf32>
    %589 = vector.shape_cast %588 : vector<8xf32> to vector<8x1xf32>
    %590 = arith.maximumf %589, %550 : vector<8x1xf32>
    %591 = vector.broadcast %590 : vector<8x1xf32> to vector<8x8xf32>
    %592 = arith.subf %587, %591 : vector<8x8xf32>
    %593 = math.exp %592 : vector<8x8xf32>
    %c0_234 = arith.constant 0 : index
    %c0_235 = arith.constant 0 : index
    %594 = vector.load %arg9[%c0_234, %c0_235] : memref<8x8xf32, #tpu.memory_space<vmem>>, vector<8x8xf32>
    %595 = arith.mulf %593, %594 : vector<8x8xf32>
    %596 = arith.subf %550, %590 : vector<8x1xf32>
    %597 = math.exp %596 : vector<8x1xf32>
    %c0_236 = arith.constant 0 : index
    %c0_237 = arith.constant 0 : index
    %598 = vector.load %arg16[%c0_236, %c0_237] : memref<8x1xf32, #tpu.memory_space<vmem>>, vector<8x1xf32>
    %599 = arith.mulf %597, %598 : vector<8x1xf32>
    %cst_238 = arith.constant dense<0.000000e+00> : vector<8xf32>
    %600 = vector.multi_reduction <add>, %595, %cst_238 [1] : vector<8x8xf32> to vector<8xf32>
    %601 = vector.shape_cast %600 : vector<8xf32> to vector<8x1xf32>
    %602 = arith.addf %601, %599 : vector<8x1xf32>
    %c64_239 = arith.constant 64 : index
    %c256_240 = arith.constant 256 : index
    %603 = vector.load %arg21[%c64_239, %c256_240] : memref<73x512xf32, #tpu.memory_space<vmem>>, vector<8x128xf32>
    %cst_241 = arith.constant dense<0.000000e+00> : vector<8x128xf32>
    %604 = tpu.matmul %595, %603, %cst_241 {dimension_numbers = #tpu.dot_dimension_numbers<[1], [0], [0], [1], [0, 0, 1, 1], [], []>} : vector<8x8xf32>, vector<8x128xf32>, vector<8x128xf32> -> vector<8x128xf32>
    %605 = vector.broadcast %599 : vector<8x1xf32> to vector<8x128xf32>
    %606 = vector.broadcast %551 : vector<1x128xf32> to vector<8x128xf32>
    %607 = arith.mulf %605, %606 : vector<8x128xf32>
    %608 = arith.addf %604, %607 : vector<8x128xf32>
    %cst_242 = arith.constant 3.000000e+00 : f32
    %609 = vector.broadcast %cst_242 : f32 to vector<8x1xf32>
    %610 = arith.mulf %602, %609 : vector<8x1xf32>
    %611 = tpu.reciprocal %610 {approx = true} : vector<8x1xf32> -> vector<8x1xf32>
    %612 = vector.broadcast %611 : vector<8x1xf32> to vector<8x128xf32>
    %613 = arith.mulf %608, %612 : vector<8x128xf32>
    %614 = arith.addf %585, %613 : vector<8x128xf32>
    %615 = vector.extract_strided_slice %478 {offsets = [0, 0], sizes = [64, 128], strides = [1, 1]} : vector<73x128xf32> to vector<64x128xf32>
    %cst_243 = arith.constant dense<0.000000e+00> : vector<8x64xf32>
    %616 = tpu.matmul %546, %615, %cst_243 {dimension_numbers = #tpu.dot_dimension_numbers<[1], [1], [0], [0], [0, 0, 1, 0], [], []>} : vector<8x128xf32>, vector<64x128xf32>, vector<8x64xf32> -> vector<8x64xf32>
    %cst_244 = arith.constant dense<0xFF800000> : vector<8xf32>
    %617 = vector.multi_reduction <maximumf>, %616, %cst_244 [1] : vector<8x64xf32> to vector<8xf32>
    %618 = vector.shape_cast %617 : vector<8xf32> to vector<8x1xf32>
    %619 = arith.maximumf %618, %550 : vector<8x1xf32>
    %620 = vector.broadcast %619 : vector<8x1xf32> to vector<8x64xf32>
    %621 = arith.subf %616, %620 : vector<8x64xf32>
    %622 = math.exp %621 : vector<8x64xf32>
    %c0_245 = arith.constant 0 : index
    %c0_246 = arith.constant 0 : index
    %623 = vector.load %arg10[%c0_245, %c0_246] : memref<8x64xf32, #tpu.memory_space<vmem>>, vector<8x64xf32>
    %624 = arith.mulf %622, %623 : vector<8x64xf32>
    %625 = arith.subf %550, %619 : vector<8x1xf32>
    %626 = math.exp %625 : vector<8x1xf32>
    %c0_247 = arith.constant 0 : index
    %c0_248 = arith.constant 0 : index
    %627 = vector.load %arg17[%c0_247, %c0_248] : memref<8x1xf32, #tpu.memory_space<vmem>>, vector<8x1xf32>
    %628 = arith.mulf %626, %627 : vector<8x1xf32>
    %cst_249 = arith.constant dense<0.000000e+00> : vector<8xf32>
    %629 = vector.multi_reduction <add>, %624, %cst_249 [1] : vector<8x64xf32> to vector<8xf32>
    %630 = vector.shape_cast %629 : vector<8xf32> to vector<8x1xf32>
    %631 = arith.addf %630, %628 : vector<8x1xf32>
    %c0_250 = arith.constant 0 : index
    %c256_251 = arith.constant 256 : index
    %632 = vector.load %arg21[%c0_250, %c256_251] : memref<73x512xf32, #tpu.memory_space<vmem>>, vector<64x128xf32>
    %cst_252 = arith.constant dense<0.000000e+00> : vector<8x128xf32>
    %633 = tpu.matmul %624, %632, %cst_252 {dimension_numbers = #tpu.dot_dimension_numbers<[1], [0], [0], [1], [0, 0, 1, 1], [], []>} : vector<8x64xf32>, vector<64x128xf32>, vector<8x128xf32> -> vector<8x128xf32>
    %634 = vector.broadcast %628 : vector<8x1xf32> to vector<8x128xf32>
    %635 = vector.broadcast %551 : vector<1x128xf32> to vector<8x128xf32>
    %636 = arith.mulf %634, %635 : vector<8x128xf32>
    %637 = arith.addf %633, %636 : vector<8x128xf32>
    %cst_253 = arith.constant 3.000000e+00 : f32
    %638 = vector.broadcast %cst_253 : f32 to vector<8x1xf32>
    %639 = arith.mulf %631, %638 : vector<8x1xf32>
    %640 = tpu.reciprocal %639 {approx = true} : vector<8x1xf32> -> vector<8x1xf32>
    %641 = vector.broadcast %640 : vector<8x1xf32> to vector<8x128xf32>
    %642 = arith.mulf %637, %641 : vector<8x128xf32>
    %643 = arith.addf %614, %642 : vector<8x128xf32>
    %c64_254 = arith.constant 64 : index
    %c256_255 = arith.constant 256 : index
    %644 = vector.load %arg21[%c64_254, %c256_255] : memref<73x512xf32, #tpu.memory_space<vmem>>, vector<8x128xf32>
    tpu.vector_store %arg21[%c64_254, %c256_255], %643 {strides = array<i32>} : memref<73x512xf32, #tpu.memory_space<vmem>>, vector<8x128xf32>,
    %645 = vector.extract_strided_slice %477 {offsets = [72, 0], sizes = [1, 128], strides = [1, 1]} : vector<73x128xf32> to vector<1x128xf32>
    %646 = arith.mulf %645, %479 : vector<1x128xf32>
    %cst_256 = arith.constant dense<0.000000e+00> : vector<1xf32>
    %647 = vector.multi_reduction <add>, %646, %cst_256 [1] : vector<1x128xf32> to vector<1xf32>
    %648 = vector.shape_cast %647 : vector<1xf32> to vector<1x1xf32>
    %c0_257 = arith.constant 0 : index
    %c256_258 = arith.constant 256 : index
    %649 = vector.load %arg21[%c0_257, %c256_258] : memref<73x512xf32, #tpu.memory_space<vmem>>, vector<1x128xf32>
    %cst_259 = arith.constant 0.000000e+00 : f32
    %650 = vector.broadcast %cst_259 : f32 to vector<1x128xf32>
    %651 = vector.extract_strided_slice %478 {offsets = [72, 0], sizes = [1, 128], strides = [1, 1]} : vector<73x128xf32> to vector<1x128xf32>
    %652 = arith.mulf %645, %651 : vector<1x128xf32>
    %cst_260 = arith.constant dense<0.000000e+00> : vector<1xf32>
    %653 = vector.multi_reduction <add>, %652, %cst_260 [1] : vector<1x128xf32> to vector<1xf32>
    %654 = vector.shape_cast %653 : vector<1xf32> to vector<1x1xf32>
    %cst_261 = arith.constant dense<0xFF800000> : vector<1xf32>
    %655 = vector.multi_reduction <maximumf>, %654, %cst_261 [1] : vector<1x1xf32> to vector<1xf32>
    %656 = vector.shape_cast %655 : vector<1xf32> to vector<1x1xf32>
    %657 = arith.maximumf %656, %648 : vector<1x1xf32>
    %658 = arith.subf %654, %657 : vector<1x1xf32>
    %659 = math.exp %658 : vector<1x1xf32>
    %c0_262 = arith.constant 0 : index
    %c0_263 = arith.constant 0 : index
    %660 = vector.load %arg11[%c0_262, %c0_263] : memref<1x1xf32, #tpu.memory_space<vmem>>, vector<1x1xf32>
    %661 = arith.mulf %659, %660 : vector<1x1xf32>
    %662 = arith.subf %648, %657 : vector<1x1xf32>
    %663 = math.exp %662 : vector<1x1xf32>
    %c0_264 = arith.constant 0 : index
    %c0_265 = arith.constant 0 : index
    %664 = vector.load %arg18[%c0_264, %c0_265] : memref<1x1xf32, #tpu.memory_space<vmem>>, vector<1x1xf32>
    %665 = arith.mulf %663, %664 : vector<1x1xf32>
    %cst_266 = arith.constant dense<0.000000e+00> : vector<1xf32>
    %666 = vector.multi_reduction <add>, %661, %cst_266 [1] : vector<1x1xf32> to vector<1xf32>
    %667 = vector.shape_cast %666 : vector<1xf32> to vector<1x1xf32>
    %668 = arith.addf %667, %665 : vector<1x1xf32>
    %c72_267 = arith.constant 72 : index
    %c256_268 = arith.constant 256 : index
    %669 = vector.load %arg21[%c72_267, %c256_268] : memref<73x512xf32, #tpu.memory_space<vmem>>, vector<1x128xf32>
    %670 = vector.broadcast %661 : vector<1x1xf32> to vector<1x128xf32>
    %671 = arith.mulf %670, %669 : vector<1x128xf32>
    %672 = vector.broadcast %665 : vector<1x1xf32> to vector<1x128xf32>
    %673 = arith.mulf %672, %649 : vector<1x128xf32>
    %674 = arith.addf %671, %673 : vector<1x128xf32>
    %cst_269 = arith.constant 3.000000e+00 : f32
    %675 = vector.broadcast %cst_269 : f32 to vector<1x1xf32>
    %676 = arith.mulf %668, %675 : vector<1x1xf32>
    %677 = tpu.reciprocal %676 {approx = true} : vector<1x1xf32> -> vector<1x1xf32>
    %678 = vector.broadcast %677 : vector<1x1xf32> to vector<1x128xf32>
    %679 = arith.mulf %674, %678 : vector<1x128xf32>
    %680 = arith.addf %650, %679 : vector<1x128xf32>
    %681 = vector.extract_strided_slice %478 {offsets = [64, 0], sizes = [8, 128], strides = [1, 1]} : vector<73x128xf32> to vector<8x128xf32>
    %cst_270 = arith.constant dense<0.000000e+00> : vector<1x8xf32>
    %682 = tpu.matmul %645, %681, %cst_270 {dimension_numbers = #tpu.dot_dimension_numbers<[1], [1], [0], [0], [0, 0, 1, 0], [], []>} : vector<1x128xf32>, vector<8x128xf32>, vector<1x8xf32> -> vector<1x8xf32>
    %cst_271 = arith.constant dense<0xFF800000> : vector<1xf32>
    %683 = vector.multi_reduction <maximumf>, %682, %cst_271 [1] : vector<1x8xf32> to vector<1xf32>
    %684 = vector.shape_cast %683 : vector<1xf32> to vector<1x1xf32>
    %685 = arith.maximumf %684, %648 : vector<1x1xf32>
    %686 = vector.broadcast %685 : vector<1x1xf32> to vector<1x8xf32>
    %687 = arith.subf %682, %686 : vector<1x8xf32>
    %688 = math.exp %687 : vector<1x8xf32>
    %c0_272 = arith.constant 0 : index
    %c0_273 = arith.constant 0 : index
    %689 = vector.load %arg12[%c0_272, %c0_273] : memref<1x8xf32, #tpu.memory_space<vmem>>, vector<1x8xf32>
    %690 = arith.mulf %688, %689 : vector<1x8xf32>
    %691 = arith.subf %648, %685 : vector<1x1xf32>
    %692 = math.exp %691 : vector<1x1xf32>
    %c0_274 = arith.constant 0 : index
    %c0_275 = arith.constant 0 : index
    %693 = vector.load %arg19[%c0_274, %c0_275] : memref<1x1xf32, #tpu.memory_space<vmem>>, vector<1x1xf32>
    %694 = arith.mulf %692, %693 : vector<1x1xf32>
    %cst_276 = arith.constant dense<0.000000e+00> : vector<1xf32>
    %695 = vector.multi_reduction <add>, %690, %cst_276 [1] : vector<1x8xf32> to vector<1xf32>
    %696 = vector.shape_cast %695 : vector<1xf32> to vector<1x1xf32>
    %697 = arith.addf %696, %694 : vector<1x1xf32>
    %c64_277 = arith.constant 64 : index
    %c256_278 = arith.constant 256 : index
    %698 = vector.load %arg21[%c64_277, %c256_278] : memref<73x512xf32, #tpu.memory_space<vmem>>, vector<8x128xf32>
    %cst_279 = arith.constant dense<0.000000e+00> : vector<1x128xf32>
    %699 = tpu.matmul %690, %698, %cst_279 {dimension_numbers = #tpu.dot_dimension_numbers<[1], [0], [0], [1], [0, 0, 1, 1], [], []>} : vector<1x8xf32>, vector<8x128xf32>, vector<1x128xf32> -> vector<1x128xf32>
    %700 = vector.broadcast %694 : vector<1x1xf32> to vector<1x128xf32>
    %701 = arith.mulf %700, %649 : vector<1x128xf32>
    %702 = arith.addf %699, %701 : vector<1x128xf32>
    %cst_280 = arith.constant 3.000000e+00 : f32
    %703 = vector.broadcast %cst_280 : f32 to vector<1x1xf32>
    %704 = arith.mulf %697, %703 : vector<1x1xf32>
    %705 = tpu.reciprocal %704 {approx = true} : vector<1x1xf32> -> vector<1x1xf32>
    %706 = vector.broadcast %705 : vector<1x1xf32> to vector<1x128xf32>
    %707 = arith.mulf %702, %706 : vector<1x128xf32>
    %708 = arith.addf %680, %707 : vector<1x128xf32>
    %c72_281 = arith.constant 72 : index
    %c256_282 = arith.constant 256 : index
    %709 = vector.load %arg21[%c72_281, %c256_282] : memref<73x512xf32, #tpu.memory_space<vmem>>, vector<1x128xf32>
    tpu.vector_store %arg21[%c72_281, %c256_282], %708 {strides = array<i32>} : memref<73x512xf32, #tpu.memory_space<vmem>>, vector<1x128xf32>,
    %710 = vector.extract_strided_slice %7 {offsets = [0, 384], sizes = [73, 128], strides = [1, 1]} : vector<73x512xf32> to vector<73x128xf32>
    %711 = vector.extract_strided_slice %8 {offsets = [0, 384], sizes = [73, 128], strides = [1, 1]} : vector<73x512xf32> to vector<73x128xf32>
    %712 = vector.extract_strided_slice %711 {offsets = [0, 0], sizes = [1, 128], strides = [1, 1]} : vector<73x128xf32> to vector<1x128xf32>
    %713 = vector.extract_strided_slice %710 {offsets = [0, 0], sizes = [64, 128], strides = [1, 1]} : vector<73x128xf32> to vector<64x128xf32>
    %714 = vector.broadcast %712 : vector<1x128xf32> to vector<64x128xf32>
    %715 = arith.mulf %713, %714 : vector<64x128xf32>
    %cst_283 = arith.constant dense<0.000000e+00> : vector<64xf32>
    %716 = vector.multi_reduction <add>, %715, %cst_283 [1] : vector<64x128xf32> to vector<64xf32>
    %717 = vector.shape_cast %716 : vector<64xf32> to vector<64x1xf32>
    %c0_284 = arith.constant 0 : index
    %c384 = arith.constant 384 : index
    %718 = vector.load %arg21[%c0_284, %c384] : memref<73x512xf32, #tpu.memory_space<vmem>>, vector<1x128xf32>
    %cst_285 = arith.constant 0.000000e+00 : f32
    %719 = vector.broadcast %cst_285 : f32 to vector<64x128xf32>
    %720 = vector.extract_strided_slice %711 {offsets = [64, 0], sizes = [8, 128], strides = [1, 1]} : vector<73x128xf32> to vector<8x128xf32>
    %cst_286 = arith.constant dense<0.000000e+00> : vector<64x8xf32>
    %721 = tpu.matmul %713, %720, %cst_286 {dimension_numbers = #tpu.dot_dimension_numbers<[1], [1], [0], [0], [0, 0, 1, 0], [], []>} : vector<64x128xf32>, vector<8x128xf32>, vector<64x8xf32> -> vector<64x8xf32>
    %cst_287 = arith.constant dense<0xFF800000> : vector<64xf32>
    %722 = vector.multi_reduction <maximumf>, %721, %cst_287 [1] : vector<64x8xf32> to vector<64xf32>
    %723 = vector.shape_cast %722 : vector<64xf32> to vector<64x1xf32>
    %724 = arith.maximumf %723, %717 : vector<64x1xf32>
    %725 = vector.broadcast %724 : vector<64x1xf32> to vector<64x8xf32>
    %726 = arith.subf %721, %725 : vector<64x8xf32>
    %727 = math.exp %726 : vector<64x8xf32>
    %c0_288 = arith.constant 0 : index
    %c0_289 = arith.constant 0 : index
    %728 = vector.load %arg6[%c0_288, %c0_289] : memref<64x8xf32, #tpu.memory_space<vmem>>, vector<64x8xf32>
    %729 = arith.mulf %727, %728 : vector<64x8xf32>
    %730 = arith.subf %717, %724 : vector<64x1xf32>
    %731 = math.exp %730 : vector<64x1xf32>
    %c0_290 = arith.constant 0 : index
    %c0_291 = arith.constant 0 : index
    %732 = vector.load %arg13[%c0_290, %c0_291] : memref<64x1xf32, #tpu.memory_space<vmem>>, vector<64x1xf32>
    %733 = arith.mulf %731, %732 : vector<64x1xf32>
    %cst_292 = arith.constant dense<0.000000e+00> : vector<64xf32>
    %734 = vector.multi_reduction <add>, %729, %cst_292 [1] : vector<64x8xf32> to vector<64xf32>
    %735 = vector.shape_cast %734 : vector<64xf32> to vector<64x1xf32>
    %736 = arith.addf %735, %733 : vector<64x1xf32>
    %c64_293 = arith.constant 64 : index
    %c384_294 = arith.constant 384 : index
    %737 = vector.load %arg21[%c64_293, %c384_294] : memref<73x512xf32, #tpu.memory_space<vmem>>, vector<8x128xf32>
    %cst_295 = arith.constant dense<0.000000e+00> : vector<64x128xf32>
    %738 = tpu.matmul %729, %737, %cst_295 {dimension_numbers = #tpu.dot_dimension_numbers<[1], [0], [0], [1], [0, 0, 1, 1], [], []>} : vector<64x8xf32>, vector<8x128xf32>, vector<64x128xf32> -> vector<64x128xf32>
    %739 = vector.broadcast %733 : vector<64x1xf32> to vector<64x128xf32>
    %740 = vector.broadcast %718 : vector<1x128xf32> to vector<64x128xf32>
    %741 = arith.mulf %739, %740 : vector<64x128xf32>
    %742 = arith.addf %738, %741 : vector<64x128xf32>
    %cst_296 = arith.constant 3.000000e+00 : f32
    %743 = vector.broadcast %cst_296 : f32 to vector<64x1xf32>
    %744 = arith.mulf %736, %743 : vector<64x1xf32>
    %745 = tpu.reciprocal %744 {approx = true} : vector<64x1xf32> -> vector<64x1xf32>
    %746 = vector.broadcast %745 : vector<64x1xf32> to vector<64x128xf32>
    %747 = arith.mulf %742, %746 : vector<64x128xf32>
    %748 = arith.addf %719, %747 : vector<64x128xf32>
    %749 = vector.extract_strided_slice %711 {offsets = [0, 0], sizes = [64, 128], strides = [1, 1]} : vector<73x128xf32> to vector<64x128xf32>
    %cst_297 = arith.constant dense<0.000000e+00> : vector<64x64xf32>
    %750 = tpu.matmul %713, %749, %cst_297 {dimension_numbers = #tpu.dot_dimension_numbers<[1], [1], [0], [0], [0, 0, 1, 0], [], []>} : vector<64x128xf32>, vector<64x128xf32>, vector<64x64xf32> -> vector<64x64xf32>
    %cst_298 = arith.constant dense<0xFF800000> : vector<64xf32>
    %751 = vector.multi_reduction <maximumf>, %750, %cst_298 [1] : vector<64x64xf32> to vector<64xf32>
    %752 = vector.shape_cast %751 : vector<64xf32> to vector<64x1xf32>
    %753 = arith.maximumf %752, %717 : vector<64x1xf32>
    %754 = vector.broadcast %753 : vector<64x1xf32> to vector<64x64xf32>
    %755 = arith.subf %750, %754 : vector<64x64xf32>
    %756 = math.exp %755 : vector<64x64xf32>
    %c0_299 = arith.constant 0 : index
    %c0_300 = arith.constant 0 : index
    %757 = vector.load %arg7[%c0_299, %c0_300] : memref<64x64xf32, #tpu.memory_space<vmem>>, vector<64x64xf32>
    %758 = arith.mulf %756, %757 : vector<64x64xf32>
    %759 = arith.subf %717, %753 : vector<64x1xf32>
    %760 = math.exp %759 : vector<64x1xf32>
    %c0_301 = arith.constant 0 : index
    %c0_302 = arith.constant 0 : index
    %761 = vector.load %arg14[%c0_301, %c0_302] : memref<64x1xf32, #tpu.memory_space<vmem>>, vector<64x1xf32>
    %762 = arith.mulf %760, %761 : vector<64x1xf32>
    %cst_303 = arith.constant dense<0.000000e+00> : vector<64xf32>
    %763 = vector.multi_reduction <add>, %758, %cst_303 [1] : vector<64x64xf32> to vector<64xf32>
    %764 = vector.shape_cast %763 : vector<64xf32> to vector<64x1xf32>
    %765 = arith.addf %764, %762 : vector<64x1xf32>
    %c0_304 = arith.constant 0 : index
    %c384_305 = arith.constant 384 : index
    %766 = vector.load %arg21[%c0_304, %c384_305] : memref<73x512xf32, #tpu.memory_space<vmem>>, vector<64x128xf32>
    %cst_306 = arith.constant dense<0.000000e+00> : vector<64x128xf32>
    %767 = tpu.matmul %758, %766, %cst_306 {dimension_numbers = #tpu.dot_dimension_numbers<[1], [0], [0], [1], [0, 0, 1, 1], [], []>} : vector<64x64xf32>, vector<64x128xf32>, vector<64x128xf32> -> vector<64x128xf32>
    %768 = vector.broadcast %762 : vector<64x1xf32> to vector<64x128xf32>
    %769 = vector.broadcast %718 : vector<1x128xf32> to vector<64x128xf32>
    %770 = arith.mulf %768, %769 : vector<64x128xf32>
    %771 = arith.addf %767, %770 : vector<64x128xf32>
    %cst_307 = arith.constant 3.000000e+00 : f32
    %772 = vector.broadcast %cst_307 : f32 to vector<64x1xf32>
    %773 = arith.mulf %765, %772 : vector<64x1xf32>
    %774 = tpu.reciprocal %773 {approx = true} : vector<64x1xf32> -> vector<64x1xf32>
    %775 = vector.broadcast %774 : vector<64x1xf32> to vector<64x128xf32>
    %776 = arith.mulf %771, %775 : vector<64x128xf32>
    %777 = arith.addf %748, %776 : vector<64x128xf32>
    %c0_308 = arith.constant 0 : index
    %c384_309 = arith.constant 384 : index
    %778 = vector.load %arg21[%c0_308, %c384_309] : memref<73x512xf32, #tpu.memory_space<vmem>>, vector<64x128xf32>
    tpu.vector_store %arg21[%c0_308, %c384_309], %777 {strides = array<i32>} : memref<73x512xf32, #tpu.memory_space<vmem>>, vector<64x128xf32>,
    %779 = vector.extract_strided_slice %710 {offsets = [64, 0], sizes = [8, 128], strides = [1, 1]} : vector<73x128xf32> to vector<8x128xf32>
    %780 = vector.broadcast %712 : vector<1x128xf32> to vector<8x128xf32>
    %781 = arith.mulf %779, %780 : vector<8x128xf32>
    %cst_310 = arith.constant dense<0.000000e+00> : vector<8xf32>
    %782 = vector.multi_reduction <add>, %781, %cst_310 [1] : vector<8x128xf32> to vector<8xf32>
    %783 = vector.shape_cast %782 : vector<8xf32> to vector<8x1xf32>
    %c0_311 = arith.constant 0 : index
    %c384_312 = arith.constant 384 : index
    %784 = vector.load %arg21[%c0_311, %c384_312] : memref<73x512xf32, #tpu.memory_space<vmem>>, vector<1x128xf32>
    %cst_313 = arith.constant 0.000000e+00 : f32
    %785 = vector.broadcast %cst_313 : f32 to vector<8x128xf32>
    %786 = vector.extract_strided_slice %711 {offsets = [72, 0], sizes = [1, 128], strides = [1, 1]} : vector<73x128xf32> to vector<1x128xf32>
    %787 = vector.broadcast %786 : vector<1x128xf32> to vector<8x128xf32>
    %788 = arith.mulf %779, %787 : vector<8x128xf32>
    %cst_314 = arith.constant dense<0.000000e+00> : vector<8xf32>
    %789 = vector.multi_reduction <add>, %788, %cst_314 [1] : vector<8x128xf32> to vector<8xf32>
    %790 = vector.shape_cast %789 : vector<8xf32> to vector<8x1xf32>
    %cst_315 = arith.constant dense<0xFF800000> : vector<8xf32>
    %791 = vector.multi_reduction <maximumf>, %790, %cst_315 [1] : vector<8x1xf32> to vector<8xf32>
    %792 = vector.shape_cast %791 : vector<8xf32> to vector<8x1xf32>
    %793 = arith.maximumf %792, %783 : vector<8x1xf32>
    %794 = arith.subf %790, %793 : vector<8x1xf32>
    %795 = math.exp %794 : vector<8x1xf32>
    %c0_316 = arith.constant 0 : index
    %c0_317 = arith.constant 0 : index
    %796 = vector.load %arg8[%c0_316, %c0_317] : memref<8x1xf32, #tpu.memory_space<vmem>>, vector<8x1xf32>
    %797 = arith.mulf %795, %796 : vector<8x1xf32>
    %798 = arith.subf %783, %793 : vector<8x1xf32>
    %799 = math.exp %798 : vector<8x1xf32>
    %c0_318 = arith.constant 0 : index
    %c0_319 = arith.constant 0 : index
    %800 = vector.load %arg15[%c0_318, %c0_319] : memref<8x1xf32, #tpu.memory_space<vmem>>, vector<8x1xf32>
    %801 = arith.mulf %799, %800 : vector<8x1xf32>
    %cst_320 = arith.constant dense<0.000000e+00> : vector<8xf32>
    %802 = vector.multi_reduction <add>, %797, %cst_320 [1] : vector<8x1xf32> to vector<8xf32>
    %803 = vector.shape_cast %802 : vector<8xf32> to vector<8x1xf32>
    %804 = arith.addf %803, %801 : vector<8x1xf32>
    %c72_321 = arith.constant 72 : index
    %c384_322 = arith.constant 384 : index
    %805 = vector.load %arg21[%c72_321, %c384_322] : memref<73x512xf32, #tpu.memory_space<vmem>>, vector<1x128xf32>
    %806 = vector.broadcast %797 : vector<8x1xf32> to vector<8x128xf32>
    %807 = vector.broadcast %805 : vector<1x128xf32> to vector<8x128xf32>
    %808 = arith.mulf %806, %807 : vector<8x128xf32>
    %809 = vector.broadcast %801 : vector<8x1xf32> to vector<8x128xf32>
    %810 = vector.broadcast %784 : vector<1x128xf32> to vector<8x128xf32>
    %811 = arith.mulf %809, %810 : vector<8x128xf32>
    %812 = arith.addf %808, %811 : vector<8x128xf32>
    %cst_323 = arith.constant 3.000000e+00 : f32
    %813 = vector.broadcast %cst_323 : f32 to vector<8x1xf32>
    %814 = arith.mulf %804, %813 : vector<8x1xf32>
    %815 = tpu.reciprocal %814 {approx = true} : vector<8x1xf32> -> vector<8x1xf32>
    %816 = vector.broadcast %815 : vector<8x1xf32> to vector<8x128xf32>
    %817 = arith.mulf %812, %816 : vector<8x128xf32>
    %818 = arith.addf %785, %817 : vector<8x128xf32>
    %819 = vector.extract_strided_slice %711 {offsets = [64, 0], sizes = [8, 128], strides = [1, 1]} : vector<73x128xf32> to vector<8x128xf32>
    %cst_324 = arith.constant dense<0.000000e+00> : vector<8x8xf32>
    %820 = tpu.matmul %779, %819, %cst_324 {dimension_numbers = #tpu.dot_dimension_numbers<[1], [1], [0], [0], [0, 0, 1, 0], [], []>} : vector<8x128xf32>, vector<8x128xf32>, vector<8x8xf32> -> vector<8x8xf32>
    %cst_325 = arith.constant dense<0xFF800000> : vector<8xf32>
    %821 = vector.multi_reduction <maximumf>, %820, %cst_325 [1] : vector<8x8xf32> to vector<8xf32>
    %822 = vector.shape_cast %821 : vector<8xf32> to vector<8x1xf32>
    %823 = arith.maximumf %822, %783 : vector<8x1xf32>
    %824 = vector.broadcast %823 : vector<8x1xf32> to vector<8x8xf32>
    %825 = arith.subf %820, %824 : vector<8x8xf32>
    %826 = math.exp %825 : vector<8x8xf32>
    %c0_326 = arith.constant 0 : index
    %c0_327 = arith.constant 0 : index
    %827 = vector.load %arg9[%c0_326, %c0_327] : memref<8x8xf32, #tpu.memory_space<vmem>>, vector<8x8xf32>
    %828 = arith.mulf %826, %827 : vector<8x8xf32>
    %829 = arith.subf %783, %823 : vector<8x1xf32>
    %830 = math.exp %829 : vector<8x1xf32>
    %c0_328 = arith.constant 0 : index
    %c0_329 = arith.constant 0 : index
    %831 = vector.load %arg16[%c0_328, %c0_329] : memref<8x1xf32, #tpu.memory_space<vmem>>, vector<8x1xf32>
    %832 = arith.mulf %830, %831 : vector<8x1xf32>
    %cst_330 = arith.constant dense<0.000000e+00> : vector<8xf32>
    %833 = vector.multi_reduction <add>, %828, %cst_330 [1] : vector<8x8xf32> to vector<8xf32>
    %834 = vector.shape_cast %833 : vector<8xf32> to vector<8x1xf32>
    %835 = arith.addf %834, %832 : vector<8x1xf32>
    %c64_331 = arith.constant 64 : index
    %c384_332 = arith.constant 384 : index
    %836 = vector.load %arg21[%c64_331, %c384_332] : memref<73x512xf32, #tpu.memory_space<vmem>>, vector<8x128xf32>
    %cst_333 = arith.constant dense<0.000000e+00> : vector<8x128xf32>
    %837 = tpu.matmul %828, %836, %cst_333 {dimension_numbers = #tpu.dot_dimension_numbers<[1], [0], [0], [1], [0, 0, 1, 1], [], []>} : vector<8x8xf32>, vector<8x128xf32>, vector<8x128xf32> -> vector<8x128xf32>
    %838 = vector.broadcast %832 : vector<8x1xf32> to vector<8x128xf32>
    %839 = vector.broadcast %784 : vector<1x128xf32> to vector<8x128xf32>
    %840 = arith.mulf %838, %839 : vector<8x128xf32>
    %841 = arith.addf %837, %840 : vector<8x128xf32>
    %cst_334 = arith.constant 3.000000e+00 : f32
    %842 = vector.broadcast %cst_334 : f32 to vector<8x1xf32>
    %843 = arith.mulf %835, %842 : vector<8x1xf32>
    %844 = tpu.reciprocal %843 {approx = true} : vector<8x1xf32> -> vector<8x1xf32>
    %845 = vector.broadcast %844 : vector<8x1xf32> to vector<8x128xf32>
    %846 = arith.mulf %841, %845 : vector<8x128xf32>
    %847 = arith.addf %818, %846 : vector<8x128xf32>
    %848 = vector.extract_strided_slice %711 {offsets = [0, 0], sizes = [64, 128], strides = [1, 1]} : vector<73x128xf32> to vector<64x128xf32>
    %cst_335 = arith.constant dense<0.000000e+00> : vector<8x64xf32>
    %849 = tpu.matmul %779, %848, %cst_335 {dimension_numbers = #tpu.dot_dimension_numbers<[1], [1], [0], [0], [0, 0, 1, 0], [], []>} : vector<8x128xf32>, vector<64x128xf32>, vector<8x64xf32> -> vector<8x64xf32>
    %cst_336 = arith.constant dense<0xFF800000> : vector<8xf32>
    %850 = vector.multi_reduction <maximumf>, %849, %cst_336 [1] : vector<8x64xf32> to vector<8xf32>
    %851 = vector.shape_cast %850 : vector<8xf32> to vector<8x1xf32>
    %852 = arith.maximumf %851, %783 : vector<8x1xf32>
    %853 = vector.broadcast %852 : vector<8x1xf32> to vector<8x64xf32>
    %854 = arith.subf %849, %853 : vector<8x64xf32>
    %855 = math.exp %854 : vector<8x64xf32>
    %c0_337 = arith.constant 0 : index
    %c0_338 = arith.constant 0 : index
    %856 = vector.load %arg10[%c0_337, %c0_338] : memref<8x64xf32, #tpu.memory_space<vmem>>, vector<8x64xf32>
    %857 = arith.mulf %855, %856 : vector<8x64xf32>
    %858 = arith.subf %783, %852 : vector<8x1xf32>
    %859 = math.exp %858 : vector<8x1xf32>
    %c0_339 = arith.constant 0 : index
    %c0_340 = arith.constant 0 : index
    %860 = vector.load %arg17[%c0_339, %c0_340] : memref<8x1xf32, #tpu.memory_space<vmem>>, vector<8x1xf32>
    %861 = arith.mulf %859, %860 : vector<8x1xf32>
    %cst_341 = arith.constant dense<0.000000e+00> : vector<8xf32>
    %862 = vector.multi_reduction <add>, %857, %cst_341 [1] : vector<8x64xf32> to vector<8xf32>
    %863 = vector.shape_cast %862 : vector<8xf32> to vector<8x1xf32>
    %864 = arith.addf %863, %861 : vector<8x1xf32>
    %c0_342 = arith.constant 0 : index
    %c384_343 = arith.constant 384 : index
    %865 = vector.load %arg21[%c0_342, %c384_343] : memref<73x512xf32, #tpu.memory_space<vmem>>, vector<64x128xf32>
    %cst_344 = arith.constant dense<0.000000e+00> : vector<8x128xf32>
    %866 = tpu.matmul %857, %865, %cst_344 {dimension_numbers = #tpu.dot_dimension_numbers<[1], [0], [0], [1], [0, 0, 1, 1], [], []>} : vector<8x64xf32>, vector<64x128xf32>, vector<8x128xf32> -> vector<8x128xf32>
    %867 = vector.broadcast %861 : vector<8x1xf32> to vector<8x128xf32>
    %868 = vector.broadcast %784 : vector<1x128xf32> to vector<8x128xf32>
    %869 = arith.mulf %867, %868 : vector<8x128xf32>
    %870 = arith.addf %866, %869 : vector<8x128xf32>
    %cst_345 = arith.constant 3.000000e+00 : f32
    %871 = vector.broadcast %cst_345 : f32 to vector<8x1xf32>
    %872 = arith.mulf %864, %871 : vector<8x1xf32>
    %873 = tpu.reciprocal %872 {approx = true} : vector<8x1xf32> -> vector<8x1xf32>
    %874 = vector.broadcast %873 : vector<8x1xf32> to vector<8x128xf32>
    %875 = arith.mulf %870, %874 : vector<8x128xf32>
    %876 = arith.addf %847, %875 : vector<8x128xf32>
    %c64_346 = arith.constant 64 : index
    %c384_347 = arith.constant 384 : index
    %877 = vector.load %arg21[%c64_346, %c384_347] : memref<73x512xf32, #tpu.memory_space<vmem>>, vector<8x128xf32>
    tpu.vector_store %arg21[%c64_346, %c384_347], %876 {strides = array<i32>} : memref<73x512xf32, #tpu.memory_space<vmem>>, vector<8x128xf32>,
    %878 = vector.extract_strided_slice %710 {offsets = [72, 0], sizes = [1, 128], strides = [1, 1]} : vector<73x128xf32> to vector<1x128xf32>
    %879 = arith.mulf %878, %712 : vector<1x128xf32>
    %cst_348 = arith.constant dense<0.000000e+00> : vector<1xf32>
    %880 = vector.multi_reduction <add>, %879, %cst_348 [1] : vector<1x128xf32> to vector<1xf32>
    %881 = vector.shape_cast %880 : vector<1xf32> to vector<1x1xf32>
    %c0_349 = arith.constant 0 : index
    %c384_350 = arith.constant 384 : index
    %882 = vector.load %arg21[%c0_349, %c384_350] : memref<73x512xf32, #tpu.memory_space<vmem>>, vector<1x128xf32>
    %cst_351 = arith.constant 0.000000e+00 : f32
    %883 = vector.broadcast %cst_351 : f32 to vector<1x128xf32>
    %884 = vector.extract_strided_slice %711 {offsets = [72, 0], sizes = [1, 128], strides = [1, 1]} : vector<73x128xf32> to vector<1x128xf32>
    %885 = arith.mulf %878, %884 : vector<1x128xf32>
    %cst_352 = arith.constant dense<0.000000e+00> : vector<1xf32>
    %886 = vector.multi_reduction <add>, %885, %cst_352 [1] : vector<1x128xf32> to vector<1xf32>
    %887 = vector.shape_cast %886 : vector<1xf32> to vector<1x1xf32>
    %cst_353 = arith.constant dense<0xFF800000> : vector<1xf32>
    %888 = vector.multi_reduction <maximumf>, %887, %cst_353 [1] : vector<1x1xf32> to vector<1xf32>
    %889 = vector.shape_cast %888 : vector<1xf32> to vector<1x1xf32>
    %890 = arith.maximumf %889, %881 : vector<1x1xf32>
    %891 = arith.subf %887, %890 : vector<1x1xf32>
    %892 = math.exp %891 : vector<1x1xf32>
    %c0_354 = arith.constant 0 : index
    %c0_355 = arith.constant 0 : index
    %893 = vector.load %arg11[%c0_354, %c0_355] : memref<1x1xf32, #tpu.memory_space<vmem>>, vector<1x1xf32>
    %894 = arith.mulf %892, %893 : vector<1x1xf32>
    %895 = arith.subf %881, %890 : vector<1x1xf32>
    %896 = math.exp %895 : vector<1x1xf32>
    %c0_356 = arith.constant 0 : index
    %c0_357 = arith.constant 0 : index
    %897 = vector.load %arg18[%c0_356, %c0_357] : memref<1x1xf32, #tpu.memory_space<vmem>>, vector<1x1xf32>
    %898 = arith.mulf %896, %897 : vector<1x1xf32>
    %cst_358 = arith.constant dense<0.000000e+00> : vector<1xf32>
    %899 = vector.multi_reduction <add>, %894, %cst_358 [1] : vector<1x1xf32> to vector<1xf32>
    %900 = vector.shape_cast %899 : vector<1xf32> to vector<1x1xf32>
    %901 = arith.addf %900, %898 : vector<1x1xf32>
    %c72_359 = arith.constant 72 : index
    %c384_360 = arith.constant 384 : index
    %902 = vector.load %arg21[%c72_359, %c384_360] : memref<73x512xf32, #tpu.memory_space<vmem>>, vector<1x128xf32>
    %903 = vector.broadcast %894 : vector<1x1xf32> to vector<1x128xf32>
    %904 = arith.mulf %903, %902 : vector<1x128xf32>
    %905 = vector.broadcast %898 : vector<1x1xf32> to vector<1x128xf32>
    %906 = arith.mulf %905, %882 : vector<1x128xf32>
    %907 = arith.addf %904, %906 : vector<1x128xf32>
    %cst_361 = arith.constant 3.000000e+00 : f32
    %908 = vector.broadcast %cst_361 : f32 to vector<1x1xf32>
    %909 = arith.mulf %901, %908 : vector<1x1xf32>
    %910 = tpu.reciprocal %909 {approx = true} : vector<1x1xf32> -> vector<1x1xf32>
    %911 = vector.broadcast %910 : vector<1x1xf32> to vector<1x128xf32>
    %912 = arith.mulf %907, %911 : vector<1x128xf32>
    %913 = arith.addf %883, %912 : vector<1x128xf32>
    %914 = vector.extract_strided_slice %711 {offsets = [64, 0], sizes = [8, 128], strides = [1, 1]} : vector<73x128xf32> to vector<8x128xf32>
    %cst_362 = arith.constant dense<0.000000e+00> : vector<1x8xf32>
    %915 = tpu.matmul %878, %914, %cst_362 {dimension_numbers = #tpu.dot_dimension_numbers<[1], [1], [0], [0], [0, 0, 1, 0], [], []>} : vector<1x128xf32>, vector<8x128xf32>, vector<1x8xf32> -> vector<1x8xf32>
    %cst_363 = arith.constant dense<0xFF800000> : vector<1xf32>
    %916 = vector.multi_reduction <maximumf>, %915, %cst_363 [1] : vector<1x8xf32> to vector<1xf32>
    %917 = vector.shape_cast %916 : vector<1xf32> to vector<1x1xf32>
    %918 = arith.maximumf %917, %881 : vector<1x1xf32>
    %919 = vector.broadcast %918 : vector<1x1xf32> to vector<1x8xf32>
    %920 = arith.subf %915, %919 : vector<1x8xf32>
    %921 = math.exp %920 : vector<1x8xf32>
    %c0_364 = arith.constant 0 : index
    %c0_365 = arith.constant 0 : index
    %922 = vector.load %arg12[%c0_364, %c0_365] : memref<1x8xf32, #tpu.memory_space<vmem>>, vector<1x8xf32>
    %923 = arith.mulf %921, %922 : vector<1x8xf32>
    %924 = arith.subf %881, %918 : vector<1x1xf32>
    %925 = math.exp %924 : vector<1x1xf32>
    %c0_366 = arith.constant 0 : index
    %c0_367 = arith.constant 0 : index
    %926 = vector.load %arg19[%c0_366, %c0_367] : memref<1x1xf32, #tpu.memory_space<vmem>>, vector<1x1xf32>
    %927 = arith.mulf %925, %926 : vector<1x1xf32>
    %cst_368 = arith.constant dense<0.000000e+00> : vector<1xf32>
    %928 = vector.multi_reduction <add>, %923, %cst_368 [1] : vector<1x8xf32> to vector<1xf32>
    %929 = vector.shape_cast %928 : vector<1xf32> to vector<1x1xf32>
    %930 = arith.addf %929, %927 : vector<1x1xf32>
    %c64_369 = arith.constant 64 : index
    %c384_370 = arith.constant 384 : index
    %931 = vector.load %arg21[%c64_369, %c384_370] : memref<73x512xf32, #tpu.memory_space<vmem>>, vector<8x128xf32>
    %cst_371 = arith.constant dense<0.000000e+00> : vector<1x128xf32>
    %932 = tpu.matmul %923, %931, %cst_371 {dimension_numbers = #tpu.dot_dimension_numbers<[1], [0], [0], [1], [0, 0, 1, 1], [], []>} : vector<1x8xf32>, vector<8x128xf32>, vector<1x128xf32> -> vector<1x128xf32>
    %933 = vector.broadcast %927 : vector<1x1xf32> to vector<1x128xf32>
    %934 = arith.mulf %933, %882 : vector<1x128xf32>
    %935 = arith.addf %932, %934 : vector<1x128xf32>
    %cst_372 = arith.constant 3.000000e+00 : f32
    %936 = vector.broadcast %cst_372 : f32 to vector<1x1xf32>
    %937 = arith.mulf %930, %936 : vector<1x1xf32>
    %938 = tpu.reciprocal %937 {approx = true} : vector<1x1xf32> -> vector<1x1xf32>
    %939 = vector.broadcast %938 : vector<1x1xf32> to vector<1x128xf32>
    %940 = arith.mulf %935, %939 : vector<1x128xf32>
    %941 = arith.addf %913, %940 : vector<1x128xf32>
    %c72_373 = arith.constant 72 : index
    %c384_374 = arith.constant 384 : index
    %942 = vector.load %arg21[%c72_373, %c384_374] : memref<73x512xf32, #tpu.memory_space<vmem>>, vector<1x128xf32>
    tpu.vector_store %arg21[%c72_373, %c384_374], %941 {strides = array<i32>} : memref<73x512xf32, #tpu.memory_space<vmem>>, vector<1x128xf32>,
    %c0_375 = arith.constant 0 : index
    %c0_376 = arith.constant 0 : index
    %943 = vector.load %arg21[%c0_375, %c0_376] : memref<73x512xf32, #tpu.memory_space<vmem>>, vector<73x512xf32>
    %c0_377 = arith.constant 0 : index
    %c0_378 = arith.constant 0 : index
    %944 = vector.load %arg4[%c0_377, %c0_378] : memref<512x128xf32, #tpu.memory_space<vmem>>, vector<512x128xf32>
    %cst_379 = arith.constant dense<0.000000e+00> : vector<73x128xf32>
    %945 = tpu.matmul %943, %944, %cst_379 {dimension_numbers = #tpu.dot_dimension_numbers<[1], [0], [0], [1], [0, 0, 1, 1], [], []>} : vector<73x512xf32>, vector<512x128xf32>, vector<73x128xf32> -> vector<73x128xf32>
    %c0_380 = arith.constant 0 : index
    %c0_381 = arith.constant 0 : index
    %946 = vector.load %arg5[%c0_380, %c0_381] : memref<1x128xf32, #tpu.memory_space<vmem>>, vector<1x128xf32>
    %947 = vector.broadcast %946 : vector<1x128xf32> to vector<73x128xf32>
    %948 = arith.addf %945, %947 : vector<73x128xf32>
    %c0_382 = arith.constant 0 : index
    %c0_383 = arith.constant 0 : index
    %c0_384 = arith.constant 0 : index
    %949 = vector.load %arg20[%c0_382, %c0_383, %c0_384] : memref<1x73x128xf32, #tpu.memory_space<vmem>>, vector<1x73x128xf32>
    %950 = vector.shape_cast %949 : vector<1x73x128xf32> to vector<73x128xf32>
    %951 = vector.shape_cast %948 : vector<73x128xf32> to vector<1x73x128xf32>
    tpu.vector_store %arg20[%c0_382, %c0_383, %c0_384], %951 {strides = array<i32>} : memref<1x73x128xf32, #tpu.memory_space<vmem>>, vector<1x73x128xf32>,
    return
  }
  func.func @transform_0(%arg0: i32) -> (i32, i32, i32) {
    %c0_i32 = arith.constant 0 : i32
    %c0_i32_0 = arith.constant 0 : i32
    %c0_i32_1 = arith.constant 0 : i32
    return %arg0, %c0_i32, %c0_i32_0 : i32, i32, i32
  }
  func.func @transform_1(%arg0: i32) -> (i32, i32) {
    %c0_i32 = arith.constant 0 : i32
    %c0_i32_0 = arith.constant 0 : i32
    %c0_i32_1 = arith.constant 0 : i32
    return %c0_i32, %c0_i32_0 : i32, i32
  }
  func.func @transform_2(%arg0: i32) -> (i32, i32) {
    %c0_i32 = arith.constant 0 : i32
    %c0_i32_0 = arith.constant 0 : i32
    %c0_i32_1 = arith.constant 0 : i32
    return %c0_i32, %c0_i32_0 : i32, i32
  }
  func.func @transform_3(%arg0: i32) -> (i32, i32) {
    %c0_i32 = arith.constant 0 : i32
    %c0_i32_0 = arith.constant 0 : i32
    %c0_i32_1 = arith.constant 0 : i32
    return %c0_i32, %c0_i32_0 : i32, i32
  }
  func.func @transform_4(%arg0: i32) -> (i32, i32) {
    %c0_i32 = arith.constant 0 : i32
    %c0_i32_0 = arith.constant 0 : i32
    %c0_i32_1 = arith.constant 0 : i32
    return %c0_i32, %c0_i32_0 : i32, i32
  }
  func.func @transform_5(%arg0: i32) -> (i32, i32) {
    %c0_i32 = arith.constant 0 : i32
    %c0_i32_0 = arith.constant 0 : i32
    %c0_i32_1 = arith.constant 0 : i32
    return %c0_i32, %c0_i32_0 : i32, i32
  }
  func.func @transform_6(%arg0: i32) -> (i32, i32) {
    %c0_i32 = arith.constant 0 : i32
    %c0_i32_0 = arith.constant 0 : i32
    %c0_i32_1 = arith.constant 0 : i32
    return %c0_i32, %c0_i32_0 : i32, i32
  }
  func.func @transform_7(%arg0: i32) -> (i32, i32) {
    %c0_i32 = arith.constant 0 : i32
    %c0_i32_0 = arith.constant 0 : i32
    %c0_i32_1 = arith.constant 0 : i32
    return %c0_i32, %c0_i32_0 : i32, i32
  }
  func.func @transform_8(%arg0: i32) -> (i32, i32) {
    %c0_i32 = arith.constant 0 : i32
    %c0_i32_0 = arith.constant 0 : i32
    %c0_i32_1 = arith.constant 0 : i32
    return %c0_i32, %c0_i32_0 : i32, i32
  }
  func.func @transform_9(%arg0: i32) -> (i32, i32) {
    %c0_i32 = arith.constant 0 : i32
    %c0_i32_0 = arith.constant 0 : i32
    %c0_i32_1 = arith.constant 0 : i32
    return %c0_i32, %c0_i32_0 : i32, i32
  }
  func.func @transform_10(%arg0: i32) -> (i32, i32) {
    %c0_i32 = arith.constant 0 : i32
    %c0_i32_0 = arith.constant 0 : i32
    %c0_i32_1 = arith.constant 0 : i32
    return %c0_i32, %c0_i32_0 : i32, i32
  }
  func.func @transform_11(%arg0: i32) -> (i32, i32) {
    %c0_i32 = arith.constant 0 : i32
    %c0_i32_0 = arith.constant 0 : i32
    %c0_i32_1 = arith.constant 0 : i32
    return %c0_i32, %c0_i32_0 : i32, i32
  }
  func.func @transform_12(%arg0: i32) -> (i32, i32) {
    %c0_i32 = arith.constant 0 : i32
    %c0_i32_0 = arith.constant 0 : i32
    %c0_i32_1 = arith.constant 0 : i32
    return %c0_i32, %c0_i32_0 : i32, i32
  }
  func.func @transform_13(%arg0: i32) -> (i32, i32) {
    %c0_i32 = arith.constant 0 : i32
    %c0_i32_0 = arith.constant 0 : i32
    %c0_i32_1 = arith.constant 0 : i32
    return %c0_i32, %c0_i32_0 : i32, i32
  }
  func.func @transform_14(%arg0: i32) -> (i32, i32) {
    %c0_i32 = arith.constant 0 : i32
    %c0_i32_0 = arith.constant 0 : i32
    %c0_i32_1 = arith.constant 0 : i32
    return %c0_i32, %c0_i32_0 : i32, i32
  }
  func.func @transform_15(%arg0: i32) -> (i32, i32) {
    %c0_i32 = arith.constant 0 : i32
    %c0_i32_0 = arith.constant 0 : i32
    %c0_i32_1 = arith.constant 0 : i32
    return %c0_i32, %c0_i32_0 : i32, i32
  }
  func.func @transform_16(%arg0: i32) -> (i32, i32) {
    %c0_i32 = arith.constant 0 : i32
    %c0_i32_0 = arith.constant 0 : i32
    %c0_i32_1 = arith.constant 0 : i32
    return %c0_i32, %c0_i32_0 : i32, i32
  }
  func.func @transform_17(%arg0: i32) -> (i32, i32) {
    %c0_i32 = arith.constant 0 : i32
    %c0_i32_0 = arith.constant 0 : i32
    %c0_i32_1 = arith.constant 0 : i32
    return %c0_i32, %c0_i32_0 : i32, i32
  }
  func.func @transform_18(%arg0: i32) -> (i32, i32) {
    %c0_i32 = arith.constant 0 : i32
    %c0_i32_0 = arith.constant 0 : i32
    %c0_i32_1 = arith.constant 0 : i32
    return %c0_i32, %c0_i32_0 : i32, i32
  }
  func.func @transform_19(%arg0: i32) -> (i32, i32, i32) {
    %c0_i32 = arith.constant 0 : i32
    %c0_i32_0 = arith.constant 0 : i32
    %c0_i32_1 = arith.constant 0 : i32
    return %arg0, %c0_i32, %c0_i32_0 : i32, i32, i32
  }
}

</mosaic_0001>

<bundles_post_ra>
// kernel: tpu_custom_call.1
= control target key start
LH: loop header
LB: loop body
LE: loop exit
PB: predicated region body
PF: predicated region fallthrough
CT: control target
= control target key end

     0   :  { %s14383_s0 = inlined_call_operand.vmem [shape: f32[2,73,128], index: 0, kind: input, shape index: {}]   ;;  %s14384_s1 = inlined_call_operand.hbm [shape: f32[128,1536], index: 1, kind: input, shape index: {}]   ;;  %s14385_s2 = inlined_call_operand.vmem [shape: f32[1,1536], index: 2, kind: input, shape index: {}]   ;;  %s14386_s3 = inlined_call_operand.vmem [shape: f32[512,128], index: 3, kind: input, shape index: {}]   ;;  %s14387_s4 = inlined_call_operand.vmem [shape: f32[1,128], index: 4, kind: input, shape index: {}]   ;;  %s14388_s5 = inlined_call_operand.vmem [shape: f32[64,8], index: 5, kind: input, shape index: {}]   ;;  %s14389_s6 = inlined_call_operand.hbm [shape: f32[64,64], index: 6, kind: input, shape index: {}]   ;;  %s14390_s7 = inlined_call_operand.vmem [shape: f32[8,1], index: 7, kind: input, shape index: {}]   ;;  %s14391_s8 = inlined_call_operand.vmem [shape: f32[8,8], index: 8, kind: input, shape index: {}]   ;;  %s14392_s9 = inlined_call_operand.vmem [shape: f32[8,64], index: 9, kind: input, shape index: {}]   ;;  %s14393_s10 = inlined_call_operand.<no memory space> [shape: f32[1,1], index: 10, kind: input, shape index: {}]   ;;  %s14394_s11 = inlined_call_operand.vmem [shape: f32[1,8], index: 11, kind: input, shape index: {}]   ;;  %s14395_s12 = inlined_call_operand.vmem [shape: f32[64,1], index: 12, kind: input, shape index: {}]   ;;  %s14396_s13 = inlined_call_operand.vmem [shape: f32[64,1], index: 13, kind: input, shape index: {}]   ;;  %s14397_s14 = inlined_call_operand.vmem [shape: f32[8,1], index: 14, kind: input, shape index: {}]   ;;  %s14398_s15 = inlined_call_operand.vmem [shape: f32[8,1], index: 15, kind: input, shape index: {}]   ;;  %s14399_s16 = inlined_call_operand.vmem [shape: f32[8,1], index: 16, kind: input, shape index: {}]   ;;  %s14400_s19 = inlined_call_operand.vmem [shape: f32[2,73,128], index: 19, kind: output, shape index: {}]   ;;  %s14401_s17 = inlined_call_operand.<no memory space> [shape: f32[1,1], index: 17, kind: input, shape index: {}]   ;;  %s14402_s18 = inlined_call_operand.<no memory space> [shape: f32[1,1], index: 18, kind: input, shape index: {}]  }
   0x1   :  { %14452 = sst [smem:[#allocation80_spill]] %s14383_s0  ;;  %v24_v0 = vstv %s14393_s10  ;;  %v26_v1 = vstv %s14401_s17  ;;  %v28_v2 = vstv %s14402_s18 }
   0x2   :  { %14453 = sst [smem:[#allocation81_spill]] %s14384_s1  ;;  %25 = vst [vmem:[#allocation3] sm:$0x1] %v24_v0  ;;  %27 = vst [vmem:[#allocation4] sm:$0x1] %v26_v1 }
   0x3   :  { %14454 = sst [smem:[#allocation82_spill]] %s14385_s2  ;;  %29 = vst [vmem:[#allocation5] sm:$0x1] %v28_v2 }
   0x4   :  { %14455 = sst [smem:[#allocation83_spill]] %s14386_s3 }
   0x5   :  { %30 = vsyncpa [#allocation7], 0 }
   0x6   :  { %31 = vsyncpa [#allocation9], 0  ;;  %s10654_s2 = smov 0  }
   0x7 LB: > { %s10536_s10 = smov [#allocation6]   ;;  %s10660_s23 = sadd.s32 4294967295, %s10534_s2   ;;  %s10534_s2 = sphi %s10654_s2, %s37_s2  }
   0x8   : > { %s484_s17 = sshll.u32 %s10536_s10, 4  ;;  %p8825_p0 = scmp.ge.s32.totalorder %s10534_s2, 1  ;;  %s485_s17 = int_to_ptr.vmem [resolvable:$true] %s484_s17 }
   0x9   : > { %p472_p1 = scmp.lt.s32.totalorder %s10534_s2, 3  ;;  %p9925_p3 = scmp.eq.s32.totalorder %s10660_s23, 0 }
   0xa   : > { %s10537_s24 = smov [#allocation8]   ;;  %s10479_s26 = scalar_lea.vmem %s485_s17, 24576 }
   0xb   : > { %p10664_p2 = pnand %p8825_p0, %p472_p1  ;;  %s509_s25 = sshll.u32 %s10537_s24, 4  ;;  %s510_s25 = int_to_ptr.vmem [resolvable:$true] %s509_s25 }
   0xc   : > { %p10480_p7 = scmp.ne.s32.totalorder %s485_s17, %s10479_s26  ;;  %p10487_p10 = scmp.lt.s32.totalorder %s485_s17, %s485_s17 }
   0xd   : > { %p9918_p4 = pneg %p10664_p2  ;;  %p10488_p11 = scmp.lt.s32.totalorder %s10479_s26, %s10479_s26 }
   0xf   : > { %p10673_p5 = pnand %p9925_p3, %p9918_p4  ;;  %p10489_p12 = por %p10488_p11, %p10487_p10 }
  0x11   : > { %p10470_p6 = pneg %p10673_p5 }
  0x13   : > { %p10482_p8 = pnand %p10480_p7, %p10470_p6 }
  0x15   : > { %p10483_p9 = pneg %p10482_p8 }
  0x17   : > { %p10490_p13 = pnand %p10489_p12, %p10483_p9 }
  0x19   : > { %10493 = shalt.err (!%p10490_p13)
}
  0x1a   : > { %s10538_s27 = smov 1536   ;;  %s10539_s28 = smov 96  }
  0x1b   : > { %s14458_s30 = sld [smem:[#allocation81_spill]]  ;;  %s10505_s20 = scalar_lea.vmem %s510_s25, 1024 }
  0x1c   : > { %p10506_p0 = scmp.ne.s32.totalorder %s510_s25, %s10505_s20  ;;  %p10513_p7 = scmp.lt.s32.totalorder %s510_s25, %s510_s25 }
  0x1d   : > { %p10514_p8 = scmp.lt.s32.totalorder %s10505_s20, %s10505_s20 }
  0x1e   : > { %p10508_p1 = pnand %p10506_p0, %p10470_p6 }
  0x1f   : > { %p10515_p10 = por %p10514_p8, %p10513_p7 }
  0x20   : > { %p10509_p4 = pneg %p10508_p1 }
  0x21   : > { %9921 = dma.hbm_to_vmem [thread:$0]  (!%p10673_p5), %s14458_s30, 24576, %s485_s17, [#allocation7], %s10538_s27, %s10538_s27, %s10539_s28  }
  0x22   : > { %p10516_p9 = pnand %p10515_p10, %p10509_p4 }
  0x24   : > { %10519 = shalt.err (!%p10516_p9)
}
  0x25   : > { %s10540_s21 = smov 128   ;;  %s10541_s1 = smov 8  }
  0x26   : > { %9924 = dma.hbm_to_vmem [thread:$0]  (!%p10673_p5), %s14389_s6, 1024, %s510_s25, [#allocation9], %s10540_s21, %s10540_s21, %s10541_s1  }
  0x27   : > { %569 = sbr.rel (%p10664_p2) target bundleno = 6090 (0x17ca), region = 96 }
  0x2c   : > { %10525 = dma.done.wait (%p9925_p3), [#allocation7], 24576  }
  0x2d   : > { %10527 = vsyncadd (%p9925_p3), [#allocation7], 4294942720 }
  0x2e   : > { %10529 = dma.done.wait (%p9925_p3), [#allocation9], 1024  }
  0x2f   : > { %10531 = vsyncadd (%p9925_p3), [#allocation9], 4294966272  ;;  %v14405_v3 = vmov 0.0   ;;  %v830_v4 = vld [vmem:[#allocation6 + $0x5a8] sm:$0xff]  ;;  %v829_v5 = vld [vmem:[#allocation6 + $0x5a0] sm:$0xff]  ;;  %p629_p2 = scmp.lt.s32.totalorder %s10660_s23, 1 }
  0x30   : > { %969 = vmatprep.mubr.f32.mxu0 %v14405_v3  ;;  %1094 = vmatprep.mubr.f32.mxu1 %v14405_v3  ;;  %v818_v6 = vld [vmem:[#allocation6 + $0x548] sm:$0xff]  ;;  %v817_v7 = vld [vmem:[#allocation6 + $0x540] sm:$0xff]  ;;  %s14459_s25 = sld [smem:[#allocation80_spill]]  ;;  %vm10543_vm0 = vmmov 0   ;;  %vm1829_vm1 = vcmask 64512   ;;  %vm2329_vm2 = vcmask 523264  }
  0x31   : > { %905 = vmatprep.subr.mxu0 %v830_v4  ;;  %v806_v8 = vld [vmem:[#allocation6 + $0x4e8] sm:$0xff]  ;;  %v805_v9 = vld [vmem:[#allocation6 + $0x4e0] sm:$0xff]  ;;  %s14633_s23 = smov (!%p629_p2, %s10660_s23), 1  ;;  %s14461_s28 = sld [smem:[#allocation82_spill]]  ;;  %vm3149_vm3 = vcmask 1040384   ;;  %vm3264_vm4 = vcmask 57344  }
  0x32   : > { %906 = vmatpush1.msra.mxu0 %v829_v5  ;;  %v794_v10 = vld [vmem:[#allocation6 + $0x488] sm:$0xff]  ;;  %v793_v11 = vld [vmem:[#allocation6 + $0x480] sm:$0xff]  ;;  %s9909_s17 = smul.u32 80, %s14633_s23  ;;  %s14614_s18 = sld [smem:[#allocation83_spill]] }
  0x33   : > { %907 = vmatprep.subr.mxu0 %v818_v6  ;;  %v782_v12 = vld [vmem:[#allocation6 + $0x428] sm:$0xff]  ;;  %v781_v13 = vld [vmem:[#allocation6 + $0x420] sm:$0xff] }
  0x34   : > { %908 = vmatpush1.msra.mxu0 %v817_v7  ;;  %v770_v14 = vld [vmem:[#allocation6 + $0x3c8] sm:$0xff]  ;;  %v769_v15 = vld [vmem:[#allocation6 + $0x3c0] sm:$0xff] }
  0x35   : > { %909 = vmatprep.subr.mxu0 %v806_v8  ;;  %v758_v16 = vld [vmem:[#allocation6 + $0x368] sm:$0xff]  ;;  %v757_v17 = vld [vmem:[#allocation6 + $0x360] sm:$0xff] }
  0x36   : > { %910 = vmatpush1.msra.mxu0 %v805_v9  ;;  %v746_v18 = vld [vmem:[#allocation6 + $0x308] sm:$0xff]  ;;  %v745_v19 = vld [vmem:[#allocation6 + $0x300] sm:$0xff]  ;;  %s10717_s3 = scalar_lea.vmem %s14459_s25, %s9909_s17  ;;  %s14354_s25 = scalar_lea.vmem %s14400_s19, %s9909_s17 }
  0x37   : > { %911 = vmatprep.subr.mxu0 %v794_v10  ;;  %v734_v20 = vld [vmem:[#allocation6 + $0x2a8] sm:$0xff]  ;;  %v733_v21 = vld [vmem:[#allocation6 + $0x2a0] sm:$0xff]  ;;  %v10735_v51 = vld [vmem:[%s10717_s3 + $0x18] sm:$0xff] }
  0x38   : > { %912 = vmatpush1.msra.mxu0 %v793_v11  ;;  %v722_v22 = vld [vmem:[#allocation6 + $0x248] sm:$0xff]  ;;  %v721_v23 = vld [vmem:[#allocation6 + $0x240] sm:$0xff]  ;;  %v10755_v8 = vld [vmem:[%s10717_s3 + $0x38] sm:$0xff] }
  0x39   : > { %913 = vmatprep.subr.mxu0 %v782_v12  ;;  %v710_v24 = vld [vmem:[#allocation6 + $0x1e8] sm:$0xff]  ;;  %v709_v25 = vld [vmem:[#allocation6 + $0x1e0] sm:$0xff] }
  0x3a   : > { %914 = vmatpush1.msra.mxu0 %v781_v13  ;;  %v698_v26 = vld [vmem:[#allocation6 + $0x188] sm:$0xff]  ;;  %v697_v27 = vld [vmem:[#allocation6 + $0x180] sm:$0xff] }
  0x3b   : > { %915 = vmatprep.subr.mxu0 %v770_v14  ;;  %v686_v28 = vld [vmem:[#allocation6 + $0x128] sm:$0xff]  ;;  %v685_v29 = vld [vmem:[#allocation6 + $0x120] sm:$0xff] }
  0x3c   : > { %916 = vmatpush1.msra.mxu0 %v769_v15  ;;  %v674_v30 = vld [vmem:[#allocation6 + $0xc8] sm:$0xff]  ;;  %v673_v31 = vld [vmem:[#allocation6 + $0xc0] sm:$0xff] }
  0x3d   : > { %917 = vmatprep.subr.mxu0 %v758_v16  ;;  %v662_v32 = vld [vmem:[#allocation6 + $0x68] sm:$0xff]  ;;  %v661_v33 = vld [vmem:[#allocation6 + $0x60] sm:$0xff] }
  0x3e   : > { %918 = vmatpush1.msra.mxu0 %v757_v17  ;;  %v650_v34 = vld [vmem:[#allocation6 + $0x8] sm:$0xff]  ;;  %v649_v35 = vld [vmem:[#allocation6] sm:$0xff] }
  0x3f   : > { %919 = vmatprep.subr.mxu0 %v746_v18  ;;  %v10720_v36 = vld [vmem:[%s10717_s3] sm:$0xff]  ;;  %v834_v37 = vld [vmem:[#allocation6 + $0x5c8] sm:$0xff]  ;;  %v10765_v15 = vld [vmem:[%s10717_s3 + $0x48] sm:$0x1] }
  0x40   : > { %920 = vmatpush1.msra.mxu0 %v745_v19  ;;  %v833_v38 = vld [vmem:[#allocation6 + $0x5c0] sm:$0xff]  ;;  %v822_v39 = vld [vmem:[#allocation6 + $0x568] sm:$0xff] }
  0x41   : > { %921 = vmatprep.subr.mxu0 %v734_v20  ;;  %v821_v40 = vld [vmem:[#allocation6 + $0x560] sm:$0xff]  ;;  %v810_v42 = vld [vmem:[#allocation6 + $0x508] sm:$0xff] }
  0x42   : > { %922 = vmatpush1.msra.mxu0 %v733_v21  ;;  %v10725_v41 = vld [vmem:[%s10717_s3 + $0x8] sm:$0xff]  ;;  %v10730_v46 = vld [vmem:[%s10717_s3 + $0x10] sm:$0xff]  ;;  %v10740_v56 = vld [vmem:[%s10717_s3 + $0x20] sm:$0xff] }
  0x43   : > { %923 = vmatprep.subr.mxu0 %v722_v22  ;;  %v809_v43 = vld [vmem:[#allocation6 + $0x500] sm:$0xff]  ;;  %v798_v44 = vld [vmem:[#allocation6 + $0x4a8] sm:$0xff] }
  0x44   : > { %924 = vmatpush1.msra.mxu0 %v721_v23  ;;  %v797_v45 = vld [vmem:[#allocation6 + $0x4a0] sm:$0xff]  ;;  %v786_v47 = vld [vmem:[#allocation6 + $0x448] sm:$0xff] }
  0x45   : > { %925 = vmatprep.subr.mxu0 %v710_v24  ;;  %v785_v48 = vld [vmem:[#allocation6 + $0x440] sm:$0xff]  ;;  %v774_v49 = vld [vmem:[#allocation6 + $0x3e8] sm:$0xff] }
  0x46   : > { %926 = vmatpush1.msra.mxu0 %v709_v25  ;;  %v773_v50 = vld [vmem:[#allocation6 + $0x3e0] sm:$0xff]  ;;  %v762_v52 = vld [vmem:[#allocation6 + $0x388] sm:$0xff] }
  0x47   : > { %927 = vmatprep.subr.mxu0 %v698_v26  ;;  %v761_v53 = vld [vmem:[#allocation6 + $0x380] sm:$0xff]  ;;  %v750_v54 = vld [vmem:[#allocation6 + $0x328] sm:$0xff] }
  0x48   : > { %928 = vmatpush1.msra.mxu0 %v697_v27  ;;  %v749_v55 = vld [vmem:[#allocation6 + $0x320] sm:$0xff]  ;;  %v738_v57 = vld [vmem:[#allocation6 + $0x2c8] sm:$0xff] }
  0x49   : > { %929 = vmatprep.subr.mxu0 %v686_v28  ;;  %v737_v58 = vld [vmem:[#allocation6 + $0x2c0] sm:$0xff]  ;;  %v726_v59 = vld [vmem:[#allocation6 + $0x268] sm:$0xff] }
  0x4a   : > { %930 = vmatpush1.msra.mxu0 %v685_v29  ;;  %v725_v60 = vld [vmem:[#allocation6 + $0x260] sm:$0xff]  ;;  %v714_v62 = vld [vmem:[#allocation6 + $0x208] sm:$0xff] }
  0x4b   : > { %931 = vmatprep.subr.mxu0 %v674_v30  ;;  %v10745_v61 = vld [vmem:[%s10717_s3 + $0x28] sm:$0xff]  ;;  %v10750_v2 = vld [vmem:[%s10717_s3 + $0x30] sm:$0xff]  ;;  %v10760_v13 = vld [vmem:[%s10717_s3 + $0x40] sm:$0xff] }
  0x4c   : > { %932 = vmatpush1.msra.mxu0 %v673_v31  ;;  %v713_v63 = vld [vmem:[#allocation6 + $0x200] sm:$0xff]  ;;  %v702_v0 = vld [vmem:[#allocation6 + $0x1a8] sm:$0xff] }
  0x4d   : > { %933 = vmatprep.subr.mxu0 %v662_v32  ;;  %v701_v1 = vld [vmem:[#allocation6 + $0x1a0] sm:$0xff]  ;;  %v690_v4 = vld [vmem:[#allocation6 + $0x148] sm:$0xff] }
  0x4e   : > { %934 = vmatpush1.msra.mxu0 %v661_v33  ;;  %v689_v5 = vld [vmem:[#allocation6 + $0x140] sm:$0xff]  ;;  %v678_v6 = vld [vmem:[#allocation6 + $0xe8] sm:$0xff] }
  0x4f   : > { %935 = vmatprep.subr.mxu0 %v650_v34  ;;  %v677_v7 = vld [vmem:[#allocation6 + $0xe0] sm:$0xff]  ;;  %v666_v9 = vld [vmem:[#allocation6 + $0x88] sm:$0xff] }
  0x50   : > { %936 = vmatpush1.msra.mxu0 %v649_v35  ;;  %v665_v10 = vld [vmem:[#allocation6 + $0x80] sm:$0xff]  ;;  %v654_v11 = vld [vmem:[#allocation6 + $0x28] sm:$0xff] }
  0x51   : > { %970 = vmatmul.mubr.f32.vlgmr.msra.gmra.mxu0 %v10720_v36  ;;  %1155 = vmatprep.subr.mxu0 %v834_v37  ;;  %v653_v12 = vld [vmem:[#allocation6 + $0x20] sm:$0xff]  ;;  %v838_v14 = vld [vmem:[#allocation6 + $0x5e8] sm:$0xff] }
  0x52   : > { %975 = vmatprep.mubr.f32.mxu0 %v14405_v3  ;;  %1156 = vmatpush1.msra.mxu0 %v833_v38  ;;  %v837_v16 = vld [vmem:[#allocation6 + $0x5e0] sm:$0xff]  ;;  %v826_v17 = vld [vmem:[#allocation6 + $0x588] sm:$0xff] }
  0x53   : > { %1157 = vmatprep.subr.mxu0 %v822_v39  ;;  %v825_v18 = vld [vmem:[#allocation6 + $0x580] sm:$0xff]  ;;  %v814_v19 = vld [vmem:[#allocation6 + $0x528] sm:$0xff] }
  0x54   : > { %1158 = vmatpush1.msra.mxu0 %v821_v40  ;;  %v813_v20 = vld [vmem:[#allocation6 + $0x520] sm:$0xff]  ;;  %v802_v21 = vld [vmem:[#allocation6 + $0x4c8] sm:$0xff] }
  0x55   : > { %976 = vmatmul.mubr.f32.gmra.mxu0 %v10725_v41  ;;  %1159 = vmatprep.subr.mxu0 %v810_v42  ;;  %v801_v22 = vld [vmem:[#allocation6 + $0x4c0] sm:$0xff]  ;;  %v790_v23 = vld [vmem:[#allocation6 + $0x468] sm:$0xff] }
  0x56   : > { %981 = vmatprep.mubr.f32.mxu0 %v14405_v3  ;;  %1160 = vmatpush1.msra.mxu0 %v809_v43  ;;  %v789_v24 = vld [vmem:[#allocation6 + $0x460] sm:$0xff]  ;;  %v778_v25 = vld [vmem:[#allocation6 + $0x408] sm:$0xff] }
  0x57   : > { %1161 = vmatprep.subr.mxu0 %v798_v44  ;;  %v777_v26 = vld [vmem:[#allocation6 + $0x400] sm:$0xff]  ;;  %v766_v27 = vld [vmem:[#allocation6 + $0x3a8] sm:$0xff] }
  0x58   : > { %1162 = vmatpush1.msra.mxu0 %v797_v45  ;;  %v765_v28 = vld [vmem:[#allocation6 + $0x3a0] sm:$0xff]  ;;  %v754_v29 = vld [vmem:[#allocation6 + $0x348] sm:$0xff] }
  0x59   : > { %982 = vmatmul.mubr.f32.gmra.mxu0 %v10730_v46  ;;  %1163 = vmatprep.subr.mxu0 %v786_v47  ;;  %v753_v30 = vld [vmem:[#allocation6 + $0x340] sm:$0xff]  ;;  %v742_v31 = vld [vmem:[#allocation6 + $0x2e8] sm:$0xff] }
  0x5a   : > { %987 = vmatprep.mubr.f32.mxu0 %v14405_v3  ;;  %1164 = vmatpush1.msra.mxu0 %v785_v48  ;;  %v741_v32 = vld [vmem:[#allocation6 + $0x2e0] sm:$0xff]  ;;  %v730_v33 = vld [vmem:[#allocation6 + $0x288] sm:$0xff] }
  0x5b   : > { %1165 = vmatprep.subr.mxu0 %v774_v49  ;;  %v729_v34 = vld [vmem:[#allocation6 + $0x280] sm:$0xff]  ;;  %v718_v35 = vld [vmem:[#allocation6 + $0x228] sm:$0xff] }
  0x5c   : > { %1166 = vmatpush1.msra.mxu0 %v773_v50  ;;  %v717_v37 = vld [vmem:[#allocation6 + $0x220] sm:$0xff]  ;;  %v706_v38 = vld [vmem:[#allocation6 + $0x1c8] sm:$0xff]  ;;  %v845_v50 = vlaneseq }
  0x5d   : > { %988 = vmatmul.mubr.f32.gmra.mxu0 %v10735_v51  ;;  %1167 = vmatprep.subr.mxu0 %v762_v52  ;;  %v705_v39 = vld [vmem:[#allocation6 + $0x1c0] sm:$0xff]  ;;  %v694_v40 = vld [vmem:[#allocation6 + $0x168] sm:$0xff] }
  0x5e   : > { %993 = vmatprep.mubr.f32.mxu0 %v14405_v3  ;;  %1168 = vmatpush1.msra.mxu0 %v761_v53  ;;  %v693_v42 = vld [vmem:[#allocation6 + $0x160] sm:$0xff]  ;;  %v682_v43 = vld [vmem:[#allocation6 + $0x108] sm:$0xff]  ;;  %v10808_v52 = vshrl.u32 %v845_v50, 7  ;;  %v712_v50 = vld [vmem:[#allocation6 + $0x1f8] sm:$0xff] }
  0x5f   : > { %1169 = vmatprep.subr.mxu0 %v750_v54  ;;  %v681_v44 = vld [vmem:[#allocation6 + $0x100] sm:$0xff]  ;;  %v670_v45 = vld [vmem:[#allocation6 + $0xa8] sm:$0xff] }
  0x60   : > { %1170 = vmatpush1.msra.mxu0 %v749_v55  ;;  %v669_v47 = vld [vmem:[#allocation6 + $0xa0] sm:$0xff]  ;;  %v658_v48 = vld [vmem:[#allocation6 + $0x48] sm:$0xff]  ;;  %14460 = vst [vmem:[#allocation12_spill] sm:$0xff] %v10808_v52  ;;  %v10811_v53 = vsub.s32 0, %v10808_v52 }
  0x61   : > { %994 = vmatmul.mubr.f32.gmra.mxu0 %v10740_v56  ;;  %1171 = vmatprep.subr.mxu0 %v738_v57  ;;  %v657_v49 = vld [vmem:[#allocation6 + $0x40] sm:$0xff] }
  0x62   : > { %999 = vmatprep.mubr.f32.mxu0 %v14405_v3  ;;  %1172 = vmatpush1.msra.mxu0 %v737_v58  ;;  %v10816_v54 = vld [vmem:[%s14461_s28] sm:$0xff] }
  0x63   : > { %1173 = vmatprep.subr.mxu0 %v726_v59  ;;  %v10820_v55 = vrot.slane %v10816_v54, %v10811_v53 }
  0x64   : > { %1174 = vmatpush1.msra.mxu0 %v725_v60 }
  0x65   : > { %1000 = vmatmul.mubr.f32.gmra.mxu0 %v10745_v61  ;;  %1175 = vmatprep.subr.mxu0 %v714_v62 }
  0x66   : > { %1005 = vmatprep.mubr.f32.mxu0 %v14405_v3  ;;  %1176 = vmatpush1.msra.mxu0 %v713_v63 }
  0x67   : > { %1177 = vmatprep.subr.mxu0 %v702_v0 }
  0x68   : > { %1178 = vmatpush1.msra.mxu0 %v701_v1 }
  0x69   : > { %1006 = vmatmul.mubr.f32.gmra.mxu0 %v10750_v2  ;;  %1179 = vmatprep.subr.mxu0 %v690_v4 }
  0x6a   : > { %1011 = vmatprep.mubr.f32.mxu0 %v14405_v3  ;;  %1180 = vmatpush1.msra.mxu0 %v689_v5 }
  0x6b   : > { %1181 = vmatprep.subr.mxu0 %v678_v6 }
  0x6c   : > { %1182 = vmatpush1.msra.mxu0 %v677_v7 }
  0x6d   : > { %1012 = vmatmul.mubr.f32.gmra.mxu0 %v10755_v8  ;;  %1183 = vmatprep.subr.mxu0 %v666_v9 }
  0x6e   : > { %1017 = vmatprep.mubr.f32.mxu0 %v14405_v3  ;;  %1184 = vmatpush1.msra.mxu0 %v665_v10  ;;  %v832_v10 = vld [vmem:[#allocation6 + $0x5b8] sm:$0xff] }
  0x6f   : > { %1185 = vmatprep.subr.mxu0 %v654_v11  ;;  %1030 = vmatprep.subr.mxu1 %v832_v10 }
  0x70   : > { %1186 = vmatpush1.msra.mxu0 %v653_v12  ;;  %v831_v12 = vld [vmem:[#allocation6 + $0x5b0] sm:$0xff] }
  0x71   : > { %1018 = vmatmul.mubr.f32.gmra.mxu0 %v10760_v13  ;;  %1405 = vmatprep.subr.mxu0 %v838_v14  ;;  %v820_v14 = vld [vmem:[#allocation6 + $0x558] sm:$0xff] }
  0x72   : > { %1023 = vmatprep.mubr.f32.mxu0 %v14405_v3  ;;  %1031 = vmatpush1.msra.mxu1 %v831_v12 }
  0x73   : > { %1032 = vmatprep.subr.mxu1 %v820_v14  ;;  %v700_v14 = vld [vmem:[#allocation6 + $0x198] sm:$0xff] }
  0x75   : > { %1024 = vmatmul.mubr.f32.gmra.mxu0 %v10765_v15 }
  0x76   : > { %1219 = vmatprep.mubr.f32.mxu0 %v14405_v3 }
  0x79   : > { %1220 = vmatmul.mubr.f32.vlgmr.msra.gmra.mxu0 %v10720_v36 }
  0x7a   : > { %1225 = vmatprep.mubr.f32.mxu0 %v14405_v3  ;;  %1406 = vmatpush1.msra.mxu0 %v837_v16 }
  0x7b   : > { %1407 = vmatprep.subr.mxu0 %v826_v17  ;;  %v819_v17 = vld [vmem:[#allocation6 + $0x550] sm:$0xff] }
  0x7c   : > { %1408 = vmatpush1.msra.mxu0 %v825_v18  ;;  %1033 = vmatpush1.msra.mxu1 %v819_v17  ;;  %v808_v18 = vld [vmem:[#allocation6 + $0x4f8] sm:$0xff] }
  0x7d   : > { %1226 = vmatmul.mubr.f32.gmra.mxu0 %v10725_v41  ;;  %1409 = vmatprep.subr.mxu0 %v814_v19 }
  0x7e   : > { %1231 = vmatprep.mubr.f32.mxu0 %v14405_v3  ;;  %1410 = vmatpush1.msra.mxu0 %v813_v20  ;;  %v807_v20 = vld [vmem:[#allocation6 + $0x4f0] sm:$0xff] }
  0x7f   : > { %1411 = vmatprep.subr.mxu0 %v802_v21  ;;  %1034 = vmatprep.subr.mxu1 %v808_v18  ;;  %v796_v21 = vld [vmem:[#allocation6 + $0x498] sm:$0xff]  ;;  %v699_v18 = vld [vmem:[#allocation6 + $0x190] sm:$0xff] }
  0x80   : > { %1412 = vmatpush1.msra.mxu0 %v801_v22  ;;  %1035 = vmatpush1.msra.mxu1 %v807_v20 }
  0x81   : > { %1232 = vmatmul.mubr.f32.gmra.mxu0 %v10730_v46  ;;  %1413 = vmatprep.subr.mxu0 %v790_v23  ;;  %v795_v23 = vld [vmem:[#allocation6 + $0x490] sm:$0xff] }
  0x82   : > { %1237 = vmatprep.mubr.f32.mxu0 %v14405_v3  ;;  %1414 = vmatpush1.msra.mxu0 %v789_v24  ;;  %v784_v24 = vld [vmem:[#allocation6 + $0x438] sm:$0xff] }
  0x83   : > { %1415 = vmatprep.subr.mxu0 %v778_v25  ;;  %1036 = vmatprep.subr.mxu1 %v796_v21 }
  0x84   : > { %1416 = vmatpush1.msra.mxu0 %v777_v26  ;;  %1037 = vmatpush1.msra.mxu1 %v795_v23  ;;  %v783_v26 = vld [vmem:[#allocation6 + $0x430] sm:$0xff]  ;;  %v688_v23 = vld [vmem:[#allocation6 + $0x138] sm:$0xff] }
  0x85   : > { %1238 = vmatmul.mubr.f32.gmra.mxu0 %v10735_v51  ;;  %1417 = vmatprep.subr.mxu0 %v766_v27  ;;  %v772_v27 = vld [vmem:[#allocation6 + $0x3d8] sm:$0xff] }
  0x86   : > { %1243 = vmatprep.mubr.f32.mxu0 %v14405_v3  ;;  %1418 = vmatpush1.msra.mxu0 %v765_v28 }
  0x87   : > { %1419 = vmatprep.subr.mxu0 %v754_v29  ;;  %1038 = vmatprep.subr.mxu1 %v784_v24  ;;  %v771_v29 = vld [vmem:[#allocation6 + $0x3d0] sm:$0xff] }
  0x88   : > { %1420 = vmatpush1.msra.mxu0 %v753_v30  ;;  %1039 = vmatpush1.msra.mxu1 %v783_v26  ;;  %v687_v24 = vld [vmem:[#allocation6 + $0x130] sm:$0xff] }
  0x89   : > { %1244 = vmatmul.mubr.f32.gmra.mxu0 %v10740_v56  ;;  %1421 = vmatprep.subr.mxu0 %v742_v31  ;;  %v863_v31 = vsub.s32 4, %v10808_v52 }
  0x8a   : > { %1249 = vmatprep.mubr.f32.mxu0 %v14405_v3  ;;  %1422 = vmatpush1.msra.mxu0 %v741_v32  ;;  %v760_v32 = vld [vmem:[#allocation6 + $0x378] sm:$0xff] }
  0x8b   : > { %1423 = vmatprep.subr.mxu0 %v730_v33  ;;  %1040 = vmatprep.subr.mxu1 %v772_v27  ;;  %v676_v27 = vld [vmem:[#allocation6 + $0xd8] sm:$0xff] }
  0x8c   : > { %1424 = vmatpush1.msra.mxu0 %v729_v34  ;;  %1041 = vmatpush1.msra.mxu1 %v771_v29  ;;  %v759_v34 = vld [vmem:[#allocation6 + $0x370] sm:$0xff] }
  0x8d   : > { %1250 = vmatmul.mubr.f32.gmra.mxu0 %v10745_v61  ;;  %1425 = vmatprep.subr.mxu0 %v718_v35  ;;  %v748_v35 = vld [vmem:[#allocation6 + $0x318] sm:$0xff]  ;;  %v675_v29 = vld [vmem:[#allocation6 + $0xd0] sm:$0xff] }
  0x8e   : > { %1255 = vmatprep.mubr.f32.mxu0 %v14405_v3  ;;  %1426 = vmatpush1.msra.mxu0 %v717_v37 }
  0x8f   : > { %1427 = vmatprep.subr.mxu0 %v706_v38  ;;  %1042 = vmatprep.subr.mxu1 %v760_v32  ;;  %v747_v38 = vld [vmem:[#allocation6 + $0x310] sm:$0xff]  ;;  %v664_v32 = vld [vmem:[#allocation6 + $0x78] sm:$0xff] }
  0x90   : > { %1428 = vmatpush1.msra.mxu0 %v705_v39  ;;  %1043 = vmatpush1.msra.mxu1 %v759_v34 }
  0x91   : > { %1256 = vmatmul.mubr.f32.gmra.mxu0 %v10750_v2  ;;  %1429 = vmatprep.subr.mxu0 %v694_v40  ;;  %v10867_v40 = vrot.slane %v10816_v54, %v863_v31 }
  0x92   : > { %1261 = vmatprep.mubr.f32.mxu0 %v14405_v3  ;;  %1430 = vmatpush1.msra.mxu0 %v693_v42  ;;  %v736_v42 = vld [vmem:[#allocation6 + $0x2b8] sm:$0xff] }
  0x93   : > { %1431 = vmatprep.subr.mxu0 %v682_v43  ;;  %1044 = vmatprep.subr.mxu1 %v748_v35  ;;  %v663_v35 = vld [vmem:[#allocation6 + $0x70] sm:$0xff] }
  0x94   : > { %1432 = vmatpush1.msra.mxu0 %v681_v44  ;;  %1045 = vmatpush1.msra.mxu1 %v747_v38  ;;  %v735_v44 = vld [vmem:[#allocation6 + $0x2b0] sm:$0xff] }
  0x95   : > { %1262 = vmatmul.mubr.f32.gmra.mxu0 %v10755_v8  ;;  %1433 = vmatprep.subr.mxu0 %v670_v45  ;;  %v724_v45 = vld [vmem:[#allocation6 + $0x258] sm:$0xff] }
  0x96   : > { %1267 = vmatprep.mubr.f32.mxu0 %v14405_v3  ;;  %1434 = vmatpush1.msra.mxu0 %v669_v47 }
  0x97   : > { %1435 = vmatprep.subr.mxu0 %v658_v48  ;;  %1046 = vmatprep.subr.mxu1 %v736_v42  ;;  %v723_v48 = vld [vmem:[#allocation6 + $0x250] sm:$0xff] }
  0x98   : > { %1436 = vmatpush1.msra.mxu0 %v657_v49  ;;  %1047 = vmatpush1.msra.mxu1 %v735_v44  ;;  %v651_v42 = vld [vmem:[#allocation6 + $0x10] sm:$0xff] }
  0x99   : > { %1268 = vmatmul.mubr.f32.gmra.mxu0 %v10760_v13  ;;  %1048 = vmatprep.subr.mxu1 %v724_v45 }
  0x9a   : > { %1273 = vmatprep.mubr.f32.mxu0 %v14405_v3  ;;  %1049 = vmatpush1.msra.mxu1 %v723_v48 }
  0x9b   : > { %1050 = vmatprep.subr.mxu1 %v712_v50 }
  0x9d   : > { %1274 = vmatmul.mubr.f32.gmra.mxu0 %v10765_v15 }
  0x9e   : > { %1469 = vmatprep.mubr.f32.mxu0 %v14405_v3 }
  0xa1   : > { %1470 = vmatmul.mubr.f32.vlgmr.msra.gmra.mxu0 %v10720_v36 }
  0xa2   : > { %1475 = vmatprep.mubr.f32.mxu0 %v14405_v3 }
  0xa5   : > { %1476 = vmatmul.mubr.f32.gmra.mxu0 %v10725_v41 }
  0xa6   : > { %1481 = vmatprep.mubr.f32.mxu0 %v14405_v3 }
  0xa9   : > { %1482 = vmatmul.mubr.f32.gmra.mxu0 %v10730_v46 }
  0xaa   : > { %1487 = vmatprep.mubr.f32.mxu0 %v14405_v3 }
  0xad   : > { %1488 = vmatmul.mubr.f32.gmra.mxu0 %v10735_v51 }
  0xae   : > { %1493 = vmatprep.mubr.f32.mxu0 %v14405_v3 }
  0xb1   : > { %1494 = vmatmul.mubr.f32.gmra.mxu0 %v10740_v56 }
  0xb2   : > { %1499 = vmatprep.mubr.f32.mxu0 %v14405_v3 }
  0xb5   : > { %1500 = vmatmul.mubr.f32.gmra.mxu0 %v10745_v61 }
  0xb6   : > { %1505 = vmatprep.mubr.f32.mxu0 %v14405_v3 }
  0xb9   : > { %1506 = vmatmul.mubr.f32.gmra.mxu0 %v10750_v2 }
  0xba   : > { %1511 = vmatprep.mubr.f32.mxu0 %v14405_v3 }
  0xbd   : > { %1512 = vmatmul.mubr.f32.gmra.mxu0 %v10755_v8 }
  0xbe   : > { %1517 = vmatprep.mubr.f32.mxu0 %v14405_v3 }
  0xc1   : > { %1518 = vmatmul.mubr.f32.gmra.mxu0 %v10760_v13 }
  0xc2   : > { %1523 = vmatprep.mubr.f32.mxu0 %v14405_v3 }
  0xc5   : > { %1524 = vmatmul.mubr.f32.gmra.mxu0 %v10765_v15 }
 0x111   : > { %v971_v57 = vpop.f32.mrf.mxu0 }
 0x112   : > { %v10823_v58 = vadd.f32 %v971_v57, %v10820_v55 }
 0x113   : > { %v10825_v59 = vpop.f32.mrf.mxu0 }
 0x114   : > { %14462 = vst [vmem:[#allocation13_spill] sm:$0xff] %v10825_v59  ;;  %9343 = vmatprep.mubr.f32.mxu0 %v10823_v58 }
 0x115   : > { %v10828_v60 = vpop.f32.mrf.mxu0 }
 0x116   : > { %v10878_v10 = vadd.f32 %v10828_v60, %v10820_v55 }
 0x117   : > { %v10830_v62 = vpop.f32.mrf.mxu0 }
 0x118   : > { %14463 = vst [vmem:[#allocation14_spill] sm:$0xff] %v10830_v62 }
 0x119   : > { %v10832_v63 = vpop.f32.mrf.mxu0 }
 0x11a   : > { %v10894_v26 = vadd.f32 %v10832_v63, %v10820_v55 }
 0x11b   : > { %v10834_v0 = vpop.f32.mrf.mxu0 }
 0x11c   : > { %14464 = vst [vmem:[#allocation15_spill] sm:$0xff] %v10834_v0 }
 0x11d   : > { %v10836_v1 = vpop.f32.mrf.mxu0 }
 0x11e   : > { %v10904_v63 = vadd.f32 %v10836_v1, %v10820_v55 }
 0x11f   : > { %v10838_v4 = vpop.f32.mrf.mxu0 }
 0x120   : > { %14465 = vst [vmem:[#allocation16_spill] sm:$0xff] %v10838_v4 }
 0x121   : > { %v10840_v5 = vpop.f32.mrf.mxu0 }
 0x123   : > { %v10842_v6 = vpop.f32.mrf.mxu0 }
 0x124   : > { %14466 = vst [vmem:[#allocation17_spill] sm:$0xff] %v10842_v6 }
 0x125   : > { %v1001_v7 = vpop.f32.mrf.mxu0 }
 0x126   : > { %v10845_v9 = vadd.f32 %v1001_v7, %v10820_v55  ;;  %v711_v7 = vld [vmem:[#allocation6 + $0x1f0] sm:$0xff] }
 0x127   : > { %v10847_v11 = vpop.f32.mrf.mxu0  ;;  %1051 = vmatpush1.msra.mxu1 %v711_v7 }
 0x128   : > { %14467 = vst [vmem:[#allocation18_spill] sm:$0xff] %v10847_v11  ;;  %1052 = vmatprep.subr.mxu1 %v700_v14 }
 0x129   : > { %v10849_v16 = vpop.f32.mrf.mxu0  ;;  %1053 = vmatpush1.msra.mxu1 %v699_v18  ;;  %v835_v18 = vld [vmem:[#allocation6 + $0x5d0] sm:$0xff] }
 0x12a   : > { %1054 = vmatprep.subr.mxu1 %v688_v23  ;;  %v823_v23 = vld [vmem:[#allocation6 + $0x570] sm:$0xff] }
 0x12b   : > { %v10851_v19 = vpop.f32.mrf.mxu0  ;;  %1055 = vmatpush1.msra.mxu1 %v687_v24  ;;  %v812_v24 = vld [vmem:[#allocation6 + $0x518] sm:$0xff] }
 0x12c   : > { %14468 = vst [vmem:[#allocation19_spill] sm:$0xff] %v10851_v19  ;;  %1056 = vmatprep.subr.mxu1 %v676_v27 }
 0x12d   : > { %v10853_v22 = vpop.f32.mrf.mxu0  ;;  %1057 = vmatpush1.msra.mxu1 %v675_v29  ;;  %v811_v29 = vld [vmem:[#allocation6 + $0x510] sm:$0xff] }
 0x12e   : > { %1058 = vmatprep.subr.mxu1 %v664_v32 }
 0x12f   : > { %v10855_v25 = vpop.f32.mrf.mxu0  ;;  %1059 = vmatpush1.msra.mxu1 %v663_v35  ;;  %v799_v35 = vld [vmem:[#allocation6 + $0x4b0] sm:$0xff] }
 0x130   : > { %14469 = vst [vmem:[#allocation20_spill] sm:$0xff] %v10855_v25 }
 0x131   : > { %v1019_v28 = vpop.f32.mrf.mxu0 }
 0x132   : > { %v10858_v30 = vadd.f32 %v1019_v28, %v10820_v55 }
 0x133   : > { %v10861_v33 = vpop.f32.mrf.mxu0 }
 0x134   : > { %14470 = vst [vmem:[#allocation21_spill] sm:$0xff] %v10861_v33 }
 0x135   : > { %v1025_v37 = vpop.f32.mrf.mxu0 }
 0x136   : > { %v10864_v39 = vadd.f32 %v1025_v37, %v10820_v55  ;;  %v652_v37 = vld [vmem:[#allocation6 + $0x18] sm:$0xff] }
 0x137   : > { %v10869_v43 = vpop.f32.mrf.mxu0  ;;  %1060 = vmatprep.subr.mxu1 %v652_v37  ;;  %v788_v37 = vld [vmem:[#allocation6 + $0x458] sm:$0xff] }
 0x138   : > { %14471 = vst [vmem:[#allocation22_spill] sm:$0xff] %v10864_v39  ;;  %14472 = vst [vmem:[#allocation23_spill] sm:$0xff] %v10869_v43  ;;  %1061 = vmatpush1.msra.mxu1 %v651_v42  ;;  %v787_v42 = vld [vmem:[#allocation6 + $0x450] sm:$0xff]  ;;  %v14484_v43 = vmov 0.0  }
 0x139   : > { %v1221_v47 = vpop.f32.mrf.mxu0  ;;  %1095 = vmatmul.mubr.f32.vlgmr.msra.gmra.mxu1 %v10720_v36 }
 0x13a   : > { %v10872_v49 = vadd.f32 %v1221_v47, %v10867_v40  ;;  %v10914_v47 = vadd.f32 %v10840_v5, %v10820_v55  ;;  %1100 = vmatprep.mubr.f32.mxu1 %v14405_v3  ;;  %v836_v5 = vld [vmem:[#allocation6 + $0x5d8] sm:$0xff] }
 0x13b   : > { %v10874_v57 = vpop.f32.mrf.mxu0  ;;  %1280 = vmatprep.subr.mxu1 %v836_v5  ;;  %v775_v5 = vld [vmem:[#allocation6 + $0x3f0] sm:$0xff] }
 0x13c   : > { %14473 = vst [vmem:[#allocation24_spill] sm:$0xff] %v10874_v57  ;;  %v10882_v12 = vrot.slane %v10872_v49, %v10811_v53  ;;  %1281 = vmatpush1.msra.mxu1 %v835_v18 }
 0x13d   : > { %v10884_v17 = vpop.f32.mrf.mxu0  ;;  %1101 = vmatmul.mubr.f32.gmra.mxu1 %v10725_v41 }
 0x13e   : > { %v1700_v20 = vmul.f32 %v10882_v12, %v10878_v10  ;;  %v1699_v21 = vmul.f32 %v10882_v12, %v10823_v58  ;;  %v1701_v31 = vmul.f32 %v10882_v12, %v10894_v26  ;;  %v1702_v44 = vmul.f32 %v10882_v12, %v10904_v63  ;;  %1106 = vmatprep.mubr.f32.mxu1 %v14405_v3 }
 0x13f   : > { %v10890_v60 = vpop.f32.mrf.mxu0  ;;  %v1703_v48 = vmul.f32 %v10882_v12, %v10914_v47 }
 0x140   : > { %14474 = vst [vmem:[#allocation25_spill] sm:$0xff] %v10890_v60  ;;  %1709 = vadd.xlane.f32.xlu1 %v1700_v20  ;;  %1707 = vadd.xlane.f32.xlu0 %v1699_v21  ;;  %v824_v20 = vld [vmem:[#allocation6 + $0x578] sm:$0xff] }
 0x141   : > { %v10896_v28 = vpop.f32.mrf.mxu0  ;;  %1107 = vmatmul.mubr.f32.gmra.mxu1 %v10730_v46  ;;  %1282 = vmatprep.subr.mxu1 %v824_v20  ;;  %v728_v60 = vld [vmem:[#allocation6 + $0x278] sm:$0xff] }
 0x142   : > { %1112 = vmatprep.mubr.f32.mxu1 %v14405_v3  ;;  %1283 = vmatpush1.msra.mxu1 %v823_v23  ;;  %v764_v23 = vld [vmem:[#allocation6 + $0x398] sm:$0xff] }
 0x143   : > { %v10900_v34 = vpop.f32.mrf.mxu0  ;;  %1284 = vmatprep.subr.mxu1 %v812_v24 }
 0x144   : > { %14475 = vst [vmem:[#allocation26_spill] sm:$0xff] %v10900_v34  ;;  %1711 = vadd.xlane.f32.xlu0 %v1701_v31  ;;  %v800_v31 = vld [vmem:[#allocation6 + $0x4b8] sm:$0xff]  ;;  %1285 = vmatpush1.msra.mxu1 %v811_v29  ;;  %v842_v29 = vld [vmem:[%s14461_s28 + $0x8] sm:$0xf] }
 0x145   : > { %v10906_v38 = vpop.f32.mrf.mxu0  ;;  %1113 = vmatmul.mubr.f32.gmra.mxu1 %v10735_v51  ;;  %1286 = vmatprep.subr.mxu1 %v800_v31  ;;  %v763_v31 = vld [vmem:[#allocation6 + $0x390] sm:$0xff] }
 0x146   : > { %1118 = vmatprep.mubr.f32.mxu1 %v14405_v3  ;;  %1287 = vmatpush1.msra.mxu1 %v799_v35  ;;  %v11018_v25 = vadd.f32 %v10906_v38, %v10867_v40  ;;  %v680_v38 = vld [vmem:[#allocation6 + $0xf8] sm:$0xff] }
 0x147   : > { %v10910_v45 = vpop.f32.mrf.mxu0  ;;  %1288 = vmatprep.subr.mxu1 %v788_v37  ;;  %v752_v37 = vld [vmem:[#allocation6 + $0x338] sm:$0xff] }
 0x148   : > { %14476 = vst [vmem:[#allocation27_spill] sm:$0xff] %v10910_v45  ;;  %1713 = vadd.xlane.f32.xlu0 %v1702_v44  ;;  %1289 = vmatpush1.msra.mxu1 %v787_v42 }
 0x149   : > { %v10917_v1 = vpop.f32.mrf.mxu0  ;;  %1119 = vmatmul.mubr.f32.gmra.mxu1 %v10740_v56 }
 0x14a   : > { %1124 = vmatprep.mubr.f32.mxu1 %v14405_v3 }
 0x14b   : > { %v10922_v50 = vpop.f32.mrf.mxu0 }
 0x14c   : > { %14477 = vst [vmem:[#allocation28_spill] sm:$0xff] %v10922_v50  ;;  %1715 = vadd.xlane.f32.xlu0 %v1703_v48  ;;  %v776_v48 = vld [vmem:[#allocation6 + $0x3f8] sm:$0xff] }
 0x14d   : > { %v10925_v7 = vpop.f32.mrf.mxu0  ;;  %1290 = vmatprep.subr.mxu1 %v776_v48  ;;  %1125 = vmatmul.mubr.f32.gmra.mxu1 %v10745_v61  ;;  %v751_v48 = vld [vmem:[#allocation6 + $0x330] sm:$0xff] }
 0x14e   : > { %1291 = vmatpush1.msra.mxu1 %v775_v5  ;;  %1130 = vmatprep.mubr.f32.mxu1 %v14484_v43 }
 0x14f   : > { %v10928_v14 = vpop.f32.mrf.mxu0  ;;  %1292 = vmatprep.subr.mxu1 %v764_v23 }
 0x150   : > { %14478 = vst [vmem:[#allocation29_spill] sm:$0xff] %v10928_v14  ;;  %1293 = vmatpush1.msra.mxu1 %v763_v31 }
 0x151   : > { %v1257_v21 = vpop.f32.mrf.mxu0  ;;  %1294 = vmatprep.subr.mxu1 %v752_v37  ;;  %1131 = vmatmul.mubr.f32.gmra.mxu1 %v10750_v2 }
 0x152   : > { %v10966_v33 = vadd.f32 %v1257_v21, %v10867_v40  ;;  %1295 = vmatpush1.msra.mxu1 %v751_v48  ;;  %1136 = vmatprep.mubr.f32.mxu1 %v14484_v43 }
 0x153   : > { %v10932_v27 = vpop.f32.mrf.mxu0 }
 0x154   : > { %14479 = vst [vmem:[#allocation30_spill] sm:$0xff] %v10932_v27  ;;  %v1886_v27 = vld [vmem:[%s14388_s5] sm:$0xff] }
 0x155   : > { %v1263_v32 = vpop.f32.mrf.mxu0  ;;  %1137 = vmatmul.mubr.f32.gmra.mxu1 %v10755_v8 }
 0x156   : > { %v10949_v35 = vadd.f32 %v1263_v32, %v10867_v40  ;;  %v10960_v32 = vrot.slane %v842_v29, %v10811_v53  ;;  %1142 = vmatprep.mubr.f32.mxu1 %v14484_v43 }
 0x157   : > { %v10936_v44 = vpop.f32.mrf.mxu0 }
 0x158   : > { %14480 = vst [vmem:[#allocation31_spill] sm:$0xff] %v10936_v44 }
 0x159   : > { %v1269_v18 = vpop.f32.mrf.mxu0  ;;  %1143 = vmatmul.mubr.f32.gmra.mxu1 %v10760_v13 }
 0x15a   : > { %v10941_v20 = vadd.f32 %v1269_v18, %v10867_v40  ;;  %v14407_v18 = vsub.s32 1, %v10808_v52  ;;  %1148 = vmatprep.mubr.f32.mxu1 %v14484_v43 }
 0x15b   : > { %v10943_v24 = vpop.f32.mrf.mxu0 }
 0x15c   : > { %14481 = vst [vmem:[#allocation32_spill] sm:$0xff] %v10943_v24  ;;  %9341 = vmatprep.subr.mxu0 %v10941_v20  ;;  %v10971_v23 = vrot.slane %v842_v29, %v14407_v18  ;;  %v10983_v29 = vadd.f32 %v10925_v7, %v10867_v40  ;;  %v10996_v7 = vadd.f32 %v10849_v16, %v10820_v55 }
 0x15d   : > { %v1275_v42 = vpop.f32.mrf.mxu0  ;;  %9342 = vmatpush3.xpose.msra.mxu0 %v10941_v20  ;;  %1149 = vmatmul.mubr.f32.gmra.mxu1 %v10765_v15 }
 0x15e   : > { %v10956_v3 = vadd.f32 %v1275_v42, %v10867_v40  ;;  %9369 = vmatprep.subr.mxu0 %v10949_v35  ;;  %v740_v42 = vld [vmem:[#allocation6 + $0x2d8] sm:$0xff]  ;;  %1344 = vmatprep.mubr.f32.mxu1 %v14484_v43 }
 0x15f   : > { %v10962_v5 = vpop.f32.mrf.mxu0  ;;  %1296 = vmatprep.subr.mxu1 %v740_v42 }
 0x160   : > { %14482 = vst [vmem:[#allocation33_spill] sm:$0xff] %v10956_v3  ;;  %14483 = vst [vmem:[#allocation34_spill] sm:$0xff] %v10962_v5  ;;  %9344 = vmatmul.mubr.f32.vlgmr.msra.gmra.mxu0 %v10878_v10  ;;  %v739_v5 = vld [vmem:[#allocation6 + $0x2d0] sm:$0xff] }
 0x161   : > { %9346 = vmatprep.mubr.f32.mxu0 %v10894_v26  ;;  %9370 = vmatpush3.xpose.msra.mxu0 %v10949_v35  ;;  %v1471_v31 = vpop.f32.mrf.mxu0 }
 0x162   : > { %9371 = vmatprep.subr.mxu0 %v10966_v33  ;;  %v10977_v37 = vadd.f32 %v1471_v31, %v10960_v32  ;;  %1297 = vmatpush1.msra.mxu1 %v739_v5  ;;  %v727_v31 = vld [vmem:[#allocation6 + $0x270] sm:$0xff]  ;;  %v716_v5 = vld [vmem:[#allocation6 + $0x218] sm:$0xff] }
 0x163   : > { %v1473_v21 = vpop.f32.mrf.mxu0  ;;  %1298 = vmatprep.subr.mxu1 %v728_v60  ;;  %v704_v60 = vld [vmem:[#allocation6 + $0x1b8] sm:$0xff] }
 0x164   : > { %9347 = vmatmul.mubr.f32.gmra.mxu0 %v10904_v63  ;;  %1655 = vst [vmem:[#allocation2] sm:$0xff] %v10977_v37  ;;  %v1474_v48 = vadd.f32 %v1473_v21, %v10971_v23  ;;  %1299 = vmatpush1.msra.mxu1 %v727_v31  ;;  %v11000_v21 = vadd.f32 %v10917_v1, %v10867_v40 }
 0x165   : > { %9349 = vmatprep.mubr.f32.mxu0 %v10914_v47  ;;  %9372 = vmatpush3.xpose.msra.mxu0 %v10966_v33  ;;  %v1477_v42 = vpop.f32.mrf.mxu0  ;;  %v11009_v31 = vadd.f32 %v10853_v22, %v10820_v55  ;;  %v692_v22 = vld [vmem:[#allocation6 + $0x158] sm:$0xff] }
 0x166   : > { %9373 = vmatprep.subr.mxu0 %v10983_v29  ;;  %1656 = vst [vmem:[#allocation2 + $0x8] sm:$0xff] %v1474_v48  ;;  %v10992_v18 = vadd.f32 %v1477_v42, %v10960_v32  ;;  %v715_v48 = vld [vmem:[#allocation6 + $0x210] sm:$0xff]  ;;  %1300 = vmatprep.subr.mxu1 %v716_v5 }
 0x167   : > { %v1479_v34 = vpop.f32.mrf.mxu0  ;;  %1301 = vmatpush1.msra.mxu1 %v715_v48  ;;  %v703_v42 = vld [vmem:[#allocation6 + $0x1b0] sm:$0xff] }
 0x168   : > { %9350 = vmatmul.mubr.f32.gmra.mxu0 %v10845_v9  ;;  %v1480_v45 = vadd.f32 %v1479_v34, %v10971_v23  ;;  %1302 = vmatprep.subr.mxu1 %v704_v60  ;;  %v691_v5 = vld [vmem:[#allocation6 + $0x150] sm:$0xff] }
 0x169   : > { %9352 = vmatprep.mubr.f32.mxu0 %v10996_v7  ;;  %9374 = vmatpush3.xpose.msra.mxu0 %v10983_v29  ;;  %v1483_v16 = vpop.f32.mrf.mxu0  ;;  %v679_v60 = vld [vmem:[#allocation6 + $0xf0] sm:$0xff] }
 0x16a   : > { %9375 = vmatprep.subr.mxu0 %v11000_v21  ;;  %1660 = vst [vmem:[#allocation2 + $0x28] sm:$0xff] %v1480_v45  ;;  %v11013_v1 = vadd.f32 %v1483_v16, %v10960_v32  ;;  %1303 = vmatpush1.msra.mxu1 %v703_v42  ;;  %v667_v42 = vld [vmem:[#allocation6 + $0x90] sm:$0xff] }
 0x16b   : > { %v1485_v34 = vpop.f32.mrf.mxu0  ;;  %1304 = vmatprep.subr.mxu1 %v692_v22 }
 0x16c   : > { %9353 = vmatmul.mubr.f32.gmra.mxu0 %v11009_v31  ;;  %v1486_v55 = vadd.f32 %v1485_v34, %v10971_v23  ;;  %v11031_v34 = vadd.f32 %v10896_v28, %v10867_v40  ;;  %1305 = vmatpush1.msra.mxu1 %v691_v5  ;;  %v656_v28 = vld [vmem:[#allocation6 + $0x38] sm:$0xff]  ;;  %v655_v5 = vld [vmem:[#allocation6 + $0x30] sm:$0xff] }
 0x16d   : > { %9376 = vmatpush3.xpose.msra.mxu0 %v11000_v21  ;;  %9385 = vmatprep.mubr.f32.mxu0 %v10823_v58  ;;  %v1489_v45 = vpop.f32.mrf.mxu0 }
 0x16e   : > { %9377 = vmatprep.subr.mxu0 %v11018_v25  ;;  %1664 = vst [vmem:[#allocation2 + $0x48] sm:$0xff] %v1486_v55  ;;  %v11026_v48 = vadd.f32 %v1489_v45, %v10960_v32  ;;  %v668_v55 = vld [vmem:[#allocation6 + $0x98] sm:$0xff]  ;;  %1306 = vmatprep.subr.mxu1 %v680_v38 }
 0x16f   : > { %v1491_v16 = vpop.f32.mrf.mxu0  ;;  %1307 = vmatpush1.msra.mxu1 %v679_v60  ;;  %v839_v60 = vld [vmem:[#allocation6 + $0x5f0] sm:$0xff] }
 0x170   : > { %v1492_v58 = vadd.f32 %v1491_v16, %v10971_v23  ;;  %1308 = vmatprep.subr.mxu1 %v668_v55  ;;  %v11043_v16 = vadd.f32 %v10884_v17, %v10867_v40  ;;  %v828_v17 = vld [vmem:[#allocation6 + $0x598] sm:$0xff]  ;;  %v827_v55 = vld [vmem:[#allocation6 + $0x590] sm:$0xff] }
 0x171   : > { %9378 = vmatpush3.xpose.msra.mxu0 %v11018_v25  ;;  %v1495_v45 = vpop.f32.mrf.mxu0  ;;  %1309 = vmatpush1.msra.mxu1 %v667_v42 }
 0x172   : > { %9379 = vmatprep.subr.mxu0 %v11031_v34  ;;  %1668 = vst [vmem:[#allocation2 + $0x68] sm:$0xff] %v1492_v58  ;;  %v11038_v22 = vadd.f32 %v1495_v45, %v10960_v32  ;;  %v840_v58 = vld [vmem:[#allocation6 + $0x5f8] sm:$0xff]  ;;  %1310 = vmatprep.subr.mxu1 %v656_v28 }
 0x173   : > { %v1497_v50 = vpop.f32.mrf.mxu0  ;;  %1311 = vmatpush1.msra.mxu1 %v655_v5  ;;  %v816_v28 = vld [vmem:[#allocation6 + $0x538] sm:$0xff] }
 0x174   : > { %v1498_v38 = vadd.f32 %v1497_v50, %v10971_v23  ;;  %1345 = vmatmul.mubr.f32.vlgmr.msra.gmra.mxu1 %v10720_v36  ;;  %1530 = vmatprep.subr.mxu1 %v840_v58  ;;  %v815_v36 = vld [vmem:[#allocation6 + $0x530] sm:$0xff]  ;;  %v804_v58 = vld [vmem:[#allocation6 + $0x4d8] sm:$0xff] }
 0x175   : > { %9380 = vmatpush3.xpose.msra.mxu0 %v11031_v34  ;;  %v1501_v45 = vpop.f32.mrf.mxu0  ;;  %1350 = vmatprep.mubr.f32.mxu1 %v14484_v43 }
 0x176   : > { %9381 = vmatprep.subr.mxu0 %v11043_v16  ;;  %1672 = vst [vmem:[#allocation2 + $0x88] sm:$0xff] %v1498_v38  ;;  %v11050_v15 = vadd.f32 %v1501_v45, %v10960_v32  ;;  %1531 = vmatpush1.msra.mxu1 %v839_v60  ;;  %v803_v60 = vld [vmem:[#allocation6 + $0x4d0] sm:$0xff] }
 0x177   : > { %v1503_v40 = vpop.f32.mrf.mxu0  ;;  %1532 = vmatprep.subr.mxu1 %v828_v17  ;;  %v792_v17 = vld [vmem:[#allocation6 + $0x478] sm:$0xff] }
 0x178   : > { %v1504_v50 = vadd.f32 %v1503_v40, %v10971_v23  ;;  %1533 = vmatpush1.msra.mxu1 %v827_v55  ;;  %v780_v55 = vld [vmem:[#allocation6 + $0x418] sm:$0xff] }
 0x179   : > { %9382 = vmatpush3.xpose.msra.mxu0 %v11043_v16  ;;  %v1507_v42 = vpop.f32.mrf.mxu0  ;;  %1351 = vmatmul.mubr.f32.gmra.mxu1 %v10725_v41  ;;  %v791_v41 = vld [vmem:[#allocation6 + $0x470] sm:$0xff] }
 0x17a   : > { %9383 = vmatprep.subr.mxu0 %v10872_v49  ;;  %1676 = vst [vmem:[#allocation2 + $0xa8] sm:$0xff] %v1504_v50  ;;  %v11058_v5 = vadd.f32 %v1507_v42, %v10960_v32  ;;  %1534 = vmatprep.subr.mxu1 %v816_v28 }
 0x17b   : > { %v1509_v38 = vpop.f32.mrf.mxu0  ;;  %1356 = vmatprep.mubr.f32.mxu1 %v14484_v43  ;;  %1535 = vmatpush1.msra.mxu1 %v815_v36 }
 0x17c   : > { %v1510_v45 = vadd.f32 %v1509_v38, %v10971_v23  ;;  %1536 = vmatprep.subr.mxu1 %v804_v58  ;;  %v755_v38 = vld [vmem:[#allocation6 + $0x350] sm:$0xff] }
 0x17d   : > { %9384 = vmatpush3.xpose.msra.mxu0 %v10872_v49  ;;  %v11064_v40 = vpop.f32.mrf.mxu0  ;;  %1537 = vmatpush1.msra.mxu1 %v803_v60  ;;  %v743_v58 = vld [vmem:[#allocation6 + $0x2f0] sm:$0xff]  ;;  %v708_v60 = vld [vmem:[#allocation6 + $0x1d8] sm:$0xff] }
 0x17e   : > { %9435 = vmatprep.subr.mxu0 %v14484_v43  ;;  %1680 = vst [vmem:[#allocation2 + $0xc8] sm:$0xff] %v1510_v45  ;;  %1357 = vmatmul.mubr.f32.gmra.mxu1 %v10730_v46  ;;  %v779_v46 = vld [vmem:[#allocation6 + $0x410] sm:$0xff]  ;;  %v720_v45 = vld [vmem:[#allocation6 + $0x238] sm:$0xff] }
 0x17f   : > { %v11067_v50 = vpop.f32.mrf.mxu0  ;;  %1538 = vmatprep.subr.mxu1 %v792_v17  ;;  %1362 = vmatprep.mubr.f32.mxu1 %v14484_v43  ;;  %v707_v17 = vld [vmem:[#allocation6 + $0x1d0] sm:$0xff] }
 0x180   : > { %9386 = vmatmul.mubr.f32.vlgmr.msra.gmra.mxu0 %v10878_v10  ;;  %1539 = vmatpush1.msra.mxu1 %v791_v41  ;;  %v695_v41 = vld [vmem:[#allocation6 + $0x170] sm:$0xff] }
 0x181   : > { %9388 = vmatprep.mubr.f32.mxu0 %v10894_v26  ;;  %9436 = vmatpush3.xpose.msra.mxu0 %v10949_v35  ;;  %v11074_v42 = vpop.f32.mrf.mxu0  ;;  %v768_v26 = vld [vmem:[#allocation6 + $0x3b8] sm:$0xff] }
 0x182   : > { %9437 = vmatprep.subr.mxu0 %v14484_v43  ;;  %1363 = vmatmul.mubr.f32.gmra.mxu1 %v10735_v51 }
 0x183   : > { %v1521_v28 = vpop.f32.mrf.mxu0  ;;  %1540 = vmatprep.subr.mxu1 %v780_v55  ;;  %1368 = vmatprep.mubr.f32.mxu1 %v14484_v43  ;;  %v683_v55 = vld [vmem:[#allocation6 + $0x110] sm:$0xff] }
 0x184   : > { %9389 = vmatmul.mubr.f32.gmra.mxu0 %v10904_v63  ;;  %v11080_v10 = vadd.f32 %v1521_v28, %v10971_v23  ;;  %1541 = vmatpush1.msra.mxu1 %v779_v46  ;;  %v767_v63 = vld [vmem:[#allocation6 + $0x3b0] sm:$0xff]  ;;  %v11116_v46 = vadd.f32 %v11074_v42, %v10960_v32  ;;  %v11127_v42 = vadd.f32 %v11067_v50, %v10971_v23  ;;  %v10457_v50 = vld [vmem:[%s10717_s3 + $0x20] sm:$0xff] }
 0x185   : > { %9391 = vmatprep.mubr.f32.mxu0 %v10914_v47  ;;  %9438 = vmatpush3.xpose.msra.mxu0 %v10966_v33  ;;  %v1525_v35 = vpop.f32.mrf.mxu0  ;;  %v756_v33 = vld [vmem:[#allocation6 + $0x358] sm:$0xff]  ;;  %v671_v28 = vld [vmem:[#allocation6 + $0xb0] sm:$0xff] }
 0x186   : > { %9439 = vmatprep.subr.mxu0 %v14484_v43  ;;  %1688 = vst [vmem:[#allocation2 + $0x108] sm:$0xff] %v11080_v10  ;;  %v1526_v51 = vadd.f32 %v1525_v35, %v10960_v32  ;;  %1369 = vmatmul.mubr.f32.gmra.mxu1 %v10740_v56  ;;  %v744_v56 = vld [vmem:[#allocation6 + $0x2f8] sm:$0xff]  ;;  %14485 = vst [vmem:[#allocation35_spill] sm:$0xff] %v11127_v42 }
 0x187   : > { %v1527_v36 = vpop.f32.mrf.mxu0  ;;  %1542 = vmatprep.subr.mxu1 %v768_v26  ;;  %1374 = vmatprep.mubr.f32.mxu1 %v14484_v43  ;;  %v659_v26 = vld [vmem:[#allocation6 + $0x50] sm:$0xff]  ;;  %v10453_v35 = vld [vmem:[%s10717_s3] sm:$0xff] }
 0x188   : > { %9392 = vmatmul.mubr.f32.gmra.mxu0 %v10845_v9  ;;  %1691 = vst [vmem:[#allocation2 + $0x120] sm:$0x1] %v1526_v51  ;;  %v1528_v47 = vadd.f32 %v1527_v36, %v10971_v23  ;;  %1543 = vmatpush1.msra.mxu1 %v767_v63  ;;  %v10455_v23 = vld [vmem:[%s10717_s3 + $0x10] sm:$0xff]  ;;  %v10460_v36 = vld [vmem:[%s10717_s3 + $0x38] sm:$0xff]  ;;  %v10461_v63 = vld [vmem:[%s10717_s3 + $0x40] sm:$0xff] }
 0x189   : > { %9394 = vmatprep.mubr.f32.mxu0 %v10996_v7  ;;  %9440 = vmatpush3.xpose.msra.mxu0 %v10983_v29  ;;  %v732_v29 = vld [vmem:[#allocation6 + $0x298] sm:$0xff]  ;;  %v10459_v51 = vld [vmem:[%s10717_s3 + $0x30] sm:$0xff] }
 0x18a   : > { %9441 = vmatprep.subr.mxu0 %v14484_v43  ;;  %1692 = vst [vmem:[#allocation2 + $0x128] sm:$0x1] %v1528_v47  ;;  %1375 = vmatmul.mubr.f32.gmra.mxu1 %v10745_v61  ;;  %v731_v61 = vld [vmem:[#allocation6 + $0x290] sm:$0xff] }
 0x18b   : > { %1544 = vmatprep.subr.mxu1 %v756_v33  ;;  %1380 = vmatprep.mubr.f32.mxu1 %v14484_v43 }
 0x18c   : > { %9395 = vmatmul.mubr.f32.gmra.mxu0 %v11009_v31  ;;  %1545 = vmatpush1.msra.mxu1 %v755_v38 }
 0x18d   : > { %9442 = vmatpush3.xpose.msra.mxu0 %v11000_v21  ;;  %9451 = vmatprep.mubr.msk.f32.mxu0 %vm10543_vm0, %v14484_v43  ;;  %v719_v21 = vld [vmem:[#allocation6 + $0x230] sm:$0xff] }
 0x18e   : > { %9443 = vmatprep.subr.mxu0 %v14484_v43  ;;  %1546 = vmatprep.subr.mxu1 %v744_v56 }
 0x18f   : > { %1381 = vmatmul.mubr.f32.gmra.mxu1 %v10750_v2  ;;  %v696_v2 = vld [vmem:[#allocation6 + $0x178] sm:$0xff] }
 0x190   : > { %1547 = vmatpush1.msra.mxu1 %v743_v58  ;;  %1386 = vmatprep.mubr.f32.mxu1 %v14484_v43 }
 0x191   : > { %9444 = vmatpush3.xpose.msra.mxu0 %v11018_v25  ;;  %1548 = vmatprep.subr.mxu1 %v732_v29  ;;  %v684_v25 = vld [vmem:[#allocation6 + $0x118] sm:$0xff] }
 0x192   : > { %9445 = vmatprep.subr.mxu0 %v14484_v43  ;;  %1549 = vmatpush1.msra.mxu1 %v731_v61 }
 0x193   : > { %1550 = vmatprep.subr.mxu1 %v720_v45  ;;  %1387 = vmatmul.mubr.f32.gmra.mxu1 %v10755_v8  ;;  %v672_v8 = vld [vmem:[#allocation6 + $0xb8] sm:$0xff]  ;;  %v1704_v45 = vmul.f32 %v10882_v12, %v10845_v9  ;;  %v1706_v9 = vmul.f32 %v10882_v12, %v11009_v31 }
 0x194   : > { %1551 = vmatpush1.msra.mxu1 %v719_v21  ;;  %1392 = vmatprep.mubr.f32.mxu1 %v14484_v43 }
 0x195   : > { %9446 = vmatpush3.xpose.msra.mxu0 %v11031_v34  ;;  %1552 = vmatprep.subr.mxu1 %v708_v60  ;;  %v660_v34 = vld [vmem:[#allocation6 + $0x58] sm:$0xff] }
 0x196   : > { %9447 = vmatprep.subr.mxu0 %v14484_v43  ;;  %1553 = vmatpush1.msra.mxu1 %v707_v17  ;;  %v1705_v17 = vmul.f32 %v10882_v12, %v10996_v7 }
 0x197   : > { %1554 = vmatprep.subr.mxu1 %v696_v2  ;;  %1393 = vmatmul.mubr.f32.gmra.mxu1 %v10760_v13  ;;  %v10452_v13 = vld [vmem:[%s10717_s3 + $0x48] sm:$0x1] }
 0x198   : > { %1555 = vmatpush1.msra.mxu1 %v695_v41  ;;  %1398 = vmatprep.mubr.f32.mxu1 %v14484_v43 }
 0x199   : > { %9448 = vmatpush3.xpose.msra.mxu0 %v11043_v16  ;;  %1556 = vmatprep.subr.mxu1 %v684_v25  ;;  %v11123_v16 = vadd.f32 %v11064_v40, %v10960_v32  ;;  %v10454_v32 = vld [vmem:[%s10717_s3 + $0x8] sm:$0xff]  ;;  %v10456_v40 = vld [vmem:[%s10717_s3 + $0x18] sm:$0xff] }
 0x19a   : > { %9449 = vmatprep.subr.mxu0 %v14484_v43  ;;  %1557 = vmatpush1.msra.mxu1 %v683_v55 }
 0x19b   : > { %1558 = vmatprep.subr.mxu1 %v672_v8  ;;  %1399 = vmatmul.mubr.f32.gmra.mxu1 %v10452_v13 }
 0x19c   : > { %1559 = vmatpush1.msra.mxu1 %v671_v28  ;;  %1594 = vmatprep.mubr.f32.mxu1 %v14484_v43 }
 0x19d   : > { %9450 = vmatpush3.xpose.msra.mxu0 %v10872_v49  ;;  %1560 = vmatprep.subr.mxu1 %v660_v34 }
 0x19e   : > { %1561 = vmatpush1.msra.mxu1 %v659_v26  ;;  %9497 = vmatprep.subr.mxu0 %v11080_v10 }
 0x19f   : > { %9355 = vmatprep.subr.mxu1 %v11116_v46  ;;  %1595 = vmatmul.mubr.f32.vlgmr.msra.gmra.mxu1 %v10453_v35 }
 0x1a0   : > { %9452 = vmatmul.mubr.f32.vlgmr.msra.gmra.mxu0 %v10858_v30  ;;  %9356 = vmatpush3.msra.mxu1 %v11116_v46 }
 0x1a1   : > { %9498 = vmatpush3.msra.mxu0 %v11080_v10  ;;  %9397 = vmatprep.subr.mxu1 %v11123_v16  ;;  %v10458_v10 = vld [vmem:[%s10717_s3 + $0x28] sm:$0xff] }
 0x1a2   : > { %9539 = vmatprep.subr.mxu0 %v11127_v42  ;;  %1600 = vmatprep.mubr.f32.mxu1 %v14484_v43 }
 0x1a3   : > { %1601 = vmatmul.mubr.f32.gmra.mxu1 %v10454_v32 }
 0x1a4   : > { %1606 = vmatprep.mubr.f32.mxu1 %v14484_v43 }
 0x1a7   : > { %1607 = vmatmul.mubr.f32.gmra.mxu1 %v10455_v23 }
 0x1a8   : > { %1612 = vmatprep.mubr.f32.mxu1 %v14484_v43 }
 0x1ab   : > { %1613 = vmatmul.mubr.f32.gmra.mxu1 %v10456_v40 }
 0x1ac   : > { %1618 = vmatprep.mubr.f32.mxu1 %v14484_v43 }
 0x1af   : > { %1619 = vmatmul.mubr.f32.gmra.mxu1 %v10457_v50 }
 0x1b0   : > { %1624 = vmatprep.mubr.f32.mxu1 %v14484_v43 }
 0x1b3   : > { %1625 = vmatmul.mubr.f32.gmra.mxu1 %v10458_v10 }
 0x1b4   : > { %1630 = vmatprep.mubr.f32.mxu1 %v14484_v43 }
 0x1b7   : > { %1631 = vmatmul.mubr.f32.gmra.mxu1 %v10459_v51 }
 0x1b8   : > { %1636 = vmatprep.mubr.f32.mxu1 %v14484_v43 }
 0x1bb   : > { %1637 = vmatmul.mubr.f32.gmra.mxu1 %v10460_v36 }
 0x1bc   : > { %1642 = vmatprep.mubr.f32.mxu1 %v14484_v43 }
 0x1bf   : > { %1643 = vmatmul.mubr.f32.gmra.mxu1 %v10461_v63 }
 0x1c0   : > { %1648 = vmatprep.mubr.f32.mxu1 %v14484_v43 }
 0x1c3   : > { %1649 = vmatmul.mubr.f32.gmra.mxu1 %v10452_v13 }
 0x220   : > { %v11154_v47 = vpop.f32.mrf.mxu0 }
 0x221   : > { %v1833_v33 = vsel %vm1829_vm1, %v11154_v47, -inf }
 0x222   : > { %1834 = vmax.xlane.f32.xlu1 %v1833_v33  ;;  %v11158_v38 = vpop.f32.mrf.mxu0 }
 0x223   : > { %v1830_v56 = vsel %vm1829_vm1, %v11158_v38, -inf }
 0x224   : > { %v11162_v58 = vpop.f32.mrf.mxu0  ;;  %1831 = vmax.xlane.f32.xlu0 %v1830_v56 }
 0x225   : > { %v1839_v29 = vsel %vm1829_vm1, %v11162_v58, -inf }
 0x226   : > { %1840 = vmax.xlane.f32.xlu1 %v1839_v29  ;;  %v11166_v61 = vpop.f32.mrf.mxu0 }
 0x227   : > { %v1836_v21 = vsel %vm1829_vm1, %v11166_v61, -inf }
 0x228   : > { %1717 = vadd.xlane.f32.xlu0 %v1704_v45  ;;  %v11172_v60 = vpop.f32.mrf.mxu0  ;;  %v2739_v45 = vmul.f32 %v10882_v12, %v10858_v30 }
 0x229   : > { %v1845_v2 = vsel %vm1829_vm1, %v11172_v60, -inf }
 0x22a   : > { %1837 = vmax.xlane.f32.xlu1 %v1836_v21  ;;  %v11178_v41 = vpop.f32.mrf.mxu0  ;;  %v10544_v21 = vmov 0  }
 0x22b   : > { %v1842_v25 = vsel %vm1829_vm1, %v11178_v41, -inf  ;;  %9947 = vset.pattern.permute.xlu1 %v10544_v21  ;;  %9946 = vset.pattern.permute.xlu0 %v10544_v21 }
 0x22c   : > { %1719 = vadd.xlane.f32.xlu0 %v1705_v17  ;;  %v11184_v55 = vpop.f32.mrf.mxu0 }
 0x22d   : > { %v1851_v7 = vsel %vm1829_vm1, %v11184_v55, -inf }
 0x22e   : > { %1846 = vmax.xlane.f32.xlu1 %v1845_v2  ;;  %v11188_v8 = vpop.f32.mrf.mxu0 }
 0x22f   : > { %v1848_v28 = vsel %vm1829_vm1, %v11188_v8, -inf }
 0x230   : > { %1721 = vadd.xlane.f32.xlu0 %v1706_v9 }
 0x232   : > { %1843 = vmax.xlane.f32.xlu1 %v1842_v25  ;;  %v14408_v25 = vsub.s32 2, %v10808_v52 }
 0x236   : > { %1852 = vmax.xlane.f32.xlu1 %v1851_v7  ;;  %v1096_v7 = vpop.f32.mrf.mxu1 }
 0x23a   : > { %1849 = vmax.xlane.f32.xlu1 %v1848_v28  ;;  %v11234_v28 = vrot.slane %v10816_v54, %v14408_v25 }
 0x23c   : > { %14486 = vst [vmem:[#allocation36_spill] sm:$0xff] %v11234_v28  ;;  %v11237_v12 = vadd.f32 %v1096_v7, %v11234_v28 }
 0x23e   : > { %14487 = vst [vmem:[#allocation37_spill] sm:$0xff] %v11237_v12 }
 0x240   : > { %v11192_v34 = vpop.f32.mrf.mxu0 }
 0x241   : > { %v2333_v31 = vsel %vm2329_vm2, %v11192_v34, -inf }
 0x242   : > { %v11196_v13 = vpop.f32.mrf.mxu0  ;;  %2334 = vmax.xlane.f32.xlu1 %v2333_v31  ;;  %v11239_v31 = vpop.f32.mrf.mxu1 }
 0x243   : > { %v2330_v26 = vsel %vm2329_vm2, %v11196_v13, -inf  ;;  %14488 = vst [vmem:[#allocation38_spill] sm:$0xff] %v11239_v31 }
 0x244   : > { %v11200_v35 = vpop.f32.mrf.mxu0  ;;  %2331 = vmax.xlane.f32.xlu0 %v2330_v26  ;;  %v11241_v26 = vpop.f32.mrf.mxu1 }
 0x245   : > { %v2339_v32 = vsel %vm2329_vm2, %v11200_v35, -inf  ;;  %14489 = vst [vmem:[#allocation39_spill] sm:$0xff] %v11241_v26 }
 0x246   : > { %v11204_v23 = vpop.f32.mrf.mxu0  ;;  %2340 = vmax.xlane.f32.xlu1 %v2339_v32  ;;  %v11243_v32 = vpop.f32.mrf.mxu1 }
 0x247   : > { %v2336_v40 = vsel %vm2329_vm2, %v11204_v23, -inf  ;;  %14490 = vst [vmem:[#allocation40_spill] sm:$0xff] %v11243_v32 }
 0x248   : > { %v11208_v50 = vpop.f32.mrf.mxu0  ;;  %2337 = vmax.xlane.f32.xlu0 %v2336_v40  ;;  %v1108_v40 = vpop.f32.mrf.mxu1 }
 0x249   : > { %v2345_v10 = vsel %vm2329_vm2, %v11208_v50, -inf }
 0x24a   : > { %v11212_v51 = vpop.f32.mrf.mxu0  ;;  %2346 = vmax.xlane.f32.xlu1 %v2345_v10  ;;  %v11246_v10 = vadd.f32 %v1108_v40, %v11234_v28 }
 0x24b   : > { %v2342_v36 = vsel %vm2329_vm2, %v11212_v51, -inf }
 0x24c   : > { %v11216_v63 = vpop.f32.mrf.mxu0  ;;  %2343 = vmax.xlane.f32.xlu0 %v2342_v36  ;;  %14491 = vst [vmem:[#allocation41_spill] sm:$0xff] %v11246_v10  ;;  %v11248_v36 = vpop.xlane.xlu0 %1707 }
 0x24d   : > { %v2351_v33 = vsel %vm2329_vm2, %v11216_v63, -inf }
 0x24e   : > { %v11220_v56 = vpop.f32.mrf.mxu0  ;;  %2352 = vmax.xlane.f32.xlu1 %v2351_v33  ;;  %v11250_v33 = vpop.f32.mrf.mxu1 }
 0x24f   : > { %v2348_v29 = vsel %vm2329_vm2, %v11220_v56, -inf  ;;  %14492 = vst [vmem:[#allocation42_spill] sm:$0xff] %v11250_v33 }
 0x250   : > { %2349 = vmax.xlane.f32.xlu0 %v2348_v29  ;;  %v1114_v29 = vpop.f32.mrf.mxu1  ;;  %v11257_v21 = vpop.xlane.xlu0 %1711 }
 0x251   : > { %v11253_v54 = vadd.f32 %v1114_v29, %v11234_v28 }
 0x253   : > { %14493 = vst [vmem:[#allocation43_spill] sm:$0xff] %v11253_v54 }
 0x254   : > { %2740 = vadd.xlane.f32.xlu0 %v2739_v45  ;;  %v11255_v45 = vpop.f32.mrf.mxu1  ;;  %v11267_v32 = vpop.xlane.xlu0 %1713 }
 0x255   : > { %14494 = vst [vmem:[#allocation44_spill] sm:$0xff] %v11255_v45  ;;  %v11274_v45 = vpop.xlane.xlu1 %1709 }
 0x260   : > { %v11226_v17 = vpop.f32.mrf.mxu0 }
 0x261   : > { %v3033_v2 = vsel %vm2329_vm2, %v11226_v17, -inf }
 0x262   : > { %v9453_v9 = vpop.f32.mrf.mxu0  ;;  %3034 = vmax.xlane.f32.xlu1 %v3033_v2  ;;  %v1120_v2 = vpop.f32.mrf.mxu1 }
 0x263   : > { %v11260_v9 = vadd.f32 %v1120_v2, %v11234_v28  ;;  %v11278_v2 = vpop.xlane.xlu0 %1715 }
 0x264   : > { %v11262_v7 = vpop.f32.mrf.mxu1 }
 0x265   : > { %14495 = vst [vmem:[#allocation45_spill] sm:$0xff] %v11260_v9  ;;  %14496 = vst [vmem:[#allocation46_spill] sm:$0xff] %v11262_v7 }
 0x266   : > { %v1126_v40 = vpop.f32.mrf.mxu1 }
 0x267   : > { %v11265_v25 = vadd.f32 %v1126_v40, %v11234_v28 }
 0x268   : > { %v11269_v31 = vpop.f32.mrf.mxu1 }
 0x269   : > { %14497 = vst [vmem:[#allocation47_spill] sm:$0xff] %v11265_v25  ;;  %14498 = vst [vmem:[#allocation48_spill] sm:$0xff] %v11269_v31 }
 0x26a   : > { %v1132_v29 = vpop.f32.mrf.mxu1 }
 0x26b   : > { %v11272_v33 = vadd.f32 %v1132_v29, %v11234_v28 }
 0x26c   : > { %v11276_v54 = vpop.f32.mrf.mxu1 }
 0x26d   : > { %14499 = vst [vmem:[#allocation49_spill] sm:$0xff] %v11272_v33  ;;  %14500 = vst [vmem:[#allocation50_spill] sm:$0xff] %v11276_v54 }
 0x26e   : > { %v1138_v9 = vpop.f32.mrf.mxu1 }
 0x26f   : > { %v11281_v7 = vadd.f32 %v1138_v9, %v11234_v28 }
 0x270   : > { %v11283_v25 = vpop.f32.mrf.mxu1 }
 0x271   : > { %14501 = vst [vmem:[#allocation51_spill] sm:$0xff] %v11281_v7  ;;  %14502 = vst [vmem:[#allocation52_spill] sm:$0xff] %v11283_v25 }
 0x272   : > { %v1144_v12 = vpop.f32.mrf.mxu1 }
 0x273   : > { %v11294_v54 = vadd.f32 %v1144_v12, %v11234_v28 }
 0x274   : > { %v11296_v9 = vpop.f32.mrf.mxu1 }
 0x275   : > { %14503 = vst [vmem:[#allocation53_spill] sm:$0xff] %v11294_v54  ;;  %14504 = vst [vmem:[#allocation54_spill] sm:$0xff] %v11296_v9 }
 0x276   : > { %v1150_v42 = vpop.f32.mrf.mxu1 }
 0x278   : > { %v11310_v9 = vpop.f32.mrf.mxu1 }
 0x279   : > { %14506 = vst [vmem:[#allocation56_spill] sm:$0xff] %v11310_v9 }
 0x2ab   : > { %v1835_v40 = vpop.xlane.xlu1 %1834 }
 0x2ac   : > { %v11286_v10 = vmax.f32 %v1835_v40, %v11274_v45 }
 0x2ad   : > { %v1832_v31 = vpop.xlane.xlu0 %1831 }
 0x2ae   : > { %v1863_v29 = vsub.f32 %v11154_v47, %v11286_v10  ;;  %v11291_v33 = vmax.f32 %v1832_v31, %v11248_v36  ;;  %v11306_v31 = vadd.f32 %v1150_v42, %v11234_v28 }
 0x2af   : > { %v1841_v26 = vpop.xlane.xlu1 %1840 }
 0x2b0   : > { %v1872_v7 = vmul.f32 1.442695, %v1863_v29  ;;  %v1862_v25 = vsub.f32 %v11158_v38, %v11291_v33  ;;  %v11301_v40 = vmax.f32 %v1841_v26, %v11267_v32  ;;  %14505 = vst [vmem:[#allocation55_spill] sm:$0xff] %v11306_v31  ;;  %v871_v26 = vsub.s32 6, %v10808_v52 }
 0x2b1   : > { %v11303_v47 = vpop.xlane.xlu0 %1717 }
 0x2b2   : > { %9948 = vpow2.f32 %v1872_v7  ;;  %v1870_v19 = vmul.f32 1.442695, %v1862_v25  ;;  %v1865_v12 = vsub.f32 %v11162_v58, %v11301_v40  ;;  %v11316_v7 = vpop.f32.mrf.mxu1 }
 0x2b3   : > { %v1838_v54 = vpop.xlane.xlu1 %1837  ;;  %14507 = vst [vmem:[#allocation57_spill] sm:$0xff] %v11316_v7 }
 0x2b4   : > { %9950 = vpow2.f32 %v1870_v19  ;;  %v11313_v38 = vmax.f32 %v1838_v54, %v11257_v21  ;;  %v1876_v29 = vmul.f32 1.442695, %v1865_v12  ;;  %v11320_v31 = vpop.f32.mrf.mxu1  ;;  %v10462_v54 = vld [vmem:[%s14461_s28] sm:$0xff] }
 0x2b5   : > { %14508 = vst [vmem:[#allocation58_spill] sm:$0xff] %v11320_v31  ;;  %v11322_v28 = vpop.xlane.xlu0 %1719  ;;  %v11330_v12 = vrot.slane %v10462_v54, %v871_v26  ;;  %v1887_v26 = vld [vmem:[%s14388_s5 + $0x8] sm:$0xff] }
 0x2b6   : > { %v1864_v25 = vsub.f32 %v11166_v61, %v11313_v38  ;;  %9952 = vpow2.f32 %v1876_v29  ;;  %v1352_v9 = vpop.f32.mrf.mxu1 }
 0x2b7   : > { %v1847_v42 = vpop.xlane.xlu1 %1846  ;;  %14509 = vst [vmem:[#allocation59_spill] sm:$0xff] %v11330_v12  ;;  %v11335_v29 = vadd.f32 %v1352_v9, %v11330_v12 }
 0x2b8   : > { %v1874_v58 = vmul.f32 1.442695, %v1864_v25  ;;  %v11325_v19 = vmax.f32 %v1847_v42, %v11303_v47  ;;  %v11337_v31 = vpop.f32.mrf.mxu1 }
 0x2b9   : > { %14510 = vst [vmem:[#allocation60_spill] sm:$0xff] %v11335_v29  ;;  %14511 = vst [vmem:[#allocation61_spill] sm:$0xff] %v11337_v31  ;;  %v11345_v11 = vpop.xlane.xlu0 %1721 }
 0x2ba   : > { %9954 = vpow2.f32 %v1874_v58  ;;  %v1867_v61 = vsub.f32 %v11172_v60, %v11325_v19  ;;  %v1358_v54 = vpop.f32.mrf.mxu1 }
 0x2bb   : > { %v1844_v25 = vpop.xlane.xlu1 %1843  ;;  %v11350_v9 = vadd.f32 %v1358_v54, %v11330_v12 }
 0x2bc   : > { %v1880_v7 = vmul.f32 1.442695, %v1867_v61  ;;  %v11340_v42 = vmax.f32 %v1844_v25, %v11278_v2  ;;  %v11352_v31 = vpop.f32.mrf.mxu1 }
 0x2bd   : > { %14512 = vst [vmem:[#allocation62_spill] sm:$0xff] %v11350_v9  ;;  %14513 = vst [vmem:[#allocation63_spill] sm:$0xff] %v11352_v31 }
 0x2be   : > { %v1866_v60 = vsub.f32 %v11178_v41, %v11340_v42  ;;  %9956 = vpow2.f32 %v1880_v7  ;;  %v1364_v24 = vpop.f32.mrf.mxu1 }
 0x2bf   : > { %v9949_v58 = vpop.eup %9948  ;;  %v1853_v29 = vpop.xlane.xlu1 %1852 }
 0x2c0   : > { %v1878_v61 = vmul.f32 1.442695, %v1866_v60  ;;  %v11355_v25 = vmax.f32 %v1853_v29, %v11345_v11  ;;  %v1895_v14 = vmul.f32 %v9949_v58, %v1887_v26  ;;  %v1889_v29 = vld [vmem:[%s14388_s5 + $0x18] sm:$0xff]  ;;  %v11367_v26 = vadd.f32 %v1364_v24, %v11330_v12  ;;  %v11369_v60 = vpop.f32.mrf.mxu1 }
 0x2c1   : > { %v9951_v44 = vpop.eup %9950  ;;  %14515 = vst [vmem:[#allocation65_spill] sm:$0xff] %v11369_v60 }
 0x2c2   : > { %9958 = vpow2.f32 %v1878_v61  ;;  %v1869_v41 = vsub.f32 %v11184_v55, %v11355_v25  ;;  %v1945_v54 = vsel %vm1829_vm1, %v1895_v14, 0.0  ;;  %v1894_v7 = vmul.f32 %v9951_v44, %v1886_v27  ;;  %14514 = vst [vmem:[#allocation64_spill] sm:$0xff] %v11367_v26  ;;  %v1888_v27 = vld [vmem:[%s14388_s5 + $0x10] sm:$0xff]  ;;  %v1370_v44 = vpop.f32.mrf.mxu1 }
 0x2c3   : > { %v1850_v9 = vpop.xlane.xlu1 %1849  ;;  %1946 = vadd.xlane.f32.xlu0 %v1945_v54  ;;  %v9953_v58 = vpop.eup %9952  ;;  %v1904_v55 = vsub.f32 %v11257_v21, %v11313_v38  ;;  %v1903_v38 = vsub.f32 %v11274_v45, %v11286_v10  ;;  %v11386_v26 = vadd.f32 %v1370_v44, %v11330_v12 }
 0x2c4   : > { %v1884_v31 = vmul.f32 1.442695, %v1869_v41  ;;  %v1860_v61 = vmax.f32 %v1850_v9, %v11322_v28  ;;  %9357 = vmatprep.mubr.msk.f32.mxu1 %vm1829_vm1, %v1894_v7  ;;  %v1942_v41 = vsel %vm1829_vm1, %v1894_v7, 0.0  ;;  %v1897_v60 = vmul.f32 %v9953_v58, %v1889_v29  ;;  %v11388_v6 = vpop.f32.mrf.mxu1 }
 0x2c5   : > { %9358 = vmatmul.mubr.msk.f32.vlgmr.msra.gmra.mxu1 %vm1829_vm1, %v1895_v14  ;;  %14516 = vst [vmem:[#allocation66_spill] sm:$0xff] %v11386_v26  ;;  %14517 = vst [vmem:[#allocation67_spill] sm:$0xff] %v11388_v6  ;;  %v1914_v7 = vmul.f32 1.442695, %v1904_v55  ;;  %v1912_v58 = vmul.f32 1.442695, %v1903_v38 }
 0x2c6   : > { %v1868_v54 = vsub.f32 %v11188_v8, %v1860_v61  ;;  %v1908_v24 = vsub.f32 %v11322_v28, %v1860_v61  ;;  %9398 = vmatpush3.msra.mxu1 %v11123_v16  ;;  %9960 = vpow2.f32 %v1884_v31  ;;  %v1376_v29 = vpop.f32.mrf.mxu1  ;;  %v1951_v16 = vsel %vm1829_vm1, %v1897_v60, 0.0 }
 0x2c7   : > { %v9955_v9 = vpop.eup %9954  ;;  %1943 = vadd.xlane.f32.xlu0 %v1942_v41  ;;  %9399 = vmatprep.subr.mxu1 %v11058_v5  ;;  %v11396_v10 = vadd.f32 %v1376_v29, %v11330_v12 }
 0x2c8   : > { %v1882_v8 = vmul.f32 1.442695, %v1868_v54  ;;  %v1922_v61 = vmul.f32 1.442695, %v1908_v24  ;;  %v1896_v14 = vmul.f32 %v9955_v9, %v1888_v27  ;;  %9400 = vmatpush3.msra.mxu1 %v11058_v5  ;;  %v11402_v55 = vpop.f32.mrf.mxu1 }
 0x2c9   : > { %9401 = vmatprep.subr.mxu1 %v11050_v15  ;;  %14518 = vst [vmem:[#allocation68_spill] sm:$0xff] %v11396_v10  ;;  %14519 = vst [vmem:[#allocation69_spill] sm:$0xff] %v11402_v55 }
 0x2ca   : > { %9962 = vpow2.f32 %v1882_v8  ;;  %9360 = vmatprep.mubr.msk.f32.mxu1 %vm1829_vm1, %v1896_v14  ;;  %9402 = vmatpush3.msra.mxu1 %v11050_v15  ;;  %v1891_v15 = vld [vmem:[%s14388_s5 + $0x28] sm:$0xff] }
 0x2cb   : > { %9964 = vpow2.f32 %v1922_v61  ;;  %v2335_v31 = vpop.xlane.xlu1 %2334  ;;  %1952 = vadd.xlane.f32.xlu0 %v1951_v16  ;;  %9403 = vmatprep.subr.mxu1 %v11038_v22  ;;  %v9957_v27 = vpop.eup %9956 }
 0x2cc   : > { %v2355_v5 = vmax.f32 %v2335_v31, %v11274_v45  ;;  %9361 = vmatmul.mubr.msk.f32.gmra.mxu1 %vm1829_vm1, %v1897_v60  ;;  %9966 = vpow2.f32 %v1914_v7  ;;  %v1948_v60 = vsel %vm1829_vm1, %v1896_v14, 0.0  ;;  %v1899_v8 = vmul.f32 %v9957_v27, %v1891_v15  ;;  %v1382_v61 = vpop.f32.mrf.mxu1 }
 0x2cd   : > { %9404 = vmatpush3.msra.mxu1 %v11038_v22  ;;  %v2332_v44 = vpop.xlane.xlu0 %2331  ;;  %v1890_v22 = vld [vmem:[%s14388_s5 + $0x20] sm:$0xff]  ;;  %9968 = vpow2.f32 %v1912_v58 }
 0x2ce   : > { %v2363_v54 = vsub.f32 %v11192_v34, %v2355_v5  ;;  %v2403_v24 = vsub.f32 %v11274_v45, %v2355_v5  ;;  %9405 = vmatprep.subr.mxu1 %v11026_v48  ;;  %v11412_v41 = vmax.f32 %v2332_v44, %v11248_v36  ;;  %v11433_v58 = vpop.f32.mrf.mxu1  ;;  %v1957_v15 = vsel %vm1829_vm1, %v1899_v8, 0.0 }
 0x2cf   : > { %v9959_v9 = vpop.eup %9958  ;;  %9406 = vmatpush3.msra.mxu1 %v11026_v48  ;;  %v2341_v38 = vpop.xlane.xlu1 %2340  ;;  %1949 = vadd.xlane.f32.xlu0 %v1948_v60  ;;  %v11427_v48 = vadd.f32 %v1382_v61, %v11330_v12  ;;  %14521 = vst [vmem:[#allocation71_spill] sm:$0xff] %v11433_v58 }
 0x2d0   : > { %v2372_v34 = vmul.f32 1.442695, %v2363_v54  ;;  %v2362_v45 = vsub.f32 %v11196_v13, %v11412_v41  ;;  %9407 = vmatprep.subr.mxu1 %v11013_v1  ;;  %v2412_v7 = vmul.f32 1.442695, %v2403_v24  ;;  %v11423_v14 = vmax.f32 %v2341_v38, %v11267_v32  ;;  %v1388_v54 = vpop.f32.mrf.mxu1 }
 0x2d1   : > { %9408 = vmatpush3.msra.mxu1 %v11013_v1  ;;  %v2338_v29 = vpop.xlane.xlu0 %2337  ;;  %v1898_v16 = vmul.f32 %v9959_v9, %v1890_v22  ;;  %14520 = vst [vmem:[#allocation70_spill] sm:$0xff] %v11427_v48  ;;  %v1932_v9 = vld [vmem:[%s14395_s12 + $0x30] sm:$0xff] }
 0x2d2   : > { %v2370_v31 = vmul.f32 1.442695, %v2362_v45  ;;  %9409 = vmatprep.subr.mxu1 %v10992_v18  ;;  %v11431_v13 = vmax.f32 %v2338_v29, %v11257_v21  ;;  %9970 = vpow2.f32 %v2372_v34  ;;  %v2365_v5 = vsub.f32 %v11200_v35, %v11423_v14  ;;  %v11457_v38 = vpop.f32.mrf.mxu1  ;;  %v1892_v29 = vld [vmem:[%s14388_s5 + $0x30] sm:$0xff] }
 0x2d3   : > { %9410 = vmatpush3.msra.mxu1 %v10992_v18  ;;  %9363 = vmatprep.mubr.msk.f32.mxu1 %vm1829_vm1, %v1898_v16  ;;  %v2347_v1 = vpop.xlane.xlu1 %2346  ;;  %v9961_v35 = vpop.eup %9960  ;;  %14522 = vst [vmem:[#allocation72_spill] sm:$0xff] %v11457_v38 }
 0x2d4   : > { %9972 = vpow2.f32 %v2370_v31  ;;  %v2364_v27 = vsub.f32 %v11204_v23, %v11431_v13  ;;  %9411 = vmatprep.subr.mxu1 %v10977_v37  ;;  %v11443_v44 = vmax.f32 %v2347_v1, %v11303_v47  ;;  %9364 = vmatmul.mubr.msk.f32.gmra.mxu1 %vm1829_vm1, %v1899_v8  ;;  %v2376_v18 = vmul.f32 1.442695, %v2365_v5  ;;  %v1893_v23 = vld [vmem:[%s14388_s5 + $0x38] sm:$0xff]  ;;  %v1394_v5 = vpop.f32.mrf.mxu1 }
 0x2d5   : > { %9974 = vpow2.f32 %v2412_v7  ;;  %9412 = vmatpush3.msra.mxu1 %v10977_v37  ;;  %1958 = vadd.xlane.f32.xlu0 %v1957_v15  ;;  %v2344_v24 = vpop.xlane.xlu0 %2343  ;;  %v1954_v8 = vsel %vm1829_vm1, %v1898_v16, 0.0  ;;  %v1901_v31 = vmul.f32 %v9961_v35, %v1893_v23  ;;  %v1928_v35 = vld [vmem:[%s14395_s12 + $0x10] sm:$0xff] }
 0x2d6   : > { %v2374_v60 = vmul.f32 1.442695, %v2364_v27  ;;  %v2367_v22 = vsub.f32 %v11208_v50, %v11443_v44  ;;  %9425 = vmatprep.subr.mxu1 %v14484_v43  ;;  %v11460_v37 = vmax.f32 %v2344_v24, %v11278_v2  ;;  %9976 = vpow2.f32 %v2376_v18  ;;  %v11481_v23 = vpop.f32.mrf.mxu1 }
 0x2d7   : > { %v9963_v34 = vpop.eup %9962  ;;  %v2353_v45 = vpop.xlane.xlu1 %2352  ;;  %14523 = vst [vmem:[#allocation73_spill] sm:$0xff] %v11481_v23  ;;  %v1905_v23 = vsub.f32 %v11267_v32, %v11301_v40 }
 0x2d8   : > { %v9965_v61 = vpop.eup %9964  ;;  %v2380_v7 = vmul.f32 1.442695, %v2367_v22  ;;  %v11464_v50 = vmax.f32 %v2353_v45, %v11345_v11  ;;  %9978 = vpow2.f32 %v2374_v60  ;;  %v2366_v1 = vsub.f32 %v11212_v51, %v11460_v37  ;;  %v1400_v45 = vpop.f32.mrf.mxu1 }
 0x2d9   : > { %1955 = vadd.xlane.f32.xlu0 %v1954_v8  ;;  %v2350_v27 = vpop.xlane.xlu0 %2349  ;;  %v11471_v15 = vmul.f32 %v9965_v61, %v1932_v9  ;;  %v9967_v16 = vpop.eup %9966  ;;  %v1900_v51 = vmul.f32 %v9963_v34, %v1892_v29  ;;  %v1909_v61 = vsub.f32 %v11345_v11, %v11355_v25  ;;  %v11497_v34 = vadd.f32 %v1388_v54, %v11330_v12  ;;  %v2386_v25 = vld [vmem:[#allocation8] sm:$0xff] }
 0x2da   : > { %v2369_v18 = vsub.f32 %v11216_v63, %v11464_v50  ;;  %v11476_v24 = vmax.f32 %v2350_v27, %v11322_v28  ;;  %v2378_v60 = vmul.f32 1.442695, %v2366_v1  ;;  %9980 = vpow2.f32 %v2380_v7  ;;  %v9969_v8 = vpop.eup %9968  ;;  %v11499_v7 = vpop.f32.mrf.mxu1 }
 0x2db   : > { %2007 = vperm.xlu1 %9947, %v11471_v15   ;;  %v1963_v63 = vsel %vm1829_vm1, %v1901_v31, 0.0  ;;  %9366 = vmatprep.mubr.msk.f32.mxu1 %vm1829_vm1, %v1900_v51  ;;  %v11490_v1 = vmul.f32 %v9967_v16, %v1928_v35  ;;  %14524 = vst [vmem:[#allocation74_spill] sm:$0xff] %v11497_v34  ;;  %14525 = vst [vmem:[#allocation75_spill] sm:$0xff] %v11499_v7  ;;  %v11503_v29 = vadd.f32 %v1394_v5, %v11330_v12  ;;  %v2387_v35 = vld [vmem:[#allocation8 + $0x8] sm:$0xff] }
 0x2dc   : > { %v2384_v22 = vmul.f32 1.442695, %v2369_v18  ;;  %v2368_v9 = vsub.f32 %v11220_v56, %v11476_v24  ;;  %9982 = vpow2.f32 %v2378_v60  ;;  %9367 = vmatmul.mubr.msk.f32.gmra.mxu1 %vm1829_vm1, %v1901_v31  ;;  %v1927_v56 = vld [vmem:[%s14395_s12 + $0x8] sm:$0xff]  ;;  %v1907_v18 = vsub.f32 %v11303_v47, %v11325_v19  ;;  %v1596_v54 = vpop.f32.mrf.mxu1 }
 0x2dd   : > { %1964 = vadd.xlane.f32.xlu0 %v1963_v63  ;;  %14526 = vst [vmem:[#allocation76_spill] sm:$0xff] %v11503_v29  ;;  %v1960_v31 = vsel %vm1829_vm1, %v1900_v51, 0.0  ;;  %v11509_v60 = vadd.f32 %v1400_v45, %v11330_v12  ;;  %v1924_v63 = vmul.f32 1.442695, %v1909_v61  ;;  %v11511_v7 = vmul.f32 %v9969_v8, %v1927_v56  ;;  %v2427_v19 = vld [vmem:[%s14396_s13 + $0x8] sm:$0xff] }
 0x2de   : > { %v2382_v27 = vmul.f32 1.442695, %v2368_v9  ;;  %9984 = vpow2.f32 %v2384_v22  ;;  %v14423_v5 = vsub.s32 3, %v10808_v52  ;;  %v1598_v51 = vpop.f32.mrf.mxu1  ;;  %v10463_v45 = vld [vmem:[%s14461_s28 + $0x8] sm:$0xf]  ;;  %v14528_v8 = vsub.s32 2, %v10808_v52 }
 0x2df   : > { %1987 = vperm.xlu1 %9947, %v11490_v1   ;;  %v9971_v16 = vpop.eup %9970  ;;  %14527 = vst [vmem:[#allocation77_spill] sm:$0xff] %v11509_v60  ;;  %v1920_v56 = vmul.f32 1.442695, %v1907_v18  ;;  %v1902_v12 = vsub.f32 %v11248_v36, %v11291_v33 }
 0x2e0   : > { %9986 = vpow2.f32 %v2382_v27  ;;  %v11520_v22 = vmul.f32 %v9971_v16, %v2387_v35  ;;  %v11527_v61 = vrot.slane %v10463_v45, %v14528_v8  ;;  %v11531_v27 = vrot.slane %v10463_v45, %v14423_v5  ;;  %v2388_v16 = vld [vmem:[#allocation8 + $0x10] sm:$0xff]  ;;  %v2389_v8 = vld [vmem:[#allocation8 + $0x18] sm:$0xff] }
 0x2e1   : > { %v9973_v9 = vpop.eup %9972  ;;  %1961 = vadd.xlane.f32.xlu0 %v1960_v31  ;;  %v1602_v31 = vpop.f32.mrf.mxu1  ;;  %9988 = vpow2.f32 %v1924_v63 }
 0x2e2   : > { %v9975_v6 = vpop.eup %9974  ;;  %v11514_v55 = vmul.f32 %v9973_v9, %v2386_v25  ;;  %v1906_v25 = vsub.f32 %v11278_v2, %v11340_v42  ;;  %v1597_v45 = vadd.f32 %v1596_v54, %v11527_v61  ;;  %v1599_v18 = vadd.f32 %v1598_v51, %v11531_v27  ;;  %v2390_v54 = vld [vmem:[#allocation8 + $0x20] sm:$0xff] }
 0x2e3   : > { %1982 = vperm.xlu1 %9947, %v11511_v7   ;;  %v9977_v35 = vpop.eup %9976  ;;  %v11539_v9 = vmul.f32 %v9975_v6, %v2427_v19  ;;  %v1604_v42 = vpop.f32.mrf.mxu1  ;;  %v1603_v6 = vadd.f32 %v1602_v31, %v11527_v61  ;;  %9990 = vpow2.f32 %v1920_v56  ;;  %v2392_v56 = vld [vmem:[#allocation8 + $0x30] sm:$0xff] }
 0x2e4   : > { %9413 = vmatprep.mubr.msk.f32.mxu1 %vm2329_vm2, %v11514_v55  ;;  %1657 = vst [vmem:[#allocation2 + $0x10] sm:$0xff] %v1597_v45  ;;  %1658 = vst [vmem:[#allocation2 + $0x18] sm:$0xff] %v1599_v18  ;;  %v1605_v63 = vadd.f32 %v1604_v42, %v11531_v27  ;;  %v11550_v19 = vmul.f32 %v9977_v35, %v2389_v8  ;;  %v1918_v60 = vmul.f32 1.442695, %v1906_v25  ;;  %v1916_v42 = vmul.f32 1.442695, %v1905_v23 }
 0x2e5   : > { %9414 = vmatmul.mubr.msk.f32.vlgmr.msra.gmra.mxu1 %vm2329_vm2, %v11520_v22  ;;  %v9979_v5 = vpop.eup %9978  ;;  %v1608_v51 = vpop.f32.mrf.mxu1  ;;  %1661 = vst [vmem:[#allocation2 + $0x30] sm:$0xff] %v1603_v6  ;;  %v2407_v6 = vsub.f32 %v11303_v47, %v11443_v44 }
 0x2e6   : > { %9426 = vmatpush3.xpose.msra.mxu1 %v10941_v20  ;;  %v11545_v58 = vmul.f32 %v9979_v5, %v2388_v16  ;;  %v2391_v5 = vld [vmem:[#allocation8 + $0x28] sm:$0xff]  ;;  %1662 = vst [vmem:[#allocation2 + $0x38] sm:$0xff] %v1605_v63  ;;  %v1609_v8 = vadd.f32 %v1608_v51, %v11527_v61  ;;  %9992 = vpow2.f32 %v1918_v60  ;;  %v2393_v63 = vld [vmem:[#allocation8 + $0x38] sm:$0xff] }
 0x2e7   : > { %2489 = vperm.xlu1 %9947, %v11539_v9   ;;  %9430 = vmatprep.subr.mxu1 %v14484_v43  ;;  %v9981_v38 = vpop.eup %9980  ;;  %v1610_v31 = vpop.f32.mrf.mxu1  ;;  %9994 = vpow2.f32 %v1916_v42  ;;  %v2420_v44 = vmul.f32 1.442695, %v2407_v6 }
 0x2e8   : > { %9416 = vmatprep.mubr.msk.f32.mxu1 %vm2329_vm2, %v11545_v58  ;;  %v1611_v45 = vadd.f32 %v1610_v31, %v11531_v27  ;;  %v11562_v40 = vmul.f32 %v9981_v38, %v2391_v5  ;;  %1665 = vst [vmem:[#allocation2 + $0x50] sm:$0xff] %v1609_v8 }
 0x2e9   : > { %v9983_v16 = vpop.eup %9982  ;;  %9417 = vmatmul.mubr.msk.f32.gmra.mxu1 %vm2329_vm2, %v11550_v19  ;;  %v1614_v25 = vpop.f32.mrf.mxu1  ;;  %9996 = vpow2.f32 %v2420_v44 }
 0x2ea   : > { %v11558_v35 = vmul.f32 %v9983_v16, %v2390_v54  ;;  %1666 = vst [vmem:[#allocation2 + $0x58] sm:$0xff] %v1611_v45  ;;  %v1615_v5 = vadd.f32 %v1614_v25, %v11527_v61  ;;  %v2406_v16 = vsub.f32 %v11278_v2, %v11460_v37  ;;  %v1933_v45 = vld [vmem:[%s14395_s12 + $0x38] sm:$0xff] }
 0x2eb   : > { %v9985_v18 = vpop.eup %9984  ;;  %v1616_v38 = vpop.f32.mrf.mxu1 }
 0x2ec   : > { %9419 = vmatprep.mubr.msk.f32.mxu1 %vm2329_vm2, %v11558_v35  ;;  %v1617_v23 = vadd.f32 %v1616_v38, %v11531_v27  ;;  %v11574_v60 = vmul.f32 %v9985_v18, %v2393_v63  ;;  %1669 = vst [vmem:[#allocation2 + $0x70] sm:$0xff] %v1615_v5  ;;  %v2418_v25 = vmul.f32 1.442695, %v2406_v16  ;;  %v1931_v63 = vld [vmem:[%s14395_s12 + $0x28] sm:$0xff] }
 0x2ed   : > { %v9987_v54 = vpop.eup %9986  ;;  %9420 = vmatmul.mubr.msk.f32.gmra.mxu1 %vm2329_vm2, %v11562_v40  ;;  %v1620_v47 = vpop.f32.mrf.mxu1 }
 0x2ee   : > { %v11570_v51 = vmul.f32 %v9987_v54, %v2392_v56  ;;  %1670 = vst [vmem:[#allocation2 + $0x78] sm:$0xff] %v1617_v23  ;;  %v1621_v31 = vadd.f32 %v1620_v47, %v11527_v61  ;;  %v9989_v8 = vpop.eup %9988  ;;  %9998 = vpow2.f32 %v2418_v25 }
 0x2ef   : > { %v1622_v56 = vpop.f32.mrf.mxu1  ;;  %v11589_v18 = vmul.f32 %v9989_v8, %v1933_v45 }
 0x2f0   : > { %9422 = vmatprep.mubr.msk.f32.mxu1 %vm2329_vm2, %v11570_v51  ;;  %1673 = vst [vmem:[#allocation2 + $0x90] sm:$0xff] %v1621_v31  ;;  %v1623_v2 = vadd.f32 %v1622_v56, %v11531_v27  ;;  %v9991_v6 = vpop.eup %9990 }
 0x2f1   : > { %9423 = vmatmul.mubr.msk.f32.gmra.mxu1 %vm2329_vm2, %v11574_v60  ;;  %v1626_v37 = vpop.f32.mrf.mxu1  ;;  %v11602_v23 = vmul.f32 %v9991_v6, %v1931_v63 }
 0x2f2   : > { %9427 = vmatprep.mubr.msk.f32.mxu1 %vm10543_vm0, %v14484_v43  ;;  %1674 = vst [vmem:[#allocation2 + $0x98] sm:$0xff] %v1623_v2  ;;  %v1627_v42 = vadd.f32 %v1626_v37, %v11527_v61  ;;  %v1929_v37 = vld [vmem:[%s14395_s12 + $0x18] sm:$0xff] }
 0x2f3   : > { %v1628_v54 = vpop.f32.mrf.mxu1  ;;  %v9993_v44 = vpop.eup %9992 }
 0x2f4   : > { %1677 = vst [vmem:[#allocation2 + $0xb0] sm:$0xff] %v1627_v42  ;;  %v1629_v38 = vadd.f32 %v1628_v54, %v11531_v27  ;;  %v9995_v2 = vpop.eup %9994 }
 0x2f5   : > { %9428 = vmatmul.mubr.f32.vlgmr.msra.gmra.mxu1 %v10858_v30  ;;  %v1632_v5 = vpop.f32.mrf.mxu1  ;;  %v1937_v63 = vmul.f32 %v9995_v2, %v1929_v37  ;;  %v2405_v2 = vsub.f32 %v11267_v32, %v11423_v14  ;;  %v2430_v37 = vld [vmem:[%s14396_s13 + $0x20] sm:$0xff]  ;;  %v2442_v32 = vsel %vm2329_vm2, %v11514_v55, 0.0  ;;  %v11655_v55 = vpop.xlane.xlu0 %2740 }
 0x2f6   : > { %9431 = vmatpush3.msra.mxu1 %v11116_v46  ;;  %9432 = vmatprep.mubr.msk.f32.mxu1 %vm10543_vm0, %v14484_v43  ;;  %1678 = vst [vmem:[#allocation2 + $0xb8] sm:$0xff] %v1629_v38  ;;  %v1633_v47 = vadd.f32 %v1632_v5, %v11527_v61  ;;  %v1930_v46 = vld [vmem:[%s14395_s12 + $0x20] sm:$0xff]  ;;  %v9997_v38 = vpop.eup %9996  ;;  %v2431_v5 = vld [vmem:[%s14396_s13 + $0x28] sm:$0xff] }
 0x2f7   : > { %2012 = vperm.xlu0 %9946, %v11589_v18   ;;  %9454 = vmatprep.subr.mxu1 %v14484_v43  ;;  %v1634_v16 = vpop.f32.mrf.mxu1  ;;  %v11610_v45 = vmul.f32 %v9993_v44, %v1930_v46 }
 0x2f8   : > { %1681 = vst [vmem:[#allocation2 + $0xd0] sm:$0xff] %v1633_v47  ;;  %v1635_v31 = vadd.f32 %v1634_v16, %v11531_v27  ;;  %v11628_v16 = vmul.f32 %v9997_v38, %v2431_v5  ;;  %v2416_v38 = vmul.f32 1.442695, %v2405_v2  ;;  %v2428_v2 = vld [vmem:[%s14396_s13 + $0x10] sm:$0xff] }
 0x2f9   : > { %v1638_v8 = vpop.f32.mrf.mxu1 }
 0x2fa   : > { %1682 = vst [vmem:[#allocation2 + $0xd8] sm:$0xff] %v1635_v31  ;;  %v11613_v56 = vadd.f32 %v1638_v8, %v11527_v61  ;;  %10000 = vpow2.f32 %v2416_v38 }
 0x2fb   : > { %2002 = vperm.xlu0 %9946, %v11602_v23   ;;  %v1640_v25 = vpop.f32.mrf.mxu1  ;;  %v9999_v8 = vpop.eup %9998 }
 0x2fc   : > { %14529 = vst [vmem:[#allocation78_spill] sm:$0xff] %v11613_v56  ;;  %v1641_v42 = vadd.f32 %v1640_v25, %v11531_v27  ;;  %v1910_v56 = vmul.f32 1.442695, %v1902_v12 }
 0x2fd   : > { %v1644_v6 = vpop.f32.mrf.mxu1 }
 0x2fe   : > { %1686 = vst [vmem:[#allocation2 + $0xf8] sm:$0xff] %v1641_v42  ;;  %v11621_v54 = vadd.f32 %v1644_v6, %v11527_v61  ;;  %v11638_v6 = vmul.f32 %v9999_v8, %v2430_v37 }
 0x2ff   : > { %1997 = vperm.xlu0 %9946, %v11610_v45   ;;  %v1646_v47 = vpop.f32.mrf.mxu1 }
 0x300   : > { %14530 = vst [vmem:[#allocation79_spill] sm:$0xff] %v11621_v54  ;;  %1689 = vst [vmem:[#allocation2 + $0x110] sm:$0xff] %v11621_v54  ;;  %v1647_v44 = vadd.f32 %v1646_v47, %v11531_v27  ;;  %v2402_v54 = vsub.f32 %v11248_v36, %v11412_v41  ;;  %v1926_v36 = vld [vmem:[%s14395_s12] sm:$0xff] }
 0x301   : > { %v1650_v46 = vpop.f32.mrf.mxu1 }
 0x302   : > { %1690 = vst [vmem:[#allocation2 + $0x118] sm:$0xff] %v1647_v44  ;;  %v1651_v31 = vadd.f32 %v1650_v46, %v11527_v61  ;;  %v2445_v61 = vsel %vm2329_vm2, %v11520_v22, 0.0  ;;  %v2404_v22 = vsub.f32 %v11257_v21, %v11431_v13  ;;  %v2451_v44 = vsel %vm2329_vm2, %v11550_v19, 0.0 }
 0x303   : > { %1992 = vperm.xlu0 %9946, %v1937_v63   ;;  %v1652_v25 = vpop.f32.mrf.mxu1 }
 0x304   : > { %1693 = vst [vmem:[#allocation2 + $0x130] sm:$0x1] %v1651_v31  ;;  %v1653_v42 = vadd.f32 %v1652_v25, %v11531_v27  ;;  %v2429_v27 = vld [vmem:[%s14396_s13 + $0x18] sm:$0xff]  ;;  %v2414_v47 = vmul.f32 1.442695, %v2404_v22 }
 0x306   : > { %1694 = vst [vmem:[#allocation2 + $0x138] sm:$0x1] %v1653_v42  ;;  %10002 = vpow2.f32 %v2414_v47 }
 0x307   : > { %2509 = vperm.xlu0 %9946, %v11628_v16   ;;  %v10001_v14 = vpop.eup %10000 }
 0x308   : > { %v11648_v5 = vmul.f32 %v10001_v14, %v2429_v27 }
 0x30b   : > { %2504 = vperm.xlu0 %9946, %v11638_v6   ;;  %2446 = vadd.xlane.f32.xlu1 %v2445_v61 }
 0x30f   : > { %2443 = vadd.xlane.f32.xlu1 %v2442_v32 }
 0x313   : > { %v10003_v31 = vpop.eup %10002 }
 0x314   : > { %v11664_v37 = vmul.f32 %v10003_v31, %v2428_v2 }
 0x320   : > { %2499 = vperm.xlu1 %9947, %v11648_v5  }
 0x344   : > { %2452 = vadd.xlane.f32.xlu1 %v2451_v44 }
 0x34c   : > { %v11657_v46 = vpop.xlane.xlu0 %1946 }
 0x350   : > { %v11659_v8 = vpop.xlane.xlu0 %1943 }
 0x354   : > { %v1953_v21 = vpop.xlane.xlu0 %1952 }
 0x355   : > { %2494 = vperm.xlu1 %9947, %v11664_v37   ;;  %v1969_v13 = vadd.f32 %v1953_v21, %v1937_v63 }
 0x357   : > { %v2155_v25 = vmul.f32 3.0, %v1969_v13 }
 0x358   : > { %v1950_v19 = vpop.xlane.xlu0 %1949 }
 0x359   : > { %10004 = vrcp.f32 %v2155_v25  ;;  %v1968_v42 = vadd.f32 %v1950_v19, %v11490_v1  ;;  %v2409_v25 = vsub.f32 %v11345_v11, %v11464_v50  ;;  %v2433_v11 = vld [vmem:[%s14396_s13 + $0x38] sm:$0xff] }
 0x35b   : > { %v2154_v38 = vmul.f32 3.0, %v1968_v42  ;;  %v2424_v19 = vmul.f32 1.442695, %v2409_v25  ;;  %v2454_v42 = vsel %vm2329_vm2, %v11558_v35, 0.0 }
 0x35d   : > { %10006 = vrcp.f32 %v2154_v38 }
 0x35e   : > { %v1959_v61 = vpop.xlane.xlu0 %1958 }
 0x35f   : > { %v1971_v32 = vadd.f32 %v1959_v61, %v11602_v23 }
 0x361   : > { %v2157_v14 = vmul.f32 3.0, %v1971_v32 }
 0x362   : > { %v1956_v27 = vpop.xlane.xlu0 %1955 }
 0x363   : > { %10008 = vrcp.f32 %v2157_v14  ;;  %v1970_v22 = vadd.f32 %v1956_v27, %v11610_v45  ;;  %v2448_v45 = vsel %vm2329_vm2, %v11545_v58, 0.0 }
 0x365   : > { %v2156_v47 = vmul.f32 3.0, %v1970_v22  ;;  %v11699_v22 = vpop.xlane.xlu1 %3034 }
 0x366   : > { %v10005_v44 = vpop.eup %10004  ;;  %v1965_v31 = vpop.xlane.xlu0 %1964 }
 0x367   : > { %10010 = vrcp.f32 %v2156_v47  ;;  %v1973_v63 = vadd.f32 %v1965_v31, %v11589_v18  ;;  %2185 = vperm.xlu0 %9946, %v10005_v44   ;;  %v2457_v18 = vsel %vm2329_vm2, %v11562_v40, 0.0 }
 0x369   : > { %v2159_v2 = vmul.f32 3.0, %v1973_v63  ;;  %v11705_v31 = vpop.permute.xlu1 %2007 }
 0x36a   : > { %v10007_v21 = vpop.eup %10006  ;;  %v1962_v4 = vpop.xlane.xlu0 %1961 }
 0x36b   : > { %10012 = vrcp.f32 %v2159_v2  ;;  %2180 = vperm.xlu0 %9946, %v10007_v21  }
 0x36c   : > { %10014 = vpow2.f32 %v2424_v19 }
 0x370   : > { %v10009_v1 = vpop.eup %10008 }
 0x371   : > { %2195 = vperm.xlu0 %9946, %v10009_v1   ;;  %v2408_v1 = vsub.f32 %v11322_v28, %v11476_v24 }
 0x374   : > { %v10011_v13 = vpop.eup %10010 }
 0x375   : > { %2190 = vperm.xlu0 %9946, %v10011_v13   ;;  %v11715_v13 = vpop.permute.xlu1 %1987 }
 0x378   : > { %v10013_v23 = vpop.eup %10012 }
 0x379   : > { %2205 = vperm.xlu0 %9946, %v10013_v23   ;;  %2449 = vadd.xlane.f32.xlu1 %v2448_v45  ;;  %v10015_v38 = vpop.eup %10014  ;;  %v2422_v45 = vmul.f32 1.442695, %v2408_v1  ;;  %v2432_v1 = vld [vmem:[%s14396_s13 + $0x30] sm:$0xff] }
 0x37a   : > { %v11684_v58 = vmul.f32 %v10015_v38, %v2433_v11  ;;  %v2463_v38 = vsel %vm2329_vm2, %v11574_v60, 0.0 }
 0x37b   : > { %10016 = vpow2.f32 %v2422_v45 }
 0x37d   : > { %2458 = vadd.xlane.f32.xlu1 %v2457_v18  ;;  %v11723_v18 = vpop.permute.xlu1 %1982 }
 0x381   : > { %2455 = vadd.xlane.f32.xlu1 %v2454_v42  ;;  %v11731_v24 = vpop.permute.xlu1 %2489 }
 0x385   : > { %v11679_v61 = vpop.f32.mrf.mxu1 }
 0x387   : > { %v11686_v50 = vpop.f32.mrf.mxu1 }
 0x388   : > { %v10017_v10 = vpop.eup %10016 }
 0x389   : > { %v11740_v34 = vmul.f32 %v10017_v10, %v2432_v1  ;;  %v2410_v10 = vmul.f32 1.442695, %v2402_v54  ;;  %v2460_v1 = vsel %vm2329_vm2, %v11570_v51, 0.0  ;;  %v2426_v51 = vld [vmem:[%s14396_s13] sm:$0xff] }
 0x38c   : > { %v11689_v40 = vpop.f32.mrf.mxu1 }
 0x38e   : > { %v11691_v32 = vpop.f32.mrf.mxu1 }
 0x392   : > { %2519 = vperm.xlu1 %9947, %v11684_v58  }
 0x394   : > { %v11693_v14 = vpop.f32.mrf.mxu1  ;;  %v11733_v26 = vpop.xlane.xlu1 %2446 }
 0x396   : > { %v11695_v35 = vpop.f32.mrf.mxu1 }
 0x398   : > { %v11738_v48 = vpop.xlane.xlu1 %2443 }
 0x39c   : > { %v11697_v27 = vpop.f32.mrf.mxu1  ;;  %v11743_v60 = vpop.permute.xlu1 %2499 }
 0x39e   : > { %v11701_v47 = vpop.f32.mrf.mxu1 }
 0x3a5   : > { %v11703_v44 = vpop.f32.mrf.mxu1 }
 0x3a7   : > { %v11707_v63 = vpop.f32.mrf.mxu1 }
 0x3a9   : > { %v11709_v2 = vpop.f32.mrf.mxu1 }
 0x3ab   : > { %v11711_v21 = vpop.f32.mrf.mxu1 }
 0x3ad   : > { %v11717_v23 = vpop.f32.mrf.mxu1 }
 0x3af   : > { %v11719_v25 = vpop.f32.mrf.mxu1 }
 0x3b1   : > { %v11721_v19 = vpop.f32.mrf.mxu1 }
 0x3b3   : > { %v11725_v42 = vpop.f32.mrf.mxu1 }
 0x3b5   : > { %v11729_v11 = vpop.f32.mrf.mxu1 }
 0x3b6   : > { %2464 = vadd.xlane.f32.xlu1 %v2463_v38 }
 0x3b7   : > { %v9429_v28 = vpop.f32.mrf.mxu1 }
 0x3c7   : > { %2514 = vperm.xlu1 %9947, %v11740_v34  }
 0x3cd   : > { %v2453_v45 = vpop.xlane.xlu1 %2452 }
 0x3ce   : > { %v2469_v38 = vadd.f32 %v2453_v45, %v11648_v5  ;;  %v1972_v5 = vadd.f32 %v1962_v4, %v11471_v15 }
 0x3d0   : > { %v2662_v28 = vmul.f32 3.0, %v2469_v38  ;;  %v2158_v45 = vmul.f32 3.0, %v1972_v5 }
 0x3d1   : > { %v11763_v15 = vpop.permute.xlu1 %2494 }
 0x3d2   : > { %10018 = vrcp.f32 %v2662_v28 }
 0x3d3   : > { %10020 = vpow2.f32 %v1910_v56 }
 0x3d4   : > { %10022 = vpow2.f32 %v2410_v10 }
 0x3d5   : > { %10024 = vrcp.f32 %v2158_v45 }
 0x3df   : > { %v10019_v29 = vpop.eup %10018 }
 0x3e0   : > { %2692 = vperm.xlu0 %9946, %v10019_v29   ;;  %v1967_v29 = vadd.f32 %v11657_v46, %v11511_v7  ;;  %v10021_v33 = vpop.eup %10020 }
 0x3e1   : > { %v1934_v12 = vmul.f32 %v10021_v33, %v1926_v36  ;;  %v10023_v41 = vpop.eup %10022  ;;  %v11768_v33 = vpop.permute.xlu0 %2012 }
 0x3e2   : > { %v2153_v38 = vmul.f32 3.0, %v1967_v29  ;;  %v11761_v4 = vmul.f32 %v10023_v41, %v2426_v51  ;;  %v10025_v56 = vpop.eup %10024 }
 0x3e3   : > { %v1966_v41 = vadd.f32 %v11659_v8, %v1934_v12 }
 0x3e4   : > { %10026 = vrcp.f32 %v2153_v38 }
 0x3e5   : > { %v2003_v36 = vpop.permute.xlu0 %2002 }
 0x3e9   : > { %v11771_v51 = vpop.permute.xlu0 %1997 }
 0x3eb   : > { %2461 = vadd.xlane.f32.xlu1 %v2460_v1 }
 0x3f1   : > { %v10027_v46 = vpop.eup %10026 }
 0x3fc   : > { %1977 = vperm.xlu1 %9947, %v1934_v12  }
 0x400   : > { %2484 = vperm.xlu1 %9947, %v11761_v4  }
 0x402   : > { %v2450_v7 = vpop.xlane.xlu1 %2449 }
 0x404   : > { %2200 = vperm.xlu1 %9947, %v10025_v56   ;;  %v2856_v56 = vsel %vm1829_vm1, %v11729_v11, -inf }
 0x406   : > { %v2459_v54 = vpop.xlane.xlu1 %2458 }
 0x407   : > { %v2471_v28 = vadd.f32 %v2459_v54, %v11628_v16  ;;  %v2152_v16 = vmul.f32 3.0, %v1966_v41 }
 0x408   : > { %2175 = vperm.xlu1 %9947, %v10027_v46  }
 0x409   : > { %v2664_v10 = vmul.f32 3.0, %v2471_v28 }
 0x40a   : > { %v2456_v1 = vpop.xlane.xlu1 %2455 }
 0x40b   : > { %10028 = vrcp.f32 %v2664_v10  ;;  %v2470_v5 = vadd.f32 %v2456_v1, %v11638_v6  ;;  %v1993_v6 = vpop.permute.xlu0 %1992 }
 0x40d   : > { %v2663_v29 = vmul.f32 3.0, %v2470_v5 }
 0x40e   : > { %v11775_v28 = vpop.permute.xlu1 %2519 }
 0x40f   : > { %10030 = vrcp.f32 %v2663_v29  ;;  %v2510_v54 = vpop.permute.xlu0 %2509 }
 0x410   : > { %10032 = vrcp.f32 %v2152_v16  ;;  %v11780_v16 = vld [vmem:[#allocation2] ss:$0 sm:$0xff] }
 0x411   : > { %v2018_v0 = vmul.f32 %v1993_v6, %v11780_v16  ;;  %v3148_v6 = vmul.f32 %v10872_v49, %v10864_v39  ;;  %v2466_v49 = vadd.f32 %v11738_v48, %v11761_v4  ;;  %v2019_v4 = vmul.f32 %v11771_v51, %v11780_v16 }
 0x413   : > { %v2505_v46 = vpop.permute.xlu0 %2504  ;;  %v2129_v62 = vadd.f32 %v11689_v40, %v2018_v0  ;;  %v3150_v0 = vsel %vm3149_vm3, %v3148_v6, 0.0 }
 0x417   : > { %v2186_v1 = vpop.permute.xlu0 %2185 }
 0x418   : > { %v10029_v45 = vpop.eup %10028 }
 0x419   : > { %2702 = vperm.xlu0 %9946, %v10029_v45  }
 0x41b   : > { %v11778_v12 = vpop.permute.xlu0 %2180 }
 0x41c   : > { %v10031_v38 = vpop.eup %10030 }
 0x41d   : > { %2697 = vperm.xlu0 %9946, %v10031_v38   ;;  %v10033_v10 = vpop.eup %10032 }
 0x41f   : > { %v2196_v45 = vpop.permute.xlu0 %2195 }
 0x423   : > { %v2191_v41 = vpop.permute.xlu0 %2190 }
 0x42c   : > { %2857 = vmax.xlane.f32.xlu1 %v2856_v56  ;;  %v11782_v56 = vpop.permute.xlu0 %2205 }
 0x43d   : > { %2170 = vperm.xlu1 %9947, %v10033_v10   ;;  %v2525_v10 = vmul.f32 %v11743_v60, %v11780_v16 }
 0x43f   : > { %v2465_v5 = vpop.xlane.xlu1 %2464 }
 0x440   : > { %v2473_v29 = vadd.f32 %v2465_v5, %v11684_v58  ;;  %v2636_v58 = vadd.f32 %v11709_v2, %v2525_v10  ;;  %v2746_v5 = vrot.slane %v10956_v3, %v10811_v53 }
 0x442   : > { %v2666_v8 = vmul.f32 3.0, %v2473_v29  ;;  %v2747_v57 = vmul.f32 %v2746_v5, %v10858_v30  ;;  %v2467_v30 = vadd.f32 %v11733_v26, %v11539_v9  ;;  %v2527_v26 = vmul.f32 %v2510_v54, %v11780_v16 }
 0x443   : > { %v11798_v40 = vpop.permute.xlu1 %2514 }
 0x444   : > { %10034 = vrcp.f32 %v2666_v8  ;;  %v2211_v8 = vmul.f32 %v2186_v1, %v2129_v62  ;;  %v2468_v62 = vadd.f32 %v2450_v7, %v11664_v37  ;;  %v2660_v10 = vmul.f32 3.0, %v2467_v30 }
 0x446   : > { %v2661_v1 = vmul.f32 3.0, %v2468_v62 }
 0x451   : > { %v10035_v38 = vpop.eup %10034 }
 0x452   : > { %2712 = vperm.xlu0 %9946, %v10035_v38  }
 0x45b   : > { %v2693_v29 = vpop.permute.xlu0 %2692 }
 0x45c   : > { %v2718_v59 = vmul.f32 %v2693_v29, %v2636_v58  ;;  %v2646_v29 = vadd.f32 %v11717_v23, %v2527_v26 }
 0x45e   : > { %v11791_v38 = vadd.f32 %v2718_v59, %v2211_v8  ;;  %v2526_v8 = vmul.f32 %v2505_v46, %v11780_v16 }
 0x460   : > { %2734 = vst [vmem:[#allocation2 + $0x60] sm:$0xff] %v11791_v38 }
 0x461   : > { %2748 = vadd.xlane.f32.xlu1 %v2747_v57  ;;  %v2659_v57 = vmul.f32 3.0, %v2466_v49 }
 0x465   : > { %3151 = vadd.xlane.f32.xlu1 %v3150_v0 }
 0x474   : > { %v2462_v2 = vpop.xlane.xlu1 %2461 }
 0x475   : > { %v2472_v59 = vadd.f32 %v2462_v2, %v11740_v34  ;;  %v2020_v34 = vmul.f32 %v2003_v36, %v11780_v16  ;;  %v2134_v2 = vadd.f32 %v11695_v35, %v2019_v4  ;;  %v2641_v36 = vadd.f32 %v11719_v25, %v2526_v8 }
 0x476   : > { %v3036_v35 = vmax.f32 %v11699_v22, %v11655_v55  ;;  %v2529_v22 = vmul.f32 %v11775_v28, %v11780_v16 }
 0x477   : > { %v2665_v60 = vmul.f32 3.0, %v2472_v59  ;;  %v2139_v7 = vadd.f32 %v11693_v14, %v2020_v34  ;;  %v2212_v59 = vmul.f32 %v2191_v41, %v2134_v2 }
 0x478   : > { %v11821_v51 = vpop.permute.xlu1 %1977  ;;  %v3037_v41 = vsub.f32 %v11226_v17, %v3036_v35  ;;  %v3040_v17 = vld [vmem:[%s14392_s9] sm:$0xff]  ;;  %v3042_v2 = vsub.f32 %v11655_v55, %v3036_v35 }
 0x479   : > { %10036 = vrcp.f32 %v2665_v60  ;;  %v2213_v6 = vmul.f32 %v2196_v45, %v2139_v7 }
 0x47a   : > { %10038 = vrcp.f32 %v2661_v1  ;;  %v3038_v1 = vmul.f32 1.442695, %v3037_v41  ;;  %v2754_v41 = vld [vmem:[%s14390_s7] sm:$0xff] }
 0x47b   : > { %10040 = vrcp.f32 %v2660_v10 }
 0x47c   : > { %10042 = vrcp.f32 %v2659_v57  ;;  %v11823_v46 = vpop.permute.xlu1 %2484  ;;  %v2863_v57 = vld [vmem:[%s14391_s8] sm:$0xff] }
 0x47d   : > { %10044 = vpow2.f32 %v3038_v1  ;;  %v2021_v1 = vmul.f32 %v11705_v31, %v11780_v16  ;;  %v2017_v31 = vmul.f32 %v11715_v13, %v11780_v16  ;;  %v2523_v13 = vmul.f32 %v11731_v24, %v11780_v16 }
 0x480   : > { %v11825_v45 = vpop.permute.xlu1 %2200 }
 0x484   : > { %v11829_v25 = vpop.permute.xlu1 %2175 }
 0x486   : > { %v10037_v58 = vpop.eup %10036 }
 0x487   : > { %2707 = vperm.xlu0 %9946, %v10037_v58   ;;  %v10039_v5 = vpop.eup %10038 }
 0x488   : > { %v10041_v37 = vpop.eup %10040 }
 0x489   : > { %v10043_v9 = vpop.eup %10042 }
 0x48a   : > { %v10045_v58 = vpop.eup %10044 }
 0x48b   : > { %2687 = vperm.xlu0 %9946, %v10039_v5   ;;  %v11848_v7 = vmul.f32 %v10045_v58, %v3040_v17  ;;  %v2868_v58 = vld [vmem:[%s14398_s15] sm:$0xff] }
 0x48f   : > { %2682 = vperm.xlu0 %9946, %v10041_v37   ;;  %v2022_v37 = vmul.f32 %v11768_v33, %v11780_v16 }
 0x491   : > { %v2149_v34 = vadd.f32 %v11697_v27, %v2022_v37  ;;  %v3047_v27 = vsel %vm2329_vm2, %v11848_v7, 0.0 }
 0x493   : > { %2677 = vperm.xlu0 %9946, %v10043_v9   ;;  %v2656_v9 = vadd.f32 %v11721_v19, %v2529_v22  ;;  %v2144_v22 = vadd.f32 %v11701_v47, %v2021_v1  ;;  %v3045_v47 = vld [vmem:[%s14399_s16] sm:$0xff] }
 0x494   : > { %v2703_v48 = vpop.permute.xlu0 %2702 }
 0x495   : > { %v2720_v0 = vmul.f32 %v2703_v48, %v2646_v29  ;;  %v2215_v29 = vmul.f32 %v11782_v56, %v2149_v34 }
 0x497   : > { %v11815_v62 = vadd.f32 %v2720_v0, %v2213_v6 }
 0x498   : > { %v2698_v54 = vpop.permute.xlu0 %2697 }
 0x499   : > { %2736 = vst [vmem:[#allocation2 + $0xa0] sm:$0xff] %v11815_v62  ;;  %v2719_v14 = vmul.f32 %v2698_v54, %v2641_v36 }
 0x49b   : > { %v11818_v23 = vadd.f32 %v2719_v14, %v2212_v59  ;;  %v3043_v14 = vmul.f32 1.442695, %v3042_v2  ;;  %v14531_v2 = vld [vmem:[#allocation24_spill] sm:$0xff] }
 0x49d   : > { %2735 = vst [vmem:[#allocation2 + $0x80] sm:$0xff] %v11818_v23 }
 0x4b5   : > { %v2858_v60 = vpop.xlane.xlu1 %2857 }
 0x4b6   : > { %v2859_v30 = vmax.f32 %v2858_v60, %v11655_v55  ;;  %v2528_v60 = vmul.f32 %v11798_v40, %v11780_v16  ;;  %v2524_v40 = vmul.f32 %v11763_v15, %v11780_v16  ;;  %v2124_v15 = vadd.f32 %v11691_v32, %v2017_v31 }
 0x4b8   : > { %v2860_v10 = vsub.f32 %v11729_v11, %v2859_v30  ;;  %v2865_v8 = vsub.f32 %v11655_v55, %v2859_v30  ;;  %v2759_v30 = vld [vmem:[%s14397_s14] sm:$0xff] }
 0x4b9   : > { %v11856_v19 = vpop.permute.xlu1 %2170 }
 0x4ba   : > { %v2861_v49 = vmul.f32 1.442695, %v2860_v10  ;;  %v2866_v36 = vmul.f32 1.442695, %v2865_v8  ;;  %v2626_v8 = vadd.f32 %v11703_v44, %v2523_v13 }
 0x4bc   : > { %10046 = vpow2.f32 %v2861_v49 }
 0x4c9   : > { %v10047_v5 = vpop.eup %10046 }
 0x4ca   : > { %v2864_v11 = vmul.f32 %v10047_v5, %v2863_v57  ;;  %v2651_v5 = vadd.f32 %v11725_v42, %v2528_v60  ;;  %v2631_v42 = vadd.f32 %v11711_v21, %v2524_v40  ;;  %v2015_v21 = vmul.f32 %v11821_v51, %v11780_v16 }
 0x4cc   : > { %9433 = vmatmul.mubr.msk.f32.vlgmr.msra.gmra.mxu1 %vm1829_vm1, %v2864_v11  ;;  %v2870_v26 = vsel %vm1829_vm1, %v2864_v11, 0.0  ;;  %v2214_v11 = vmul.f32 %v11825_v45, %v2144_v22  ;;  %v2114_v51 = vadd.f32 %v11686_v50, %v2015_v21 }
 0x4cd   : > { %2871 = vadd.xlane.f32.xlu0 %v2870_v26  ;;  %v2713_v28 = vpop.permute.xlu0 %2712  ;;  %9470 = vmatprep.mubr.msk.f32.mxu1 %vm10543_vm0, %v14484_v43 }
 0x4ce   : > { %v2722_v48 = vmul.f32 %v2713_v28, %v2656_v9 }
 0x4d0   : > { %v2730_v33 = vadd.f32 %v2722_v48, %v2215_v29  ;;  %v2016_v48 = vmul.f32 %v11723_v18, %v11780_v16  ;;  %v2522_v18 = vmul.f32 %v11823_v46, %v11780_v16 }
 0x4d1   : > { %3048 = vadd.xlane.f32.xlu0 %v3047_v27 }
 0x4d2   : > { %2738 = vst [vmem:[#allocation2 + $0xe0] sm:$0xff] %v2730_v33  ;;  %9455 = vmatpush3.msra.mxu1 %v2730_v33  ;;  %v2210_v33 = vmul.f32 %v11778_v12, %v2124_v15  ;;  %v2119_v32 = vadd.f32 %v11679_v61, %v2016_v48  ;;  %v2621_v16 = vadd.f32 %v11707_v63, %v2522_v18 }
 0x4d3   : > { %9456 = vmatprep.subr.mxu1 %v14484_v43 }
 0x4d4   : > { %v2209_v61 = vmul.f32 %v11829_v25, %v2119_v32 }
 0x4ea   : > { %v2749_v4 = vpop.xlane.xlu1 %2748 }
 0x4eb   : > { %v2750_v6 = vmax.f32 %v2749_v4, %v11655_v55 }
 0x4ed   : > { %v2751_v0 = vsub.f32 %v2749_v4, %v2750_v6  ;;  %v2756_v56 = vsub.f32 %v11655_v55, %v2750_v6 }
 0x4ee   : > { %v11974_v13 = vpop.xlane.xlu1 %3151 }
 0x4ef   : > { %v2752_v54 = vmul.f32 1.442695, %v2751_v0  ;;  %v2757_v59 = vmul.f32 1.442695, %v2756_v56  ;;  %v10464_v56 = vld [vmem:[%s14461_s28] sm:$0xff]  ;;  %14538 = vst [vmem:[#allocation24_spill] sm:$0xff] %v11974_v13 }
 0x4f1   : > { %10048 = vpow2.f32 %v2752_v54  ;;  %v14532_v54 = vsub.s32 1, %v10808_v52 }
 0x4f2   : > { %10050 = vpow2.f32 %v2757_v59 }
 0x4f3   : > { %10052 = vpow2.f32 %v2866_v36  ;;  %v11936_v59 = vrot.slane %v10464_v56, %v14532_v54  ;;  %v3272_v54 = vld [vmem:[%s14394_s11] sm:$0x1] }
 0x4f4   : > { %10054 = vpow2.f32 %v3043_v14 }
 0x4fe   : > { %v10049_v55 = vpop.eup %10048 }
 0x4ff   : > { %v10051_v35 = vpop.eup %10050  ;;  %v2755_v10 = vmul.f32 %v10049_v55, %v2754_v41  ;;  %v14533_v41 = vld [vmem:[#allocation13_spill] sm:$0xff] }
 0x500   : > { %v10053_v49 = vpop.eup %10052  ;;  %v2760_v57 = vmul.f32 %v10051_v35, %v2759_v30  ;;  %v11944_v60 = vadd.f32 %v14533_v41, %v11936_v59 }
 0x501   : > { %2766 = vperm.xlu1 %9947, %v2755_v10   ;;  %v2869_v26 = vmul.f32 %v10053_v49, %v2868_v58  ;;  %v10055_v9 = vpop.eup %10054 }
 0x502   : > { %2772 = vperm.xlu0 %9946, %v2760_v57   ;;  %v2762_v17 = vadd.f32 %v2760_v57, %v2755_v10  ;;  %v2708_v37 = vpop.permute.xlu0 %2707  ;;  %v11892_v4 = vmul.f32 %v10055_v9, %v3045_v47 }
 0x503   : > { %v2721_v34 = vmul.f32 %v2708_v37, %v2651_v5  ;;  %v14534_v37 = vld [vmem:[#allocation14_spill] sm:$0xff] }
 0x504   : > { %v2777_v28 = vmul.f32 3.0, %v2762_v17  ;;  %v11952_v31 = vadd.f32 %v14534_v37, %v11936_v59 }
 0x505   : > { %v2729_v29 = vadd.f32 %v2721_v34, %v2214_v11  ;;  %2877 = vperm.xlu1 %9947, %v2869_v26   ;;  %v14535_v34 = vld [vmem:[#allocation15_spill] sm:$0xff] }
 0x506   : > { %10056 = vrcp.f32 %v2777_v28  ;;  %v2688_v45 = vpop.permute.xlu0 %2687  ;;  %v14536_v28 = vld [vmem:[#allocation16_spill] sm:$0xff] }
 0x507   : > { %2737 = vst [vmem:[#allocation2 + $0xc0] sm:$0xff] %v2729_v29  ;;  %v2717_v27 = vmul.f32 %v2688_v45, %v2631_v42  ;;  %9457 = vmatpush3.msra.mxu1 %v2729_v29  ;;  %v11964_v47 = vadd.f32 %v14536_v28, %v11936_v59  ;;  %v14537_v29 = vld [vmem:[#allocation17_spill] sm:$0xff] }
 0x508   : > { %9458 = vmatprep.subr.mxu1 %v14484_v43  ;;  %v11970_v42 = vadd.f32 %v14537_v29, %v11936_v59 }
 0x509   : > { %v2725_v24 = vadd.f32 %v2717_v27, %v2210_v33  ;;  %3061 = vperm.xlu1 %9947, %v11892_v4   ;;  %9459 = vmatpush3.msra.mxu1 %v11815_v62  ;;  %v2208_v62 = vmul.f32 %v11856_v19, %v2114_v51 }
 0x50a   : > { %v2683_v12 = vpop.permute.xlu0 %2682  ;;  %9460 = vmatprep.subr.mxu1 %v14484_v43 }
 0x50b   : > { %2733 = vst [vmem:[#allocation2 + $0x40] sm:$0xff] %v2725_v24  ;;  %v2716_v44 = vmul.f32 %v2683_v12, %v2626_v8  ;;  %9461 = vmatpush3.msra.mxu1 %v11818_v23  ;;  %v2763_v8 = vld [vmem:[#allocation2 + $0x120] ss:$0 sm:$0xff] }
 0x50c   : > { %9462 = vmatprep.subr.mxu1 %v14484_v43 }
 0x50d   : > { %v2724_v6 = vadd.f32 %v2716_v44, %v2209_v61  ;;  %9463 = vmatpush3.msra.mxu1 %v11791_v38 }
 0x50e   : > { %v2678_v46 = vpop.permute.xlu0 %2677  ;;  %9464 = vmatprep.subr.mxu1 %v14484_v43 }
 0x50f   : > { %2732 = vst [vmem:[#allocation2 + $0x20] sm:$0xff] %v2724_v6  ;;  %v2715_v25 = vmul.f32 %v2678_v46, %v2621_v16  ;;  %9465 = vmatpush3.msra.mxu1 %v2725_v24 }
 0x510   : > { %9466 = vmatprep.subr.mxu1 %v14484_v43 }
 0x511   : > { %v2723_v23 = vadd.f32 %v2715_v25, %v2208_v62  ;;  %9467 = vmatpush3.msra.mxu1 %v2724_v6 }
 0x512   : > { %9468 = vmatprep.subr.mxu1 %v14484_v43 }
 0x513   : > { %v10057_v50 = vpop.eup %10056  ;;  %2731 = vst [vmem:[#allocation2] sm:$0xff] %v2723_v23  ;;  %9469 = vmatpush3.msra.mxu1 %v2723_v23 }
 0x514   : > { %2781 = vperm.xlu0 %9946, %v10057_v50   ;;  %9471 = vmatmul.mubr.msk.f32.vlgmr.msra.gmra.mxu1 %vm2329_vm2, %v11848_v7  ;;  %v867_v7 = vsub.s32 5, %v10808_v52 }
 0x515   : > { %9473 = vmatprep.subr.mxu1 %v14484_v43  ;;  %9475 = vmatprep.mubr.msk.f32.mxu1 %vm10543_vm0, %v14484_v43 }
 0x516   : > { %9474 = vmatpush3.xpose.msra.mxu1 %v10941_v20  ;;  %v11928_v20 = vrot.slane %v10464_v56, %v867_v7  ;;  %v14540_v56 = vld [vmem:[#allocation32_spill] sm:$0xff] }
 0x517   : > { %9478 = vmatprep.subr.mxu1 %v14484_v43 }
 0x518   : > { %v11932_v36 = vadd.f32 %v14531_v2, %v11928_v20  ;;  %v11982_v2 = vadd.f32 %v14540_v56, %v11928_v20 }
 0x519   : > { %9476 = vmatmul.mubr.f32.vlgmr.msra.gmra.mxu1 %v10864_v39 }
 0x51a   : > { %9480 = vmatprep.mubr.msk.f32.mxu1 %vm10543_vm0, %v14484_v43  ;;  %v11940_v14 = vrot.slane %v11932_v36, %v10811_v53  ;;  %v2742_v21 = vld [vmem:[#allocation2] ss:$0 sm:$0xff] }
 0x51c   : > { %v3377_v30 = vmul.f32 %v11940_v14, %v11944_v60  ;;  %v3378_v11 = vmul.f32 %v11940_v14, %v11952_v31  ;;  %v3380_v15 = vmul.f32 %v11940_v14, %v11964_v47  ;;  %v3381_v48 = vmul.f32 %v11940_v14, %v11970_v42 }
 0x556   : > { %v2872_v63 = vpop.xlane.xlu0 %2871 }
 0x557   : > { %v2873_v38 = vadd.f32 %v2872_v63, %v2869_v26  ;;  %v11958_v26 = vadd.f32 %v14535_v34, %v11936_v59 }
 0x559   : > { %v2954_v19 = vmul.f32 3.0, %v2873_v38  ;;  %v3379_v9 = vmul.f32 %v11940_v14, %v11958_v26 }
 0x55a   : > { %v3049_v49 = vpop.xlane.xlu0 %3048 }
 0x55b   : > { %10058 = vrcp.f32 %v2954_v19  ;;  %v3050_v22 = vadd.f32 %v3049_v49, %v11892_v4  ;;  %v14544_v49 = vld [vmem:[#allocation29_spill] sm:$0xff] }
 0x55d   : > { %v3138_v5 = vmul.f32 3.0, %v3050_v22 }
 0x55f   : > { %10060 = vrcp.f32 %v3138_v5 }
 0x568   : > { %v10059_v0 = vpop.eup %10058 }
 0x569   : > { %2958 = vperm.xlu1 %9947, %v10059_v0  }
 0x56c   : > { %v10061_v17 = vpop.eup %10060 }
 0x57c   : > { %v2767_v45 = vpop.permute.xlu1 %2766 }
 0x57d   : > { %v2773_v33 = vpop.permute.xlu0 %2772  ;;  %v2769_v24 = vmul.f32 %v2767_v45, %v2763_v8 }
 0x57e   : > { %v2775_v12 = vmul.f32 %v2773_v33, %v2742_v21 }
 0x580   : > { %v2878_v27 = vpop.permute.xlu1 %2877  ;;  %v2776_v62 = vadd.f32 %v2775_v12, %v2769_v24 }
 0x581   : > { %v2880_v61 = vmul.f32 %v2878_v27, %v2742_v21 }
 0x584   : > { %v3062_v32 = vpop.permute.xlu1 %3061 }
 0x585   : > { %v3064_v46 = vmul.f32 %v3062_v32, %v2742_v21 }
 0x58c   : > { %v2950_v55 = vpop.f32.mrf.mxu1 }
 0x58d   : > { %3385 = vadd.xlane.f32.xlu1 %v3377_v30  ;;  %v2951_v6 = vadd.f32 %v2950_v55, %v2880_v61  ;;  %v14542_v55 = vld [vmem:[#allocation31_spill] sm:$0xff] }
 0x58e   : > { %v9434_v35 = vpop.f32.mrf.mxu1 }
 0x58f   : > { %v2782_v4 = vpop.permute.xlu0 %2781  ;;  %v1266_v35 = vadd.f32 %v14542_v55, %v11928_v20 }
 0x590   : > { %v2784_v50 = vmul.f32 %v2782_v4, %v2776_v62 }
 0x5d4   : > { %v3134_v1 = vpop.f32.mrf.mxu1 }
 0x5d5   : > { %v3135_v63 = vadd.f32 %v3134_v1, %v3064_v46  ;;  %v14543_v1 = vld [vmem:[#allocation30_spill] sm:$0xff] }
 0x5d6   : > { %v9472_v10 = vpop.f32.mrf.mxu1 }
 0x5d7   : > { %v1260_v10 = vadd.f32 %v14543_v1, %v11928_v20 }
 0x5d9   : > { %v3260_v57 = vpop.f32.mrf.mxu1 }
 0x5da   : > { %v3265_v58 = vsel %vm3264_vm4, %v3260_v57, -inf }
 0x5db   : > { %3266 = vmax.xlane.f32.xlu0 %v3265_v58  ;;  %v9477_v40 = vpop.f32.mrf.mxu1  ;;  %v14545_v58 = vld [vmem:[#allocation18_spill] sm:$0xff] }
 0x5dc   : > { %v12006_v22 = vadd.f32 %v14545_v58, %v11936_v59  ;;  %v14546_v40 = vld [vmem:[#allocation19_spill] sm:$0xff] }
 0x5dd   : > { %v12010_v5 = vadd.f32 %v14546_v40, %v11936_v59 }
 0x5de   : > { %v3382_v61 = vmul.f32 %v11940_v14, %v12006_v22 }
 0x5df   : > { %v3383_v46 = vmul.f32 %v11940_v14, %v12010_v5 }
 0x5e4   : > { %v2959_v51 = vpop.permute.xlu1 %2958 }
 0x5e5   : > { %v2961_v25 = vmul.f32 %v2959_v51, %v2951_v6 }
 0x5e7   : > { %v2962_v19 = vadd.f32 %v2961_v25, %v2784_v50 }
 0x5f1   : > { %3142 = vperm.xlu0 %9946, %v10061_v17   ;;  %v14547_v17 = vld [vmem:[#allocation28_spill] sm:$0xff] }
 0x5f2   : > { %v1248_v37 = vadd.f32 %v14547_v17, %v11928_v20 }
 0x610   : > { %3387 = vadd.xlane.f32.xlu0 %v3378_v11  ;;  %v14548_v11 = vld [vmem:[#allocation20_spill] sm:$0xff] }
 0x611   : > { %v12018_v34 = vadd.f32 %v14548_v11, %v11936_v59 }
 0x614   : > { %3389 = vadd.xlane.f32.xlu0 %v3379_v9  ;;  %v14549_v9 = vld [vmem:[#allocation27_spill] sm:$0xff] }
 0x615   : > { %v1242_v28 = vadd.f32 %v14549_v9, %v11928_v20 }
 0x618   : > { %3391 = vadd.xlane.f32.xlu0 %v3380_v15  ;;  %v14550_v15 = vld [vmem:[#allocation26_spill] sm:$0xff] }
 0x619   : > { %v1236_v29 = vadd.f32 %v14550_v15, %v11928_v20 }
 0x61c   : > { %3393 = vadd.xlane.f32.xlu0 %v3381_v48  ;;  %v14551_v48 = vld [vmem:[#allocation25_spill] sm:$0xff] }
 0x61d   : > { %v1230_v45 = vadd.f32 %v14551_v48, %v11928_v20  ;;  %v12139_v48 = vpop.xlane.xlu1 %3385 }
 0x664   : > { %v3267_v18 = vpop.xlane.xlu0 %3266 }
 0x665   : > { %v11977_v44 = vmax.f32 %v3267_v18, %v11974_v13 }
 0x667   : > { %14539 = vst [vmem:[#allocation13_spill] sm:$0xff] %v11977_v44  ;;  %v3269_v16 = vsub.f32 %v3260_v57, %v11977_v44  ;;  %v1254_v57 = vadd.f32 %v14544_v49, %v11928_v20 }
 0x669   : > { %v3270_v23 = vmul.f32 1.442695, %v3269_v16 }
 0x66b   : > { %10062 = vpow2.f32 %v3270_v23  ;;  %v3384_v23 = vmul.f32 %v11940_v14, %v12018_v34 }
 0x66c   : > { %v3143_v38 = vpop.permute.xlu0 %3142 }
 0x66d   : > { %v3145_v0 = vmul.f32 %v3143_v38, %v3135_v63 }
 0x66f   : > { %v3146_v7 = vadd.f32 %v3145_v0, %v2962_v19 }
 0x671   : > { %3147 = vst [vmem:[#allocation2 + $0x100] sm:$0xff] %v3146_v7  ;;  %9479 = vmatpush3.msra.mxu1 %v3146_v7 }
 0x672   : > { %9483 = vmatprep.subr.mxu1 %v11982_v2 }
 0x678   : > { %v10063_v41 = vpop.eup %10062 }
 0x679   : > { %v11988_v30 = vmul.f32 %v10063_v41, %v3272_v54 }
 0x67b   : > { %14541 = vst [vmem:[#allocation14_spill] sm:$0xff] %v11988_v30  ;;  %9481 = vmatmul.mubr.msk.f32.vlgmr.msra.gmra.mxu1 %vm1829_vm1, %v11988_v30 }
 0x67c   : > { %9484 = vmatpush3.xpose.msra.mxu1 %v11982_v2  ;;  %9485 = vmatprep.mubr.f32.mxu1 %v11944_v60 }
 0x67d   : > { %9511 = vmatprep.subr.mxu1 %v1266_v35 }
 0x67f   : > { %9486 = vmatmul.mubr.f32.vlgmr.msra.gmra.mxu1 %v11952_v31 }
 0x680   : > { %9512 = vmatpush3.xpose.msra.mxu1 %v1266_v35  ;;  %9488 = vmatprep.mubr.f32.mxu1 %v11958_v26 }
 0x681   : > { %9513 = vmatprep.subr.mxu1 %v1260_v10 }
 0x683   : > { %9489 = vmatmul.mubr.f32.gmra.mxu1 %v11964_v47 }
 0x684   : > { %9514 = vmatpush3.xpose.msra.mxu1 %v1260_v10  ;;  %9491 = vmatprep.mubr.f32.mxu1 %v11970_v42 }
 0x685   : > { %9515 = vmatprep.subr.mxu1 %v1254_v57 }
 0x687   : > { %9492 = vmatmul.mubr.f32.gmra.mxu1 %v12006_v22 }
 0x688   : > { %9516 = vmatpush3.xpose.msra.mxu1 %v1254_v57  ;;  %9494 = vmatprep.mubr.f32.mxu1 %v12010_v5 }
 0x689   : > { %9517 = vmatprep.subr.mxu1 %v1248_v37 }
 0x68b   : > { %9495 = vmatmul.mubr.f32.gmra.mxu1 %v12018_v34 }
 0x68c   : > { %9518 = vmatpush3.xpose.msra.mxu1 %v1248_v37  ;;  %9527 = vmatprep.mubr.f32.mxu1 %v11944_v60  ;;  %v14552_v60 = vld [vmem:[#allocation21_spill] sm:$0xff] }
 0x68d   : > { %9519 = vmatprep.subr.mxu1 %v1242_v28 }
 0x690   : > { %9520 = vmatpush3.xpose.msra.mxu1 %v1242_v28 }
 0x691   : > { %9521 = vmatprep.subr.mxu1 %v1236_v29 }
 0x694   : > { %9522 = vmatpush3.xpose.msra.mxu1 %v1236_v29 }
 0x695   : > { %9523 = vmatprep.subr.mxu1 %v1230_v45 }
 0x698   : > { %9524 = vmatpush3.xpose.msra.mxu1 %v1230_v45 }
 0x699   : > { %9525 = vmatprep.subr.mxu1 %v11932_v36 }
 0x69c   : > { %9526 = vmatpush3.xpose.msra.mxu1 %v11932_v36 }
 0x69d   : > { %9577 = vmatprep.subr.mxu1 %v14484_v43 }
 0x69f   : > { %9528 = vmatmul.mubr.f32.vlgmr.msra.gmra.mxu1 %v11952_v31  ;;  %v12050_v31 = vadd.f32 %v14552_v60, %v11936_v59 }
 0x6a0   : > { %9530 = vmatprep.mubr.f32.mxu1 %v11958_v26  ;;  %9578 = vmatpush3.xpose.msra.mxu1 %v1266_v35  ;;  %v14553_v26 = vld [vmem:[#allocation79_spill] sm:$0xff] }
 0x6a1   : > { %9579 = vmatprep.subr.mxu1 %v14484_v43 }
 0x6a3   : > { %9531 = vmatmul.mubr.f32.gmra.mxu1 %v11964_v47  ;;  %v10465_v47 = vld [vmem:[#allocation2 + $0x110] sm:$0xff] }
 0x6a4   : > { %9533 = vmatprep.mubr.f32.mxu1 %v11970_v42  ;;  %9580 = vmatpush3.xpose.msra.mxu1 %v1260_v10  ;;  %v14554_v42 = vld [vmem:[#allocation78_spill] sm:$0xff] }
 0x6a5   : > { %9581 = vmatprep.subr.mxu1 %v14484_v43 }
 0x6a7   : > { %9534 = vmatmul.mubr.f32.gmra.mxu1 %v12006_v22 }
 0x6a8   : > { %9536 = vmatprep.mubr.f32.mxu1 %v12010_v5  ;;  %9582 = vmatpush3.xpose.msra.mxu1 %v1254_v57 }
 0x6a9   : > { %9583 = vmatprep.subr.mxu1 %v14484_v43 }
 0x6ab   : > { %9537 = vmatmul.mubr.f32.gmra.mxu1 %v12018_v34 }
 0x6ac   : > { %9584 = vmatpush3.xpose.msra.mxu1 %v1248_v37  ;;  %9593 = vmatprep.mubr.msk.f32.mxu1 %vm10543_vm0, %v14484_v43  ;;  %v4415_v37 = vmul.f32 %v11940_v14, %v12050_v31 }
 0x6ad   : > { %9585 = vmatprep.subr.mxu1 %v14484_v43 }
 0x6b0   : > { %9586 = vmatpush3.xpose.msra.mxu1 %v1242_v28  ;;  %v12133_v28 = vpop.xlane.xlu0 %3387 }
 0x6b1   : > { %9587 = vmatprep.subr.mxu1 %v14484_v43 }
 0x6b4   : > { %9588 = vmatpush3.xpose.msra.mxu1 %v1236_v29  ;;  %v12135_v15 = vpop.xlane.xlu0 %3389 }
 0x6b5   : > { %9589 = vmatprep.subr.mxu1 %v14484_v43 }
 0x6b8   : > { %9590 = vmatpush3.xpose.msra.mxu1 %v1230_v45  ;;  %v12137_v29 = vpop.xlane.xlu0 %3391 }
 0x6b9   : > { %9591 = vmatprep.subr.mxu1 %v14484_v43 }
 0x6bc   : > { %9592 = vmatpush3.xpose.msra.mxu1 %v11932_v36  ;;  %v12141_v45 = vpop.xlane.xlu0 %3393 }
 0x6bd   : > { %9639 = vmatprep.subr.mxu1 %v14553_v26 }
 0x6bf   : > { %9594 = vmatmul.mubr.f32.vlgmr.msra.gmra.mxu1 %v12050_v31 }
 0x6c0   : > { %9640 = vmatpush3.msra.mxu1 %v10465_v47 }
 0x6c1   : > { %9681 = vmatprep.subr.mxu1 %v14554_v42 }
 0x73b   : > { %v12055_v33 = vpop.f32.mrf.mxu1 }
 0x73c   : > { %14555 = vst [vmem:[#allocation15_spill] sm:$0xff] %v12055_v33 }
 0x73d   : > { %v9482_v27 = vpop.f32.mrf.mxu1 }
 0x73f   : > { %v12057_v4 = vpop.f32.mrf.mxu1 }
 0x740   : > { %v3510_v32 = vsel %vm1829_vm1, %v12057_v4, -inf }
 0x741   : > { %3511 = vmax.xlane.f32.xlu1 %v3510_v32  ;;  %v12061_v8 = vpop.f32.mrf.mxu1 }
 0x742   : > { %v3507_v21 = vsel %vm1829_vm1, %v12061_v8, -inf }
 0x743   : > { %3508 = vmax.xlane.f32.xlu0 %v3507_v21  ;;  %v12065_v18 = vpop.f32.mrf.mxu1 }
 0x744   : > { %v3516_v24 = vsel %vm1829_vm1, %v12065_v18, -inf }
 0x745   : > { %3517 = vmax.xlane.f32.xlu1 %v3516_v24  ;;  %v12069_v12 = vpop.f32.mrf.mxu1 }
 0x746   : > { %v3513_v6 = vsel %vm1829_vm1, %v12069_v12, -inf }
 0x747   : > { %3395 = vadd.xlane.f32.xlu0 %v3382_v61  ;;  %v12073_v51 = vpop.f32.mrf.mxu1 }
 0x748   : > { %v3522_v62 = vsel %vm1829_vm1, %v12073_v51, -inf }
 0x749   : > { %3514 = vmax.xlane.f32.xlu1 %v3513_v6  ;;  %v12077_v16 = vpop.f32.mrf.mxu1 }
 0x74a   : > { %v3519_v50 = vsel %vm1829_vm1, %v12077_v16, -inf }
 0x74b   : > { %3397 = vadd.xlane.f32.xlu0 %v3383_v46  ;;  %v12083_v25 = vpop.f32.mrf.mxu1 }
 0x74c   : > { %v3528_v19 = vsel %vm1829_vm1, %v12083_v25, -inf }
 0x74d   : > { %3523 = vmax.xlane.f32.xlu1 %v3522_v62  ;;  %v12089_v63 = vpop.f32.mrf.mxu1 }
 0x74e   : > { %v3525_v38 = vsel %vm1829_vm1, %v12089_v63, -inf }
 0x74f   : > { %3399 = vadd.xlane.f32.xlu0 %v3384_v23 }
 0x751   : > { %3520 = vmax.xlane.f32.xlu1 %v3519_v50 }
 0x755   : > { %3526 = vmax.xlane.f32.xlu1 %v3525_v38 }
 0x759   : > { %3529 = vmax.xlane.f32.xlu1 %v3528_v19 }
 0x75f   : > { %v12095_v0 = vpop.f32.mrf.mxu1 }
 0x760   : > { %v4009_v7 = vsel %vm2329_vm2, %v12095_v0, -inf }
 0x761   : > { %v12099_v56 = vpop.f32.mrf.mxu1  ;;  %4010 = vmax.xlane.f32.xlu1 %v4009_v7 }
 0x762   : > { %v4006_v54 = vsel %vm2329_vm2, %v12099_v56, -inf }
 0x763   : > { %4007 = vmax.xlane.f32.xlu0 %v4006_v54  ;;  %v12103_v41 = vpop.f32.mrf.mxu1 }
 0x764   : > { %v4015_v55 = vsel %vm2329_vm2, %v12103_v41, -inf }
 0x765   : > { %v12107_v35 = vpop.f32.mrf.mxu1  ;;  %4016 = vmax.xlane.f32.xlu1 %v4015_v55 }
 0x766   : > { %v4012_v1 = vsel %vm2329_vm2, %v12107_v35, -inf }
 0x767   : > { %4013 = vmax.xlane.f32.xlu0 %v4012_v1  ;;  %v12111_v10 = vpop.f32.mrf.mxu1 }
 0x768   : > { %v4021_v49 = vsel %vm2329_vm2, %v12111_v10, -inf }
 0x769   : > { %v12115_v57 = vpop.f32.mrf.mxu1  ;;  %4022 = vmax.xlane.f32.xlu1 %v4021_v49 }
 0x76a   : > { %v4018_v58 = vsel %vm2329_vm2, %v12115_v57, -inf }
 0x76b   : > { %4019 = vmax.xlane.f32.xlu0 %v4018_v58  ;;  %v12119_v22 = vpop.f32.mrf.mxu1 }
 0x76c   : > { %v4027_v40 = vsel %vm2329_vm2, %v12119_v22, -inf }
 0x76d   : > { %v12123_v5 = vpop.f32.mrf.mxu1  ;;  %4028 = vmax.xlane.f32.xlu1 %v4027_v40 }
 0x76e   : > { %v4024_v17 = vsel %vm2329_vm2, %v12123_v5, -inf }
 0x76f   : > { %4025 = vmax.xlane.f32.xlu0 %v4024_v17 }
 0x773   : > { %4416 = vadd.xlane.f32.xlu0 %v4415_v37 }
 0x77f   : > { %v12129_v11 = vpop.f32.mrf.mxu1 }
 0x780   : > { %v4709_v34 = vsel %vm2329_vm2, %v12129_v11, -inf }
 0x781   : > { %v9595_v9 = vpop.f32.mrf.mxu1  ;;  %4710 = vmax.xlane.f32.xlu1 %v4709_v34 }
 0x782   : > { %v3563_v9 = vld [vmem:[%s14388_s5] sm:$0xff] }
 0x7ca   : > { %v3512_v60 = vpop.xlane.xlu1 %3511 }
 0x7cb   : > { %v3532_v14 = vmax.f32 %v3512_v60, %v12133_v28 }
 0x7cc   : > { %v3509_v26 = vpop.xlane.xlu0 %3508 }
 0x7cd   : > { %v3540_v47 = vsub.f32 %v12057_v4, %v3532_v14  ;;  %v12146_v27 = vmax.f32 %v3509_v26, %v12139_v48  ;;  %v3580_v26 = vsub.f32 %v12133_v28, %v3532_v14 }
 0x7ce   : > { %v3518_v32 = vpop.xlane.xlu1 %3517 }
 0x7cf   : > { %v3549_v21 = vmul.f32 1.442695, %v3540_v47  ;;  %v3539_v24 = vsub.f32 %v12061_v8, %v12146_v27  ;;  %v12151_v61 = vmax.f32 %v3518_v32, %v12137_v29 }
 0x7d0   : > { %v12160_v38 = vpop.xlane.xlu0 %3395 }
 0x7d1   : > { %10064 = vpow2.f32 %v3549_v21  ;;  %v3547_v6 = vmul.f32 1.442695, %v3539_v24  ;;  %v3542_v46 = vsub.f32 %v12065_v18, %v12151_v61 }
 0x7d2   : > { %v3515_v62 = vpop.xlane.xlu1 %3514 }
 0x7d3   : > { %10066 = vpow2.f32 %v3547_v6  ;;  %v12156_v4 = vmax.f32 %v3515_v62, %v12135_v15  ;;  %v3553_v23 = vmul.f32 1.442695, %v3542_v46  ;;  %v3566_v46 = vld [vmem:[%s14388_s5 + $0x18] sm:$0xff] }
 0x7d4   : > { %v12167_v1 = vpop.xlane.xlu0 %3397 }
 0x7d5   : > { %v3541_v50 = vsub.f32 %v12069_v12, %v12156_v4  ;;  %10068 = vpow2.f32 %v3553_v23  ;;  %v3564_v12 = vld [vmem:[%s14388_s5 + $0x8] sm:$0xff] }
 0x7d6   : > { %v3524_v8 = vpop.xlane.xlu1 %3523 }
 0x7d7   : > { %v3551_v19 = vmul.f32 1.442695, %v3541_v50  ;;  %v3536_v7 = vmax.f32 %v3524_v8, %v12160_v38  ;;  %v3565_v8 = vld [vmem:[%s14388_s5 + $0x10] sm:$0xff] }
 0x7d8   : > { %v12182_v21 = vpop.xlane.xlu0 %3399 }
 0x7d9   : > { %10070 = vpow2.f32 %v3551_v19  ;;  %v3544_v54 = vsub.f32 %v12073_v51, %v3536_v7 }
 0x7da   : > { %v3521_v18 = vpop.xlane.xlu1 %3520 }
 0x7db   : > { %v12165_v55 = vmax.f32 %v3521_v18, %v12141_v45  ;;  %v3557_v49 = vmul.f32 1.442695, %v3544_v54 }
 0x7dd   : > { %v3543_v58 = vsub.f32 %v12077_v16, %v12165_v55  ;;  %10072 = vpow2.f32 %v3557_v49 }
 0x7de   : > { %v10065_v40 = vpop.eup %10064  ;;  %v3527_v17 = vpop.xlane.xlu1 %3526 }
 0x7df   : > { %v3555_v37 = vmul.f32 1.442695, %v3543_v58  ;;  %v3537_v34 = vmax.f32 %v3527_v17, %v12167_v1  ;;  %v3572_v51 = vmul.f32 %v10065_v40, %v3564_v12  ;;  %v14556_v12 = vld [vmem:[#allocation35_spill] sm:$0xff]  ;;  %v4156_v58 = vld [vmem:[#allocation2 + $0xc8] sm:$0xff] }
 0x7e0   : > { %v10067_v60 = vpop.eup %10066 }
 0x7e1   : > { %10074 = vpow2.f32 %v3555_v37  ;;  %v3545_v47 = vsub.f32 %v12089_v63, %v3537_v34  ;;  %v3585_v32 = vsub.f32 %v12167_v1, %v3537_v34  ;;  %v3622_v16 = vsel %vm1829_vm1, %v3572_v51, 0.0  ;;  %v4155_v34 = vld [vmem:[#allocation2 + $0xa8] sm:$0xff] }
 0x7e2   : > { %v3530_v24 = vpop.xlane.xlu1 %3529  ;;  %3623 = vadd.xlane.f32.xlu0 %v3622_v16  ;;  %v3571_v6 = vmul.f32 %v10067_v60, %v3563_v9  ;;  %v10069_v62 = vpop.eup %10068  ;;  %v3589_v63 = vmul.f32 1.442695, %v3580_v26  ;;  %v3584_v37 = vsub.f32 %v12160_v38, %v3536_v7  ;;  %v4154_v9 = vld [vmem:[#allocation2 + $0x88] sm:$0xff] }
 0x7e3   : > { %v3559_v23 = vmul.f32 1.442695, %v3545_v47  ;;  %v3599_v14 = vmul.f32 1.442695, %v3585_v32  ;;  %v12188_v50 = vmax.f32 %v3530_v24, %v12182_v21  ;;  %v3574_v18 = vmul.f32 %v10069_v62, %v3566_v46  ;;  %v4153_v7 = vld [vmem:[#allocation2 + $0x68] sm:$0xff]  ;;  %v3567_v62 = vld [vmem:[%s14388_s5 + $0x20] sm:$0xff] }
 0x7e4   : > { %9499 = vmatprep.mubr.msk.f32.mxu0 %vm1829_vm1, %v3571_v6  ;;  %v3619_v54 = vsel %vm1829_vm1, %v3571_v6, 0.0  ;;  %v3597_v26 = vmul.f32 1.442695, %v3584_v37 }
 0x7e5   : > { %10076 = vpow2.f32 %v3559_v23  ;;  %v3546_v19 = vsub.f32 %v12083_v25, %v12188_v50  ;;  %9500 = vmatmul.mubr.msk.f32.vlgmr.msra.gmra.mxu0 %vm1829_vm1, %v3572_v51  ;;  %v3628_v25 = vsel %vm1829_vm1, %v3574_v18, 0.0 }
 0x7e6   : > { %v10071_v49 = vpop.eup %10070  ;;  %10078 = vpow2.f32 %v3599_v14  ;;  %9540 = vmatpush3.msra.mxu0 %v14556_v12  ;;  %3620 = vadd.xlane.f32.xlu0 %v3619_v54 }
 0x7e7   : > { %v3561_v40 = vmul.f32 1.442695, %v3546_v19  ;;  %9541 = vmatprep.subr.mxu0 %v4156_v58  ;;  %v3573_v17 = vmul.f32 %v10071_v49, %v3565_v8  ;;  %10080 = vpow2.f32 %v3589_v63  ;;  %v4152_v63 = vld [vmem:[#allocation2 + $0x48] sm:$0xff] }
 0x7e8   : > { %9542 = vmatpush3.msra.mxu0 %v4156_v58 }
 0x7e9   : > { %10082 = vpow2.f32 %v3561_v40  ;;  %9543 = vmatprep.subr.mxu0 %v4155_v34  ;;  %9502 = vmatprep.mubr.msk.f32.mxu0 %vm1829_vm1, %v3573_v17  ;;  %v3625_v46 = vsel %vm1829_vm1, %v3573_v17, 0.0 }
 0x7ea   : > { %9544 = vmatpush3.msra.mxu0 %v4155_v34  ;;  %v4011_v51 = vpop.xlane.xlu1 %4010  ;;  %3629 = vadd.xlane.f32.xlu0 %v3628_v25  ;;  %v10073_v32 = vpop.eup %10072  ;;  %10084 = vpow2.f32 %v3597_v26 }
 0x7eb   : > { %v4031_v60 = vmax.f32 %v4011_v51, %v12133_v28  ;;  %9545 = vmatprep.subr.mxu0 %v4154_v9  ;;  %9503 = vmatmul.mubr.msk.f32.gmra.mxu0 %vm1829_vm1, %v3574_v18  ;;  %v4151_v18 = vld [vmem:[#allocation2 + $0x28] sm:$0xff] }
 0x7ec   : > { %9546 = vmatpush3.msra.mxu0 %v4154_v9  ;;  %v4008_v47 = vpop.xlane.xlu0 %4007  ;;  %v4150_v51 = vld [vmem:[#allocation2 + $0x8] sm:$0xff] }
 0x7ed   : > { %v4039_v16 = vsub.f32 %v12095_v0, %v4031_v60  ;;  %v4079_v24 = vsub.f32 %v12133_v28, %v4031_v60  ;;  %9547 = vmatprep.subr.mxu0 %v4153_v7  ;;  %v12207_v6 = vmax.f32 %v4008_v47, %v12139_v48  ;;  %v3568_v0 = vld [vmem:[%s14388_s5 + $0x28] sm:$0xff] }
 0x7ee   : > { %v10075_v23 = vpop.eup %10074  ;;  %9548 = vmatpush3.msra.mxu0 %v4153_v7  ;;  %v4017_v14 = vpop.xlane.xlu1 %4016  ;;  %3626 = vadd.xlane.f32.xlu0 %v3625_v46  ;;  %v12226_v17 = vmul.f32 %v10073_v32, %v3568_v0  ;;  %v3604_v46 = vld [vmem:[%s14395_s12 + $0x8] sm:$0xff] }
 0x7ef   : > { %v4048_v28 = vmul.f32 1.442695, %v4039_v16  ;;  %v4088_v8 = vmul.f32 1.442695, %v4079_v24  ;;  %v4038_v19 = vsub.f32 %v12099_v56, %v12207_v6  ;;  %9549 = vmatprep.subr.mxu0 %v4152_v63  ;;  %v12219_v54 = vmax.f32 %v4017_v14, %v12137_v29  ;;  %v3609_v56 = vld [vmem:[%s14395_s12 + $0x30] sm:$0xff] }
 0x7f0   : > { %9550 = vmatpush3.msra.mxu0 %v4152_v63  ;;  %v4014_v49 = vpop.xlane.xlu0 %4013  ;;  %v12221_v12 = vmul.f32 %v10075_v23, %v3567_v62  ;;  %v3570_v62 = vld [vmem:[%s14388_s5 + $0x38] sm:$0xff] }
 0x7f1   : > { %10086 = vpow2.f32 %v4048_v28  ;;  %v4046_v58 = vmul.f32 1.442695, %v4038_v19  ;;  %9551 = vmatprep.subr.mxu0 %v4151_v18  ;;  %v12224_v40 = vmax.f32 %v4014_v49, %v12135_v15  ;;  %v4041_v34 = vsub.f32 %v12103_v41, %v12219_v54  ;;  %v3569_v41 = vld [vmem:[%s14388_s5 + $0x30] sm:$0xff] }
 0x7f2   : > { %v10077_v37 = vpop.eup %10076  ;;  %10088 = vpow2.f32 %v4088_v8  ;;  %9552 = vmatpush3.msra.mxu0 %v4151_v18  ;;  %v4023_v25 = vpop.xlane.xlu1 %4022  ;;  %9505 = vmatprep.mubr.msk.f32.mxu0 %vm1829_vm1, %v12221_v12 }
 0x7f3   : > { %v10079_v9 = vpop.eup %10078  ;;  %10090 = vpow2.f32 %v4046_v58  ;;  %v4040_v60 = vsub.f32 %v12107_v35, %v12224_v40  ;;  %v12238_v26 = vmax.f32 %v4023_v25, %v12160_v38  ;;  %9553 = vmatprep.subr.mxu0 %v4150_v51  ;;  %9506 = vmatmul.mubr.msk.f32.gmra.mxu0 %vm1829_vm1, %v12226_v17  ;;  %v4052_v7 = vmul.f32 1.442695, %v4041_v34 }
 0x7f4   : > { %9554 = vmatpush3.msra.mxu0 %v4150_v51  ;;  %v4020_v47 = vpop.xlane.xlu0 %4019  ;;  %v12245_v32 = vmul.f32 %v10079_v9, %v3609_v56  ;;  %v10081_v16 = vpop.eup %10080  ;;  %v12260_v0 = vmul.f32 %v10077_v37, %v3569_v41 }
 0x7f5   : > { %v4050_v24 = vmul.f32 1.442695, %v4040_v60  ;;  %v4043_v35 = vsub.f32 %v12111_v10, %v12238_v26  ;;  %9567 = vmatprep.subr.mxu0 %v14484_v43  ;;  %v12257_v14 = vmax.f32 %v4020_v47, %v12141_v45  ;;  %10092 = vpow2.f32 %v4052_v7  ;;  %v4062_v60 = vld [vmem:[#allocation8] sm:$0xff]  ;;  %v4063_v7 = vld [vmem:[#allocation8 + $0x8] sm:$0xff] }
 0x7f6   : > { %v10083_v23 = vpop.eup %10082  ;;  %v4029_v63 = vpop.xlane.xlu1 %4028  ;;  %3684 = vperm.xlu1 %9947, %v12245_v32   ;;  %9508 = vmatprep.mubr.msk.f32.mxu0 %vm1829_vm1, %v12260_v0  ;;  %v12269_v18 = vmul.f32 %v10081_v16, %v3604_v46  ;;  %v3608_v47 = vld [vmem:[%s14395_s12 + $0x28] sm:$0xff] }
 0x7f7   : > { %v4056_v10 = vmul.f32 1.442695, %v4043_v35  ;;  %v12263_v28 = vmax.f32 %v4029_v63, %v12182_v21  ;;  %10094 = vpow2.f32 %v4050_v24  ;;  %v4042_v8 = vsub.f32 %v12115_v57, %v12257_v14  ;;  %v10085_v25 = vpop.eup %10084  ;;  %v4065_v63 = vld [vmem:[#allocation8 + $0x18] sm:$0xff] }
 0x7f8   : > { %v4026_v19 = vpop.xlane.xlu0 %4025  ;;  %v12271_v49 = vmul.f32 %v10083_v23, %v3570_v62  ;;  %v12292_v46 = vmul.f32 %v10085_v25, %v3608_v47  ;;  %v4064_v62 = vld [vmem:[#allocation8 + $0x10] sm:$0xff] }
 0x7f9   : > { %v4045_v58 = vsub.f32 %v12119_v22, %v12263_v28  ;;  %v12276_v56 = vmax.f32 %v4026_v19, %v12167_v1  ;;  %v4054_v37 = vmul.f32 1.442695, %v4042_v8  ;;  %10096 = vpow2.f32 %v4056_v10  ;;  %v4103_v22 = vld [vmem:[%s14396_s13 + $0x8] sm:$0xff] }
 0x7fa   : > { %3659 = vperm.xlu1 %9947, %v12269_v18   ;;  %9509 = vmatmul.mubr.msk.f32.gmra.mxu0 %vm1829_vm1, %v12271_v49 }
 0x7fb   : > { %v4060_v57 = vmul.f32 1.442695, %v4045_v58  ;;  %v4044_v34 = vsub.f32 %v12123_v5, %v12276_v56  ;;  %10098 = vpow2.f32 %v4054_v37  ;;  %v4066_v58 = vld [vmem:[#allocation8 + $0x20] sm:$0xff] }
 0x7fd   : > { %v4058_v51 = vmul.f32 1.442695, %v4044_v34  ;;  %10100 = vpow2.f32 %v4060_v57  ;;  %v4067_v57 = vld [vmem:[#allocation8 + $0x28] sm:$0xff] }
 0x7fe   : > { %v10087_v9 = vpop.eup %10086 }
 0x7ff   : > { %v10089_v41 = vpop.eup %10088  ;;  %10102 = vpow2.f32 %v4058_v51  ;;  %v4071_v35 = vmul.f32 %v10087_v9, %v4063_v7 }
 0x800   : > { %v10091_v16 = vpop.eup %10090  ;;  %v12289_v24 = vmul.f32 %v10089_v41, %v4103_v22  ;;  %v4068_v22 = vld [vmem:[#allocation8 + $0x30] sm:$0xff] }
 0x801   : > { %v4070_v5 = vmul.f32 %v10091_v16, %v4062_v60  ;;  %v4069_v60 = vld [vmem:[#allocation8 + $0x38] sm:$0xff]  ;;  %v4550_v16 = vld [vmem:[#allocation2 + $0x108] sm:$0xff] }
 0x802   : > { %4165 = vperm.xlu1 %9947, %v12289_v24   ;;  %v10093_v23 = vpop.eup %10092 }
 0x803   : > { %9555 = vmatprep.mubr.msk.f32.mxu0 %vm2329_vm2, %v4070_v5  ;;  %v4073_v19 = vmul.f32 %v10093_v23, %v4065_v63  ;;  %v3634_v23 = vsel %vm1829_vm1, %v12226_v17, 0.0  ;;  %v3607_v17 = vld [vmem:[%s14395_s12 + $0x20] sm:$0xff] }
 0x804   : > { %9556 = vmatmul.mubr.msk.f32.vlgmr.msra.gmra.mxu0 %vm2329_vm2, %v4071_v35  ;;  %3679 = vperm.xlu0 %9946, %v12292_v46   ;;  %v10095_v10 = vpop.eup %10094 }
 0x805   : > { %9568 = vmatpush3.xpose.msra.mxu0 %v11982_v2  ;;  %v4072_v8 = vmul.f32 %v10095_v10, %v4064_v62  ;;  %v3583_v62 = vsub.f32 %v12141_v45, %v12165_v55  ;;  %v4080_v10 = vsub.f32 %v12135_v15, %v12224_v40 }
 0x806   : > { %9572 = vmatprep.subr.mxu0 %v14484_v43  ;;  %v10097_v37 = vpop.eup %10096 }
 0x807   : > { %9558 = vmatprep.mubr.msk.f32.mxu0 %vm2329_vm2, %v4072_v8  ;;  %v4075_v51 = vmul.f32 %v10097_v37, %v4067_v57  ;;  %v3595_v63 = vmul.f32 1.442695, %v3583_v62  ;;  %v4090_v37 = vmul.f32 1.442695, %v4080_v10  ;;  %v4118_v57 = vsel %vm2329_vm2, %v4070_v5, 0.0 }
 0x808   : > { %v10099_v34 = vpop.eup %10098  ;;  %9559 = vmatmul.mubr.msk.f32.gmra.mxu0 %vm2329_vm2, %v4073_v19 }
 0x809   : > { %v4074_v25 = vmul.f32 %v10099_v34, %v4066_v58  ;;  %v4121_v58 = vsel %vm2329_vm2, %v4071_v35, 0.0  ;;  %10104 = vpow2.f32 %v3595_v63  ;;  %v4127_v34 = vsel %vm2329_vm2, %v4073_v19, 0.0  ;;  %v4104_v35 = vld [vmem:[%s14396_s13 + $0x10] sm:$0xff] }
 0x80a   : > { %v10101_v9 = vpop.eup %10100  ;;  %10106 = vpow2.f32 %v4090_v37  ;;  %v3586_v19 = vsub.f32 %v12182_v21, %v12188_v50  ;;  %v3610_v50 = vld [vmem:[%s14395_s12 + $0x38] sm:$0xff]  ;;  %v3637_v37 = vsel %vm1829_vm1, %v12260_v0, 0.0  ;;  %v3579_v0 = vsub.f32 %v12139_v48, %v12146_v27 }
 0x80b   : > { %9561 = vmatprep.mubr.msk.f32.mxu0 %vm2329_vm2, %v4074_v25  ;;  %v12305_v47 = vmul.f32 %v10101_v9, %v4069_v60  ;;  %v3631_v9 = vsel %vm1829_vm1, %v12221_v12, 0.0  ;;  %v4130_v12 = vsel %vm2329_vm2, %v4074_v25, 0.0  ;;  %v3582_v25 = vsub.f32 %v12137_v29, %v12151_v61 }
 0x80c   : > { %v10103_v41 = vpop.eup %10102  ;;  %9562 = vmatmul.mubr.msk.f32.gmra.mxu0 %vm2329_vm2, %v4075_v51  ;;  %v3601_v60 = vmul.f32 1.442695, %v3586_v19 }
 0x80d   : > { %v12303_v7 = vmul.f32 %v10103_v41, %v4068_v22  ;;  %v4085_v41 = vsub.f32 %v12182_v21, %v12263_v28  ;;  %v4109_v28 = vld [vmem:[%s14396_s13 + $0x38] sm:$0xff] }
 0x80e   : > { %10108 = vpow2.f32 %v3601_v60 }
 0x80f   : > { %9564 = vmatprep.mubr.msk.f32.mxu0 %vm2329_vm2, %v12303_v7  ;;  %v4100_v62 = vmul.f32 1.442695, %v4085_v41 }
 0x810   : > { %9565 = vmatmul.mubr.msk.f32.gmra.mxu0 %vm2329_vm2, %v12305_v47 }
 0x811   : > { %9569 = vmatprep.mubr.msk.f32.mxu0 %vm10543_vm0, %v14484_v43  ;;  %10110 = vpow2.f32 %v4100_v62 }
 0x814   : > { %9570 = vmatmul.mubr.f32.vlgmr.msra.gmra.mxu0 %v12050_v31 }
 0x815   : > { %9573 = vmatpush3.msra.mxu0 %v4550_v16  ;;  %9574 = vmatprep.mubr.msk.f32.mxu0 %vm10543_vm0, %v14484_v43  ;;  %v4124_v16 = vsel %vm2329_vm2, %v4072_v8, 0.0 }
 0x816   : > { %9596 = vmatprep.subr.mxu0 %v14484_v43  ;;  %v10105_v55 = vpop.eup %10104 }
 0x817   : > { %v12329_v22 = vmul.f32 %v10105_v55, %v3607_v17  ;;  %v10107_v40 = vpop.eup %10106 }
 0x818   : > { %v12335_v5 = vmul.f32 %v10107_v40, %v4104_v35  ;;  %v4083_v35 = vsub.f32 %v12160_v38, %v12238_v26  ;;  %v4084_v38 = vsub.f32 %v12167_v1, %v12276_v56  ;;  %v3606_v26 = vld [vmem:[%s14395_s12 + $0x18] sm:$0xff]  ;;  %v3605_v1 = vld [vmem:[%s14395_s12 + $0x10] sm:$0xff] }
 0x81a   : > { %v4096_v19 = vmul.f32 1.442695, %v4083_v35 }
 0x81b   : > { %v10109_v63 = vpop.eup %10108 }
 0x81c   : > { %v12350_v10 = vmul.f32 %v10109_v63, %v3610_v50 }
 0x81e   : > { %v10111_v21 = vpop.eup %10110 }
 0x81f   : > { %v12356_v8 = vmul.f32 %v10111_v21, %v4109_v28 }
 0x823   : > { %3635 = vadd.xlane.f32.xlu0 %v3634_v23  ;;  %v4133_v23 = vsel %vm2329_vm2, %v4075_v51, 0.0  ;;  %v3640_v51 = vsel %vm1829_vm1, %v12271_v49, 0.0  ;;  %v4081_v49 = vsub.f32 %v12137_v29, %v12219_v54  ;;  %v4078_v29 = vsub.f32 %v12139_v48, %v12207_v6 }
 0x824   : > { %v4139_v54 = vsel %vm2329_vm2, %v12305_v47, 0.0  ;;  %v4098_v6 = vmul.f32 1.442695, %v4084_v38  ;;  %v4108_v38 = vld [vmem:[%s14396_s13 + $0x30] sm:$0xff] }
 0x825   : > { %v4092_v61 = vmul.f32 1.442695, %v4081_v49 }
 0x826   : > { %4122 = vadd.xlane.f32.xlu1 %v4121_v58  ;;  %v12363_v58 = vpop.xlane.xlu0 %4416 }
 0x82a   : > { %4119 = vadd.xlane.f32.xlu1 %v4118_v57  ;;  %v3593_v57 = vmul.f32 1.442695, %v3582_v25 }
 0x82c   : > { %10112 = vpow2.f32 %v3593_v57  ;;  %v4107_v57 = vld [vmem:[%s14396_s13 + $0x28] sm:$0xff] }
 0x82e   : > { %4128 = vadd.xlane.f32.xlu1 %v4127_v34  ;;  %v3581_v34 = vsub.f32 %v12135_v15, %v12156_v4  ;;  %v4082_v15 = vsub.f32 %v12141_v45, %v12257_v14  ;;  %v4086_v45 = vmul.f32 1.442695, %v4078_v29  ;;  %v4136_v14 = vsel %vm2329_vm2, %v12303_v7, 0.0  ;;  %v4105_v7 = vld [vmem:[%s14396_s13 + $0x18] sm:$0xff] }
 0x830   : > { %v3591_v17 = vmul.f32 1.442695, %v3581_v34  ;;  %v4094_v60 = vmul.f32 1.442695, %v4082_v15 }
 0x832   : > { %10114 = vpow2.f32 %v3591_v17 }
 0x833   : > { %10116 = vpow2.f32 %v4092_v61 }
 0x834   : > { %10118 = vpow2.f32 %v4096_v19  ;;  %v4106_v19 = vld [vmem:[%s14396_s13 + $0x20] sm:$0xff] }
 0x839   : > { %3674 = vperm.xlu0 %9946, %v12329_v22   ;;  %v10113_v27 = vpop.eup %10112 }
 0x83a   : > { %v3614_v47 = vmul.f32 %v10113_v27, %v3606_v26 }
 0x83f   : > { %4170 = vperm.xlu1 %9947, %v12335_v5   ;;  %v10115_v41 = vpop.eup %10114 }
 0x840   : > { %v3613_v62 = vmul.f32 %v10115_v41, %v3605_v1 }
 0x858   : > { %3632 = vadd.xlane.f32.xlu0 %v3631_v9  ;;  %v3587_v9 = vmul.f32 1.442695, %v3579_v0 }
 0x85a   : > { %10120 = vpow2.f32 %v3587_v9  ;;  %v4102_v9 = vld [vmem:[%s14396_s13] sm:$0xff] }
 0x85b   : > { %10122 = vpow2.f32 %v4094_v60 }
 0x85c   : > { %10124 = vpow2.f32 %v4086_v45 }
 0x85d   : > { %10126 = vpow2.f32 %v4098_v6 }
 0x863   : > { %4125 = vadd.xlane.f32.xlu1 %v4124_v16 }
 0x867   : > { %4134 = vadd.xlane.f32.xlu1 %v4133_v23  ;;  %v10117_v23 = vpop.eup %10116 }
 0x868   : > { %v12402_v25 = vmul.f32 %v10117_v23, %v4105_v7 }
 0x86b   : > { %4131 = vadd.xlane.f32.xlu1 %v4130_v12  ;;  %v3624_v55 = vpop.xlane.xlu0 %3623 }
 0x86c   : > { %v3644_v63 = vadd.f32 %v3624_v55, %v12269_v18  ;;  %v3603_v18 = vld [vmem:[%s14395_s12] sm:$0xff] }
 0x86e   : > { %3689 = vperm.xlu0 %9946, %v12350_v10   ;;  %v3830_v49 = vmul.f32 3.0, %v3644_v63 }
 0x86f   : > { %v12371_v40 = vpop.xlane.xlu0 %3620 }
 0x873   : > { %v3630_v4 = vpop.xlane.xlu0 %3629 }
 0x874   : > { %v3646_v56 = vadd.f32 %v3630_v4, %v3614_v47 }
 0x876   : > { %v3832_v50 = vmul.f32 3.0, %v3646_v56 }
 0x877   : > { %v3627_v48 = vpop.xlane.xlu0 %3626 }
 0x878   : > { %v3645_v28 = vadd.f32 %v3627_v48, %v3613_v62  ;;  %10128 = vrcp.f32 %v3832_v50 }
 0x87c   : > { %4195 = vperm.xlu1 %9947, %v12356_v8  }
 0x87f   : > { %v12393_v16 = vpop.permute.xlu0 %3679 }
 0x88d   : > { %3641 = vadd.xlane.f32.xlu0 %v3640_v51 }
 0x891   : > { %3638 = vadd.xlane.f32.xlu0 %v3637_v37  ;;  %v10119_v37 = vpop.eup %10118 }
 0x892   : > { %v10121_v17 = vpop.eup %10120  ;;  %v12413_v61 = vmul.f32 %v10119_v37, %v4107_v57 }
 0x893   : > { %v10123_v35 = vpop.eup %10122  ;;  %v3611_v15 = vmul.f32 %v10121_v17, %v3603_v18 }
 0x894   : > { %v10125_v4 = vpop.eup %10124  ;;  %v12424_v29 = vmul.f32 %v10123_v35, %v4106_v19 }
 0x895   : > { %v12431_v27 = vmul.f32 %v10125_v4, %v4102_v9  ;;  %v12470_v4 = vpop.xlane.xlu1 %4710 }
 0x899   : > { %v12472_v9 = vpop.permute.xlu1 %3684 }
 0x8a0   : > { %4140 = vadd.xlane.f32.xlu1 %v4139_v54  ;;  %v10127_v54 = vpop.eup %10126 }
 0x8a1   : > { %v12437_v45 = vmul.f32 %v10127_v54, %v4108_v38  ;;  %v10129_v48 = vpop.eup %10128  ;;  %v12474_v38 = vpop.permute.xlu1 %3659 }
 0x8a4   : > { %4137 = vadd.xlane.f32.xlu1 %v4136_v14 }
 0x8a5   : > { %v12399_v12 = vpop.f32.mrf.mxu0 }
 0x8a7   : > { %3669 = vperm.xlu0 %9946, %v3614_v47   ;;  %v12411_v55 = vpop.f32.mrf.mxu0 }
 0x8ab   : > { %3664 = vperm.xlu0 %9946, %v3613_v62   ;;  %v12415_v0 = vpop.f32.mrf.mxu0 }
 0x8ac   : > { %v3636_v21 = vpop.xlane.xlu0 %3635 }
 0x8ad   : > { %v3648_v51 = vadd.f32 %v3636_v21, %v12292_v46  ;;  %v3831_v46 = vmul.f32 3.0, %v3645_v28  ;;  %v12426_v60 = vpop.f32.mrf.mxu0 }
 0x8af   : > { %v3834_v34 = vmul.f32 3.0, %v3648_v51  ;;  %4175 = vperm.xlu0 %9946, %v12402_v25  }
 0x8b1   : > { %10130 = vrcp.f32 %v3834_v34 }
 0x8b2   : > { %10132 = vrcp.f32 %v3830_v49  ;;  %v3643_v49 = vadd.f32 %v12371_v40, %v3611_v15  ;;  %v12476_v40 = vpop.permute.xlu1 %4165 }
 0x8b3   : > { %4185 = vperm.xlu0 %9946, %v12413_v61   ;;  %10134 = vrcp.f32 %v3831_v46  ;;  %v12434_v26 = vpop.f32.mrf.mxu0 }
 0x8b4   : > { %v12464_v34 = vpop.permute.xlu0 %3674  ;;  %v3829_v35 = vmul.f32 3.0, %v3643_v49 }
 0x8b5   : > { %3654 = vperm.xlu1 %9947, %v3611_v15   ;;  %v12440_v14 = vpop.f32.mrf.mxu0 }
 0x8b7   : > { %4180 = vperm.xlu0 %9946, %v12424_v29  }
 0x8b9   : > { %4160 = vperm.xlu1 %9947, %v12431_v27  }
 0x8ba   : > { %v12442_v47 = vpop.f32.mrf.mxu0 }
 0x8bb   : > { %4190 = vperm.xlu0 %9946, %v12437_v45  }
 0x8bc   : > { %v12444_v56 = vpop.f32.mrf.mxu0 }
 0x8be   : > { %v10131_v6 = vpop.eup %10130 }
 0x8bf   : > { %3862 = vperm.xlu0 %9946, %v10129_v48   ;;  %3872 = vperm.xlu1 %9947, %v10131_v6   ;;  %v10133_v41 = vpop.eup %10132 }
 0x8c0   : > { %v10135_v1 = vpop.eup %10134 }
 0x8c3   : > { %3857 = vperm.xlu0 %9946, %v10135_v1   ;;  %3852 = vperm.xlu1 %9947, %v10133_v41   ;;  %v14557_v1 = vld [vmem:[#allocation34_spill] sm:$0xff] }
 0x8c4   : > { %v12446_v62 = vpop.f32.mrf.mxu0 }
 0x8c6   : > { %v12448_v23 = vpop.f32.mrf.mxu0 }
 0x8c8   : > { %v12450_v7 = vpop.f32.mrf.mxu0 }
 0x8ca   : > { %v12452_v63 = vpop.f32.mrf.mxu0 }
 0x8cc   : > { %v12454_v50 = vpop.f32.mrf.mxu0 }
 0x8ce   : > { %v12456_v21 = vpop.f32.mrf.mxu0 }
 0x8d0   : > { %v12458_v28 = vpop.f32.mrf.mxu0 }
 0x8d2   : > { %v12460_v51 = vpop.f32.mrf.mxu0 }
 0x8d4   : > { %v12462_v37 = vpop.f32.mrf.mxu0 }
 0x8d5   : > { %v4532_v19 = vsel %vm1829_vm1, %v12462_v37, -inf }
 0x8d6   : > { %v9571_v57 = vpop.f32.mrf.mxu0 }
 0x8d7   : > { %v12482_v57 = vadd.f32 %v14557_v1, %v11928_v20 }
 0x8d9   : > { %14558 = vst [vmem:[#allocation16_spill] sm:$0xff] %v12482_v57 }
 0x8e1   : > { %v3633_v17 = vpop.xlane.xlu0 %3632 }
 0x8e2   : > { %v3647_v18 = vadd.f32 %v3633_v17, %v12329_v22  ;;  %v4123_v22 = vpop.xlane.xlu1 %4122 }
 0x8e4   : > { %v3833_v46 = vmul.f32 3.0, %v3647_v18  ;;  %v4422_v18 = vrot.slane %v12482_v57, %v10811_v53 }
 0x8e6   : > { %10136 = vrcp.f32 %v3833_v46  ;;  %v4120_v15 = vpop.xlane.xlu1 %4119  ;;  %v4423_v33 = vmul.f32 %v4422_v18, %v12050_v31 }
 0x8e7   : > { %4533 = vmax.xlane.f32.xlu1 %v4532_v19  ;;  %10138 = vrcp.f32 %v3829_v35 }
 0x8e9   : > { %v12484_v17 = vpop.permute.xlu0 %3689 }
 0x8ea   : > { %v4129_v6 = vpop.xlane.xlu1 %4128 }
 0x8eb   : > { %v4145_v30 = vadd.f32 %v4129_v6, %v12402_v25 }
 0x8ed   : > { %v4338_v44 = vmul.f32 3.0, %v4145_v30 }
 0x8ee   : > { %v12478_v41 = vpop.permute.xlu1 %4170 }
 0x8f2   : > { %v4126_v49 = vpop.xlane.xlu1 %4125 }
 0x8f3   : > { %v10137_v54 = vpop.eup %10136 }
 0x8f4   : > { %3867 = vperm.xlu0 %9946, %v10137_v54   ;;  %v10139_v48 = vpop.eup %10138 }
 0x8f6   : > { %v4135_v19 = vpop.xlane.xlu1 %4134 }
 0x8f7   : > { %v4147_v13 = vadd.f32 %v4135_v19, %v12413_v61  ;;  %v4142_v19 = vadd.f32 %v4120_v15, %v12431_v27  ;;  %v4712_v15 = vmax.f32 %v12470_v4, %v12363_v58  ;;  %v4539_v4 = vld [vmem:[%s14391_s8] sm:$0xff] }
 0x8f8   : > { %3847 = vperm.xlu1 %9947, %v10139_v48  }
 0x8f9   : > { %v4340_v57 = vmul.f32 3.0, %v4147_v13  ;;  %v4144_v13 = vadd.f32 %v4126_v49, %v12335_v5 }
 0x8fa   : > { %v4132_v3 = vpop.xlane.xlu1 %4131 }
 0x916   : > { %v3642_v46 = vpop.xlane.xlu0 %3641 }
 0x917   : > { %v3650_v35 = vadd.f32 %v3642_v46, %v12350_v10  ;;  %v4146_v10 = vadd.f32 %v4132_v3, %v12424_v29  ;;  %v12494_v46 = vpop.permute.xlu1 %4195  ;;  %v4143_v29 = vadd.f32 %v4123_v22, %v12289_v24 }
 0x919   : > { %v3836_v54 = vmul.f32 3.0, %v3650_v35  ;;  %v4339_v31 = vmul.f32 3.0, %v4146_v10 }
 0x91a   : > { %v3639_v48 = vpop.xlane.xlu0 %3638 }
 0x91b   : > { %10140 = vrcp.f32 %v3836_v54  ;;  %v3649_v20 = vadd.f32 %v3639_v48, %v12245_v32 }
 0x91c   : > { %4424 = vadd.xlane.f32.xlu1 %v4423_v33 }
 0x91d   : > { %v3835_v1 = vmul.f32 3.0, %v3649_v20 }
 0x91f   : > { %10142 = vrcp.f32 %v3835_v1 }
 0x920   : > { %10144 = vrcp.f32 %v4338_v44 }
 0x921   : > { %10146 = vrcp.f32 %v4340_v57  ;;  %v4337_v57 = vmul.f32 3.0, %v4144_v13 }
 0x922   : > { %10148 = vrcp.f32 %v4339_v31  ;;  %v4713_v31 = vsub.f32 %v12129_v11, %v4712_v15 }
 0x928   : > { %v10141_v18 = vpop.eup %10140 }
 0x929   : > { %v4141_v25 = vpop.xlane.xlu1 %4140  ;;  %3882 = vperm.xlu0 %9946, %v10141_v18  }
 0x92a   : > { %v4149_v32 = vadd.f32 %v4141_v25, %v12356_v8  ;;  %v4336_v8 = vmul.f32 3.0, %v4143_v29  ;;  %v4716_v29 = vld [vmem:[%s14392_s9] sm:$0xff] }
 0x92c   : > { %v10143_v33 = vpop.eup %10142  ;;  %v4342_v30 = vmul.f32 3.0, %v4149_v32  ;;  %v4714_v32 = vmul.f32 1.442695, %v4713_v31 }
 0x92d   : > { %v4138_v6 = vpop.xlane.xlu1 %4137  ;;  %3877 = vperm.xlu0 %9946, %v10143_v33   ;;  %v10145_v3 = vpop.eup %10144 }
 0x92e   : > { %v4148_v61 = vadd.f32 %v4138_v6, %v12437_v45  ;;  %10150 = vrcp.f32 %v4342_v30  ;;  %v10147_v35 = vpop.eup %10146  ;;  %v4335_v45 = vmul.f32 3.0, %v4142_v19  ;;  %v3670_v33 = vpop.permute.xlu0 %3669 }
 0x92f   : > { %v10149_v54 = vpop.eup %10148 }
 0x930   : > { %v4341_v44 = vmul.f32 3.0, %v4148_v61 }
 0x931   : > { %4368 = vperm.xlu0 %9946, %v10145_v3   ;;  %v12501_v20 = vpop.permute.xlu1 %3654 }
 0x932   : > { %10152 = vrcp.f32 %v4341_v44  ;;  %v12514_v61 = vpop.permute.xlu0 %3664 }
 0x933   : > { %10154 = vrcp.f32 %v4337_v57 }
 0x934   : > { %10156 = vrcp.f32 %v4336_v8  ;;  %v14559_v8 = vld [vmem:[#allocation23_spill] sm:$0xff] }
 0x935   : > { %4378 = vperm.xlu0 %9946, %v10147_v35   ;;  %10158 = vrcp.f32 %v4335_v45  ;;  %v12503_v1 = vpop.permute.xlu1 %4160  ;;  %v12530_v19 = vadd.f32 %v14559_v8, %v11936_v59 }
 0x936   : > { %10160 = vpow2.f32 %v4714_v32  ;;  %v4176_v13 = vpop.permute.xlu0 %4175 }
 0x937   : > { %14560 = vst [vmem:[#allocation17_spill] sm:$0xff] %v12530_v19 }
 0x939   : > { %4373 = vperm.xlu0 %9946, %v10149_v54  }
 0x93a   : > { %v12505_v27 = vpop.permute.xlu1 %3872  ;;  %v4186_v11 = vpop.permute.xlu0 %4185 }
 0x93b   : > { %v10151_v48 = vpop.eup %10150 }
 0x93d   : > { %4388 = vperm.xlu0 %9946, %v10151_v48   ;;  %v4824_v48 = vmul.f32 %v11932_v36, %v12530_v19 }
 0x93e   : > { %v12509_v10 = vpop.permute.xlu1 %3852  ;;  %v4181_v54 = vpop.permute.xlu0 %4180 }
 0x93f   : > { %v10153_v5 = vpop.eup %10152 }
 0x940   : > { %v10155_v49 = vpop.eup %10154 }
 0x941   : > { %4383 = vperm.xlu0 %9946, %v10153_v5   ;;  %v10157_v24 = vpop.eup %10156  ;;  %v4825_v5 = vsel %vm3149_vm3, %v4824_v48, 0.0 }
 0x942   : > { %v10159_v22 = vpop.eup %10158 }
 0x943   : > { %v10161_v3 = vpop.eup %10160 }
 0x944   : > { %v12524_v35 = vmul.f32 %v10161_v3, %v4716_v29 }
 0x945   : > { %4363 = vperm.xlu0 %9946, %v10155_v49   ;;  %v4191_v49 = vpop.permute.xlu0 %4190 }
 0x946   : > { %v4723_v45 = vsel %vm2329_vm2, %v12524_v35, 0.0 }
 0x949   : > { %4358 = vperm.xlu0 %9946, %v10157_v24   ;;  %v3863_v24 = vpop.permute.xlu0 %3862 }
 0x94d   : > { %4353 = vperm.xlu0 %9946, %v10159_v22   ;;  %v12537_v22 = vpop.permute.xlu0 %3857 }
 0x96f   : > { %v3868_v31 = vpop.permute.xlu0 %3867 }
 0x970   : > { %v4534_v18 = vpop.xlane.xlu1 %4533 }
 0x971   : > { %v4535_v25 = vmax.f32 %v4534_v18, %v12363_v58 }
 0x973   : > { %v4536_v30 = vsub.f32 %v12462_v37, %v4535_v25  ;;  %v4541_v3 = vsub.f32 %v12363_v58, %v4535_v25 }
 0x974   : > { %v12539_v18 = vpop.permute.xlu1 %3847 }
 0x975   : > { %v4537_v6 = vmul.f32 1.442695, %v4536_v30  ;;  %v12541_v30 = vld [vmem:[#allocation2 + $0x8] ss:$0 sm:$0xff]  ;;  %v4542_v39 = vmul.f32 1.442695, %v4541_v3 }
 0x976   : > { %v4201_v36 = vmul.f32 %v4176_v13, %v12541_v30  ;;  %v4203_v48 = vmul.f32 %v4186_v11, %v12541_v30  ;;  %v4202_v11 = vmul.f32 %v4181_v54, %v12541_v30 }
 0x977   : > { %10162 = vpow2.f32 %v4537_v6 }
 0x978   : > { %v4312_v52 = vadd.f32 %v12450_v7, %v4201_v36  ;;  %v4322_v7 = vadd.f32 %v12454_v50, %v4203_v48  ;;  %v4317_v54 = vadd.f32 %v12456_v21, %v4202_v11  ;;  %v4435_v21 = vld [vmem:[%s14397_s14] sm:$0xff]  ;;  %v3694_v48 = vmul.f32 %v12514_v61, %v12541_v30 }
 0x984   : > { %v10163_v44 = vpop.eup %10162 }
 0x985   : > { %v4540_v57 = vmul.f32 %v10163_v44, %v4539_v4  ;;  %v3695_v4 = vmul.f32 %v3670_v33, %v12541_v30  ;;  %v3697_v33 = vmul.f32 %v12393_v16, %v12541_v30 }
 0x987   : > { %9575 = vmatmul.mubr.msk.f32.vlgmr.msra.gmra.mxu0 %vm1829_vm1, %v4540_v57  ;;  %v4546_v37 = vsel %vm1829_vm1, %v4540_v57, 0.0 }
 0x988   : > { %4547 = vadd.xlane.f32.xlu0 %v4546_v37  ;;  %9612 = vmatprep.mubr.msk.f32.mxu0 %vm10543_vm0, %v14484_v43  ;;  %v4718_v37 = vsub.f32 %v12363_v58, %v4712_v15  ;;  %v3696_v15 = vmul.f32 %v12464_v34, %v12541_v30  ;;  %v4205_v34 = vmul.f32 %v12494_v46, %v12541_v30 }
 0x989   : > { %v3698_v46 = vmul.f32 %v12472_v9, %v12541_v30 }
 0x98c   : > { %4724 = vadd.xlane.f32.xlu0 %v4723_v45 }
 0x990   : > { %4826 = vadd.xlane.f32.xlu0 %v4825_v5  ;;  %v3806_v5 = vadd.f32 %v12415_v0, %v3695_v4 }
 0x992   : > { %v3888_v13 = vmul.f32 %v3863_v24, %v3806_v5 }
 0x9a4   : > { %v3883_v59 = vpop.permute.xlu0 %3882 }
 0x9a5   : > { %v4425_v32 = vpop.xlane.xlu1 %4424 }
 0x9a6   : > { %v4426_v6 = vmax.f32 %v4425_v32, %v12363_v58 }
 0x9a8   : > { %v4427_v44 = vsub.f32 %v4425_v32, %v4426_v6  ;;  %v4432_v29 = vsub.f32 %v12363_v58, %v4426_v6  ;;  %v3878_v57 = vpop.permute.xlu0 %3877  ;;  %v4719_v6 = vmul.f32 1.442695, %v4718_v37  ;;  %v3816_v58 = vadd.f32 %v12434_v26, %v3697_v33 }
 0x9a9   : > { %v3699_v26 = vmul.f32 %v12484_v17, %v12541_v30  ;;  %v4430_v17 = vld [vmem:[%s14390_s7] sm:$0xff] }
 0x9aa   : > { %v4428_v8 = vmul.f32 1.442695, %v4427_v44  ;;  %v4433_v45 = vmul.f32 1.442695, %v4432_v29  ;;  %v3890_v16 = vmul.f32 %v12505_v27, %v3816_v58  ;;  %v4204_v27 = vmul.f32 %v4191_v49, %v12541_v30 }
 0x9ab   : > { %v3826_v44 = vadd.f32 %v12442_v47, %v3699_v26 }
 0x9ac   : > { %10164 = vpow2.f32 %v4428_v8  ;;  %v4369_v25 = vpop.permute.xlu0 %4368  ;;  %v4327_v9 = vadd.f32 %v12460_v51, %v4204_v27  ;;  %v14561_v27 = vld [vmem:[#allocation59_spill] sm:$0xff] }
 0x9ad   : > { %10166 = vpow2.f32 %v4433_v45  ;;  %v4394_v32 = vmul.f32 %v4369_v25, %v4312_v52  ;;  %v3811_v52 = vadd.f32 %v12440_v14, %v3696_v15  ;;  %v4332_v14 = vadd.f32 %v12458_v28, %v4205_v34 }
 0x9ae   : > { %10168 = vpow2.f32 %v4542_v39  ;;  %v3892_v8 = vmul.f32 %v3883_v59, %v3826_v44  ;;  %v3821_v45 = vadd.f32 %v12444_v56, %v3698_v46  ;;  %v4544_v59 = vld [vmem:[%s14398_s15] sm:$0xff]  ;;  %v3801_v15 = vadd.f32 %v12426_v60, %v3694_v48  ;;  %v14562_v44 = vld [vmem:[#allocation57_spill] sm:$0xff] }
 0x9af   : > { %v12558_v0 = vadd.f32 %v4394_v32, %v3888_v13  ;;  %10170 = vpow2.f32 %v4719_v6  ;;  %v3889_v50 = vmul.f32 %v3868_v31, %v3811_v52  ;;  %v4200_v13 = vmul.f32 %v12478_v41, %v12541_v30 }
 0x9b0   : > { %v4379_v4 = vpop.permute.xlu0 %4378  ;;  %v3891_v6 = vmul.f32 %v3878_v57, %v3821_v45  ;;  %v4721_v57 = vld [vmem:[%s14399_s16] sm:$0xff] }
 0x9b1   : > { %4410 = vst [vmem:[#allocation2 + $0x68] sm:$0xff] %v12558_v0  ;;  %v4396_v24 = vmul.f32 %v4379_v4, %v4322_v7  ;;  %v4307_v61 = vadd.f32 %v12452_v63, %v4200_v13  ;;  %v3693_v4 = vmul.f32 %v12474_v38, %v12541_v30  ;;  %v4199_v63 = vmul.f32 %v12476_v40, %v12541_v30  ;;  %v14566_v13 = vld [vmem:[#allocation41_spill] sm:$0xff] }
 0x9b2   : > { %v3692_v38 = vmul.f32 %v12501_v20, %v12541_v30  ;;  %v4198_v40 = vmul.f32 %v12503_v1, %v12541_v30 }
 0x9b3   : > { %v4404_v39 = vadd.f32 %v4396_v24, %v3890_v16  ;;  %v3887_v24 = vmul.f32 %v12537_v22, %v3801_v15  ;;  %v3796_v52 = vadd.f32 %v12399_v12, %v3693_v4  ;;  %v4302_v34 = vadd.f32 %v12446_v62, %v4199_v63  ;;  %v14570_v15 = vld [vmem:[#allocation49_spill] sm:$0xff] }
 0x9b4   : > { %v4374_v36 = vpop.permute.xlu0 %4373  ;;  %v3791_v62 = vadd.f32 %v12411_v55, %v3692_v38  ;;  %v4297_v20 = vadd.f32 %v12448_v23, %v4198_v40 }
 0x9b5   : > { %4412 = vst [vmem:[#allocation2 + $0xa8] sm:$0xff] %v4404_v39  ;;  %v4395_v3 = vmul.f32 %v4374_v36, %v4317_v54  ;;  %v3886_v36 = vmul.f32 %v12509_v10, %v3796_v52  ;;  %v4439_v52 = vld [vmem:[#allocation2 + $0x128] ss:$0 sm:$0xff] }
 0x9b6   : > { %v3885_v30 = vmul.f32 %v12539_v18, %v3791_v62 }
 0x9b7   : > { %v4403_v29 = vadd.f32 %v4395_v3, %v3889_v50 }
 0x9b8   : > { %v4389_v37 = vpop.permute.xlu0 %4388 }
 0x9b9   : > { %v10165_v31 = vpop.eup %10164  ;;  %4411 = vst [vmem:[#allocation2 + $0x88] sm:$0xff] %v4403_v29  ;;  %v4398_v49 = vmul.f32 %v4389_v37, %v4332_v14  ;;  %v14564_v14 = vld [vmem:[#allocation39_spill] sm:$0xff] }
 0x9ba   : > { %v10167_v47 = vpop.eup %10166  ;;  %v4431_v28 = vmul.f32 %v10165_v31, %v4430_v17 }
 0x9bb   : > { %v4406_v5 = vadd.f32 %v4398_v49, %v3892_v8  ;;  %v4436_v33 = vmul.f32 %v10167_v47, %v4435_v21  ;;  %v10169_v25 = vpop.eup %10168 }
 0x9bc   : > { %4442 = vperm.xlu0 %9946, %v4431_v28   ;;  %v4384_v32 = vpop.permute.xlu0 %4383  ;;  %v10171_v51 = vpop.eup %10170  ;;  %v12592_v7 = vmul.f32 %v10169_v25, %v4544_v59  ;;  %v14567_v59 = vld [vmem:[#allocation43_spill] sm:$0xff] }
 0x9bd   : > { %4414 = vst [vmem:[#allocation2 + $0xe8] sm:$0xff] %v4406_v5  ;;  %4448 = vperm.xlu1 %9947, %v4436_v33   ;;  %v4438_v56 = vadd.f32 %v4436_v33, %v4431_v28  ;;  %v4397_v58 = vmul.f32 %v4384_v32, %v4327_v9  ;;  %9597 = vmatpush3.msra.mxu0 %v4406_v5  ;;  %v14565_v9 = vld [vmem:[#allocation37_spill] sm:$0xff] }
 0x9be   : > { %9598 = vmatprep.subr.mxu0 %v14484_v43  ;;  %v4722_v26 = vmul.f32 %v10171_v51, %v4721_v57 }
 0x9bf   : > { %v4453_v41 = vmul.f32 3.0, %v4438_v56  ;;  %v4405_v11 = vadd.f32 %v4397_v58, %v3891_v6  ;;  %v14568_v56 = vld [vmem:[#allocation45_spill] sm:$0xff] }
 0x9c0   : > { %v4364_v16 = vpop.permute.xlu0 %4363 }
 0x9c1   : > { %10172 = vrcp.f32 %v4453_v41  ;;  %4413 = vst [vmem:[#allocation2 + $0xc8] sm:$0xff] %v4405_v11  ;;  %4553 = vperm.xlu1 %9947, %v12592_v7   ;;  %v4393_v60 = vmul.f32 %v4364_v16, %v4307_v61  ;;  %9599 = vmatpush3.msra.mxu0 %v4405_v11  ;;  %v14569_v61 = vld [vmem:[#allocation47_spill] sm:$0xff] }
 0x9c2   : > { %9600 = vmatprep.subr.mxu0 %v14484_v43  ;;  %v14571_v11 = vld [vmem:[#allocation51_spill] sm:$0xff] }
 0x9c3   : > { %v4401_v22 = vadd.f32 %v4393_v60, %v3887_v24  ;;  %9601 = vmatpush3.msra.mxu0 %v4404_v39 }
 0x9c4   : > { %v4359_v54 = vpop.permute.xlu0 %4358  ;;  %9602 = vmatprep.subr.mxu0 %v14484_v43 }
 0x9c5   : > { %4409 = vst [vmem:[#allocation2 + $0x48] sm:$0xff] %v4401_v22  ;;  %4737 = vperm.xlu1 %9947, %v4722_v26   ;;  %v4392_v12 = vmul.f32 %v4359_v54, %v4302_v34  ;;  %9603 = vmatpush3.msra.mxu0 %v4403_v29  ;;  %v14563_v29 = vld [vmem:[#allocation36_spill] sm:$0xff] }
 0x9c6   : > { %9604 = vmatprep.subr.mxu0 %v14484_v43  ;;  %v12636_v17 = vadd.f32 %v14564_v14, %v14563_v29  ;;  %v14576_v29 = vld [vmem:[#allocation74_spill] sm:$0xff] }
 0x9c7   : > { %v4400_v50 = vadd.f32 %v4392_v12, %v3886_v36  ;;  %9605 = vmatpush3.msra.mxu0 %v12558_v0  ;;  %v14577_v14 = vld [vmem:[#allocation70_spill] sm:$0xff] }
 0x9c8   : > { %v4354_v1 = vpop.permute.xlu0 %4353  ;;  %9606 = vmatprep.subr.mxu0 %v14484_v43 }
 0x9c9   : > { %4408 = vst [vmem:[#allocation2 + $0x28] sm:$0xff] %v4400_v50  ;;  %v4391_v10 = vmul.f32 %v4354_v1, %v4297_v20  ;;  %9607 = vmatpush3.msra.mxu0 %v4401_v22 }
 0x9ca   : > { %9608 = vmatprep.subr.mxu0 %v14484_v43 }
 0x9cb   : > { %v4399_v39 = vadd.f32 %v4391_v10, %v3885_v30  ;;  %9609 = vmatpush3.msra.mxu0 %v4400_v50 }
 0x9cc   : > { %9610 = vmatprep.subr.mxu0 %v14484_v43 }
 0x9cd   : > { %4407 = vst [vmem:[#allocation2 + $0x8] sm:$0xff] %v4399_v39  ;;  %9611 = vmatpush3.msra.mxu0 %v4399_v39 }
 0x9ce   : > { %v10173_v55 = vpop.eup %10172  ;;  %9613 = vmatmul.mubr.msk.f32.vlgmr.msra.gmra.mxu0 %vm2329_vm2, %v12524_v35  ;;  %9615 = vmatprep.subr.mxu0 %v14484_v43 }
 0x9cf   : > { %4457 = vperm.xlu0 %9946, %v10173_v55   ;;  %9616 = vmatpush3.xpose.msra.mxu0 %v11982_v2  ;;  %v12632_v2 = vadd.f32 %v14562_v44, %v14561_v27 }
 0x9d0   : > { %9617 = vmatprep.mubr.msk.f32.mxu0 %vm10543_vm0, %v14484_v43  ;;  %9620 = vmatprep.subr.mxu0 %v14484_v43 }
 0x9d1   : > { %v12640_v46 = vrot.slane %v12632_v2, %v10811_v53 }
 0x9d2   : > { %9618 = vmatmul.mubr.f32.vlgmr.msra.gmra.mxu0 %v12530_v19 }
 0x9d3   : > { %9622 = vmatprep.mubr.msk.f32.mxu0 %vm10543_vm0, %v14484_v43  ;;  %v5052_v37 = vmul.f32 %v12640_v46, %v12636_v17  ;;  %v5051_v25 = vmul.f32 %v12640_v46, %v14565_v9  ;;  %v5053_v32 = vmul.f32 %v12640_v46, %v14566_v13  ;;  %v5054_v6 = vmul.f32 %v12640_v46, %v14567_v59 }
 0x9d4   : > { %v5055_v58 = vmul.f32 %v12640_v46, %v14568_v56  ;;  %v5056_v51 = vmul.f32 %v12640_v46, %v14569_v61  ;;  %v5057_v41 = vmul.f32 %v12640_v46, %v14570_v15  ;;  %v4418_v60 = vld [vmem:[#allocation2 + $0x8] ss:$0 sm:$0xff] }
 0xa11   : > { %v4548_v23 = vpop.xlane.xlu0 %4547 }
 0xa12   : > { %v4549_v49 = vadd.f32 %v4548_v23, %v12592_v7  ;;  %v5058_v7 = vmul.f32 %v12640_v46, %v14571_v11 }
 0xa14   : > { %v4630_v28 = vmul.f32 3.0, %v4549_v49  ;;  %v14582_v49 = vld [vmem:[#allocation60_spill] sm:$0xff] }
 0xa15   : > { %v4725_v18 = vpop.xlane.xlu0 %4724 }
 0xa16   : > { %v4726_v0 = vadd.f32 %v4725_v18, %v4722_v26 }
 0xa18   : > { %v4814_v3 = vmul.f32 3.0, %v4726_v0 }
 0xa19   : > { %v12660_v16 = vpop.xlane.xlu0 %4826 }
 0xa1a   : > { %10174 = vrcp.f32 %v4814_v3  ;;  %14572 = vst [vmem:[#allocation32_spill] sm:$0xff] %v12660_v16  ;;  %v14574_v3 = vld [vmem:[#allocation76_spill] sm:$0xff] }
 0xa1b   : > { %10176 = vrcp.f32 %v4630_v28 }
 0xa27   : > { %v10175_v35 = vpop.eup %10174 }
 0xa28   : > { %4818 = vperm.xlu0 %9946, %v10175_v35   ;;  %v10177_v33 = vpop.eup %10176  ;;  %v4946_v35 = vld [vmem:[%s14394_s11] sm:$0x1] }
 0xa37   : > { %v4443_v63 = vpop.permute.xlu0 %4442 }
 0xa38   : > { %v4449_v57 = vpop.permute.xlu1 %4448  ;;  %v4445_v34 = vmul.f32 %v4443_v63, %v4439_v52 }
 0xa39   : > { %v4451_v26 = vmul.f32 %v4449_v57, %v4418_v60 }
 0xa3b   : > { %v4452_v62 = vadd.f32 %v4451_v26, %v4445_v34 }
 0xa3c   : > { %v4554_v4 = vpop.permute.xlu1 %4553 }
 0xa3d   : > { %v4556_v22 = vmul.f32 %v4554_v4, %v4418_v60 }
 0xa40   : > { %v4738_v24 = vpop.permute.xlu1 %4737 }
 0xa41   : > { %v4740_v36 = vmul.f32 %v4738_v24, %v4418_v60 }
 0xa47   : > { %v4626_v21 = vpop.f32.mrf.mxu0  ;;  %5061 = vadd.xlane.f32.xlu0 %v5052_v37  ;;  %v14578_v37 = vld [vmem:[#allocation68_spill] sm:$0xff] }
 0xa48   : > { %v4627_v12 = vadd.f32 %v4626_v21, %v4556_v22  ;;  %v14579_v21 = vld [vmem:[#allocation66_spill] sm:$0xff] }
 0xa49   : > { %v9576_v31 = vpop.f32.mrf.mxu0 }
 0xa4a   : > { %v4458_v38 = vpop.permute.xlu0 %4457  ;;  %v14580_v31 = vld [vmem:[#allocation64_spill] sm:$0xff] }
 0xa4b   : > { %v4460_v30 = vmul.f32 %v4458_v38, %v4452_v62 }
 0xa8e   : > { %v4810_v8 = vpop.f32.mrf.mxu0 }
 0xa8f   : > { %v4811_v10 = vadd.f32 %v4810_v8, %v4740_v36  ;;  %v14581_v8 = vld [vmem:[#allocation62_spill] sm:$0xff] }
 0xa90   : > { %v9614_v47 = vpop.f32.mrf.mxu0 }
 0xa91   : > { %v14583_v47 = vld [vmem:[#allocation53_spill] sm:$0xff] }
 0xa92   : > { %v4935_v45 = vpop.f32.mrf.mxu0 }
 0xa93   : > { %v4939_v48 = vsel %vm3264_vm4, %v4935_v45, -inf }
 0xa94   : > { %4940 = vmax.xlane.f32.xlu1 %v4939_v48  ;;  %v9619_v5 = vpop.f32.mrf.mxu0 }
 0xaa3   : > { %v4819_v20 = vpop.permute.xlu0 %4818 }
 0xaa4   : > { %v4821_v23 = vmul.f32 %v4819_v20, %v4811_v10 }
 0xaa5   : > { %4634 = vperm.xlu1 %9947, %v10177_v33  }
 0xac9   : > { %5059 = vadd.xlane.f32.xlu1 %v5051_v25 }
 0xacd   : > { %5063 = vadd.xlane.f32.xlu1 %v5053_v32 }
 0xad1   : > { %5065 = vadd.xlane.f32.xlu1 %v5054_v6 }
 0xad5   : > { %5067 = vadd.xlane.f32.xlu1 %v5055_v58 }
 0xad9   : > { %5069 = vadd.xlane.f32.xlu1 %v5056_v51 }
 0xadd   : > { %5071 = vadd.xlane.f32.xlu1 %v5057_v41 }
 0xae1   : > { %5073 = vadd.xlane.f32.xlu1 %v5058_v7 }
 0xb1d   : > { %v4941_v40 = vpop.xlane.xlu1 %4940 }
 0xb1e   : > { %v12663_v54 = vmax.f32 %v4941_v40, %v12660_v16  ;;  %v5783_v16 = vld [vmem:[%s14396_s13 + $0x38] sm:$0xff] }
 0xb20   : > { %14573 = vst [vmem:[#allocation31_spill] sm:$0xff] %v12663_v54  ;;  %v4943_v50 = vsub.f32 %v4935_v45, %v12663_v54  ;;  %v7505_v45 = vld [vmem:[#allocation2 + $0xf8] sm:$0xff] }
 0xb21   : > { %v4635_v1 = vpop.permute.xlu1 %4634 }
 0xb22   : > { %v4944_v39 = vmul.f32 1.442695, %v4943_v50  ;;  %v4637_v55 = vmul.f32 %v4635_v1, %v4627_v12 }
 0xb24   : > { %10178 = vpow2.f32 %v4944_v39  ;;  %v4638_v18 = vadd.f32 %v4637_v55, %v4460_v30  ;;  %v12792_v55 = vpop.xlane.xlu0 %5061 }
 0xb26   : > { %v4822_v0 = vadd.f32 %v4821_v23, %v4638_v18 }
 0xb28   : > { %4823 = vst [vmem:[#allocation2 + $0x108] sm:$0xff] %v4822_v0  ;;  %9621 = vmatpush3.msra.mxu0 %v4822_v0 }
 0xb29   : > { %9625 = vmatprep.subr.mxu0 %v14574_v3 }
 0xb31   : > { %v10179_v27 = vpop.eup %10178 }
 0xb32   : > { %v12670_v44 = vmul.f32 %v10179_v27, %v4946_v35 }
 0xb34   : > { %14575 = vst [vmem:[#allocation30_spill] sm:$0xff] %v12670_v44  ;;  %9623 = vmatmul.mubr.msk.f32.vlgmr.msra.gmra.mxu0 %vm1829_vm1, %v12670_v44 }
 0xb35   : > { %9626 = vmatpush3.xpose.msra.mxu0 %v14574_v3  ;;  %9627 = vmatprep.mubr.f32.mxu0 %v14565_v9 }
 0xb36   : > { %9653 = vmatprep.subr.mxu0 %v14576_v29 }
 0xb38   : > { %9628 = vmatmul.mubr.f32.vlgmr.msra.gmra.mxu0 %v12636_v17 }
 0xb39   : > { %9654 = vmatpush3.xpose.msra.mxu0 %v14576_v29  ;;  %9630 = vmatprep.mubr.f32.mxu0 %v14566_v13 }
 0xb3a   : > { %9655 = vmatprep.subr.mxu0 %v14577_v14 }
 0xb3c   : > { %9631 = vmatmul.mubr.f32.gmra.mxu0 %v14567_v59 }
 0xb3d   : > { %9656 = vmatpush3.xpose.msra.mxu0 %v14577_v14  ;;  %9633 = vmatprep.mubr.f32.mxu0 %v14568_v56 }
 0xb3e   : > { %9657 = vmatprep.subr.mxu0 %v14578_v37 }
 0xb40   : > { %9634 = vmatmul.mubr.f32.gmra.mxu0 %v14569_v61 }
 0xb41   : > { %9658 = vmatpush3.xpose.msra.mxu0 %v14578_v37  ;;  %9636 = vmatprep.mubr.f32.mxu0 %v14570_v15 }
 0xb42   : > { %9659 = vmatprep.subr.mxu0 %v14579_v21 }
 0xb44   : > { %9637 = vmatmul.mubr.f32.gmra.mxu0 %v14571_v11 }
 0xb45   : > { %9660 = vmatpush3.xpose.msra.mxu0 %v14579_v21  ;;  %9669 = vmatprep.mubr.f32.mxu0 %v14565_v9 }
 0xb46   : > { %9661 = vmatprep.subr.mxu0 %v14580_v31 }
 0xb49   : > { %9662 = vmatpush3.xpose.msra.mxu0 %v14580_v31 }
 0xb4a   : > { %9663 = vmatprep.subr.mxu0 %v14581_v8 }
 0xb4d   : > { %9664 = vmatpush3.xpose.msra.mxu0 %v14581_v8 }
 0xb4e   : > { %9665 = vmatprep.subr.mxu0 %v14582_v49 }
 0xb51   : > { %9666 = vmatpush3.xpose.msra.mxu0 %v14582_v49 }
 0xb52   : > { %9667 = vmatprep.subr.mxu0 %v12632_v2  ;;  %v12788_v10 = vpop.xlane.xlu1 %5059 }
 0xb55   : > { %9668 = vmatpush3.xpose.msra.mxu0 %v12632_v2 }
 0xb56   : > { %9719 = vmatprep.subr.mxu0 %v14484_v43  ;;  %v12790_v39 = vpop.xlane.xlu1 %5063 }
 0xb58   : > { %9670 = vmatmul.mubr.f32.vlgmr.msra.gmra.mxu0 %v12636_v17  ;;  %v6999_v17 = vld [vmem:[#allocation2 + $0x118] sm:$0xff] }
 0xb59   : > { %9672 = vmatprep.mubr.f32.mxu0 %v14566_v13  ;;  %9720 = vmatpush3.xpose.msra.mxu0 %v14576_v29 }
 0xb5a   : > { %9721 = vmatprep.subr.mxu0 %v14484_v43  ;;  %v12794_v23 = vpop.xlane.xlu1 %5065 }
 0xb5c   : > { %9673 = vmatmul.mubr.f32.gmra.mxu0 %v14567_v59 }
 0xb5d   : > { %9675 = vmatprep.mubr.f32.mxu0 %v14568_v56  ;;  %9722 = vmatpush3.xpose.msra.mxu0 %v14577_v14 }
 0xb5e   : > { %9723 = vmatprep.subr.mxu0 %v14484_v43  ;;  %v12803_v14 = vpop.xlane.xlu1 %5067 }
 0xb60   : > { %9676 = vmatmul.mubr.f32.gmra.mxu0 %v14569_v61 }
 0xb61   : > { %9678 = vmatprep.mubr.f32.mxu0 %v14570_v15  ;;  %9724 = vmatpush3.xpose.msra.mxu0 %v14578_v37 }
 0xb62   : > { %9725 = vmatprep.subr.mxu0 %v14484_v43 }
 0xb64   : > { %9679 = vmatmul.mubr.f32.gmra.mxu0 %v14571_v11 }
 0xb65   : > { %9726 = vmatpush3.xpose.msra.mxu0 %v14579_v21  ;;  %9735 = vmatprep.mubr.msk.f32.mxu0 %vm10543_vm0, %v14484_v43 }
 0xb66   : > { %9727 = vmatprep.subr.mxu0 %v14484_v43 }
 0xb69   : > { %9728 = vmatpush3.xpose.msra.mxu0 %v14580_v31 }
 0xb6a   : > { %9729 = vmatprep.subr.mxu0 %v14484_v43 }
 0xb6d   : > { %9730 = vmatpush3.xpose.msra.mxu0 %v14581_v8 }
 0xb6e   : > { %9731 = vmatprep.subr.mxu0 %v14484_v43 }
 0xb71   : > { %9732 = vmatpush3.xpose.msra.mxu0 %v14582_v49 }
 0xb72   : > { %9733 = vmatprep.subr.mxu0 %v14484_v43 }
 0xb75   : > { %9734 = vmatpush3.xpose.msra.mxu0 %v12632_v2 }
 0xb76   : > { %9781 = vmatprep.subr.mxu0 %v6999_v17 }
 0xb78   : > { %9736 = vmatmul.mubr.f32.vlgmr.msra.gmra.mxu0 %v14583_v47 }
 0xb79   : > { %9782 = vmatpush3.msra.mxu0 %v6999_v17 }
 0xb7a   : > { %9823 = vmatprep.subr.mxu0 %v7505_v45  ;;  %v12808_v45 = vpop.xlane.xlu1 %5069 }
 0xbf4   : > { %v12726_v28 = vpop.f32.mrf.mxu0 }
 0xbf5   : > { %14584 = vst [vmem:[#allocation29_spill] sm:$0xff] %v12726_v28 }
 0xbf6   : > { %v9624_v48 = vpop.f32.mrf.mxu0 }
 0xbf8   : > { %v9629_v5 = vpop.f32.mrf.mxu0 }
 0xbf9   : > { %v5184_v33 = vsel %vm1829_vm1, %v9629_v5, -inf }
 0xbfa   : > { %5185 = vmax.xlane.f32.xlu0 %v5184_v33  ;;  %v5142_v9 = vpop.f32.mrf.mxu0 }
 0xbfb   : > { %v5181_v25 = vsel %vm1829_vm1, %v5142_v9, -inf }
 0xbfc   : > { %v12730_v13 = vpop.f32.mrf.mxu0 }
 0xbfd   : > { %v5190_v32 = vsel %vm1829_vm1, %v12730_v13, -inf }
 0xbfe   : > { %5182 = vmax.xlane.f32.xlu0 %v5181_v25  ;;  %v12734_v59 = vpop.f32.mrf.mxu0 }
 0xbff   : > { %v5187_v6 = vsel %vm1829_vm1, %v12734_v59, -inf }
 0xc00   : > { %v12738_v56 = vpop.f32.mrf.mxu0 }
 0xc01   : > { %v5196_v58 = vsel %vm1829_vm1, %v12738_v56, -inf }
 0xc02   : > { %5191 = vmax.xlane.f32.xlu0 %v5190_v32  ;;  %v12742_v61 = vpop.f32.mrf.mxu0 }
 0xc03   : > { %v5193_v51 = vsel %vm1829_vm1, %v12742_v61, -inf }
 0xc04   : > { %v12746_v15 = vpop.f32.mrf.mxu0 }
 0xc05   : > { %v5202_v41 = vsel %vm1829_vm1, %v12746_v15, -inf }
 0xc06   : > { %5188 = vmax.xlane.f32.xlu0 %v5187_v6  ;;  %v12750_v11 = vpop.f32.mrf.mxu0 }
 0xc07   : > { %v5199_v7 = vsel %vm1829_vm1, %v12750_v11, -inf }
 0xc0a   : > { %5197 = vmax.xlane.f32.xlu0 %v5196_v58  ;;  %v12813_v58 = vpop.xlane.xlu1 %5071 }
 0xc0e   : > { %5194 = vmax.xlane.f32.xlu0 %v5193_v51 }
 0xc12   : > { %5203 = vmax.xlane.f32.xlu0 %v5202_v41 }
 0xc16   : > { %5200 = vmax.xlane.f32.xlu0 %v5199_v7 }
 0xc18   : > { %v12754_v57 = vpop.f32.mrf.mxu0 }
 0xc19   : > { %v5683_v4 = vsel %vm2329_vm2, %v12754_v57, -inf }
 0xc1a   : > { %v12758_v63 = vpop.f32.mrf.mxu0  ;;  %5684 = vmax.xlane.f32.xlu0 %v5683_v4 }
 0xc1b   : > { %v5680_v24 = vsel %vm2329_vm2, %v12758_v63, -inf }
 0xc1c   : > { %5681 = vmax.xlane.f32.xlu1 %v5680_v24  ;;  %v12762_v60 = vpop.f32.mrf.mxu0 }
 0xc1d   : > { %v5689_v52 = vsel %vm2329_vm2, %v12762_v60, -inf }
 0xc1e   : > { %v12766_v26 = vpop.f32.mrf.mxu0  ;;  %5690 = vmax.xlane.f32.xlu0 %v5689_v52 }
 0xc1f   : > { %v5686_v34 = vsel %vm2329_vm2, %v12766_v26, -inf }
 0xc20   : > { %5687 = vmax.xlane.f32.xlu1 %v5686_v34  ;;  %v12770_v38 = vpop.f32.mrf.mxu0 }
 0xc21   : > { %v5695_v40 = vsel %vm2329_vm2, %v12770_v38, -inf }
 0xc22   : > { %v12774_v22 = vpop.f32.mrf.mxu0  ;;  %5696 = vmax.xlane.f32.xlu0 %v5695_v40 }
 0xc23   : > { %v5692_v36 = vsel %vm2329_vm2, %v12774_v22, -inf }
 0xc24   : > { %5693 = vmax.xlane.f32.xlu1 %v5692_v36  ;;  %v12778_v12 = vpop.f32.mrf.mxu0 }
 0xc25   : > { %v5701_v62 = vsel %vm2329_vm2, %v12778_v12, -inf }
 0xc26   : > { %v12782_v50 = vpop.f32.mrf.mxu0  ;;  %5702 = vmax.xlane.f32.xlu0 %v5701_v62 }
 0xc27   : > { %v5698_v20 = vsel %vm2329_vm2, %v12782_v50, -inf }
 0xc28   : > { %5699 = vmax.xlane.f32.xlu1 %v5698_v20  ;;  %v12827_v20 = vpop.xlane.xlu1 %5073 }
 0xc38   : > { %v12786_v1 = vpop.f32.mrf.mxu0 }
 0xc3a   : > { %v9737_v30 = vpop.f32.mrf.mxu0 }
 0xc83   : > { %v5186_v18 = vpop.xlane.xlu0 %5185 }
 0xc84   : > { %v12797_v0 = vmax.f32 %v5186_v18, %v12792_v55 }
 0xc86   : > { %v5214_v35 = vsub.f32 %v9629_v5, %v12797_v0 }
 0xc87   : > { %v5183_v27 = vpop.xlane.xlu0 %5182 }
 0xc88   : > { %v12801_v29 = vmax.f32 %v5183_v27, %v12788_v10  ;;  %v5223_v37 = vmul.f32 1.442695, %v5214_v35 }
 0xc8a   : > { %v5213_v21 = vsub.f32 %v5142_v9, %v12801_v29  ;;  %10180 = vpow2.f32 %v5223_v37 }
 0xc8b   : > { %v5192_v31 = vpop.xlane.xlu0 %5191 }
 0xc8c   : > { %v5221_v8 = vmul.f32 1.442695, %v5213_v21  ;;  %v5208_v49 = vmax.f32 %v5192_v31, %v12794_v23 }
 0xc8e   : > { %10182 = vpow2.f32 %v5221_v8  ;;  %v5216_v17 = vsub.f32 %v12730_v13, %v5208_v49  ;;  %v5256_v52 = vsub.f32 %v12794_v23, %v5208_v49  ;;  %v5240_v8 = vld [vmem:[%s14388_s5 + $0x18] sm:$0xff] }
 0xc8f   : > { %v5189_v48 = vpop.xlane.xlu0 %5188 }
 0xc90   : > { %v5227_v5 = vmul.f32 1.442695, %v5216_v17  ;;  %v5207_v33 = vmax.f32 %v5189_v48, %v12790_v39  ;;  %v5267_v21 = vmul.f32 1.442695, %v5256_v52  ;;  %v5828_v52 = vld [vmem:[#allocation2 + $0x90] sm:$0xff] }
 0xc92   : > { %10184 = vpow2.f32 %v5227_v5  ;;  %v5215_v25 = vsub.f32 %v12734_v59, %v5207_v33  ;;  %v5237_v59 = vld [vmem:[%s14388_s5] sm:$0xff]  ;;  %v5254_v5 = vsub.f32 %v12792_v55, %v12797_v0  ;;  %v5829_v0 = vld [vmem:[#allocation2 + $0xb0] sm:$0xff] }
 0xc93   : > { %v5198_v32 = vpop.xlane.xlu0 %5197 }
 0xc94   : > { %v5225_v6 = vmul.f32 1.442695, %v5215_v25  ;;  %v5210_v9 = vmax.f32 %v5198_v32, %v12808_v45  ;;  %v5830_v32 = vld [vmem:[#allocation2 + $0xd0] sm:$0xff] }
 0xc96   : > { %10186 = vpow2.f32 %v5225_v6  ;;  %v5218_v51 = vsub.f32 %v12738_v56, %v5210_v9  ;;  %v5258_v13 = vsub.f32 %v12808_v45, %v5210_v9  ;;  %v5238_v56 = vld [vmem:[%s14388_s5 + $0x8] sm:$0xff]  ;;  %v5239_v9 = vld [vmem:[%s14388_s5 + $0x10] sm:$0xff] }
 0xc97   : > { %v5195_v41 = vpop.xlane.xlu0 %5194  ;;  %v10181_v34 = vpop.eup %10180 }
 0xc98   : > { %v5231_v7 = vmul.f32 1.442695, %v5218_v51  ;;  %v5271_v4 = vmul.f32 1.442695, %v5258_v13  ;;  %v5209_v24 = vmax.f32 %v5195_v41, %v12803_v14  ;;  %v12835_v31 = vmul.f32 %v10181_v34, %v5238_v56  ;;  %v5827_v56 = vld [vmem:[#allocation2 + $0x70] sm:$0xff] }
 0xc9a   : > { %10188 = vpow2.f32 %v5231_v7  ;;  %v5217_v40 = vsub.f32 %v12742_v61, %v5209_v24  ;;  %v5257_v36 = vsub.f32 %v12803_v14, %v5209_v24  ;;  %v5255_v61 = vsub.f32 %v12790_v39, %v5207_v33 }
 0xc9b   : > { %v10183_v62 = vpop.eup %10182  ;;  %10190 = vpow2.f32 %v5271_v4  ;;  %v5204_v30 = vpop.xlane.xlu0 %5203  ;;  %v5263_v7 = vmul.f32 1.442695, %v5254_v5 }
 0xc9c   : > { %v5229_v18 = vmul.f32 1.442695, %v5217_v40  ;;  %v5269_v35 = vmul.f32 1.442695, %v5257_v36  ;;  %v12830_v27 = vmax.f32 %v5204_v30, %v12827_v20  ;;  %v12832_v37 = vmul.f32 %v10183_v62, %v5237_v59  ;;  %v5282_v62 = vld [vmem:[%s14395_s12 + $0x28] sm:$0xff] }
 0xc9d   : > { %v5265_v6 = vmul.f32 1.442695, %v5255_v61 }
 0xc9e   : > { %10192 = vpow2.f32 %v5229_v18  ;;  %v5220_v49 = vsub.f32 %v12746_v15, %v12830_v27  ;;  %9641 = vmatprep.mubr.msk.f32.mxu1 %vm1829_vm1, %v12832_v37 }
 0xc9f   : > { %v10185_v17 = vpop.eup %10184  ;;  %10194 = vpow2.f32 %v5269_v35  ;;  %9642 = vmatmul.mubr.msk.f32.vlgmr.msra.gmra.mxu1 %vm1829_vm1, %v12835_v31  ;;  %v5201_v48 = vpop.xlane.xlu0 %5200 }
 0xca0   : > { %v5235_v33 = vmul.f32 1.442695, %v5220_v49  ;;  %9682 = vmatpush3.msra.mxu1 %v14554_v42  ;;  %v12850_v25 = vmax.f32 %v5201_v48, %v12813_v58  ;;  %v5248_v15 = vmul.f32 %v10185_v17, %v5240_v8  ;;  %10196 = vpow2.f32 %v5267_v21  ;;  %v5826_v8 = vld [vmem:[#allocation2 + $0x50] sm:$0xff] }
 0xca1   : > { %9683 = vmatprep.subr.mxu1 %v5830_v32 }
 0xca2   : > { %v5219_v51 = vsub.f32 %v12750_v11, %v12850_v25  ;;  %9684 = vmatpush3.msra.mxu1 %v5830_v32  ;;  %v5302_v13 = vsel %vm1829_vm1, %v5248_v15, 0.0  ;;  %10198 = vpow2.f32 %v5235_v33  ;;  %v5253_v11 = vsub.f32 %v12788_v10, %v12801_v29  ;;  %v5242_v29 = vld [vmem:[%s14388_s5 + $0x28] sm:$0xff] }
 0xca3   : > { %v10187_v42 = vpop.eup %10186  ;;  %9685 = vmatprep.subr.mxu1 %v5829_v0  ;;  %5303 = vadd.xlane.f32.xlu1 %v5302_v13  ;;  %v5685_v41 = vpop.xlane.xlu0 %5684  ;;  %10200 = vpow2.f32 %v5265_v6 }
 0xca4   : > { %v5233_v4 = vmul.f32 1.442695, %v5219_v51  ;;  %9686 = vmatpush3.msra.mxu1 %v5829_v0  ;;  %v5705_v24 = vmax.f32 %v5685_v41, %v12792_v55  ;;  %v12859_v59 = vmul.f32 %v10187_v42, %v5239_v9  ;;  %v5261_v49 = vmul.f32 1.442695, %v5253_v11 }
 0xca5   : > { %v5682_v34 = vpop.xlane.xlu1 %5681  ;;  %9687 = vmatprep.subr.mxu1 %v5828_v52 }
 0xca6   : > { %10202 = vpow2.f32 %v5233_v4  ;;  %v5713_v40 = vsub.f32 %v12754_v57, %v5705_v24  ;;  %v12865_v36 = vmax.f32 %v5682_v34, %v12788_v10  ;;  %9688 = vmatpush3.msra.mxu1 %v5828_v52  ;;  %9644 = vmatprep.mubr.msk.f32.mxu1 %vm1829_vm1, %v12859_v59  ;;  %v5753_v18 = vsub.f32 %v12792_v55, %v5705_v24  ;;  %v5824_v4 = vld [vmem:[#allocation2 + $0x10] sm:$0xff] }
 0xca7   : > { %v10189_v30 = vpop.eup %10188  ;;  %9689 = vmatprep.subr.mxu1 %v5827_v56  ;;  %9645 = vmatmul.mubr.msk.f32.gmra.mxu1 %vm1829_vm1, %v5248_v15  ;;  %v5691_v57 = vpop.xlane.xlu0 %5690  ;;  %10204 = vpow2.f32 %v5263_v7  ;;  %v5825_v15 = vld [vmem:[#allocation2 + $0x30] sm:$0xff] }
 0xca8   : > { %v10191_v35 = vpop.eup %10190  ;;  %v5722_v21 = vmul.f32 1.442695, %v5713_v40  ;;  %v5712_v61 = vsub.f32 %v12758_v63, %v12865_v36  ;;  %9690 = vmatpush3.msra.mxu1 %v5827_v56  ;;  %v12880_v17 = vmax.f32 %v5691_v57, %v12794_v23  ;;  %v5250_v55 = vmul.f32 %v10189_v30, %v5242_v29  ;;  %v5281_v63 = vld [vmem:[%s14395_s12 + $0x20] sm:$0xff]  ;;  %v5280_v56 = vld [vmem:[%s14395_s12 + $0x18] sm:$0xff] }
 0xca9   : > { %v5688_v48 = vpop.xlane.xlu1 %5687  ;;  %9691 = vmatprep.subr.mxu1 %v5826_v8  ;;  %v12882_v5 = vmul.f32 %v10191_v35, %v5282_v62  ;;  %v5762_v9 = vmul.f32 1.442695, %v5753_v18  ;;  %v5244_v35 = vld [vmem:[%s14388_s5 + $0x38] sm:$0xff] }
 0xcaa   : > { %v5720_v33 = vmul.f32 1.442695, %v5712_v61  ;;  %v12885_v32 = vmax.f32 %v5688_v48, %v12790_v39  ;;  %9692 = vmatpush3.msra.mxu1 %v5826_v8  ;;  %10206 = vpow2.f32 %v5722_v21  ;;  %v5715_v51 = vsub.f32 %v12762_v60, %v12880_v17  ;;  %v5241_v60 = vld [vmem:[%s14388_s5 + $0x20] sm:$0xff] }
 0xcab   : > { %v10193_v6 = vpop.eup %10192  ;;  %9693 = vmatprep.subr.mxu1 %v5825_v15  ;;  %5353 = vperm.xlu0 %9946, %v12882_v5   ;;  %v5308_v0 = vsel %vm1829_vm1, %v5250_v55, 0.0  ;;  %v5697_v13 = vpop.xlane.xlu0 %5696 }
 0xcac   : > { %v10195_v42 = vpop.eup %10194  ;;  %10208 = vpow2.f32 %v5720_v33  ;;  %v5714_v41 = vsub.f32 %v12766_v26, %v12885_v32  ;;  %9694 = vmatpush3.msra.mxu1 %v5825_v15  ;;  %5309 = vadd.xlane.f32.xlu1 %v5308_v0  ;;  %v12897_v7 = vmax.f32 %v5697_v13, %v12808_v45  ;;  %v5726_v24 = vmul.f32 1.442695, %v5715_v51 }
 0xcad   : > { %10210 = vpow2.f32 %v5261_v49  ;;  %v5694_v52 = vpop.xlane.xlu1 %5693  ;;  %9695 = vmatprep.subr.mxu1 %v5824_v4  ;;  %v12902_v11 = vmul.f32 %v10195_v42, %v5281_v63  ;;  %v10197_v34 = vpop.eup %10196  ;;  %v5249_v29 = vmul.f32 %v10193_v6, %v5241_v60  ;;  %v5243_v63 = vld [vmem:[%s14388_s5 + $0x30] sm:$0xff]  ;;  %v5278_v60 = vld [vmem:[%s14395_s12 + $0x8] sm:$0xff] }
 0xcae   : > { %v5724_v40 = vmul.f32 1.442695, %v5714_v41  ;;  %v5717_v26 = vsub.f32 %v12770_v38, %v12897_v7  ;;  %9696 = vmatpush3.msra.mxu1 %v5824_v4  ;;  %10212 = vpow2.f32 %v5762_v9  ;;  %v12910_v62 = vmax.f32 %v5694_v52, %v12803_v14 }
 0xcaf   : > { %5348 = vperm.xlu0 %9946, %v12902_v11   ;;  %v5703_v30 = vpop.xlane.xlu0 %5702  ;;  %9709 = vmatprep.subr.mxu1 %v14484_v43  ;;  %v10199_v18 = vpop.eup %10198  ;;  %10214 = vpow2.f32 %v5726_v24  ;;  %v5305_v61 = vsel %vm1829_vm1, %v5249_v29, 0.0  ;;  %v12924_v49 = vmul.f32 %v10197_v34, %v5280_v56  ;;  %v5737_v34 = vld [vmem:[#allocation8 + $0x8] sm:$0xff] }
 0xcb0   : > { %v5730_v57 = vmul.f32 1.442695, %v5717_v26  ;;  %v12915_v38 = vmax.f32 %v5703_v30, %v12827_v20  ;;  %10216 = vpow2.f32 %v5724_v40  ;;  %v5716_v21 = vsub.f32 %v12774_v22, %v12910_v62  ;;  %9647 = vmatprep.mubr.msk.f32.mxu1 %vm1829_vm1, %v5249_v29  ;;  %v10201_v48 = vpop.eup %10200  ;;  %5306 = vadd.xlane.f32.xlu1 %v5305_v61  ;;  %v5279_v22 = vld [vmem:[%s14395_s12 + $0x10] sm:$0xff]  ;;  %v5277_v30 = vld [vmem:[%s14395_s12] sm:$0xff] }
 0xcb1   : > { %v5700_v8 = vpop.xlane.xlu1 %5699  ;;  %9648 = vmatmul.mubr.msk.f32.gmra.mxu1 %vm1829_vm1, %v5250_v55  ;;  %v5252_v55 = vmul.f32 %v10199_v18, %v5244_v35  ;;  %v12942_v42 = vmul.f32 %v10201_v48, %v5279_v22  ;;  %v5738_v35 = vld [vmem:[#allocation8 + $0x10] sm:$0xff]  ;;  %v5299_v61 = vsel %vm1829_vm1, %v12859_v59, 0.0  ;;  %v5739_v48 = vld [vmem:[#allocation8 + $0x18] sm:$0xff]  ;;  %v5777_v22 = vld [vmem:[%s14396_s13 + $0x8] sm:$0xff] }
 0xcb2   : > { %v5719_v33 = vsub.f32 %v12778_v12, %v12915_v38  ;;  %v12930_v15 = vmax.f32 %v5700_v8, %v12813_v58  ;;  %v5728_v9 = vmul.f32 1.442695, %v5716_v21  ;;  %10218 = vpow2.f32 %v5730_v57 }
 0xcb3   : > { %v10203_v6 = vpop.eup %10202  ;;  %5343 = vperm.xlu0 %9946, %v12924_v49   ;;  %v5314_v13 = vsel %vm1829_vm1, %v5252_v55, 0.0  ;;  %v5759_v44 = vsub.f32 %v12827_v20, %v12915_v38 }
 0xcb4   : > { %v5734_v51 = vmul.f32 1.442695, %v5719_v33  ;;  %v5718_v12 = vsub.f32 %v12782_v50, %v12930_v15  ;;  %v10205_v0 = vpop.eup %10204  ;;  %10220 = vpow2.f32 %v5728_v9  ;;  %v5251_v41 = vmul.f32 %v10203_v6, %v5243_v63  ;;  %5315 = vadd.xlane.f32.xlu1 %v5314_v13  ;;  %v5736_v50 = vld [vmem:[#allocation8] sm:$0xff] }
 0xcb5   : > { %v12951_v26 = vmul.f32 %v10205_v0, %v5278_v60  ;;  %v5740_v6 = vld [vmem:[#allocation8 + $0x20] sm:$0xff] }
 0xcb6   : > { %v5732_v4 = vmul.f32 1.442695, %v5718_v12  ;;  %9650 = vmatprep.mubr.msk.f32.mxu1 %vm1829_vm1, %v5251_v41  ;;  %v5311_v24 = vsel %vm1829_vm1, %v5251_v41, 0.0  ;;  %10222 = vpow2.f32 %v5734_v51  ;;  %v5741_v12 = vld [vmem:[#allocation8 + $0x28] sm:$0xff] }
 0xcb7   : > { %5338 = vperm.xlu0 %9946, %v12942_v42   ;;  %v10207_v52 = vpop.eup %10206  ;;  %9651 = vmatmul.mubr.msk.f32.gmra.mxu1 %vm1829_vm1, %v5252_v55  ;;  %v5296_v55 = vsel %vm1829_vm1, %v12835_v31, 0.0  ;;  %v5260_v31 = vsub.f32 %v12827_v20, %v12830_v27 }
 0xcb8   : > { %10224 = vpow2.f32 %v5732_v4  ;;  %5312 = vadd.xlane.f32.xlu1 %v5311_v24  ;;  %v12958_v18 = vmul.f32 %v10207_v52, %v5737_v34  ;;  %v5742_v4 = vld [vmem:[#allocation8 + $0x30] sm:$0xff]  ;;  %v5293_v24 = vsel %vm1829_vm1, %v12832_v37, 0.0  ;;  %v5259_v37 = vsub.f32 %v12813_v58, %v12850_v25 }
 0xcb9   : > { %v10209_v40 = vpop.eup %10208  ;;  %v5275_v27 = vmul.f32 1.442695, %v5260_v31  ;;  %v6224_v25 = vld [vmem:[#allocation2 + $0x110] sm:$0xff] }
 0xcba   : > { %v10211_v56 = vpop.eup %10210  ;;  %v12953_v29 = vmul.f32 %v10209_v40, %v5736_v50  ;;  %v5743_v50 = vld [vmem:[#allocation8 + $0x38] sm:$0xff]  ;;  %v6089_v40 = vmul.f32 %v12640_v46, %v14583_v47  ;;  %v5758_v46 = vsub.f32 %v12813_v58, %v12930_v15 }
 0xcbb   : > { %5333 = vperm.xlu0 %9946, %v12951_v26   ;;  %v10213_v57 = vpop.eup %10212  ;;  %v12967_v8 = vmul.f32 %v10211_v56, %v5277_v30  ;;  %10226 = vpow2.f32 %v5275_v27  ;;  %v5273_v30 = vmul.f32 1.442695, %v5259_v37  ;;  %v5284_v58 = vld [vmem:[%s14395_s12 + $0x38] sm:$0xff] }
 0xcbc   : > { %9697 = vmatprep.mubr.msk.f32.mxu1 %vm2329_vm2, %v12953_v29  ;;  %v10215_v21 = vpop.eup %10214  ;;  %5300 = vadd.xlane.f32.xlu1 %v5299_v61  ;;  %v12983_v51 = vmul.f32 %v10213_v57, %v5777_v22  ;;  %v6383_v57 = vsel %vm2329_vm2, %v12786_v1, -inf }
 0xcbd   : > { %9698 = vmatmul.mubr.msk.f32.vlgmr.msra.gmra.mxu1 %vm2329_vm2, %v12958_v18  ;;  %v10217_v33 = vpop.eup %10216  ;;  %v12977_v59 = vmul.f32 %v10215_v21, %v5739_v48  ;;  %10228 = vpow2.f32 %v5273_v30  ;;  %v5752_v48 = vsub.f32 %v12788_v10, %v12865_v36 }
 0xcbe   : > { %9710 = vmatpush3.xpose.msra.mxu1 %v14574_v3  ;;  %v12974_v63 = vmul.f32 %v10217_v33, %v5738_v35  ;;  %v5772_v35 = vmul.f32 1.442695, %v5758_v46  ;;  %v5283_v33 = vld [vmem:[%s14395_s12 + $0x30] sm:$0xff] }
 0xcbf   : > { %5328 = vperm.xlu0 %9946, %v12967_v8   ;;  %9714 = vmatprep.subr.mxu1 %v14484_v43  ;;  %v10219_v9 = vpop.eup %10218 }
 0xcc0   : > { %9700 = vmatprep.mubr.msk.f32.mxu1 %vm2329_vm2, %v12974_v63  ;;  %5297 = vadd.xlane.f32.xlu1 %v5296_v55  ;;  %v12990_v41 = vmul.f32 %v10219_v9, %v5741_v12  ;;  %10230 = vpow2.f32 %v5772_v35  ;;  %v5760_v55 = vmul.f32 1.442695, %v5752_v48  ;;  %v5782_v12 = vld [vmem:[%s14396_s13 + $0x30] sm:$0xff] }
 0xcc1   : > { %v10221_v0 = vpop.eup %10220  ;;  %9701 = vmatmul.mubr.msk.f32.gmra.mxu1 %vm2329_vm2, %v12977_v59 }
 0xcc2   : > { %v12988_v13 = vmul.f32 %v10221_v0, %v5740_v6  ;;  %v5795_v6 = vsel %vm2329_vm2, %v12958_v18, 0.0  ;;  %10232 = vpow2.f32 %v5760_v55  ;;  %v5776_v0 = vld [vmem:[%s14396_s13] sm:$0xff] }
 0xcc3   : > { %5839 = vperm.xlu0 %9946, %v12983_v51   ;;  %v10223_v60 = vpop.eup %10222 }
 0xcc4   : > { %9703 = vmatprep.mubr.msk.f32.mxu1 %vm2329_vm2, %v12988_v13  ;;  %5294 = vadd.xlane.f32.xlu1 %v5293_v24  ;;  %v13004_v56 = vmul.f32 %v10223_v60, %v5743_v50  ;;  %v5792_v60 = vsel %vm2329_vm2, %v12953_v29, 0.0  ;;  %v5779_v50 = vld [vmem:[%s14396_s13 + $0x18] sm:$0xff] }
 0xcc5   : > { %v10225_v52 = vpop.eup %10224  ;;  %9704 = vmatmul.mubr.msk.f32.gmra.mxu1 %vm2329_vm2, %v12990_v41 }
 0xcc6   : > { %v13000_v34 = vmul.f32 %v10225_v52, %v5742_v4  ;;  %v5755_v4 = vsub.f32 %v12794_v23, %v12880_v17 }
 0xcc8   : > { %9706 = vmatprep.mubr.msk.f32.mxu1 %vm2329_vm2, %v13000_v34  ;;  %6090 = vadd.xlane.f32.xlu1 %v6089_v40  ;;  %v10227_v21 = vpop.eup %10226  ;;  %v5766_v31 = vmul.f32 1.442695, %v5755_v4 }
 0xcc9   : > { %9707 = vmatmul.mubr.msk.f32.gmra.mxu1 %vm2329_vm2, %v13004_v56  ;;  %v13025_v15 = vmul.f32 %v10227_v21, %v5284_v58 }
 0xcca   : > { %9711 = vmatprep.mubr.msk.f32.mxu1 %vm10543_vm0, %v14484_v43  ;;  %v10229_v61 = vpop.eup %10228  ;;  %10234 = vpow2.f32 %v5766_v31 }
 0xccb   : > { %v13033_v22 = vmul.f32 %v10229_v61, %v5283_v33  ;;  %v5801_v61 = vsel %vm2329_vm2, %v12977_v59, 0.0 }
 0xccc   : > { %6384 = vmax.xlane.f32.xlu1 %v6383_v57  ;;  %v5754_v57 = vsub.f32 %v12790_v39, %v12885_v32  ;;  %v5778_v39 = vld [vmem:[%s14396_s13 + $0x10] sm:$0xff] }
 0xccd   : > { %9712 = vmatmul.mubr.f32.vlgmr.msra.gmra.mxu1 %v14583_v47  ;;  %v10231_v9 = vpop.eup %10230 }
 0xcce   : > { %9715 = vmatpush3.msra.mxu1 %v6224_v25  ;;  %9716 = vmatprep.mubr.msk.f32.mxu1 %vm10543_vm0, %v14484_v43  ;;  %v13041_v10 = vmul.f32 %v10231_v9, %v5782_v12  ;;  %v5764_v58 = vmul.f32 1.442695, %v5754_v57 }
 0xccf   : > { %9738 = vmatprep.subr.mxu1 %v14484_v43  ;;  %v10233_v36 = vpop.eup %10232 }
 0xcd0   : > { %v13047_v18 = vmul.f32 %v10233_v36, %v5776_v0 }
 0xcd7   : > { %v10235_v24 = vpop.eup %10234 }
 0xcd8   : > { %v13057_v52 = vmul.f32 %v10235_v24, %v5779_v50  ;;  %v5798_v50 = vsel %vm2329_vm2, %v12974_v63, 0.0  ;;  %v5781_v63 = vld [vmem:[%s14396_s13 + $0x28] sm:$0xff] }
 0xcdd   : > { %5363 = vperm.xlu1 %9947, %v13025_v15  }
 0xce1   : > { %5358 = vperm.xlu1 %9947, %v13033_v22  }
 0xce2   : > { %5796 = vadd.xlane.f32.xlu0 %v5795_v6 }
 0xce5   : > { %5864 = vperm.xlu1 %9947, %v13041_v10  }
 0xcf8   : > { %5834 = vperm.xlu0 %9946, %v13047_v18  }
 0xd17   : > { %5793 = vadd.xlane.f32.xlu0 %v5792_v60  ;;  %v5757_v60 = vsub.f32 %v12808_v45, %v12897_v7 }
 0xd2c   : > { %v5304_v40 = vpop.xlane.xlu1 %5303 }
 0xd2d   : > { %v5320_v27 = vadd.f32 %v5304_v40, %v12924_v49  ;;  %5849 = vperm.xlu0 %9946, %v13057_v52   ;;  %v5770_v40 = vmul.f32 1.442695, %v5757_v60 }
 0xd2f   : > { %v5506_v37 = vmul.f32 3.0, %v5320_v27 }
 0xd31   : > { %10236 = vrcp.f32 %v5506_v37 }
 0xd35   : > { %v5310_v23 = vpop.xlane.xlu1 %5309 }
 0xd36   : > { %v5322_v35 = vadd.f32 %v5310_v23, %v12882_v5 }
 0xd38   : > { %v5508_v48 = vmul.f32 3.0, %v5322_v35 }
 0xd39   : > { %v13061_v17 = vpop.xlane.xlu1 %5306 }
 0xd3d   : > { %v13063_v30 = vpop.xlane.xlu1 %5315 }
 0xd3e   : > { %v10237_v29 = vpop.eup %10236 }
 0xd3f   : > { %5536 = vperm.xlu1 %9947, %v10237_v29  }
 0xd41   : > { %v13065_v46 = vpop.xlane.xlu1 %5312 }
 0xd45   : > { %v5301_v25 = vpop.xlane.xlu1 %5300 }
 0xd46   : > { %v5319_v49 = vadd.f32 %v5301_v25, %v12942_v42 }
 0xd48   : > { %v5505_v21 = vmul.f32 3.0, %v5319_v49 }
 0xd4a   : > { %10238 = vrcp.f32 %v5505_v21  ;;  %v13123_v21 = vpop.permute.xlu0 %5353 }
 0xd4b   : > { %10240 = vpow2.f32 %v5764_v58 }
 0xd4c   : > { %5802 = vadd.xlane.f32.xlu0 %v5801_v61  ;;  %10242 = vrcp.f32 %v5508_v48 }
 0xd4d   : > { %10244 = vpow2.f32 %v5770_v40 }
 0xd4e   : > { %v13125_v58 = vpop.permute.xlu0 %5348 }
 0xd52   : > { %v13127_v61 = vpop.permute.xlu0 %5343 }
 0xd56   : > { %v13129_v48 = vpop.permute.xlu0 %5338 }
 0xd57   : > { %v10239_v33 = vpop.eup %10238 }
 0xd58   : > { %5531 = vperm.xlu1 %9947, %v10239_v33   ;;  %v10241_v6 = vpop.eup %10240  ;;  %v5756_v33 = vsub.f32 %v12803_v14, %v12910_v62 }
 0xd59   : > { %v10243_v9 = vpop.eup %10242  ;;  %v13076_v5 = vmul.f32 %v10241_v6, %v5778_v39 }
 0xd5a   : > { %v10245_v35 = vpop.eup %10244  ;;  %v13133_v6 = vpop.permute.xlu0 %5333  ;;  %v5768_v39 = vmul.f32 1.442695, %v5756_v33 }
 0xd5b   : > { %v13120_v49 = vmul.f32 %v10245_v35, %v5781_v63  ;;  %v5780_v35 = vld [vmem:[%s14396_s13 + $0x20] sm:$0xff] }
 0xd5c   : > { %5546 = vperm.xlu1 %9947, %v10243_v9   ;;  %v5807_v9 = vsel %vm2329_vm2, %v12990_v41, 0.0  ;;  %10246 = vpow2.f32 %v5768_v39 }
 0xd5e   : > { %v13137_v60 = vpop.permute.xlu0 %5328 }
 0xd5f   : > { %v13079_v32 = vpop.f32.mrf.mxu1 }
 0xd61   : > { %v13081_v42 = vpop.f32.mrf.mxu1 }
 0xd62   : > { %5844 = vperm.xlu0 %9946, %v13076_v5  }
 0xd67   : > { %v13083_v59 = vpop.f32.mrf.mxu1 }
 0xd69   : > { %v13085_v55 = vpop.f32.mrf.mxu1 }
 0xd71   : > { %v13087_v12 = vpop.f32.mrf.mxu1 }
 0xd73   : > { %v13089_v36 = vpop.f32.mrf.mxu1 }
 0xd77   : > { %v13091_v0 = vpop.f32.mrf.mxu1 }
 0xd79   : > { %v13093_v4 = vpop.f32.mrf.mxu1 }
 0xd7d   : > { %v13097_v31 = vpop.f32.mrf.mxu1 }
 0xd7f   : > { %v13099_v24 = vpop.f32.mrf.mxu1 }
 0xd81   : > { %5799 = vadd.xlane.f32.xlu0 %v5798_v50  ;;  %v13103_v27 = vpop.f32.mrf.mxu1  ;;  %v13139_v50 = vpop.permute.xlu0 %5839 }
 0xd83   : > { %v13105_v37 = vpop.f32.mrf.mxu1 }
 0xd85   : > { %v13107_v23 = vpop.f32.mrf.mxu1  ;;  %v13141_v40 = vpop.xlane.xlu0 %5796 }
 0xd87   : > { %v13109_v29 = vpop.f32.mrf.mxu1 }
 0xd89   : > { %v13111_v57 = vpop.f32.mrf.mxu1  ;;  %v13146_v14 = vpop.permute.xlu0 %5834 }
 0xd8b   : > { %v13113_v45 = vpop.f32.mrf.mxu1 }
 0xd8d   : > { %v13115_v7 = vpop.f32.mrf.mxu1 }
 0xd8f   : > { %v9713_v25 = vpop.f32.mrf.mxu1 }
 0xd90   : > { %v10247_v25 = vpop.eup %10246 }
 0xd91   : > { %v13148_v62 = vmul.f32 %v10247_v25, %v5780_v35  ;;  %v5804_v25 = vsel %vm2329_vm2, %v12988_v13, 0.0  ;;  %v5774_v35 = vmul.f32 1.442695, %v5759_v44  ;;  %v5813_v44 = vsel %vm2329_vm2, %v13004_v56, 0.0  ;;  %v5298_v13 = vpop.xlane.xlu1 %5297 }
 0xd92   : > { %v5323_v56 = vadd.f32 %v13065_v46, %v13033_v22 }
 0xd97   : > { %5859 = vperm.xlu0 %9946, %v13120_v49  }
 0xda0   : > { %v13151_v41 = vpop.xlane.xlu0 %5793 }
 0xda8   : > { %v13153_v63 = vpop.permute.xlu0 %5849 }
 0xdb6   : > { %5808 = vadd.xlane.f32.xlu0 %v5807_v9 }
 0xdcc   : > { %5854 = vperm.xlu0 %9946, %v13148_v62  }
 0xdd5   : > { %v5803_v33 = vpop.xlane.xlu0 %5802 }
 0xdd6   : > { %v5819_v9 = vadd.f32 %v5803_v33, %v13057_v52 }
 0xdd8   : > { %v6012_v39 = vmul.f32 3.0, %v5819_v9  ;;  %v5321_v9 = vadd.f32 %v13061_v17, %v12902_v11 }
 0xdda   : > { %10248 = vrcp.f32 %v6012_v39 }
 0xddb   : > { %10250 = vpow2.f32 %v5774_v35 }
 0xddd   : > { %v13166_v52 = vpop.permute.xlu0 %5844 }
 0xde7   : > { %v10249_v28 = vpop.eup %10248 }
 0xde8   : > { %6042 = vperm.xlu1 %9947, %v10249_v28   ;;  %v10251_v54 = vpop.eup %10250 }
 0xde9   : > { %v13163_v19 = vmul.f32 %v10251_v54, %v5783_v16  ;;  %v5810_v16 = vsel %vm2329_vm2, %v13000_v34, 0.0  ;;  %v5318_v54 = vadd.f32 %v5298_v13, %v12951_v26  ;;  %v5509_v34 = vmul.f32 3.0, %v5323_v56 }
 0xdeb   : > { %5805 = vadd.xlane.f32.xlu0 %v5804_v25  ;;  %v5504_v39 = vmul.f32 3.0, %v5318_v54  ;;  %v5324_v25 = vadd.f32 %v13063_v30, %v13025_v15 }
 0xded   : > { %v5510_v35 = vmul.f32 3.0, %v5324_v25 }
 0xe01   : > { %5869 = vperm.xlu0 %9946, %v13163_v19  }
 0xe0a   : > { %v5800_v33 = vpop.xlane.xlu0 %5799 }
 0xe0b   : > { %v5818_v28 = vadd.f32 %v5800_v33, %v13076_v5  ;;  %v5507_v5 = vmul.f32 3.0, %v5321_v9  ;;  %v13180_v33 = vpop.xlane.xlu1 %5294 }
 0xe0d   : > { %v6011_v20 = vmul.f32 3.0, %v5818_v28 }
 0xe0f   : > { %10252 = vrcp.f32 %v6011_v20  ;;  %v13182_v28 = vpop.xlane.xlu1 %6090 }
 0xe10   : > { %10254 = vrcp.f32 %v5504_v39 }
 0xe11   : > { %10256 = vrcp.f32 %v5507_v5  ;;  %v13195_v5 = vld [vmem:[#allocation2 + $0x10] ss:$0 sm:$0xff] }
 0xe12   : > { %10258 = vrcp.f32 %v5510_v35  ;;  %v13184_v11 = vpop.permute.xlu0 %5859  ;;  %v5369_v35 = vmul.f32 %v13127_v61, %v13195_v5 }
 0xe13   : > { %10260 = vrcp.f32 %v5509_v34  ;;  %v13186_v15 = vpop.xlane.xlu1 %6384 }
 0xe14   : > { %v5480_v56 = vadd.f32 %v13083_v59, %v5369_v35  ;;  %v5816_v59 = vadd.f32 %v13151_v41, %v13047_v18 }
 0xe1c   : > { %v10253_v38 = vpop.eup %10252 }
 0xe1d   : > { %6037 = vperm.xlu1 %9947, %v10253_v38   ;;  %v10255_v26 = vpop.eup %10254 }
 0xe1e   : > { %v10257_v17 = vpop.eup %10256 }
 0xe1f   : > { %v10259_v38 = vpop.eup %10258 }
 0xe20   : > { %5814 = vadd.xlane.f32.xlu0 %v5813_v44  ;;  %v10261_v46 = vpop.eup %10260  ;;  %v13189_v44 = vpop.permute.xlu1 %5363 }
 0xe24   : > { %5811 = vadd.xlane.f32.xlu0 %v5810_v16  ;;  %v13191_v13 = vpop.permute.xlu1 %5358 }
 0xe28   : > { %v13193_v54 = vpop.permute.xlu1 %5864 }
 0xe2c   : > { %v5537_v9 = vpop.permute.xlu1 %5536 }
 0xe30   : > { %v5532_v39 = vpop.permute.xlu1 %5531 }
 0xe34   : > { %v5547_v25 = vpop.permute.xlu1 %5546 }
 0xe3a   : > { %5526 = vperm.xlu0 %9946, %v10255_v26  }
 0xe3e   : > { %5541 = vperm.xlu0 %9946, %v10257_v17   ;;  %v5562_v17 = vmul.f32 %v5537_v9, %v5480_v56 }
 0xe3f   : > { %v5809_v30 = vpop.xlane.xlu0 %5808 }
 0xe40   : > { %v5821_v20 = vadd.f32 %v5809_v30, %v13120_v49  ;;  %v5875_v49 = vmul.f32 %v13153_v63, %v13195_v5  ;;  %v5817_v63 = vadd.f32 %v13141_v40, %v12983_v51  ;;  %v5874_v51 = vmul.f32 %v13166_v52, %v13195_v5 }
 0xe41   : > { %v5368_v40 = vmul.f32 %v13129_v48, %v13195_v5 }
 0xe42   : > { %v6014_v22 = vmul.f32 3.0, %v5821_v20  ;;  %5556 = vperm.xlu0 %9946, %v10259_v38   ;;  %v5986_v34 = vadd.f32 %v13103_v27, %v5875_v49  ;;  %v6010_v61 = vmul.f32 3.0, %v5817_v63  ;;  %v6009_v27 = vmul.f32 3.0, %v5816_v59 }
 0xe43   : > { %v5981_v18 = vadd.f32 %v13105_v37, %v5874_v51  ;;  %v5877_v59 = vmul.f32 %v13184_v11, %v13195_v5  ;;  %v5317_v11 = vadd.f32 %v13180_v33, %v12967_v8 }
 0xe44   : > { %10262 = vrcp.f32 %v6014_v22 }
 0xe46   : > { %5551 = vperm.xlu0 %9946, %v10261_v46  }
 0xe47   : > { %v5855_v38 = vpop.permute.xlu0 %5854 }
 0xe51   : > { %v10263_v16 = vpop.eup %10262 }
 0xe52   : > { %6052 = vperm.xlu0 %9946, %v10263_v16  }
 0xe63   : > { %v6043_v26 = vpop.permute.xlu1 %6042 }
 0xe64   : > { %v6068_v30 = vmul.f32 %v6043_v26, %v5986_v34 }
 0xe66   : > { %v13203_v20 = vadd.f32 %v6068_v30, %v5562_v17 }
 0xe68   : > { %6084 = vst [vmem:[#allocation2 + $0x70] sm:$0xff] %v13203_v20 }
 0xe74   : > { %v5806_v22 = vpop.xlane.xlu0 %5805 }
 0xe75   : > { %v5820_v46 = vadd.f32 %v5806_v22, %v13148_v62  ;;  %v5475_v62 = vadd.f32 %v13085_v55, %v5368_v40 }
 0xe77   : > { %v6013_v16 = vmul.f32 3.0, %v5820_v46  ;;  %v5561_v56 = vmul.f32 %v5532_v39, %v5475_v62  ;;  %v6206_v62 = vsel %vm1829_vm1, %v13115_v7, -inf }
 0xe79   : > { %10264 = vrcp.f32 %v6013_v16 }
 0xe7a   : > { %10266 = vrcp.f32 %v6010_v61 }
 0xe7b   : > { %10268 = vrcp.f32 %v6009_v27 }
 0xe7c   : > { %v13220_v17 = vpop.permute.xlu0 %5869 }
 0xe86   : > { %v10265_v9 = vpop.eup %10264 }
 0xe87   : > { %6047 = vperm.xlu1 %9947, %v10265_v9   ;;  %v10267_v49 = vpop.eup %10266 }
 0xe88   : > { %v10269_v35 = vpop.eup %10268 }
 0xe8b   : > { %6032 = vperm.xlu1 %9947, %v10267_v49  }
 0xe8f   : > { %6027 = vperm.xlu1 %9947, %v10269_v35  }
 0xe98   : > { %v6038_v41 = vpop.permute.xlu1 %6037 }
 0xe99   : > { %v6067_v34 = vmul.f32 %v6038_v41, %v5981_v18  ;;  %v5503_v18 = vmul.f32 3.0, %v5317_v11  ;;  %v5370_v41 = vmul.f32 %v13125_v58, %v13195_v5 }
 0xe9b   : > { %v13217_v26 = vadd.f32 %v6067_v34, %v5561_v56  ;;  %v5485_v8 = vadd.f32 %v13089_v36, %v5370_v41  ;;  %v5367_v34 = vmul.f32 %v13133_v6, %v13195_v5  ;;  %v14585_v6 = vld [vmem:[#allocation77_spill] sm:$0xff] }
 0xe9d   : > { %6083 = vst [vmem:[#allocation2 + $0x50] sm:$0xff] %v13217_v26 }
 0xea9   : > { %v5815_v30 = vpop.xlane.xlu0 %5814 }
 0xeaa   : > { %v5823_v22 = vadd.f32 %v5815_v30, %v13163_v19  ;;  %v5371_v19 = vmul.f32 %v13123_v21, %v13195_v5 }
 0xeac   : > { %v6016_v52 = vmul.f32 3.0, %v5823_v22  ;;  %v5490_v9 = vadd.f32 %v13087_v12, %v5371_v19  ;;  %v13239_v12 = vmax.f32 %v13186_v15, %v13182_v28  ;;  %v5873_v15 = vmul.f32 %v13139_v50, %v13195_v5  ;;  %v6390_v50 = vld [vmem:[%s14392_s9] sm:$0xff] }
 0xead   : > { %v5812_v63 = vpop.xlane.xlu0 %5811  ;;  %v5879_v19 = vmul.f32 %v13220_v17, %v13195_v5 }
 0xeae   : > { %10270 = vrcp.f32 %v6016_v52  ;;  %v5822_v48 = vadd.f32 %v5812_v63, %v13041_v10  ;;  %v5996_v10 = vadd.f32 %v13107_v23, %v5877_v59  ;;  %v5564_v35 = vmul.f32 %v5547_v25, %v5490_v9 }
 0xeaf   : > { %v6387_v23 = vsub.f32 %v12786_v1, %v13239_v12  ;;  %v5876_v25 = vmul.f32 %v5855_v38, %v13195_v5  ;;  %v5470_v38 = vadd.f32 %v13079_v32, %v5367_v34  ;;  %v5976_v52 = vadd.f32 %v13097_v31, %v5873_v15  ;;  %v6104_v15 = vld [vmem:[%s14390_s7] sm:$0xff] }
 0xeb0   : > { %v6015_v55 = vmul.f32 3.0, %v5822_v48  ;;  %v5373_v9 = vmul.f32 %v13189_v44, %v13195_v5 }
 0xeb1   : > { %v6388_v56 = vmul.f32 1.442695, %v6387_v23  ;;  %v5991_v33 = vadd.f32 %v13109_v29, %v5876_v25 }
 0xeb2   : > { %10272 = vrcp.f32 %v6015_v55  ;;  %v6096_v55 = vrot.slane %v14585_v6, %v10811_v53 }
 0xeb3   : > { %10274 = vrcp.f32 %v5503_v18 }
 0xeb4   : > { %10276 = vpow2.f32 %v6388_v56 }
 0xeb5   : > { %v5527_v37 = vpop.permute.xlu0 %5526 }
 0xeb6   : > { %v5560_v48 = vmul.f32 %v5527_v37, %v5470_v38 }
 0xeb9   : > { %v5542_v39 = vpop.permute.xlu0 %5541 }
 0xeba   : > { %v5563_v22 = vmul.f32 %v5542_v39, %v5485_v8  ;;  %v6097_v39 = vmul.f32 %v6096_v55, %v14583_v47  ;;  %v6006_v47 = vadd.f32 %v13111_v57, %v5879_v19 }
 0xebb   : > { %v10271_v46 = vpop.eup %10270 }
 0xebc   : > { %6062 = vperm.xlu0 %9946, %v10271_v46  }
 0xebd   : > { %v5557_v61 = vpop.permute.xlu0 %5556 }
 0xebf   : > { %v10273_v16 = vpop.eup %10272 }
 0xec0   : > { %6057 = vperm.xlu0 %9946, %v10273_v16   ;;  %v10275_v21 = vpop.eup %10274  ;;  %v14586_v16 = vld [vmem:[#allocation55_spill] sm:$0xff] }
 0xec1   : > { %v5552_v27 = vpop.permute.xlu0 %5551  ;;  %v10277_v46 = vpop.eup %10276  ;;  %v6498_v37 = vmul.f32 %v12632_v2, %v14586_v16  ;;  %v5878_v2 = vmul.f32 %v13193_v54, %v13195_v5  ;;  %v5366_v54 = vmul.f32 %v13137_v60, %v13195_v5 }
 0xec2   : > { %v6391_v32 = vmul.f32 %v10277_v46, %v6390_v50 }
 0xec3   : > { %v6499_v59 = vsel %vm3149_vm3, %v6498_v37, 0.0  ;;  %v6001_v17 = vadd.f32 %v13113_v45, %v5878_v2 }
 0xec4   : > { %v6397_v31 = vsel %vm2329_vm2, %v6391_v32, 0.0 }
 0xecd   : > { %v6053_v49 = vpop.permute.xlu0 %6052 }
 0xece   : > { %v6070_v51 = vmul.f32 %v6053_v49, %v5996_v10  ;;  %v5500_v10 = vadd.f32 %v13091_v0, %v5373_v9 }
 0xed0   : > { %v13230_v40 = vadd.f32 %v6070_v51, %v5564_v35  ;;  %v5372_v35 = vmul.f32 %v13191_v13, %v13195_v5  ;;  %v5566_v51 = vmul.f32 %v5557_v61, %v5500_v10 }
 0xed2   : > { %6086 = vst [vmem:[#allocation2 + $0xb0] sm:$0xff] %v13230_v40  ;;  %v5495_v11 = vadd.f32 %v13093_v4, %v5372_v35  ;;  %v5872_v4 = vmul.f32 %v13146_v14, %v13195_v5 }
 0xed4   : > { %v5565_v44 = vmul.f32 %v5552_v27, %v5495_v11  ;;  %v5465_v27 = vadd.f32 %v13081_v42, %v5366_v54  ;;  %v5971_v41 = vadd.f32 %v13099_v24, %v5872_v4  ;;  %v6392_v24 = vsub.f32 %v13182_v28, %v13239_v12  ;;  %v14589_v4 = vld [vmem:[#allocation58_spill] sm:$0xff] }
 0xedf   : > { %6207 = vmax.xlane.f32.xlu0 %v6206_v62 }
 0xef5   : > { %5521 = vperm.xlu0 %9946, %v10275_v21  }
 0xf02   : > { %v6048_v30 = vpop.permute.xlu1 %6047 }
 0xf03   : > { %v6069_v1 = vmul.f32 %v6048_v30, %v5991_v33 }
 0xf05   : > { %v6077_v58 = vadd.f32 %v6069_v1, %v5563_v22  ;;  %v6109_v22 = vld [vmem:[%s14397_s14] sm:$0xff] }
 0xf06   : > { %v6033_v63 = vpop.permute.xlu1 %6032 }
 0xf07   : > { %6085 = vst [vmem:[#allocation2 + $0x90] sm:$0xff] %v6077_v58  ;;  %v6066_v36 = vmul.f32 %v6033_v63, %v5976_v52 }
 0xf09   : > { %v6074_v29 = vadd.f32 %v6066_v36, %v5560_v48 }
 0xf0a   : > { %v6028_v61 = vpop.permute.xlu1 %6027 }
 0xf0b   : > { %6082 = vst [vmem:[#allocation2 + $0x30] sm:$0xff] %v6074_v29  ;;  %v6065_v8 = vmul.f32 %v6028_v61, %v5971_v41  ;;  %v14590_v61 = vld [vmem:[#allocation42_spill] sm:$0xff] }
 0xf14   : > { %6098 = vadd.xlane.f32.xlu0 %v6097_v39 }
 0xf18   : > { %6398 = vadd.xlane.f32.xlu0 %v6397_v31 }
 0xf1c   : > { %6500 = vadd.xlane.f32.xlu0 %v6499_v59 }
 0xf37   : > { %v6063_v49 = vpop.permute.xlu0 %6062 }
 0xf38   : > { %v6072_v62 = vmul.f32 %v6063_v49, %v6006_v47 }
 0xf3a   : > { %v6080_v18 = vadd.f32 %v6072_v62, %v5566_v51 }
 0xf3b   : > { %v6058_v21 = vpop.permute.xlu0 %6057 }
 0xf3c   : > { %6088 = vst [vmem:[#allocation2 + $0xf0] sm:$0xff] %v6080_v18  ;;  %v6071_v0 = vmul.f32 %v6058_v21, %v6001_v17 }
 0xf3e   : > { %v6079_v23 = vadd.f32 %v6071_v0, %v5565_v44  ;;  %v14587_v0 = vld [vmem:[#allocation12_spill] sm:$0xff] }
 0xf40   : > { %6087 = vst [vmem:[#allocation2 + $0xd0] sm:$0xff] %v6079_v23 }
 0xf68   : > { %v6208_v57 = vpop.xlane.xlu0 %6207 }
 0xf69   : > { %v13277_v25 = vmax.f32 %v6208_v57, %v13182_v28  ;;  %v10466_v57 = vld [vmem:[%s14461_s28] sm:$0xff] }
 0xf6b   : > { %v6210_v13 = vsub.f32 %v13115_v7, %v13277_v25  ;;  %v6213_v7 = vld [vmem:[%s14391_s8] sm:$0xff]  ;;  %v6215_v36 = vsub.f32 %v13182_v28, %v13277_v25 }
 0xf6d   : > { %v6211_v45 = vmul.f32 1.442695, %v6210_v13  ;;  %v14588_v13 = vsub.s32 3, %v14587_v0 }
 0xf6f   : > { %10278 = vpow2.f32 %v6211_v45  ;;  %v13340_v54 = vrot.slane %v10466_v57, %v14588_v13 }
 0xf70   : > { %v5522_v56 = vpop.permute.xlu0 %5521 }
 0xf71   : > { %v5559_v33 = vmul.f32 %v5522_v56, %v5465_v27  ;;  %v13348_v27 = vadd.f32 %v14590_v61, %v13340_v54  ;;  %v14591_v56 = vld [vmem:[#allocation44_spill] sm:$0xff] }
 0xf73   : > { %v6073_v34 = vadd.f32 %v6065_v8, %v5559_v33  ;;  %v13356_v8 = vadd.f32 %v14591_v56, %v13340_v54  ;;  %v14605_v56 = vld [vmem:[#allocation52_spill] sm:$0xff] }
 0xf75   : > { %6081 = vst [vmem:[#allocation2 + $0x10] sm:$0xff] %v6073_v34 }
 0xf7c   : > { %v10279_v60 = vpop.eup %10278 }
 0xf7d   : > { %v6214_v30 = vmul.f32 %v10279_v60, %v6213_v7 }
 0xf7f   : > { %9717 = vmatmul.mubr.msk.f32.vlgmr.msra.gmra.mxu1 %vm1829_vm1, %v6214_v30  ;;  %v6220_v46 = vsel %vm1829_vm1, %v6214_v30, 0.0  ;;  %v14593_v30 = vld [vmem:[#allocation38_spill] sm:$0xff] }
 0xf80   : > { %9739 = vmatpush3.msra.mxu1 %v6080_v18  ;;  %9754 = vmatprep.mubr.msk.f32.mxu1 %vm10543_vm0, %v14484_v43 }
 0xf81   : > { %9740 = vmatprep.subr.mxu1 %v14484_v43 }
 0xf82   : > { %9741 = vmatpush3.msra.mxu1 %v6079_v23  ;;  %v875_v23 = vsub.s32 7, %v14587_v0  ;;  %v14602_v0 = vld [vmem:[#allocation48_spill] sm:$0xff] }
 0xf83   : > { %9742 = vmatprep.subr.mxu1 %v14484_v43 }
 0xf84   : > { %9743 = vmatpush3.msra.mxu1 %v13230_v40  ;;  %v13336_v25 = vrot.slane %v10466_v57, %v875_v23  ;;  %v1129_v23 = vadd.f32 %v14602_v0, %v13340_v54  ;;  %v14603_v57 = vld [vmem:[#allocation50_spill] sm:$0xff] }
 0xf85   : > { %9744 = vmatprep.subr.mxu1 %v14484_v43  ;;  %v13414_v13 = vadd.f32 %v14603_v57, %v13340_v54  ;;  %v14611_v0 = vld [vmem:[#allocation22_spill] sm:$0xff] }
 0xf86   : > { %9745 = vmatpush3.msra.mxu1 %v6077_v58  ;;  %v6395_v58 = vld [vmem:[%s14399_s16] sm:$0xff]  ;;  %v13344_v45 = vadd.f32 %v14589_v4, %v13336_v25 }
 0xf87   : > { %9746 = vmatprep.subr.mxu1 %v14484_v43  ;;  %v14604_v4 = vld [vmem:[#allocation67_spill] sm:$0xff] }
 0xf88   : > { %9747 = vmatpush3.msra.mxu1 %v13203_v20  ;;  %v13352_v41 = vrot.slane %v13344_v45, %v10811_v53  ;;  %v1373_v61 = vadd.f32 %v14604_v4, %v13336_v25 }
 0xf89   : > { %9748 = vmatprep.subr.mxu1 %v14484_v43 }
 0xf8a   : > { %9749 = vmatpush3.msra.mxu1 %v13217_v26  ;;  %v6727_v33 = vmul.f32 %v13352_v41, %v13348_v27  ;;  %v6728_v60 = vmul.f32 %v13352_v41, %v13356_v8 }
 0xf8b   : > { %9750 = vmatprep.subr.mxu1 %v14484_v43 }
 0xf8c   : > { %9751 = vmatpush3.msra.mxu1 %v6074_v29  ;;  %v6216_v29 = vmul.f32 1.442695, %v6215_v36 }
 0xf8d   : > { %9752 = vmatprep.subr.mxu1 %v14484_v43 }
 0xf8e   : > { %9753 = vmatpush3.msra.mxu1 %v6073_v34  ;;  %v14592_v34 = vld [vmem:[#allocation46_spill] sm:$0xff] }
 0xf8f   : > { %9755 = vmatmul.mubr.msk.f32.vlgmr.msra.gmra.mxu1 %vm2329_vm2, %v6391_v32  ;;  %9757 = vmatprep.subr.mxu1 %v14484_v43  ;;  %v6218_v32 = vld [vmem:[%s14398_s15] sm:$0xff]  ;;  %v13362_v7 = vadd.f32 %v14592_v34, %v13340_v54  ;;  %v14606_v34 = vld [vmem:[#allocation65_spill] sm:$0xff] }
 0xf90   : > { %9758 = vmatpush3.xpose.msra.mxu1 %v14574_v3  ;;  %9759 = vmatprep.mubr.msk.f32.mxu1 %vm10543_vm0, %v14484_v43  ;;  %v6393_v3 = vmul.f32 1.442695, %v6392_v24 }
 0xf91   : > { %9762 = vmatprep.subr.mxu1 %v14484_v43  ;;  %v6729_v24 = vmul.f32 %v13352_v41, %v13362_v7 }
 0xf93   : > { %9760 = vmatmul.mubr.f32.vlgmr.msra.gmra.mxu1 %v14586_v16 }
 0xf94   : > { %9764 = vmatprep.mubr.msk.f32.mxu1 %vm10543_vm0, %v14484_v43 }
 0xf9d   : > { %v6099_v42 = vpop.xlane.xlu0 %6098 }
 0xf9e   : > { %v6100_v14 = vmax.f32 %v6099_v42, %v13182_v28 }
 0xfa0   : > { %v6101_v5 = vsub.f32 %v6099_v42, %v6100_v14  ;;  %v6106_v20 = vsub.f32 %v13182_v28, %v6100_v14  ;;  %v13368_v42 = vadd.f32 %v14593_v30, %v13340_v54  ;;  %v14594_v14 = vld [vmem:[#allocation40_spill] sm:$0xff]  ;;  %v14607_v30 = vld [vmem:[#allocation63_spill] sm:$0xff] }
 0xfa1   : > { %v6399_v28 = vpop.xlane.xlu0 %6398 }
 0xfa2   : > { %v6102_v26 = vmul.f32 1.442695, %v6101_v5  ;;  %v6107_v40 = vmul.f32 1.442695, %v6106_v20  ;;  %v13374_v5 = vadd.f32 %v14594_v14, %v13340_v54  ;;  %v6725_v20 = vmul.f32 %v13352_v41, %v13368_v42  ;;  %v14608_v14 = vld [vmem:[#allocation61_spill] sm:$0xff] }
 0xfa4   : > { %10280 = vpow2.f32 %v6102_v26 }
 0xfa5   : > { %10282 = vpow2.f32 %v6107_v40 }
 0xfa6   : > { %10284 = vpow2.f32 %v6393_v3  ;;  %v6726_v3 = vmul.f32 %v13352_v41, %v13374_v5 }
 0xfa7   : > { %10286 = vpow2.f32 %v6216_v29 }
 0xfb1   : > { %v10281_v12 = vpop.eup %10280 }
 0xfb2   : > { %v10283_v1 = vpop.eup %10282  ;;  %v6105_v38 = vmul.f32 %v10281_v12, %v6104_v15  ;;  %v13380_v15 = vpop.xlane.xlu0 %6500 }
 0xfb3   : > { %v10285_v52 = vpop.eup %10284  ;;  %v6110_v63 = vmul.f32 %v10283_v1, %v6109_v22  ;;  %14595 = vst [vmem:[#allocation18_spill] sm:$0xff] %v13380_v15 }
 0xfb4   : > { %6116 = vperm.xlu0 %9946, %v6105_v38   ;;  %v6396_v48 = vmul.f32 %v10285_v52, %v6395_v58  ;;  %v10287_v39 = vpop.eup %10286  ;;  %v6092_v58 = vld [vmem:[#allocation2 + $0x10] ss:$0 sm:$0xff] }
 0xfb5   : > { %6122 = vperm.xlu1 %9947, %v6110_v63   ;;  %v6112_v55 = vadd.f32 %v6110_v63, %v6105_v38  ;;  %v6219_v31 = vmul.f32 %v10287_v39, %v6218_v32  ;;  %v6113_v63 = vld [vmem:[#allocation2 + $0x130] ss:$0 sm:$0xff] }
 0xfb6   : > { %v6400_v10 = vadd.f32 %v6399_v28, %v6396_v48 }
 0xfb7   : > { %v6127_v50 = vmul.f32 3.0, %v6112_v55 }
 0xfb8   : > { %6411 = vperm.xlu0 %9946, %v6396_v48   ;;  %v6488_v35 = vmul.f32 3.0, %v6400_v10 }
 0xfb9   : > { %10288 = vrcp.f32 %v6127_v50 }
 0xfba   : > { %10290 = vrcp.f32 %v6488_v35  ;;  %v6620_v35 = vld [vmem:[%s14394_s11] sm:$0x1] }
 0xfc6   : > { %v10289_v37 = vpop.eup %10288 }
 0xfc7   : > { %v10291_v18 = vpop.eup %10290 }
 0xfd9   : > { %6221 = vadd.xlane.f32.xlu1 %v6220_v46 }
 0xfea   : > { %6227 = vperm.xlu1 %9947, %v6219_v31  }
 0xfee   : > { %6131 = vperm.xlu1 %9947, %v10289_v37  }
0x102f   : > { %v6117_v52 = vpop.permute.xlu0 %6116 }
0x1030   : > { %v6123_v62 = vpop.permute.xlu1 %6122  ;;  %v6119_v36 = vmul.f32 %v6117_v52, %v6113_v63  ;;  %v6730_v52 = vmul.f32 %v13352_v41, %v1129_v23 }
0x1031   : > { %v6125_v48 = vmul.f32 %v6123_v62, %v6092_v58 }
0x1033   : > { %v6412_v55 = vpop.permute.xlu0 %6411  ;;  %v6126_v50 = vadd.f32 %v6125_v48, %v6119_v36  ;;  %v6731_v36 = vmul.f32 %v13352_v41, %v13414_v13 }
0x1034   : > { %v6414_v46 = vmul.f32 %v6412_v55, %v6092_v58 }
0x103f   : > { %v6300_v59 = vpop.f32.mrf.mxu1 }
0x1041   : > { %v9718_v19 = vpop.f32.mrf.mxu1 }
0x104f   : > { %v6484_v9 = vpop.f32.mrf.mxu1 }
0x1050   : > { %v6485_v37 = vadd.f32 %v6484_v9, %v6414_v46 }
0x1051   : > { %v9756_v47 = vpop.f32.mrf.mxu1 }
0x1053   : > { %v6609_v49 = vpop.f32.mrf.mxu1 }
0x1054   : > { %v6613_v2 = vsel %vm3264_vm4, %v6609_v49, -inf }
0x1055   : > { %v9761_v51 = vpop.f32.mrf.mxu1  ;;  %6614 = vmax.xlane.f32.xlu1 %v6613_v2 }
0x1056   : > { %v14597_v51 = vld [vmem:[#allocation73_spill] sm:$0xff] }
0x1057   : > { %v13391_v62 = vadd.f32 %v14597_v51, %v13336_v25 }
0x1062   : > { %v6222_v11 = vpop.xlane.xlu1 %6221 }
0x1063   : > { %v6223_v17 = vadd.f32 %v6222_v11, %v6219_v31 }
0x1065   : > { %v6304_v21 = vmul.f32 3.0, %v6223_v17  ;;  %v14600_v17 = vld [vmem:[#allocation71_spill] sm:$0xff] }
0x1066   : > { %6492 = vperm.xlu1 %9947, %v10291_v18   ;;  %v6228_v26 = vpop.permute.xlu1 %6227  ;;  %v1385_v18 = vadd.f32 %v14600_v17, %v13336_v25 }
0x1067   : > { %10292 = vrcp.f32 %v6304_v21  ;;  %v6230_v29 = vmul.f32 %v6228_v26, %v6092_v58  ;;  %v14601_v21 = vld [vmem:[#allocation69_spill] sm:$0xff] }
0x1069   : > { %v6301_v39 = vadd.f32 %v6300_v59, %v6230_v29  ;;  %v14599_v59 = vld [vmem:[#allocation72_spill] sm:$0xff] }
0x106a   : > { %v6132_v40 = vpop.permute.xlu1 %6131  ;;  %v1391_v9 = vadd.f32 %v14599_v59, %v13336_v25 }
0x106b   : > { %v6134_v19 = vmul.f32 %v6132_v40, %v6126_v50 }
0x1074   : > { %v10293_v44 = vpop.eup %10292 }
0x1075   : > { %6308 = vperm.xlu0 %9946, %v10293_v44   ;;  %v1379_v44 = vadd.f32 %v14601_v21, %v13336_v25 }
0x108a   : > { %6737 = vadd.xlane.f32.xlu1 %v6727_v33  ;;  %v13421_v33 = vadd.f32 %v14605_v56, %v13340_v54 }
0x108c   : > { %v6732_v46 = vmul.f32 %v13352_v41, %v13421_v33 }
0x108e   : > { %6739 = vadd.xlane.f32.xlu1 %v6728_v60  ;;  %v1367_v60 = vadd.f32 %v14606_v34, %v13336_v25 }
0x1092   : > { %6741 = vadd.xlane.f32.xlu1 %v6729_v24  ;;  %v1361_v24 = vadd.f32 %v14607_v30, %v13336_v25 }
0x1094   : > { %6733 = vadd.xlane.f32.xlu0 %v6725_v20  ;;  %v1355_v20 = vadd.f32 %v14608_v14, %v13336_v25 }
0x1098   : > { %6735 = vadd.xlane.f32.xlu0 %v6726_v3 }
0x10de   : > { %v6615_v22 = vpop.xlane.xlu1 %6614 }
0x10df   : > { %v13383_v12 = vmax.f32 %v6615_v22, %v13380_v15 }
0x10e1   : > { %14596 = vst [vmem:[#allocation19_spill] sm:$0xff] %v13383_v12  ;;  %v6617_v1 = vsub.f32 %v6609_v49, %v13383_v12 }
0x10e2   : > { %v6493_v32 = vpop.permute.xlu1 %6492 }
0x10e3   : > { %v6618_v38 = vmul.f32 1.442695, %v6617_v1  ;;  %v6495_v47 = vmul.f32 %v6493_v32, %v6485_v37 }
0x10e5   : > { %10294 = vpow2.f32 %v6618_v38 }
0x10f0   : > { %v6309_v31 = vpop.permute.xlu0 %6308 }
0x10f1   : > { %v6311_v28 = vmul.f32 %v6309_v31, %v6301_v39 }
0x10f2   : > { %v10295_v10 = vpop.eup %10294 }
0x10f3   : > { %v6312_v49 = vadd.f32 %v6311_v28, %v6134_v19  ;;  %v13393_v11 = vmul.f32 %v10295_v10, %v6620_v35 }
0x10f5   : > { %v6496_v2 = vadd.f32 %v6495_v47, %v6312_v49  ;;  %14598 = vst [vmem:[#allocation28_spill] sm:$0xff] %v13393_v11 }
0x10f7   : > { %6497 = vst [vmem:[#allocation2 + $0x110] sm:$0xff] %v6496_v2  ;;  %9763 = vmatpush3.msra.mxu1 %v6496_v2 }
0x10f8   : > { %9765 = vmatmul.mubr.msk.f32.vlgmr.msra.gmra.mxu1 %vm1829_vm1, %v13393_v11  ;;  %9767 = vmatprep.subr.mxu1 %v13391_v62 }
0x10f9   : > { %9768 = vmatpush3.xpose.msra.mxu1 %v13391_v62  ;;  %9769 = vmatprep.mubr.f32.mxu1 %v13368_v42 }
0x10fa   : > { %9795 = vmatprep.subr.mxu1 %v1391_v9 }
0x10fc   : > { %9770 = vmatmul.mubr.f32.vlgmr.msra.gmra.mxu1 %v13374_v5 }
0x10fd   : > { %9772 = vmatprep.mubr.f32.mxu1 %v13348_v27  ;;  %9796 = vmatpush3.xpose.msra.mxu1 %v1391_v9 }
0x10fe   : > { %9797 = vmatprep.subr.mxu1 %v1385_v18 }
0x1100   : > { %9773 = vmatmul.mubr.f32.gmra.mxu1 %v13356_v8 }
0x1101   : > { %9775 = vmatprep.mubr.f32.mxu1 %v13362_v7  ;;  %9798 = vmatpush3.xpose.msra.mxu1 %v1385_v18 }
0x1102   : > { %9799 = vmatprep.subr.mxu1 %v1379_v44 }
0x1104   : > { %9776 = vmatmul.mubr.f32.gmra.mxu1 %v1129_v23 }
0x1105   : > { %9778 = vmatprep.mubr.f32.mxu1 %v13414_v13  ;;  %9800 = vmatpush3.xpose.msra.mxu1 %v1379_v44 }
0x1106   : > { %9801 = vmatprep.subr.mxu1 %v1373_v61 }
0x1108   : > { %9779 = vmatmul.mubr.f32.gmra.mxu1 %v13421_v33 }
0x1109   : > { %9802 = vmatpush3.xpose.msra.mxu1 %v1373_v61  ;;  %9811 = vmatprep.mubr.f32.mxu1 %v13368_v42 }
0x110a   : > { %9803 = vmatprep.subr.mxu1 %v1367_v60 }
0x110d   : > { %9804 = vmatpush3.xpose.msra.mxu1 %v1367_v60 }
0x110e   : > { %9805 = vmatprep.subr.mxu1 %v1361_v24 }
0x1111   : > { %9806 = vmatpush3.xpose.msra.mxu1 %v1361_v24 }
0x1112   : > { %9807 = vmatprep.subr.mxu1 %v1355_v20 }
0x1115   : > { %9808 = vmatpush3.xpose.msra.mxu1 %v1355_v20 }
0x1116   : > { %9809 = vmatprep.subr.mxu1 %v13344_v45 }
0x1119   : > { %9810 = vmatpush3.xpose.msra.mxu1 %v13344_v45 }
0x111a   : > { %9861 = vmatprep.subr.mxu1 %v14484_v43 }
0x111c   : > { %9812 = vmatmul.mubr.f32.vlgmr.msra.gmra.mxu1 %v13374_v5 }
0x111d   : > { %9814 = vmatprep.mubr.f32.mxu1 %v13348_v27  ;;  %9862 = vmatpush3.xpose.msra.mxu1 %v1391_v9  ;;  %v14609_v27 = vld [vmem:[#allocation54_spill] sm:$0xff]  ;;  %v13537_v30 = vpop.xlane.xlu0 %6733 }
0x111e   : > { %9863 = vmatprep.subr.mxu1 %v14484_v43 }
0x1120   : > { %9815 = vmatmul.mubr.f32.gmra.mxu1 %v13356_v8  ;;  %v13452_v8 = vadd.f32 %v14609_v27, %v13340_v54 }
0x1121   : > { %9817 = vmatprep.mubr.f32.mxu1 %v13362_v7  ;;  %9864 = vmatpush3.xpose.msra.mxu1 %v1385_v18  ;;  %v13541_v14 = vpop.xlane.xlu0 %6735 }
0x1122   : > { %9865 = vmatprep.subr.mxu1 %v14484_v43 }
0x1124   : > { %9818 = vmatmul.mubr.f32.gmra.mxu1 %v1129_v23  ;;  %v14612_v23 = vld [vmem:[#allocation33_spill] sm:$0xff] }
0x1125   : > { %9820 = vmatprep.mubr.f32.mxu1 %v13414_v13  ;;  %9866 = vmatpush3.xpose.msra.mxu1 %v1379_v44  ;;  %v3154_v57 = vmul.f32 %v14612_v23, %v14611_v0 }
0x1126   : > { %9867 = vmatprep.subr.mxu1 %v14484_v43 }
0x1127   : > { %v3155_v4 = vsel %vm3149_vm3, %v3154_v57, 0.0 }
0x1128   : > { %9821 = vmatmul.mubr.f32.gmra.mxu1 %v13421_v33 }
0x1129   : > { %9868 = vmatpush3.xpose.msra.mxu1 %v1373_v61  ;;  %9877 = vmatprep.mubr.msk.f32.mxu1 %vm10543_vm0, %v14484_v43  ;;  %v7763_v61 = vmul.f32 %v13352_v41, %v13452_v8 }
0x112a   : > { %9869 = vmatprep.subr.mxu1 %v14484_v43 }
0x112d   : > { %9870 = vmatpush3.xpose.msra.mxu1 %v1367_v60  ;;  %v13535_v60 = vpop.xlane.xlu1 %6737 }
0x112e   : > { %9871 = vmatprep.subr.mxu1 %v14484_v43 }
0x1131   : > { %9872 = vmatpush3.xpose.msra.mxu1 %v1361_v24  ;;  %v13539_v24 = vpop.xlane.xlu1 %6739 }
0x1132   : > { %9873 = vmatprep.subr.mxu1 %v14484_v43 }
0x1135   : > { %9874 = vmatpush3.xpose.msra.mxu1 %v1355_v20  ;;  %v13543_v20 = vpop.xlane.xlu1 %6741 }
0x1136   : > { %9875 = vmatprep.subr.mxu1 %v14484_v43 }
0x1139   : > { %9876 = vmatpush3.xpose.msra.mxu1 %v13344_v45 }
0x113c   : > { %9878 = vmatmul.mubr.f32.vlgmr.msra.gmra.mxu1 %v13452_v8 }
0x11b8   : > { %v13455_v7 = vpop.f32.mrf.mxu1 }
0x11b9   : > { %14610 = vst [vmem:[#allocation20_spill] sm:$0xff] %v13455_v7 }
0x11ba   : > { %v9766_v42 = vpop.f32.mrf.mxu1 }
0x11bc   : > { %v13457_v5 = vpop.f32.mrf.mxu1 }
0x11bd   : > { %v6858_v3 = vsel %vm1829_vm1, %v13457_v5, -inf }
0x11be   : > { %6859 = vmax.xlane.f32.xlu0 %v6858_v3  ;;  %v13461_v26 = vpop.f32.mrf.mxu1 }
0x11bf   : > { %v6855_v40 = vsel %vm1829_vm1, %v13461_v26, -inf }
0x11c0   : > { %6856 = vmax.xlane.f32.xlu1 %v6855_v40  ;;  %v13465_v22 = vpop.f32.mrf.mxu1 }
0x11c1   : > { %v6864_v1 = vsel %vm1829_vm1, %v13465_v22, -inf }
0x11c2   : > { %6865 = vmax.xlane.f32.xlu0 %v6864_v1  ;;  %v13469_v38 = vpop.f32.mrf.mxu1 }
0x11c3   : > { %v6861_v63 = vsel %vm1829_vm1, %v13469_v38, -inf }
0x11c4   : > { %6743 = vadd.xlane.f32.xlu1 %v6730_v52  ;;  %v13472_v58 = vpop.f32.mrf.mxu1 }
0x11c5   : > { %v6870_v29 = vsel %vm1829_vm1, %v13472_v58, -inf }
0x11c6   : > { %6862 = vmax.xlane.f32.xlu0 %v6861_v63  ;;  %v13476_v48 = vpop.f32.mrf.mxu1 }
0x11c7   : > { %v6867_v50 = vsel %vm1829_vm1, %v13476_v48, -inf }
0x11c8   : > { %6745 = vadd.xlane.f32.xlu1 %v6731_v36  ;;  %v13482_v55 = vpop.f32.mrf.mxu1 }
0x11c9   : > { %v6876_v31 = vsel %vm1829_vm1, %v13482_v55, -inf }
0x11ca   : > { %6871 = vmax.xlane.f32.xlu0 %v6870_v29  ;;  %v13488_v39 = vpop.f32.mrf.mxu1 }
0x11cb   : > { %v6873_v32 = vsel %vm1829_vm1, %v13488_v39, -inf }
0x11cc   : > { %6747 = vadd.xlane.f32.xlu1 %v6732_v46 }
0x11ce   : > { %6868 = vmax.xlane.f32.xlu0 %v6867_v50 }
0x11d2   : > { %6874 = vmax.xlane.f32.xlu0 %v6873_v32 }
0x11d6   : > { %6877 = vmax.xlane.f32.xlu0 %v6876_v31 }
0x11dc   : > { %v13494_v37 = vpop.f32.mrf.mxu1 }
0x11dd   : > { %v7357_v19 = vsel %vm2329_vm2, %v13494_v37, -inf }
0x11de   : > { %v13498_v28 = vpop.f32.mrf.mxu1  ;;  %7358 = vmax.xlane.f32.xlu0 %v7357_v19 }
0x11df   : > { %v7354_v10 = vsel %vm2329_vm2, %v13498_v28, -inf }
0x11e0   : > { %7355 = vmax.xlane.f32.xlu1 %v7354_v10  ;;  %v13502_v47 = vpop.f32.mrf.mxu1 }
0x11e1   : > { %v7363_v49 = vsel %vm2329_vm2, %v13502_v47, -inf }
0x11e2   : > { %v13506_v35 = vpop.f32.mrf.mxu1  ;;  %7364 = vmax.xlane.f32.xlu0 %v7363_v49 }
0x11e3   : > { %v7360_v2 = vsel %vm2329_vm2, %v13506_v35, -inf }
0x11e4   : > { %7361 = vmax.xlane.f32.xlu1 %v7360_v2  ;;  %v13510_v51 = vpop.f32.mrf.mxu1 }
0x11e5   : > { %v7369_v59 = vsel %vm2329_vm2, %v13510_v51, -inf }
0x11e6   : > { %v13514_v9 = vpop.f32.mrf.mxu1  ;;  %7370 = vmax.xlane.f32.xlu0 %v7369_v59 }
0x11e7   : > { %v7366_v17 = vsel %vm2329_vm2, %v13514_v9, -inf }
0x11e8   : > { %7367 = vmax.xlane.f32.xlu1 %v7366_v17  ;;  %v13518_v18 = vpop.f32.mrf.mxu1 }
0x11e9   : > { %v7375_v21 = vsel %vm2329_vm2, %v13518_v18, -inf }
0x11ea   : > { %v13522_v44 = vpop.f32.mrf.mxu1  ;;  %7376 = vmax.xlane.f32.xlu0 %v7375_v21 }
0x11eb   : > { %v7372_v13 = vsel %vm2329_vm2, %v13522_v44, -inf }
0x11ec   : > { %7373 = vmax.xlane.f32.xlu1 %v7372_v13 }
0x11f0   : > { %3156 = vadd.xlane.f32.xlu1 %v3155_v4 }
0x11f4   : > { %7764 = vadd.xlane.f32.xlu1 %v7763_v61  ;;  %v6911_v61 = vld [vmem:[%s14388_s5] sm:$0xff] }
0x11fc   : > { %v13531_v56 = vpop.f32.mrf.mxu1 }
0x11fd   : > { %v8057_v33 = vsel %vm2329_vm2, %v13531_v56, -inf }
0x11fe   : > { %v9879_v34 = vpop.f32.mrf.mxu1  ;;  %8058 = vmax.xlane.f32.xlu1 %v8057_v33 }
0x1247   : > { %v6860_v27 = vpop.xlane.xlu0 %6859 }
0x1248   : > { %v13546_v41 = vmax.f32 %v6860_v27, %v13541_v14 }
0x1249   : > { %v6857_v42 = vpop.xlane.xlu1 %6856 }
0x124a   : > { %v6888_v3 = vsub.f32 %v13457_v5, %v13546_v41  ;;  %v13551_v40 = vmax.f32 %v6857_v42, %v13537_v30 }
0x124b   : > { %v6866_v1 = vpop.xlane.xlu0 %6865 }
0x124c   : > { %v6897_v52 = vmul.f32 1.442695, %v6888_v3  ;;  %v6887_v63 = vsub.f32 %v13461_v26, %v13551_v40  ;;  %v13556_v36 = vmax.f32 %v6866_v1, %v13539_v24 }
0x124d   : > { %v13565_v19 = vpop.xlane.xlu1 %6743 }
0x124e   : > { %10296 = vpow2.f32 %v6897_v52  ;;  %v6895_v29 = vmul.f32 1.442695, %v6887_v63  ;;  %v6890_v46 = vsub.f32 %v13465_v22, %v13556_v36 }
0x124f   : > { %v6863_v50 = vpop.xlane.xlu0 %6862 }
0x1250   : > { %10298 = vpow2.f32 %v6895_v29  ;;  %v13561_v5 = vmax.f32 %v6863_v50, %v13535_v60  ;;  %v6901_v32 = vmul.f32 1.442695, %v6890_v46  ;;  %v6913_v46 = vld [vmem:[%s14388_s5 + $0x10] sm:$0xff] }
0x1251   : > { %v13575_v21 = vpop.xlane.xlu1 %6745 }
0x1252   : > { %v6889_v31 = vsub.f32 %v13469_v38, %v13561_v5  ;;  %10300 = vpow2.f32 %v6901_v32  ;;  %v6912_v38 = vld [vmem:[%s14388_s5 + $0x8] sm:$0xff] }
0x1253   : > { %v6872_v26 = vpop.xlane.xlu0 %6871 }
0x1254   : > { %v6899_v10 = vmul.f32 1.442695, %v6889_v31  ;;  %v13568_v49 = vmax.f32 %v6872_v26, %v13565_v19  ;;  %v10467_v31 = vld [vmem:[#allocation2 + $0xf8] sm:$0xff] }
0x1255   : > { %v13594_v42 = vpop.xlane.xlu1 %6747  ;;  %v7504_v26 = vld [vmem:[#allocation2 + $0xd8] sm:$0xff] }
0x1256   : > { %10302 = vpow2.f32 %v6899_v10  ;;  %v6892_v22 = vsub.f32 %v13472_v58, %v13568_v49 }
0x1257   : > { %v6869_v2 = vpop.xlane.xlu0 %6868 }
0x1258   : > { %v6905_v59 = vmul.f32 1.442695, %v6892_v22  ;;  %v13573_v17 = vmax.f32 %v6869_v2, %v13543_v20 }
0x125a   : > { %10304 = vpow2.f32 %v6905_v59  ;;  %v6891_v0 = vsub.f32 %v13476_v48, %v13573_v17  ;;  %v6914_v48 = vld [vmem:[%s14388_s5 + $0x18] sm:$0xff] }
0x125b   : > { %v10297_v23 = vpop.eup %10296  ;;  %v6875_v57 = vpop.xlane.xlu0 %6874 }
0x125c   : > { %v6903_v13 = vmul.f32 1.442695, %v6891_v0  ;;  %v13583_v58 = vmax.f32 %v6875_v57, %v13575_v21  ;;  %v6920_v4 = vmul.f32 %v10297_v23, %v6912_v38  ;;  %v7503_v38 = vld [vmem:[#allocation2 + $0xb8] sm:$0xff] }
0x125d   : > { %v10299_v33 = vpop.eup %10298  ;;  %v7502_v57 = vld [vmem:[#allocation2 + $0x98] sm:$0xff] }
0x125e   : > { %10306 = vpow2.f32 %v6903_v13  ;;  %v6893_v34 = vsub.f32 %v13488_v39, %v13583_v58  ;;  %v6970_v27 = vsel %vm1829_vm1, %v6920_v4, 0.0  ;;  %v13596_v1 = vmul.f32 %v10299_v33, %v6911_v61 }
0x125f   : > { %6971 = vadd.xlane.f32.xlu1 %v6970_v27  ;;  %v6878_v3 = vpop.xlane.xlu0 %6877  ;;  %v10301_v52 = vpop.eup %10300 }
0x1260   : > { %v6907_v63 = vmul.f32 1.442695, %v6893_v34  ;;  %v6886_v29 = vmax.f32 %v6878_v3, %v13594_v42  ;;  %9783 = vmatprep.mubr.msk.f32.mxu0 %vm1829_vm1, %v13596_v1  ;;  %v6922_v39 = vmul.f32 %v10301_v52, %v6914_v48  ;;  %v7501_v34 = vld [vmem:[#allocation2 + $0x78] sm:$0xff] }
0x1261   : > { %9784 = vmatmul.mubr.msk.f32.vlgmr.msra.gmra.mxu0 %vm1829_vm1, %v6920_v4 }
0x1262   : > { %10308 = vpow2.f32 %v6907_v63  ;;  %v6894_v50 = vsub.f32 %v13482_v55, %v6886_v29  ;;  %9824 = vmatpush3.msra.mxu0 %v10467_v31  ;;  %v6976_v10 = vsel %vm1829_vm1, %v6922_v39, 0.0  ;;  %v6934_v2 = vsub.f32 %v13594_v42, %v6886_v29  ;;  %v6916_v55 = vld [vmem:[%s14388_s5 + $0x28] sm:$0xff]  ;;  %v6915_v63 = vld [vmem:[%s14388_s5 + $0x20] sm:$0xff]  ;;  %v7499_v31 = vld [vmem:[#allocation2 + $0x38] sm:$0xff] }
0x1263   : > { %v10303_v32 = vpop.eup %10302  ;;  %9825 = vmatprep.subr.mxu0 %v7504_v26  ;;  %6977 = vadd.xlane.f32.xlu1 %v6976_v10 }
0x1264   : > { %v6909_v22 = vmul.f32 1.442695, %v6894_v50  ;;  %v6921_v59 = vmul.f32 %v10303_v32, %v6913_v46  ;;  %9826 = vmatpush3.msra.mxu0 %v7504_v26  ;;  %v6949_v4 = vmul.f32 1.442695, %v6934_v2 }
0x1265   : > { %9827 = vmatprep.subr.mxu0 %v7503_v38 }
0x1266   : > { %10310 = vpow2.f32 %v6909_v22  ;;  %9786 = vmatprep.mubr.msk.f32.mxu0 %vm1829_vm1, %v6921_v59  ;;  %v6973_v0 = vsel %vm1829_vm1, %v6921_v59, 0.0  ;;  %9828 = vmatpush3.msra.mxu0 %v7503_v38  ;;  %v6917_v59 = vld [vmem:[%s14388_s5 + $0x30] sm:$0xff] }
0x1267   : > { %v10305_v23 = vpop.eup %10304  ;;  %v7359_v13 = vpop.xlane.xlu0 %7358  ;;  %9829 = vmatprep.subr.mxu0 %v7502_v57  ;;  %9787 = vmatmul.mubr.msk.f32.gmra.mxu0 %vm1829_vm1, %v6922_v39  ;;  %v7500_v39 = vld [vmem:[#allocation2 + $0x58] sm:$0xff]  ;;  %10312 = vpow2.f32 %v6949_v4 }
0x1268   : > { %v13615_v61 = vmax.f32 %v7359_v13, %v13541_v14  ;;  %v6924_v33 = vmul.f32 %v10305_v23, %v6916_v55  ;;  %9830 = vmatpush3.msra.mxu0 %v7502_v57  ;;  %6974 = vadd.xlane.f32.xlu1 %v6973_v0  ;;  %v7498_v55 = vld [vmem:[#allocation2 + $0x18] sm:$0xff] }
0x1269   : > { %v7356_v27 = vpop.xlane.xlu1 %7355  ;;  %9831 = vmatprep.subr.mxu0 %v7501_v34 }
0x126a   : > { %v7387_v48 = vsub.f32 %v13494_v37, %v13615_v61  ;;  %v13620_v3 = vmax.f32 %v7356_v27, %v13537_v30  ;;  %v6982_v52 = vsel %vm1829_vm1, %v6924_v33, 0.0  ;;  %9832 = vmatpush3.msra.mxu0 %v7501_v34 }
0x126b   : > { %v10307_v29 = vpop.eup %10306  ;;  %v7365_v46 = vpop.xlane.xlu0 %7364  ;;  %9833 = vmatprep.subr.mxu0 %v7500_v39 }
0x126c   : > { %v7396_v50 = vmul.f32 1.442695, %v7387_v48  ;;  %v7386_v32 = vsub.f32 %v13498_v28, %v13620_v3  ;;  %9834 = vmatpush3.msra.mxu0 %v7500_v39  ;;  %6983 = vadd.xlane.f32.xlu1 %v6982_v52  ;;  %v13629_v37 = vmax.f32 %v7365_v46, %v13539_v24  ;;  %v13631_v10 = vmul.f32 %v10307_v29, %v6915_v63  ;;  %v6918_v48 = vld [vmem:[%s14388_s5 + $0x38] sm:$0xff] }
0x126d   : > { %v7362_v26 = vpop.xlane.xlu1 %7361  ;;  %9835 = vmatprep.subr.mxu0 %v7499_v31 }
0x126e   : > { %v7394_v22 = vmul.f32 1.442695, %v7386_v32  ;;  %v13634_v2 = vmax.f32 %v7362_v26, %v13535_v60  ;;  %10314 = vpow2.f32 %v7396_v50  ;;  %v7389_v38 = vsub.f32 %v13502_v47, %v13629_v37  ;;  %9836 = vmatpush3.msra.mxu0 %v7499_v31  ;;  %9789 = vmatprep.mubr.msk.f32.mxu0 %vm1829_vm1, %v13631_v10 }
0x126f   : > { %v10309_v28 = vpop.eup %10308  ;;  %v7371_v0 = vpop.xlane.xlu0 %7370  ;;  %9837 = vmatprep.subr.mxu0 %v7498_v55  ;;  %9790 = vmatmul.mubr.msk.f32.gmra.mxu0 %vm1829_vm1, %v6924_v33 }
0x1270   : > { %10316 = vpow2.f32 %v7394_v22  ;;  %v7388_v23 = vsub.f32 %v13506_v35, %v13634_v2  ;;  %v13647_v57 = vmax.f32 %v7371_v0, %v13565_v19  ;;  %v7400_v13 = vmul.f32 1.442695, %v7389_v38  ;;  %9838 = vmatpush3.msra.mxu0 %v7498_v55  ;;  %v14613_v38 = vld [vmem:[#allocation24_spill] sm:$0xff] }
0x1271   : > { %v7368_v4 = vpop.xlane.xlu1 %7367  ;;  %v13649_v47 = vmul.f32 %v10309_v28, %v6917_v59  ;;  %9851 = vmatprep.subr.mxu0 %v14484_v43  ;;  %v6958_v28 = vld [vmem:[%s14395_s12 + $0x38] sm:$0xff]  ;;  %v7410_v0 = vld [vmem:[#allocation8] sm:$0xff] }
0x1272   : > { %v7398_v34 = vmul.f32 1.442695, %v7388_v23  ;;  %v7391_v27 = vsub.f32 %v13510_v51, %v13647_v57  ;;  %v13658_v33 = vmax.f32 %v7368_v4, %v13543_v20  ;;  %10318 = vpow2.f32 %v7400_v13  ;;  %v7411_v13 = vld [vmem:[#allocation8 + $0x8] sm:$0xff] }
0x1273   : > { %v10311_v35 = vpop.eup %10310  ;;  %9792 = vmatprep.mubr.msk.f32.mxu0 %vm1829_vm1, %v13649_v47  ;;  %v7377_v52 = vpop.xlane.xlu0 %7376 }
0x1274   : > { %v7404_v63 = vmul.f32 1.442695, %v7391_v27  ;;  %v13663_v29 = vmax.f32 %v7377_v52, %v13594_v42  ;;  %10320 = vpow2.f32 %v7398_v34  ;;  %v7390_v51 = vsub.f32 %v13514_v9, %v13658_v33  ;;  %v10313_v59 = vpop.eup %10312 }
0x1275   : > { %v7374_v39 = vpop.xlane.xlu1 %7373  ;;  %v13667_v46 = vmul.f32 %v10311_v35, %v6918_v48  ;;  %v13683_v27 = vmul.f32 %v10313_v59, %v6958_v28  ;;  %v7414_v59 = vld [vmem:[#allocation8 + $0x20] sm:$0xff]  ;;  %v7415_v28 = vld [vmem:[#allocation8 + $0x28] sm:$0xff] }
0x1276   : > { %v7393_v50 = vsub.f32 %v13518_v18, %v13663_v29  ;;  %v13672_v32 = vmax.f32 %v7374_v39, %v13575_v21  ;;  %v7402_v31 = vmul.f32 1.442695, %v7390_v51  ;;  %10322 = vpow2.f32 %v7404_v63  ;;  %v7412_v51 = vld [vmem:[#allocation8 + $0x10] sm:$0xff] }
0x1277   : > { %9793 = vmatmul.mubr.msk.f32.gmra.mxu0 %vm1829_vm1, %v13667_v46 }
0x1278   : > { %v7408_v26 = vmul.f32 1.442695, %v7393_v50  ;;  %v7392_v22 = vsub.f32 %v13522_v44, %v13672_v32  ;;  %10324 = vpow2.f32 %v7402_v31  ;;  %v7413_v50 = vld [vmem:[#allocation8 + $0x18] sm:$0xff] }
0x1279   : > { %v3157_v9 = vpop.xlane.xlu1 %3156 }
0x127a   : > { %v7406_v18 = vmul.f32 1.442695, %v7392_v22  ;;  %v3158_v55 = vmax.f32 %v3157_v9, %v14613_v38  ;;  %10326 = vpow2.f32 %v7408_v26 }
0x127b   : > { %v10315_v23 = vpop.eup %10314 }
0x127c   : > { %v3159_v4 = vsub.f32 %v3157_v9, %v3158_v55  ;;  %v3164_v34 = vsub.f32 %v14613_v38, %v3158_v55  ;;  %10328 = vpow2.f32 %v7406_v18  ;;  %v13688_v63 = vmul.f32 %v10315_v23, %v7411_v13  ;;  %v7416_v23 = vld [vmem:[#allocation8 + $0x30] sm:$0xff] }
0x127d   : > { %v10317_v44 = vpop.eup %10316  ;;  %7037 = vperm.xlu1 %9947, %v13683_v27  }
0x127e   : > { %v3160_v48 = vmul.f32 1.442695, %v3159_v4  ;;  %v3165_v35 = vmul.f32 1.442695, %v3164_v34  ;;  %v13686_v52 = vmul.f32 %v10317_v44, %v7410_v0  ;;  %v7417_v4 = vld [vmem:[#allocation8 + $0x38] sm:$0xff] }
0x127f   : > { %v10319_v39 = vpop.eup %10318 }
0x1280   : > { %10330 = vpow2.f32 %v3160_v48  ;;  %9839 = vmatprep.mubr.msk.f32.mxu0 %vm2329_vm2, %v13686_v52  ;;  %v13698_v22 = vmul.f32 %v10319_v39, %v7413_v50  ;;  %v3162_v48 = vld [vmem:[#allocation3] sm:$0x1] }
0x1281   : > { %10332 = vpow2.f32 %v3165_v35  ;;  %9840 = vmatmul.mubr.msk.f32.vlgmr.msra.gmra.mxu0 %vm2329_vm2, %v13688_v63  ;;  %v10321_v31 = vpop.eup %10320 }
0x1282   : > { %9852 = vmatpush3.xpose.msra.mxu0 %v13391_v62  ;;  %v13695_v26 = vmul.f32 %v10321_v31, %v7412_v51  ;;  %v3167_v51 = vld [vmem:[#allocation4] sm:$0x1] }
0x1283   : > { %9856 = vmatprep.subr.mxu0 %v14484_v43  ;;  %v10323_v9 = vpop.eup %10322 }
0x1284   : > { %9842 = vmatprep.mubr.msk.f32.mxu0 %vm2329_vm2, %v13695_v26  ;;  %v13706_v0 = vmul.f32 %v10323_v9, %v7415_v28  ;;  %v7898_v28 = vld [vmem:[#allocation2 + $0x118] sm:$0xff] }
0x1285   : > { %v10325_v18 = vpop.eup %10324  ;;  %9843 = vmatmul.mubr.msk.f32.gmra.mxu0 %vm2329_vm2, %v13698_v22 }
0x1286   : > { %v13704_v55 = vmul.f32 %v10325_v18, %v7414_v59  ;;  %v6933_v18 = vsub.f32 %v13575_v21, %v13583_v58 }
0x1287   : > { %v10327_v13 = vpop.eup %10326 }
0x1288   : > { %9845 = vmatprep.mubr.msk.f32.mxu0 %vm2329_vm2, %v13704_v55  ;;  %v13714_v35 = vmul.f32 %v10327_v13, %v7417_v4  ;;  %v6988_v13 = vsel %vm1829_vm1, %v13667_v46, 0.0 }
0x1289   : > { %v10329_v34 = vpop.eup %10328  ;;  %9846 = vmatmul.mubr.msk.f32.gmra.mxu0 %vm2329_vm2, %v13706_v0 }
0x128a   : > { %v13712_v44 = vmul.f32 %v10329_v34, %v7416_v23  ;;  %v6947_v23 = vmul.f32 1.442695, %v6933_v18  ;;  %v6957_v34 = vld [vmem:[%s14395_s12 + $0x30] sm:$0xff] }
0x128c   : > { %9848 = vmatprep.mubr.msk.f32.mxu0 %vm2329_vm2, %v13712_v44  ;;  %10334 = vpow2.f32 %v6947_v23 }
0x128d   : > { %v10331_v39 = vpop.eup %10330  ;;  %9849 = vmatmul.mubr.msk.f32.gmra.mxu0 %vm2329_vm2, %v13714_v35 }
0x128e   : > { %v10333_v50 = vpop.eup %10332  ;;  %v3163_v31 = vmul.f32 %v10331_v39, %v3162_v48  ;;  %9853 = vmatprep.mubr.msk.f32.mxu0 %vm10543_vm0, %v14484_v43  ;;  %v6930_v48 = vsub.f32 %v13539_v24, %v13556_v36  ;;  %v6967_v39 = vsel %vm1829_vm1, %v13596_v1, 0.0  ;;  %v6931_v36 = vsub.f32 %v13543_v20, %v13573_v17  ;;  %v6956_v17 = vld [vmem:[%s14395_s12 + $0x28] sm:$0xff] }
0x128f   : > { %v3168_v59 = vmul.f32 %v10333_v50, %v3167_v51  ;;  %v6929_v50 = vsub.f32 %v13535_v60, %v13561_v5  ;;  %v6954_v5 = vld [vmem:[%s14395_s12 + $0x18] sm:$0xff] }
0x1290   : > { %3174 = vperm.xlu0 %9946, %v3163_v31   ;;  %v6941_v58 = vmul.f32 1.442695, %v6930_v48 }
0x1291   : > { %v13722_v9 = vadd.f32 %v3168_v59, %v3163_v31  ;;  %9854 = vmatmul.mubr.f32.vlgmr.msra.gmra.mxu0 %v13452_v8  ;;  %v6939_v46 = vmul.f32 1.442695, %v6929_v50  ;;  %v6932_v31 = vsub.f32 %v13565_v19, %v13568_v49 }
0x1292   : > { %9857 = vmatpush3.msra.mxu0 %v7898_v28  ;;  %9858 = vmatprep.mubr.msk.f32.mxu0 %vm10543_vm0, %v14484_v43  ;;  %10336 = vpow2.f32 %v6941_v58  ;;  %v6943_v28 = vmul.f32 1.442695, %v6931_v36  ;;  %v6955_v58 = vld [vmem:[%s14395_s12 + $0x20] sm:$0xff]  ;;  %v13771_v36 = vpop.xlane.xlu1 %7764 }
0x1293   : > { %9880 = vmatprep.subr.mxu0 %v14484_v43  ;;  %10338 = vpow2.f32 %v6939_v46 }
0x1294   : > { %3180 = vperm.xlu0 %9946, %v3168_v59   ;;  %v6945_v59 = vmul.f32 1.442695, %v6932_v31  ;;  %v6985_v31 = vsel %vm1829_vm1, %v13649_v47, 0.0  ;;  %v6952_v47 = vld [vmem:[%s14395_s12 + $0x8] sm:$0xff] }
0x1296   : > { %10340 = vpow2.f32 %v6945_v59  ;;  %v7466_v59 = vsel %vm2329_vm2, %v13686_v52, 0.0 }
0x1297   : > { %10342 = vpow2.f32 %v6943_v28  ;;  %v7475_v28 = vsel %vm2329_vm2, %v13698_v22, 0.0 }
0x1299   : > { %v10335_v4 = vpop.eup %10334 }
0x129a   : > { %v13737_v51 = vmul.f32 %v10335_v4, %v6957_v34  ;;  %v6928_v34 = vsub.f32 %v13541_v14, %v13546_v41  ;;  %v7469_v41 = vsel %vm2329_vm2, %v13688_v63, 0.0  ;;  %v7472_v63 = vsel %vm2329_vm2, %v13695_v26, 0.0 }
0x129b   : > { %v6979_v26 = vsel %vm1829_vm1, %v13631_v10, 0.0 }
0x129c   : > { %v6937_v50 = vmul.f32 1.442695, %v6928_v34 }
0x129e   : > { %10344 = vpow2.f32 %v6937_v50  ;;  %v6927_v50 = vsub.f32 %v13537_v30, %v13551_v40  ;;  %v7429_v40 = vsub.f32 %v13539_v24, %v13629_v37  ;;  %v6951_v37 = vld [vmem:[%s14395_s12] sm:$0xff] }
0x129f   : > { %v10337_v1 = vpop.eup %10336 }
0x12a0   : > { %v6962_v18 = vmul.f32 %v10337_v1, %v6954_v5  ;;  %v10339_v23 = vpop.eup %10338  ;;  %v13775_v5 = vpop.xlane.xlu1 %8058 }
0x12a1   : > { %6989 = vadd.xlane.f32.xlu1 %v6988_v13  ;;  %v6953_v13 = vld [vmem:[%s14395_s12 + $0x10] sm:$0xff] }
0x12a2   : > { %v6961_v49 = vmul.f32 %v10339_v23, %v6953_v13 }
0x12a3   : > { %v10341_v4 = vpop.eup %10340 }
0x12a4   : > { %v6964_v48 = vmul.f32 %v10341_v4, %v6956_v17  ;;  %v7481_v4 = vsel %vm2329_vm2, %v13706_v0, 0.0  ;;  %v7478_v17 = vsel %vm2329_vm2, %v13704_v55, 0.0 }
0x12b2   : > { %7032 = vperm.xlu1 %9947, %v13737_v51  }
0x12b3   : > { %6968 = vadd.xlane.f32.xlu0 %v6967_v39  ;;  %v10343_v39 = vpop.eup %10342 }
0x12b4   : > { %v13762_v46 = vmul.f32 %v10343_v39, %v6955_v58  ;;  %v10345_v1 = vpop.eup %10344  ;;  %v7487_v58 = vsel %vm2329_vm2, %v13714_v35, 0.0 }
0x12b5   : > { %v6960_v23 = vmul.f32 %v10345_v1, %v6952_v47 }
0x12c9   : > { %7017 = vperm.xlu0 %9946, %v6962_v18  }
0x12cd   : > { %7012 = vperm.xlu0 %9946, %v6961_v49  }
0x12d1   : > { %7027 = vperm.xlu0 %9946, %v6964_v48  }
0x12d5   : > { %7022 = vperm.xlu0 %9946, %v13762_v46  }
0x12d6   : > { %6986 = vadd.xlane.f32.xlu1 %v6985_v31 }
0x12da   : > { %7470 = vadd.xlane.f32.xlu1 %v7469_v41  ;;  %v7484_v41 = vsel %vm2329_vm2, %v13712_v44, 0.0  ;;  %v7428_v44 = vsub.f32 %v13535_v60, %v13634_v2  ;;  %v7433_v2 = vsub.f32 %v13594_v42, %v13663_v29  ;;  %v13819_v42 = vld [vmem:[#allocation2] ss:$0 sm:$0xff] }
0x12dc   : > { %v7438_v47 = vmul.f32 1.442695, %v7428_v44 }
0x12de   : > { %7467 = vadd.xlane.f32.xlu1 %v7466_v59  ;;  %v7427_v59 = vsub.f32 %v13541_v14, %v13615_v61  ;;  %v7431_v14 = vsub.f32 %v13565_v19, %v13647_v57 }
0x12e0   : > { %v7436_v10 = vmul.f32 1.442695, %v7427_v59  ;;  %v7455_v59 = vld [vmem:[%s14396_s13 + $0x28] sm:$0xff] }
0x12e2   : > { %7476 = vadd.xlane.f32.xlu1 %v7475_v28 }
0x12e6   : > { %7473 = vadd.xlane.f32.xlu1 %v7472_v63  ;;  %v7430_v63 = vsub.f32 %v13543_v20, %v13658_v33  ;;  %v7451_v20 = vld [vmem:[%s14396_s13 + $0x8] sm:$0xff] }
0x12e8   : > { %v6972_v52 = vpop.xlane.xlu1 %6971  ;;  %v7442_v19 = vmul.f32 1.442695, %v7430_v63 }
0x12e9   : > { %v13782_v13 = vadd.f32 %v6972_v52, %v6960_v23 }
0x12ea   : > { %7482 = vadd.xlane.f32.xlu1 %v7481_v4 }
0x12ec   : > { %v6978_v22 = vpop.xlane.xlu1 %6977 }
0x12ed   : > { %v6994_v34 = vadd.f32 %v6978_v22, %v6962_v18  ;;  %v6935_v18 = vmul.f32 1.442695, %v6927_v50  ;;  %v7448_v22 = vmul.f32 1.442695, %v7433_v2  ;;  %v7453_v50 = vld [vmem:[%s14396_s13 + $0x18] sm:$0xff] }
0x12ee   : > { %7479 = vadd.xlane.f32.xlu1 %v7478_v17  ;;  %v3171_v17 = vld [vmem:[#allocation2 + $0x120] ss:$0 sm:$0xff] }
0x12ef   : > { %v7180_v0 = vmul.f32 3.0, %v6994_v34 }
0x12f1   : > { %v6975_v39 = vpop.xlane.xlu1 %6974  ;;  %10346 = vrcp.f32 %v7180_v0 }
0x12f2   : > { %7488 = vadd.xlane.f32.xlu1 %v7487_v58  ;;  %v6993_v31 = vadd.f32 %v6975_v39, %v6961_v49  ;;  %10348 = vpow2.f32 %v6935_v18  ;;  %v7440_v49 = vmul.f32 1.442695, %v7429_v40 }
0x12f4   : > { %6980 = vadd.xlane.f32.xlu0 %v6979_v26  ;;  %v7179_v35 = vmul.f32 3.0, %v6993_v31 }
0x12f5   : > { %v6984_v55 = vpop.xlane.xlu1 %6983 }
0x12f6   : > { %7485 = vadd.xlane.f32.xlu1 %v7484_v41  ;;  %v6996_v28 = vadd.f32 %v6984_v55, %v6964_v48  ;;  %10350 = vrcp.f32 %v7179_v35  ;;  %v7444_v48 = vmul.f32 1.442695, %v7431_v14  ;;  %v7452_v41 = vld [vmem:[%s14396_s13 + $0x10] sm:$0xff] }
0x12f7   : > { %10352 = vpow2.f32 %v7436_v10  ;;  %v7454_v10 = vld [vmem:[%s14396_s13 + $0x20] sm:$0xff] }
0x12f8   : > { %v7182_v1 = vmul.f32 3.0, %v6996_v28 }
0x12fa   : > { %10354 = vrcp.f32 %v7182_v1 }
0x12fb   : > { %10356 = vpow2.f32 %v7440_v49  ;;  %v7457_v49 = vld [vmem:[%s14396_s13 + $0x38] sm:$0xff] }
0x12fc   : > { %10358 = vpow2.f32 %v7438_v47 }
0x12fd   : > { %10360 = vpow2.f32 %v7444_v48 }
0x12fe   : > { %v10347_v61 = vpop.eup %10346  ;;  %10362 = vpow2.f32 %v7442_v19  ;;  %v13867_v19 = vld [vmem:[#allocation2 + $0x18] ss:$0 sm:$0xff] }
0x12ff   : > { %v10349_v24 = vpop.eup %10348  ;;  %10364 = vpow2.f32 %v7448_v22 }
0x1300   : > { %v13811_v57 = vmul.f32 %v10349_v24, %v6951_v37  ;;  %v7038_v24 = vpop.permute.xlu1 %7037 }
0x1303   : > { %v10351_v60 = vpop.eup %10350 }
0x1304   : > { %v10353_v4 = vpop.eup %10352 }
0x1305   : > { %v13822_v58 = vmul.f32 %v10353_v4, %v7451_v20 }
0x1307   : > { %7210 = vperm.xlu1 %9947, %v10347_v61   ;;  %v10355_v33 = vpop.eup %10354  ;;  %v7456_v61 = vld [vmem:[%s14396_s13 + $0x30] sm:$0xff] }
0x1308   : > { %v10357_v26 = vpop.eup %10356 }
0x1309   : > { %v10359_v31 = vpop.eup %10358 }
0x130a   : > { %7007 = vperm.xlu0 %9946, %v6960_v23   ;;  %v7432_v23 = vsub.f32 %v13575_v21, %v13672_v32  ;;  %v13830_v32 = vmul.f32 %v10357_v26, %v7453_v50  ;;  %v13836_v55 = vmul.f32 %v10359_v31, %v7452_v41  ;;  %v10361_v18 = vpop.eup %10360 }
0x130b   : > { %v3175_v52 = vpop.permute.xlu0 %3174  ;;  %7205 = vperm.xlu1 %9947, %v10351_v60   ;;  %v13842_v35 = vmul.f32 %v10361_v18, %v7455_v59  ;;  %v10363_v28 = vpop.eup %10362 }
0x130c   : > { %v3177_v34 = vmul.f32 %v3175_v52, %v3171_v17  ;;  %v7446_v21 = vmul.f32 1.442695, %v7432_v23  ;;  %v13848_v40 = vmul.f32 %v10363_v28, %v7454_v10  ;;  %v10365_v1 = vpop.eup %10364 }
0x130d   : > { %v13854_v44 = vmul.f32 %v10365_v1, %v7457_v49 }
0x130e   : > { %7002 = vperm.xlu0 %9946, %v13811_v57   ;;  %10366 = vpow2.f32 %v7446_v21 }
0x130f   : > { %v3181_v29 = vpop.permute.xlu0 %3180  ;;  %7220 = vperm.xlu1 %9947, %v10355_v33   ;;  %v7047_v33 = vmul.f32 %v7038_v24, %v13867_v19 }
0x1310   : > { %v3183_v39 = vmul.f32 %v3181_v29, %v13819_v42 }
0x1312   : > { %7513 = vperm.xlu0 %9946, %v13822_v58   ;;  %v13828_v0 = vadd.f32 %v3183_v39, %v3177_v34 }
0x1316   : > { %7523 = vperm.xlu0 %9946, %v13830_v32  }
0x131a   : > { %7518 = vperm.xlu0 %9946, %v13836_v55  }
0x131b   : > { %v10367_v47 = vpop.eup %10366 }
0x131c   : > { %v13862_v48 = vmul.f32 %v10367_v47, %v7456_v61 }
0x131e   : > { %7533 = vperm.xlu0 %9946, %v13842_v35  }
0x1321   : > { %v13856_v14 = vpop.f32.mrf.mxu0 }
0x1322   : > { %7528 = vperm.xlu0 %9946, %v13848_v40  }
0x1323   : > { %v13864_v63 = vpop.f32.mrf.mxu0 }
0x1326   : > { %7543 = vperm.xlu0 %9946, %v13854_v44  }
0x1327   : > { %v9788_v37 = vpop.f32.mrf.mxu0 }
0x1329   : > { %v7148_v60 = vpop.f32.mrf.mxu0 }
0x132a   : > { %7538 = vperm.xlu0 %9946, %v13862_v48   ;;  %v6990_v2 = vpop.xlane.xlu1 %6989 }
0x132b   : > { %v6998_v16 = vadd.f32 %v6990_v2, %v13683_v27 }
0x132e   : > { %v7033_v4 = vpop.permute.xlu1 %7032 }
0x132f   : > { %v9791_v52 = vpop.f32.mrf.mxu0  ;;  %v7046_v23 = vmul.f32 %v7033_v4, %v13867_v19 }
0x1331   : > { %v7158_v20 = vpop.f32.mrf.mxu0 }
0x1337   : > { %v9794_v22 = vpop.f32.mrf.mxu0 }
0x1338   : > { %v13871_v17 = vadd.f32 %v9794_v22, %v7047_v33 }
0x1339   : > { %v7168_v29 = vpop.f32.mrf.mxu0 }
0x133a   : > { %v13873_v34 = vadd.f32 %v7168_v29, %v7046_v23 }
0x133c   : > { %v13875_v39 = vpop.xlane.xlu0 %6968 }
0x1341   : > { %v13877_v26 = vpop.f32.mrf.mxu0 }
0x1343   : > { %v13879_v50 = vpop.f32.mrf.mxu0 }
0x1344   : > { %v7018_v21 = vpop.permute.xlu0 %7017 }
0x1345   : > { %v7043_v31 = vmul.f32 %v7018_v21, %v13867_v19  ;;  %v13882_v41 = vpop.f32.mrf.mxu0 }
0x1347   : > { %v13884_v18 = vadd.f32 %v9788_v37, %v7043_v31  ;;  %v13886_v59 = vpop.f32.mrf.mxu0  ;;  %v7426_v37 = vsub.f32 %v13537_v30, %v13620_v3  ;;  %v7450_v30 = vld [vmem:[%s14396_s13] sm:$0xff] }
0x1348   : > { %v7013_v28 = vpop.permute.xlu0 %7012 }
0x1349   : > { %v7042_v10 = vmul.f32 %v7013_v28, %v13867_v19  ;;  %v13889_v1 = vpop.f32.mrf.mxu0 }
0x134b   : > { %v13891_v49 = vadd.f32 %v7148_v60, %v7042_v10  ;;  %v13893_v47 = vpop.f32.mrf.mxu0  ;;  %v7434_v60 = vmul.f32 1.442695, %v7426_v37 }
0x134c   : > { %v7028_v61 = vpop.permute.xlu0 %7027 }
0x134d   : > { %v7045_v24 = vmul.f32 %v7028_v61, %v13867_v19  ;;  %v13896_v4 = vpop.f32.mrf.mxu0  ;;  %10368 = vpow2.f32 %v7434_v60 }
0x134f   : > { %v13900_v33 = vadd.f32 %v9791_v52, %v7045_v24  ;;  %v13902_v22 = vpop.f32.mrf.mxu0 }
0x1350   : > { %v7023_v23 = vpop.permute.xlu0 %7022 }
0x1351   : > { %v7044_v29 = vmul.f32 %v7023_v23, %v13867_v19  ;;  %v13905_v21 = vpop.f32.mrf.mxu0 }
0x1353   : > { %v13907_v31 = vadd.f32 %v7158_v20, %v7044_v29  ;;  %v9855_v28 = vpop.f32.mrf.mxu0 }
0x135a   : > { %v10369_v61 = vpop.eup %10368 }
0x135b   : > { %v13912_v3 = vmul.f32 %v10369_v61, %v7450_v30 }
0x135f   : > { %v6987_v10 = vpop.xlane.xlu1 %6986 }
0x1363   : > { %v7471_v7 = vpop.xlane.xlu1 %7470 }
0x1364   : > { %v7491_v61 = vadd.f32 %v7471_v7, %v13822_v58 }
0x1367   : > { %v7468_v52 = vpop.xlane.xlu1 %7467 }
0x1368   : > { %v13915_v24 = vadd.f32 %v7468_v52, %v13912_v3 }
0x136b   : > { %v7477_v23 = vpop.xlane.xlu1 %7476 }
0x136c   : > { %v7493_v37 = vadd.f32 %v7477_v23, %v13830_v32 }
0x136e   : > { %v7686_v20 = vmul.f32 3.0, %v7493_v37  ;;  %v7684_v37 = vmul.f32 3.0, %v7491_v61 }
0x136f   : > { %v7474_v29 = vpop.xlane.xlu1 %7473 }
0x1370   : > { %10370 = vrcp.f32 %v7686_v20  ;;  %v7492_v15 = vadd.f32 %v7474_v29, %v13836_v55  ;;  %v7184_v20 = vmul.f32 3.0, %v6998_v16  ;;  %v6997_v55 = vadd.f32 %v6987_v10, %v13737_v51 }
0x1372   : > { %v7685_v30 = vmul.f32 3.0, %v7492_v15  ;;  %v7183_v7 = vmul.f32 3.0, %v6997_v55  ;;  %v8479_v55 = vld [vmem:[%s14614_s18 + $0x160] sm:$0xff] }
0x1373   : > { %v7483_v60 = vpop.xlane.xlu1 %7482 }
0x1374   : > { %v7495_v15 = vadd.f32 %v7483_v60, %v13842_v35  ;;  %v6991_v60 = vadd.f32 %v13875_v39, %v13811_v57  ;;  %v8482_v57 = vld [vmem:[%s14614_s18 + $0x178] sm:$0xff]  ;;  %v8497_v39 = vld [vmem:[%s14614_s18 + $0x1f0] sm:$0xff] }
0x1376   : > { %v7688_v58 = vmul.f32 3.0, %v7495_v15  ;;  %v8493_v15 = vld [vmem:[%s14614_s18 + $0x1d0] sm:$0xff] }
0x1377   : > { %v7480_v28 = vpop.xlane.xlu1 %7479 }
0x1378   : > { %v7494_v12 = vadd.f32 %v7480_v28, %v13848_v40 }
0x137a   : > { %v7687_v11 = vmul.f32 3.0, %v7494_v12 }
0x137b   : > { %v7489_v12 = vpop.xlane.xlu1 %7488 }
0x137c   : > { %10372 = vrcp.f32 %v7687_v11  ;;  %v7497_v27 = vadd.f32 %v7489_v12, %v13854_v44  ;;  %v7178_v44 = vmul.f32 3.0, %v13782_v13  ;;  %v8498_v13 = vld [vmem:[%s14614_s18 + $0x1f8] sm:$0xff] }
0x137d   : > { %v6981_v6 = vpop.xlane.xlu0 %6980  ;;  %v10371_v52 = vpop.eup %10370  ;;  %10374 = vrcp.f32 %v7685_v30  ;;  %9279 = vmatprep.subr.mxu1 %v8498_v13  ;;  %v8494_v12 = vld [vmem:[%s14614_s18 + $0x1d8] sm:$0xff] }
0x137e   : > { %v6995_v32 = vadd.f32 %v6981_v6, %v13762_v46  ;;  %7716 = vperm.xlu1 %9947, %v10371_v52   ;;  %v7690_v40 = vmul.f32 3.0, %v7497_v27  ;;  %9280 = vmatpush3.msra.mxu1 %v8482_v57  ;;  %v7880_v27 = vsel %vm1829_vm1, %v13905_v21, -inf  ;;  %v8469_v57 = vld [vmem:[%s14614_s18 + $0x110] sm:$0xff] }
0x137f   : > { %v7486_v6 = vpop.xlane.xlu1 %7485  ;;  %9281 = vmatprep.subr.mxu1 %v8497_v39 }
0x1380   : > { %v7181_v23 = vmul.f32 3.0, %v6995_v32  ;;  %v7496_v16 = vadd.f32 %v7486_v6, %v13862_v48  ;;  %v7177_v48 = vmul.f32 3.0, %v6991_v60  ;;  %v8481_v32 = vld [vmem:[%s14614_s18 + $0x170] sm:$0xff]  ;;  %v8492_v6 = vld [vmem:[%s14614_s18 + $0x1c8] sm:$0xff]  ;;  %v8471_v60 = vld [vmem:[%s14614_s18 + $0x120] sm:$0xff] }
0x1381   : > { %9282 = vmatpush3.msra.mxu1 %v8481_v32  ;;  %v8468_v32 = vld [vmem:[%s14614_s18 + $0x108] sm:$0xff] }
0x1382   : > { %10376 = vrcp.f32 %v7181_v23  ;;  %v7689_v10 = vmul.f32 3.0, %v7496_v16  ;;  %v8490_v16 = vld [vmem:[%s14614_s18 + $0x1b8] sm:$0xff] }
0x1383   : > { %10378 = vrcp.f32 %v7684_v37  ;;  %v8480_v37 = vld [vmem:[%s14614_s18 + $0x168] sm:$0xff] }
0x1384   : > { %10380 = vrcp.f32 %v7184_v20  ;;  %v8495_v20 = vld [vmem:[%s14614_s18 + $0x1e0] sm:$0xff] }
0x1385   : > { %10382 = vrcp.f32 %v7183_v7  ;;  %v8478_v7 = vld [vmem:[%s14614_s18 + $0x158] sm:$0xff] }
0x1386   : > { %10384 = vrcp.f32 %v7688_v58  ;;  %v7683_v58 = vmul.f32 3.0, %v13915_v24  ;;  %v8475_v24 = vld [vmem:[%s14614_s18 + $0x140] sm:$0xff] }
0x1387   : > { %10386 = vrcp.f32 %v7690_v40  ;;  %v8491_v40 = vld [vmem:[%s14614_s18 + $0x1c0] sm:$0xff] }
0x1388   : > { %10388 = vrcp.f32 %v7689_v10  ;;  %v8473_v10 = vld [vmem:[%s14614_s18 + $0x130] sm:$0xff] }
0x1389   : > { %v10373_v11 = vpop.eup %10372  ;;  %10390 = vrcp.f32 %v7178_v44  ;;  %v8487_v44 = vld [vmem:[%s14614_s18 + $0x1a0] sm:$0xff] }
0x138a   : > { %7721 = vperm.xlu1 %9947, %v10373_v11   ;;  %v10375_v46 = vpop.eup %10374  ;;  %10392 = vrcp.f32 %v7177_v48  ;;  %v8477_v11 = vld [vmem:[%s14614_s18 + $0x150] sm:$0xff]  ;;  %v14615_v48 = vld [vmem:[#allocation75_spill] sm:$0xff] }
0x138b   : > { %10394 = vrcp.f32 %v7683_v58  ;;  %v3185_v58 = vmul.f32 3.0, %v13722_v9 }
0x138e   : > { %7711 = vperm.xlu1 %9947, %v10375_v46   ;;  %v8476_v46 = vld [vmem:[%s14614_s18 + $0x148] sm:$0xff] }
0x138f   : > { %v10377_v51 = vpop.eup %10376 }
0x1390   : > { %7215 = vperm.xlu0 %9946, %v10377_v51   ;;  %v10379_v2 = vpop.eup %10378  ;;  %v8474_v51 = vld [vmem:[%s14614_s18 + $0x138] sm:$0xff] }
0x1391   : > { %v10381_v29 = vpop.eup %10380 }
0x1392   : > { %7706 = vperm.xlu1 %9947, %v10379_v2   ;;  %v10383_v35 = vpop.eup %10382  ;;  %v8489_v2 = vld [vmem:[%s14614_s18 + $0x1b0] sm:$0xff] }
0x1393   : > { %v10385_v28 = vpop.eup %10384 }
0x1394   : > { %7230 = vperm.xlu0 %9946, %v10381_v29   ;;  %v10387_v61 = vpop.eup %10386  ;;  %v8488_v29 = vld [vmem:[%s14614_s18 + $0x1a8] sm:$0xff] }
0x1395   : > { %v10389_v30 = vpop.eup %10388 }
0x1396   : > { %v10391_v52 = vpop.eup %10390 }
0x1397   : > { %v10393_v23 = vpop.eup %10392 }
0x1398   : > { %7225 = vperm.xlu0 %9946, %v10383_v35   ;;  %v8472_v35 = vld [vmem:[%s14614_s18 + $0x128] sm:$0xff]  ;;  %v10395_v13 = vpop.eup %10394 }
0x139c   : > { %7726 = vperm.xlu0 %9946, %v10385_v28   ;;  %v8486_v28 = vld [vmem:[%s14614_s18 + $0x198] sm:$0xff] }
0x13a0   : > { %7736 = vperm.xlu0 %9946, %v10387_v61   ;;  %v14011_v61 = vadd.f32 %v14615_v48, %v13336_v25  ;;  %v8484_v25 = vld [vmem:[%s14614_s18 + $0x188] sm:$0xff] }
0x13a2   : > { %v7770_v39 = vrot.slane %v14011_v61, %v10811_v53  ;;  %v14617_v53 = vld [vmem:[#allocation16_spill] sm:$0xff] }
0x13a4   : > { %7731 = vperm.xlu0 %9946, %v10389_v30   ;;  %v8470_v30 = vld [vmem:[%s14614_s18 + $0x118] sm:$0xff] }
0x13a8   : > { %7508 = vperm.xlu0 %9946, %v13912_v3   ;;  %v8496_v3 = vld [vmem:[%s14614_s18 + $0x1e8] sm:$0xff] }
0x13a9   : > { %9283 = vmatprep.subr.mxu1 %v8496_v3  ;;  %v8483_v3 = vld [vmem:[%s14614_s18 + $0x180] sm:$0xff] }
0x13aa   : > { %9284 = vmatpush3.msra.mxu1 %v8480_v37  ;;  %v7771_v37 = vmul.f32 %v7770_v39, %v13452_v8 }
0x13ab   : > { %9285 = vmatprep.subr.mxu1 %v8495_v20  ;;  %v14616_v20 = vld [vmem:[#allocation17_spill] sm:$0xff] }
0x13ac   : > { %7200 = vperm.xlu0 %9946, %v10391_v52   ;;  %9286 = vmatpush3.msra.mxu1 %v8479_v55  ;;  %v8485_v52 = vld [vmem:[%s14614_s18 + $0x190] sm:$0xff]  ;;  %v4829_v55 = vmul.f32 %v14617_v53, %v14616_v20 }
0x13ad   : > { %9287 = vmatprep.subr.mxu1 %v8494_v12  ;;  %v14618_v12 = vld [vmem:[#allocation13_spill] sm:$0xff] }
0x13ae   : > { %9288 = vmatpush3.msra.mxu1 %v8478_v7  ;;  %v3274_v7 = vsub.f32 %v14613_v38, %v14618_v12  ;;  %v14619_v38 = vld [vmem:[#allocation14_spill] sm:$0xff] }
0x13af   : > { %9289 = vmatprep.subr.mxu1 %v8493_v15  ;;  %v4830_v15 = vsel %vm3149_vm3, %v4829_v55, 0.0 }
0x13b0   : > { %7195 = vperm.xlu0 %9946, %v10393_v23   ;;  %9290 = vmatpush3.msra.mxu1 %v8477_v11  ;;  %v8467_v23 = vld [vmem:[%s14614_s18 + $0x100] sm:$0xff]  ;;  %v3275_v11 = vmul.f32 1.442695, %v3274_v7 }
0x13b1   : > { %9291 = vmatprep.subr.mxu1 %v8492_v6 }
0x13b2   : > { %9292 = vmatpush3.msra.mxu1 %v8476_v46  ;;  %10396 = vpow2.f32 %v3275_v11 }
0x13b3   : > { %9293 = vmatprep.subr.mxu1 %v8491_v40  ;;  %10398 = vrcp.f32 %v3185_v58 }
0x13b4   : > { %9294 = vmatpush3.msra.mxu1 %v8475_v24  ;;  %v3277_v24 = vld [vmem:[#allocation5] sm:$0x1] }
0x13b5   : > { %9295 = vmatprep.subr.mxu1 %v8490_v16 }
0x13b6   : > { %7881 = vmax.xlane.f32.xlu1 %v7880_v27  ;;  %9296 = vmatpush3.msra.mxu1 %v8474_v51  ;;  %v14043_v27 = vpop.permute.xlu0 %7007  ;;  %v7211_v51 = vpop.permute.xlu1 %7210 }
0x13b7   : > { %9297 = vmatprep.subr.mxu1 %v8489_v2  ;;  %v3279_v2 = vsel %vm3264_vm4, %v14619_v38, 0.0 }
0x13b8   : > { %9298 = vmatpush3.msra.mxu1 %v8473_v10 }
0x13b9   : > { %9299 = vmatprep.subr.mxu1 %v8488_v29 }
0x13ba   : > { %9300 = vmatpush3.msra.mxu1 %v8472_v35  ;;  %v14045_v6 = vpop.permute.xlu0 %7002  ;;  %v7206_v29 = vpop.permute.xlu1 %7205 }
0x13bb   : > { %9301 = vmatprep.subr.mxu1 %v8487_v44 }
0x13bc   : > { %9302 = vmatpush3.msra.mxu1 %v8471_v60 }
0x13bd   : > { %9303 = vmatprep.subr.mxu1 %v8486_v28 }
0x13be   : > { %9304 = vmatpush3.msra.mxu1 %v8470_v30  ;;  %v7514_v8 = vpop.permute.xlu0 %7513  ;;  %v7221_v60 = vpop.permute.xlu1 %7220  ;;  %v7236_v30 = vmul.f32 %v7211_v51, %v13884_v18  ;;  %v7235_v18 = vmul.f32 %v7206_v29, %v13891_v49 }
0x13bf   : > { %9305 = vmatprep.subr.mxu1 %v8485_v52  ;;  %v10397_v46 = vpop.eup %10396 }
0x13c0   : > { %9306 = vmatpush3.msra.mxu1 %v8469_v57  ;;  %v10399_v40 = vpop.eup %10398  ;;  %v14049_v10 = vmul.f32 %v10397_v46, %v3277_v24  ;;  %v7238_v24 = vmul.f32 %v7221_v60, %v13900_v33 }
0x13c1   : > { %9307 = vmatprep.subr.mxu1 %v8484_v25 }
0x13c2   : > { %9308 = vmatpush3.msra.mxu1 %v8468_v32  ;;  %v7524_v16 = vpop.permute.xlu0 %7523 }
0x13c3   : > { %9309 = vmatprep.subr.mxu1 %v8483_v3  ;;  %v7549_v35 = vmul.f32 %v7524_v16, %v13867_v19 }
0x13c4   : > { %9310 = vmatpush3.msra.mxu1 %v8467_v23 }
0x13c5   : > { %v7660_v28 = vadd.f32 %v13882_v41, %v7549_v35 }
0x13c6   : > { %v7519_v9 = vpop.permute.xlu0 %7518 }
0x13c7   : > { %7701 = vperm.xlu1 %9947, %v10395_v13   ;;  %v7548_v39 = vmul.f32 %v7519_v9, %v13867_v19 }
0x13ca   : > { %v7534_v44 = vpop.permute.xlu0 %7533 }
0x13ce   : > { %v7529_v52 = vpop.permute.xlu0 %7528 }
0x13cf   : > { %7772 = vadd.xlane.f32.xlu0 %v7771_v37  ;;  %v7550_v32 = vmul.f32 %v7529_v52, %v13867_v19  ;;  %v7655_v37 = vadd.f32 %v13886_v59, %v7548_v39  ;;  %v7551_v59 = vmul.f32 %v7534_v44, %v13867_v19 }
0x13d1   : > { %v7665_v41 = vadd.f32 %v13893_v47, %v7550_v32  ;;  %v7670_v49 = vadd.f32 %v13889_v1, %v7551_v59  ;;  %v7040_v32 = vmul.f32 %v14045_v6, %v13867_v19 }
0x13d2   : > { %v7544_v25 = vpop.permute.xlu0 %7543 }
0x13d3   : > { %4831 = vadd.xlane.f32.xlu0 %v4830_v15  ;;  %v7553_v46 = vmul.f32 %v7544_v25, %v13867_v19 }
0x13d5   : > { %v7680_v38 = vadd.f32 %v13896_v4, %v7553_v46  ;;  %v7547_v4 = vmul.f32 %v7514_v8, %v13867_v19  ;;  %v14620_v46 = vld [vmem:[#allocation56_spill] sm:$0xff] }
0x13d6   : > { %v7539_v23 = vpop.permute.xlu0 %7538 }
0x13d7   : > { %v7552_v16 = vmul.f32 %v7539_v23, %v13867_v19  ;;  %v7650_v52 = vadd.f32 %v13877_v26, %v7547_v4 }
0x13d9   : > { %v7675_v1 = vadd.f32 %v13902_v22, %v7552_v16 }
0x13e9   : > { %3189 = vperm.xlu0 %9946, %v10399_v40  }
0x13eb   : > { %3280 = vadd.xlane.f32.xlu1 %v3279_v2 }
0x13ed   : > { %3286 = vperm.xlu0 %9946, %v14049_v10  }
0x13f9   : > { %v7717_v48 = vpop.permute.xlu1 %7716 }
0x13fa   : > { %v7742_v13 = vmul.f32 %v7717_v48, %v7660_v28  ;;  %v7041_v28 = vmul.f32 %v14043_v27, %v13867_v19  ;;  %v14098_v27 = vmax.f32 %v13775_v5, %v13771_v36 }
0x13fc   : > { %v14055_v57 = vadd.f32 %v7742_v13, %v7236_v30  ;;  %v7144_v22 = vadd.f32 %v13856_v14, %v7041_v28  ;;  %v8061_v8 = vsub.f32 %v13531_v56, %v14098_v27  ;;  %v8421_v28 = vld [vmem:[#allocation2 + $0xd0] sm:$0xff] }
0x13fe   : > { %7758 = vst [vmem:[#allocation2 + $0x78] sm:$0xff] %v14055_v57  ;;  %v8062_v23 = vmul.f32 1.442695, %v8061_v8 }
0x1400   : > { %10400 = vpow2.f32 %v8062_v23 }
0x1405   : > { %v7722_v3 = vpop.permute.xlu1 %7721 }
0x1406   : > { %v7743_v12 = vmul.f32 %v7722_v3, %v7665_v41  ;;  %v7139_v41 = vadd.f32 %v13864_v63, %v7040_v32  ;;  %v8401_v63 = vld [vmem:[#allocation2 + $0x30] sm:$0xff] }
0x1409   : > { %v7712_v20 = vpop.permute.xlu1 %7711 }
0x140a   : > { %v7741_v53 = vmul.f32 %v7712_v20, %v7655_v37 }
0x140b   : > { %v7216_v55 = vpop.permute.xlu0 %7215 }
0x140c   : > { %v7237_v7 = vmul.f32 %v7216_v55, %v13907_v31  ;;  %v14064_v15 = vadd.f32 %v7741_v53, %v7235_v18 }
0x140d   : > { %v7707_v30 = vpop.permute.xlu1 %7706 }
0x140e   : > { %v14066_v11 = vadd.f32 %v7743_v12, %v7237_v7  ;;  %7757 = vst [vmem:[#allocation2 + $0x58] sm:$0xff] %v14064_v15  ;;  %v10401_v12 = vpop.eup %10400 }
0x140f   : > { %v7231_v58 = vpop.permute.xlu0 %7230 }
0x1410   : > { %7759 = vst [vmem:[#allocation2 + $0x98] sm:$0xff] %v14066_v11  ;;  %v7240_v9 = vmul.f32 %v7231_v58, %v13871_v17  ;;  %v8064_v58 = vld [vmem:[%s14392_s9] sm:$0xff] }
0x1413   : > { %v7226_v47 = vpop.permute.xlu0 %7225 }
0x1414   : > { %v7239_v33 = vmul.f32 %v7226_v47, %v13873_v34  ;;  %v7740_v34 = vmul.f32 %v7707_v30, %v7650_v52  ;;  %v8409_v47 = vld [vmem:[#allocation2 + $0x70] sm:$0xff]  ;;  %v7892_v52 = vld [vmem:[%s14398_s15] sm:$0xff] }
0x1417   : > { %v7727_v40 = vpop.permute.xlu0 %7726 }
0x1418   : > { %v7744_v31 = vmul.f32 %v7727_v40, %v7670_v49  ;;  %v14124_v49 = vadd.f32 %v14620_v46, %v13340_v54 }
0x141a   : > { %v14075_v51 = vadd.f32 %v7744_v31, %v7238_v24  ;;  %v8065_v24 = vmul.f32 %v10401_v12, %v8064_v58 }
0x141b   : > { %v7737_v2 = vpop.permute.xlu0 %7736 }
0x141c   : > { %7760 = vst [vmem:[#allocation2 + $0xb8] sm:$0xff] %v14075_v51  ;;  %v7746_v29 = vmul.f32 %v7737_v2, %v7680_v38  ;;  %v8413_v2 = vld [vmem:[#allocation2 + $0x90] sm:$0xff] }
0x141e   : > { %v14080_v35 = vadd.f32 %v7746_v29, %v7240_v9  ;;  %v8071_v9 = vsel %vm2329_vm2, %v8065_v24, 0.0  ;;  %v8172_v29 = vmul.f32 %v13344_v45, %v14124_v49 }
0x141f   : > { %v7732_v44 = vpop.permute.xlu0 %7731 }
0x1420   : > { %7762 = vst [vmem:[#allocation2 + $0xf8] sm:$0xff] %v14080_v35  ;;  %v7745_v60 = vmul.f32 %v7732_v44, %v7675_v1  ;;  %v8066_v1 = vsub.f32 %v13771_v36, %v14098_v27  ;;  %v8173_v45 = vsel %vm3149_vm3, %v8172_v29, 0.0 }
0x1422   : > { %v14088_v48 = vadd.f32 %v7745_v60, %v7239_v33  ;;  %v8417_v60 = vld [vmem:[#allocation2 + $0xb0] sm:$0xff] }
0x1423   : > { %v7509_v17 = vpop.permute.xlu0 %7508 }
0x1424   : > { %7761 = vst [vmem:[#allocation2 + $0xd8] sm:$0xff] %v14088_v48  ;;  %v7546_v26 = vmul.f32 %v7509_v17, %v13867_v19  ;;  %v8397_v19 = vld [vmem:[#allocation2 + $0x10] sm:$0xff] }
0x1426   : > { %v7645_v5 = vadd.f32 %v13879_v50, %v7546_v26  ;;  %v8405_v50 = vld [vmem:[#allocation2 + $0x50] sm:$0xff]  ;;  %v7783_v26 = vld [vmem:[%s14397_s14] sm:$0xff] }
0x1427   : > { %v7201_v13 = vpop.permute.xlu0 %7200 }
0x1428   : > { %v7234_v25 = vmul.f32 %v7201_v13, %v7144_v22 }
0x142a   : > { %v14093_v39 = vadd.f32 %v7740_v34, %v7234_v25  ;;  %v8069_v25 = vld [vmem:[%s14399_s16] sm:$0xff] }
0x142b   : > { %v7196_v37 = vpop.permute.xlu0 %7195 }
0x142c   : > { %7756 = vst [vmem:[#allocation2 + $0x38] sm:$0xff] %v14093_v39  ;;  %v7233_v53 = vmul.f32 %v7196_v37, %v7139_v41 }
0x143f   : > { %v7882_v14 = vpop.xlane.xlu1 %7881 }
0x1440   : > { %v7883_v3 = vmax.f32 %v7882_v14, %v13771_v36 }
0x1442   : > { %v7884_v20 = vsub.f32 %v13905_v21, %v7883_v3  ;;  %v7887_v21 = vld [vmem:[%s14391_s8] sm:$0xff]  ;;  %v7889_v16 = vsub.f32 %v13771_v36, %v7883_v3 }
0x1443   : > { %v7702_v18 = vpop.permute.xlu1 %7701 }
0x1444   : > { %v7885_v55 = vmul.f32 1.442695, %v7884_v20  ;;  %v7739_v56 = vmul.f32 %v7702_v18, %v7645_v5  ;;  %v7890_v44 = vmul.f32 1.442695, %v7889_v16  ;;  %v4837_v5 = vld [vmem:[#allocation3] sm:$0x1] }
0x1446   : > { %10402 = vpow2.f32 %v7885_v55  ;;  %v14109_v6 = vadd.f32 %v7739_v56, %v7233_v53 }
0x1448   : > { %7755 = vst [vmem:[#allocation2 + $0x18] sm:$0xff] %v14109_v6  ;;  %8685 = vmatprep.mubr.f32.mxu1 %v14109_v6 }
0x1449   : > { %8686 = vmatmul.mubr.f32.vlgmr.msra.gmra.mxu1 %v8397_v19 }
0x144a   : > { %8690 = vmatprep.mubr.f32.mxu1 %v14093_v39 }
0x144d   : > { %8691 = vmatmul.mubr.f32.gmra.mxu1 %v8401_v63 }
0x144e   : > { %8695 = vmatprep.mubr.f32.mxu1 %v14064_v15 }
0x1451   : > { %8696 = vmatmul.mubr.f32.gmra.mxu1 %v8405_v50 }
0x1452   : > { %8700 = vmatprep.mubr.f32.mxu1 %v14055_v57 }
0x1453   : > { %v10403_v7 = vpop.eup %10402 }
0x1454   : > { %v7888_v59 = vmul.f32 %v10403_v7, %v7887_v21 }
0x1455   : > { %8701 = vmatmul.mubr.f32.gmra.mxu1 %v8409_v47 }
0x1456   : > { %9859 = vmatmul.mubr.msk.f32.vlgmr.msra.gmra.mxu0 %vm1829_vm1, %v7888_v59  ;;  %v7894_v40 = vsel %vm1829_vm1, %v7888_v59, 0.0  ;;  %8705 = vmatprep.mubr.f32.mxu1 %v14066_v11  ;;  %v14622_v59 = vld [vmem:[#allocation15_spill] sm:$0xff] }
0x1457   : > { %9881 = vmatpush3.msra.mxu0 %v14080_v35  ;;  %7895 = vadd.xlane.f32.xlu1 %v7894_v40 }
0x1458   : > { %v7773_v31 = vpop.xlane.xlu0 %7772  ;;  %9882 = vmatprep.subr.mxu0 %v14484_v43  ;;  %9896 = vmatprep.mubr.msk.f32.mxu0 %vm10543_vm0, %v14484_v43 }
0x1459   : > { %v7774_v38 = vmax.f32 %v7773_v31, %v13771_v36  ;;  %9883 = vmatpush3.msra.mxu0 %v14088_v48  ;;  %8706 = vmatmul.mubr.f32.gmra.mxu1 %v8413_v2 }
0x145a   : > { %9884 = vmatprep.subr.mxu0 %v14484_v43  ;;  %8710 = vmatprep.mubr.f32.mxu1 %v14075_v51 }
0x145b   : > { %v7775_v54 = vsub.f32 %v7773_v31, %v7774_v38  ;;  %9885 = vmatpush3.msra.mxu0 %v14075_v51  ;;  %8072 = vadd.xlane.f32.xlu1 %v8071_v9  ;;  %v8067_v51 = vmul.f32 1.442695, %v8066_v1  ;;  %v7780_v4 = vsub.f32 %v13771_v36, %v7774_v38  ;;  %v4842_v38 = vld [vmem:[#allocation4] sm:$0x1]  ;;  %v8177_v1 = vmul.f32 %v14011_v61, %v14124_v49 }
0x145c   : > { %9886 = vmatprep.subr.mxu0 %v14484_v43  ;;  %v4832_v36 = vpop.xlane.xlu0 %4831 }
0x145d   : > { %v7776_v33 = vmul.f32 1.442695, %v7775_v54  ;;  %9887 = vmatpush3.msra.mxu0 %v14066_v11  ;;  %8711 = vmatmul.mubr.f32.gmra.mxu1 %v8417_v60  ;;  %v7781_v11 = vmul.f32 1.442695, %v7780_v4  ;;  %v14623_v54 = vld [vmem:[#allocation31_spill] sm:$0xff] }
0x145e   : > { %9888 = vmatprep.subr.mxu0 %v14484_v43  ;;  %8715 = vmatprep.mubr.f32.mxu1 %v14088_v48  ;;  %v14621_v48 = vld [vmem:[#allocation32_spill] sm:$0xff] }
0x145f   : > { %10404 = vpow2.f32 %v7776_v33  ;;  %9889 = vmatpush3.msra.mxu0 %v14055_v57  ;;  %8174 = vadd.xlane.f32.xlu1 %v8173_v45  ;;  %v8425_v57 = vld [vmem:[#allocation2 + $0xf0] sm:$0xff]  ;;  %v4833_v17 = vmax.f32 %v4832_v36, %v14621_v48  ;;  %v4948_v9 = vsub.f32 %v14621_v48, %v14623_v54  ;;  %v8396_v54 = vld [vmem:[#allocation2 + $0x8] sm:$0xff] }
0x1460   : > { %10406 = vpow2.f32 %v7890_v44  ;;  %9890 = vmatprep.subr.mxu0 %v14484_v43 }
0x1461   : > { %9891 = vmatpush3.msra.mxu0 %v14064_v15  ;;  %8716 = vmatmul.mubr.f32.gmra.mxu1 %v8421_v28  ;;  %10408 = vpow2.f32 %v8067_v51  ;;  %v7778_v15 = vld [vmem:[%s14390_s7] sm:$0xff]  ;;  %v4834_v22 = vsub.f32 %v4832_v36, %v4833_v17  ;;  %v4839_v50 = vsub.f32 %v14621_v48, %v4833_v17  ;;  %v4949_v33 = vmul.f32 1.442695, %v4948_v9  ;;  %v8464_v9 = vld [vmem:[%s14614_s18 + $0xe8] sm:$0xff] }
0x1462   : > { %9892 = vmatprep.subr.mxu0 %v14484_v43  ;;  %8720 = vmatprep.mubr.f32.mxu1 %v14080_v35  ;;  %10410 = vpow2.f32 %v7781_v11  ;;  %v4951_v36 = vld [vmem:[#allocation5] sm:$0x1] }
0x1463   : > { %9893 = vmatpush3.msra.mxu0 %v14093_v39  ;;  %v4840_v7 = vmul.f32 1.442695, %v4839_v50  ;;  %v14624_v17 = vld [vmem:[#allocation55_spill] sm:$0xff] }
0x1464   : > { %9894 = vmatprep.subr.mxu0 %v14484_v43  ;;  %v3190_v19 = vpop.permute.xlu0 %3189 }
0x1465   : > { %9895 = vmatpush3.msra.mxu0 %v14109_v6  ;;  %8721 = vmatmul.mubr.f32.gmra.mxu1 %v8425_v57  ;;  %v3192_v40 = vmul.f32 %v3190_v19, %v13828_v0  ;;  %v8178_v0 = vsel %vm3149_vm3, %v8177_v1, 0.0  ;;  %v14627_v1 = vld [vmem:[#allocation28_spill] sm:$0xff] }
0x1466   : > { %9897 = vmatmul.mubr.msk.f32.vlgmr.msra.gmra.mxu0 %vm2329_vm2, %v8065_v24  ;;  %9899 = vmatprep.subr.mxu0 %v14484_v43 }
0x1467   : > { %9900 = vmatpush3.xpose.msra.mxu0 %v13391_v62  ;;  %9901 = vmatprep.mubr.msk.f32.mxu0 %vm10543_vm0, %v14484_v43 }
0x1468   : > { %9904 = vmatprep.subr.mxu0 %v14484_v43  ;;  %v3287_v21 = vpop.permute.xlu0 %3286 }
0x1469   : > { %v3289_v12 = vmul.f32 %v3287_v21, %v13819_v42 }
0x146a   : > { %9902 = vmatmul.mubr.f32.vlgmr.msra.gmra.mxu0 %v14124_v49 }
0x146b   : > { %9906 = vmatprep.mubr.msk.f32.mxu0 %vm10543_vm0, %v14484_v43  ;;  %v4835_v43 = vmul.f32 1.442695, %v4834_v22  ;;  %v3360_v47 = vadd.f32 %v14622_v59, %v3289_v12  ;;  %v8429_v59 = vld [vmem:[#allocation2 + $0x110] sm:$0xff] }
0x146c   : > { %v10405_v35 = vpop.eup %10404 }
0x146d   : > { %v7779_v62 = vmul.f32 %v10405_v35, %v7778_v15  ;;  %v10407_v30 = vpop.eup %10406  ;;  %10412 = vpow2.f32 %v4835_v43 }
0x146e   : > { %v14174_v13 = vmul.f32 %v10407_v30, %v7892_v52  ;;  %v10409_v34 = vpop.eup %10408  ;;  %v14626_v52 = vld [vmem:[#allocation30_spill] sm:$0xff] }
0x146f   : > { %7790 = vperm.xlu0 %9946, %v7779_v62   ;;  %v8070_v27 = vmul.f32 %v10409_v34, %v8069_v25  ;;  %v10411_v32 = vpop.eup %10410  ;;  %v4953_v22 = vsel %vm3264_vm4, %v14626_v52, 0.0  ;;  %v8440_v52 = vld [vmem:[%s14614_s18 + $0x28] sm:$0xff] }
0x1470   : > { %v7784_v3 = vmul.f32 %v10411_v32, %v7783_v26 }
0x1472   : > { %v7786_v23 = vadd.f32 %v7784_v3, %v7779_v62  ;;  %v14625_v62 = vld [vmem:[#allocation77_spill] sm:$0xff] }
0x1473   : > { %7901 = vperm.xlu0 %9946, %v14174_v13   ;;  %v6503_v30 = vmul.f32 %v14625_v62, %v14624_v17  ;;  %v8441_v17 = vld [vmem:[%s14614_s18 + $0x30] sm:$0xff]  ;;  %v8456_v62 = vld [vmem:[%s14614_s18 + $0xa8] sm:$0xff] }
0x1474   : > { %v3281_v39 = vpop.xlane.xlu1 %3280  ;;  %v7801_v37 = vmul.f32 3.0, %v7786_v23 }
0x1475   : > { %v3282_v8 = vadd.f32 %v3281_v39, %v14049_v10 }
0x1477   : > { %8085 = vperm.xlu0 %9946, %v8070_v27   ;;  %v3363_v14 = vmul.f32 3.0, %v3282_v8  ;;  %v14210_v8 = vld [vmem:[#allocation2 + $0x18] ss:$0 sm:$0xff] }
0x1479   : > { %10414 = vrcp.f32 %v3363_v14 }
0x147a   : > { %v10413_v41 = vpop.eup %10412  ;;  %10416 = vrcp.f32 %v7801_v37 }
0x147b   : > { %v4838_v18 = vmul.f32 %v10413_v41, %v4837_v5 }
0x1486   : > { %v10415_v20 = vpop.eup %10414 }
0x1487   : > { %3367 = vperm.xlu1 %9947, %v10415_v20   ;;  %v10417_v10 = vpop.eup %10416 }
0x148b   : > { %4849 = vperm.xlu1 %9947, %v4838_v18  }
0x148f   : > { %7796 = vperm.xlu1 %9947, %v7784_v3   ;;  %v14216_v3 = vld [vmem:[#allocation2 + $0x138] ss:$0 sm:$0xff] }
0x1493   : > { %7805 = vperm.xlu1 %9947, %v10417_v10  }
0x14e0   : > { %v7896_v53 = vpop.xlane.xlu1 %7895 }
0x14e1   : > { %v7897_v15 = vadd.f32 %v7896_v53, %v14174_v13  ;;  %v6504_v13 = vsel %vm3149_vm3, %v6503_v30, 0.0 }
0x14e3   : > { %v7978_v49 = vmul.f32 3.0, %v7897_v15  ;;  %v8458_v15 = vld [vmem:[%s14614_s18 + $0xb8] sm:$0xff] }
0x14e4   : > { %v8073_v55 = vpop.xlane.xlu1 %8072 }
0x14e5   : > { %v8074_v56 = vadd.f32 %v8073_v55, %v8070_v27 }
0x14e7   : > { %v8162_v6 = vmul.f32 3.0, %v8074_v56 }
0x14e8   : > { %v14186_v58 = vpop.xlane.xlu1 %8174 }
0x14e9   : > { %10418 = vrcp.f32 %v8162_v6 }
0x14ea   : > { %10420 = vpow2.f32 %v4840_v7  ;;  %v7791_v34 = vpop.permute.xlu0 %7790  ;;  %v8466_v7 = vld [vmem:[%s14614_s18 + $0xf8] sm:$0xff] }
0x14eb   : > { %10422 = vpow2.f32 %v4949_v33  ;;  %v7793_v23 = vmul.f32 %v7791_v34, %v14216_v3  ;;  %v8447_v33 = vld [vmem:[%s14614_s18 + $0x60] sm:$0xff] }
0x14ec   : > { %v8439_v34 = vld [vmem:[%s14614_s18 + $0x20] sm:$0xff] }
0x14ee   : > { %v7902_v25 = vpop.permute.xlu0 %7901 }
0x14ef   : > { %v7904_v20 = vmul.f32 %v7902_v25, %v14210_v8  ;;  %v8454_v25 = vld [vmem:[%s14614_s18 + $0x98] sm:$0xff] }
0x14f2   : > { %v8086_v39 = vpop.permute.xlu0 %8085 }
0x14f3   : > { %v8088_v10 = vmul.f32 %v8086_v39, %v14210_v8 }
0x14f6   : > { %v10419_v63 = vpop.eup %10418 }
0x14f7   : > { %8166 = vperm.xlu1 %9947, %v10419_v63   ;;  %v10421_v16 = vpop.eup %10420 }
0x14f8   : > { %v14190_v2 = vmul.f32 %v10421_v16, %v4842_v38  ;;  %v10423_v28 = vpop.eup %10422  ;;  %v8449_v38 = vld [vmem:[%s14614_s18 + $0x70] sm:$0xff] }
0x14f9   : > { %v14200_v61 = vmul.f32 %v10423_v28, %v4951_v36  ;;  %v8460_v28 = vld [vmem:[%s14614_s18 + $0xc8] sm:$0xff]  ;;  %v8443_v36 = vld [vmem:[%s14614_s18 + $0x40] sm:$0xff] }
0x14fa   : > { %v4845_v42 = vadd.f32 %v14190_v2, %v4838_v18 }
0x14fc   : > { %v4860_v60 = vmul.f32 3.0, %v4845_v42  ;;  %v8448_v42 = vld [vmem:[%s14614_s18 + $0x68] sm:$0xff] }
0x14fe   : > { %10424 = vrcp.f32 %v4860_v60  ;;  %v8462_v60 = vld [vmem:[%s14614_s18 + $0xd8] sm:$0xff] }
0x14ff   : > { %10426 = vrcp.f32 %v7978_v49  ;;  %v8442_v49 = vld [vmem:[%s14614_s18 + $0x38] sm:$0xff] }
0x1502   : > { %v3368_v46 = vpop.permute.xlu1 %3367 }
0x1503   : > { %v3370_v24 = vmul.f32 %v3368_v46, %v3360_v47  ;;  %v8294_v47 = vld [vmem:[%s14394_s11] sm:$0x1] }
0x1505   : > { %v3371_v31 = vadd.f32 %v3370_v24, %v3192_v40  ;;  %v8450_v24 = vld [vmem:[%s14614_s18 + $0x78] sm:$0xff] }
0x1506   : > { %v14208_v43 = vpop.permute.xlu1 %4849 }
0x1507   : > { %3372 = vst [vmem:[#allocation2 + $0x120] sm:$0x1] %v3371_v31  ;;  %v8465_v31 = vld [vmem:[%s14614_s18 + $0xf0] sm:$0xff] }
0x150a   : > { %v7797_v27 = vpop.permute.xlu1 %7796 }
0x150b   : > { %v10425_v57 = vpop.eup %10424  ;;  %v7799_v26 = vmul.f32 %v7797_v27, %v14210_v8  ;;  %v8438_v27 = vld [vmem:[%s14614_s18 + $0x18] sm:$0xff] }
0x150c   : > { %v10427_v48 = vpop.eup %10426 }
0x150d   : > { %v7800_v5 = vadd.f32 %v7799_v26, %v7793_v23  ;;  %v8453_v26 = vld [vmem:[%s14614_s18 + $0x90] sm:$0xff] }
0x150e   : > { %v7806_v41 = vpop.permute.xlu1 %7805  ;;  %v8437_v23 = vld [vmem:[%s14614_s18 + $0x10] sm:$0xff] }
0x150f   : > { %v7808_v6 = vmul.f32 %v7806_v41, %v7800_v5  ;;  %v8436_v41 = vld [vmem:[%s14614_s18 + $0x8] sm:$0xff]  ;;  %v8435_v5 = vld [vmem:[%s14614_s18] sm:$0xff] }
0x1516   : > { %v7974_v29 = vpop.f32.mrf.mxu0 }
0x1517   : > { %v7975_v53 = vadd.f32 %v7974_v29, %v7904_v20  ;;  %v8463_v29 = vld [vmem:[%s14614_s18 + $0xe0] sm:$0xff] }
0x1518   : > { %v9860_v44 = vpop.f32.mrf.mxu0  ;;  %v8451_v20 = vld [vmem:[%s14614_s18 + $0x80] sm:$0xff] }
0x1519   : > { %v6627_v44 = vsel %vm3264_vm4, %v14627_v1, 0.0  ;;  %v8412_v1 = vld [vmem:[#allocation2 + $0x88] sm:$0xff] }
0x151b   : > { %8179 = vadd.xlane.f32.xlu1 %v8178_v0  ;;  %v8446_v0 = vld [vmem:[%s14614_s18 + $0x58] sm:$0xff] }
0x1526   : > { %v8158_v45 = vpop.f32.mrf.mxu0 }
0x1527   : > { %v8159_v19 = vadd.f32 %v8158_v45, %v8088_v10  ;;  %v8461_v45 = vld [vmem:[%s14614_s18 + $0xd0] sm:$0xff] }
0x1528   : > { %v9898_v51 = vpop.f32.mrf.mxu0 }
0x1529   : > { %v8445_v51 = vld [vmem:[%s14614_s18 + $0x50] sm:$0xff] }
0x152a   : > { %v8283_v4 = vpop.f32.mrf.mxu0 }
0x152b   : > { %v8287_v11 = vsel %vm3264_vm4, %v8283_v4, -inf }
0x152c   : > { %v9903_v35 = vpop.f32.mrf.mxu0  ;;  %8288 = vmax.xlane.f32.xlu0 %v8287_v11  ;;  %4864 = vperm.xlu1 %9947, %v10425_v57   ;;  %v8459_v11 = vld [vmem:[%s14614_s18 + $0xc0] sm:$0xff] }
0x1530   : > { %4960 = vperm.xlu1 %9947, %v14200_v61  }
0x1542   : > { %7982 = vperm.xlu0 %9946, %v10427_v48   ;;  %v8457_v48 = vld [vmem:[%s14614_s18 + $0xb0] sm:$0xff] }
0x1561   : > { %4954 = vadd.xlane.f32.xlu0 %v4953_v22 }
0x1565   : > { %6505 = vadd.xlane.f32.xlu0 %v6504_v13  ;;  %v8455_v13 = vld [vmem:[%s14614_s18 + $0xa0] sm:$0xff] }
0x1572   : > { %v8167_v55 = vpop.permute.xlu1 %8166 }
0x1573   : > { %v8169_v50 = vmul.f32 %v8167_v55, %v8159_v19  ;;  %v8400_v55 = vld [vmem:[#allocation2 + $0x28] sm:$0xff]  ;;  %v14629_v19 = vld [vmem:[#allocation18_spill] sm:$0xff] }
0x15a4   : > { %v8180_v57 = vpop.xlane.xlu1 %8179 }
0x15a5   : > { %v8181_v35 = vmax.f32 %v8180_v57, %v14186_v58 }
0x15a7   : > { %v8182_v30 = vsub.f32 %v8180_v57, %v8181_v35  ;;  %v8187_v22 = vsub.f32 %v14186_v58, %v8181_v35  ;;  %v6516_v57 = vld [vmem:[#allocation4] sm:$0x1] }
0x15a9   : > { %v8183_v39 = vmul.f32 1.442695, %v8182_v30 }
0x15b5   : > { %v8289_v32 = vpop.xlane.xlu0 %8288 }
0x15b6   : > { %v14214_v14 = vmax.f32 %v8289_v32, %v14186_v58  ;;  %v8188_v32 = vmul.f32 1.442695, %v8187_v22 }
0x15b8   : > { %v8291_v37 = vsub.f32 %v8283_v4, %v14214_v14  ;;  %v8444_v4 = vld [vmem:[%s14614_s18 + $0x48] sm:$0xff] }
0x15ba   : > { %v8292_v18 = vmul.f32 1.442695, %v8291_v37  ;;  %v8452_v37 = vld [vmem:[%s14614_s18 + $0x88] sm:$0xff] }
0x15bc   : > { %10428 = vpow2.f32 %v8292_v18 }
0x15bd   : > { %v7983_v56 = vpop.permute.xlu0 %7982  ;;  %10430 = vpow2.f32 %v8183_v39 }
0x15be   : > { %v7985_v63 = vmul.f32 %v7983_v56, %v7975_v53  ;;  %10432 = vpow2.f32 %v8188_v32  ;;  %v8395_v53 = vld [vmem:[#allocation2] sm:$0xff]  ;;  %v8296_v32 = vsub.f32 %v14186_v58, %v14214_v14  ;;  %v4828_v58 = vld [vmem:[#allocation2 + $0x8] ss:$0 sm:$0xff] }
0x15c0   : > { %v7986_v21 = vadd.f32 %v7985_v63, %v7808_v6  ;;  %v14628_v6 = vld [vmem:[#allocation19_spill] sm:$0xff] }
0x15c1   : > { %v6622_v63 = vsub.f32 %v14629_v19, %v14628_v6 }
0x15c2   : > { %v8170_v12 = vadd.f32 %v8169_v50, %v7986_v21  ;;  %v8399_v21 = vld [vmem:[#allocation2 + $0x20] sm:$0xff] }
0x15c4   : > { %8171 = vst [vmem:[#allocation2 + $0x118] sm:$0xff] %v8170_v12  ;;  %9905 = vmatpush3.msra.mxu0 %v8170_v12  ;;  %8725 = vmatprep.mubr.f32.mxu1 %v8170_v12  ;;  %v8404_v12 = vld [vmem:[#allocation2 + $0x48] sm:$0xff] }
0x15c5   : > { %9217 = vmatprep.subr.mxu0 %v8466_v7  ;;  %8726 = vmatmul.mubr.f32.gmra.mxu1 %v8429_v59 }
0x15c9   : > { %v10429_v46 = vpop.eup %10428 }
0x15ca   : > { %v8295_v40 = vmul.f32 %v10429_v46, %v8294_v47  ;;  %v10431_v47 = vpop.eup %10430  ;;  %v6623_v46 = vmul.f32 1.442695, %v6622_v63 }
0x15cc   : > { %v8301_v16 = vsel %vm3264_vm4, %v8295_v40, 0.0  ;;  %9907 = vmatmul.mubr.msk.f32.vlgmr.msra.gmra.mxu0 %vm1829_vm1, %v8295_v40 }
0x15cd   : > { %8302 = vadd.xlane.f32.xlu0 %v8301_v16  ;;  %9218 = vmatpush3.msra.mxu0 %v8450_v24  ;;  %v8408_v16 = vld [vmem:[#allocation2 + $0x68] sm:$0xff] }
0x15ce   : > { %8570 = vmatprep.mubr.f32.mxu0 %v8396_v54  ;;  %9219 = vmatprep.subr.mxu0 %v8465_v31  ;;  %v10433_v31 = vpop.eup %10432  ;;  %v8190_v54 = vld [vmem:[#allocation4] sm:$0x1] }
0x15cf   : > { %9220 = vmatpush3.msra.mxu0 %v8449_v38  ;;  %v8185_v38 = vld [vmem:[#allocation3] sm:$0x1] }
0x15d0   : > { %9221 = vmatprep.subr.mxu0 %v8464_v9  ;;  %v8407_v9 = vld [vmem:[#allocation2 + $0x60] sm:$0xff] }
0x15d1   : > { %6628 = vadd.xlane.f32.xlu0 %v6627_v44  ;;  %9222 = vmatpush3.msra.mxu0 %v8448_v42  ;;  %v8186_v42 = vmul.f32 %v10431_v47, %v8185_v38  ;;  %v8411_v44 = vld [vmem:[#allocation2 + $0x80] sm:$0xff]  ;;  %v9311_v38 = vpop.f32.mrf.mxu1 }
0x15d2   : > { %9223 = vmatprep.subr.mxu0 %v8463_v29  ;;  %v14333_v29 = vmul.f32 %v10433_v31, %v8190_v54 }
0x15d3   : > { %9224 = vmatpush3.msra.mxu0 %v8447_v33 }
0x15d4   : > { %9225 = vmatprep.subr.mxu0 %v8462_v60  ;;  %v8193_v33 = vadd.f32 %v14333_v29, %v8186_v42 }
0x15d5   : > { %9226 = vmatpush3.msra.mxu0 %v8446_v0  ;;  %v8416_v0 = vld [vmem:[#allocation2 + $0xa8] sm:$0xff] }
0x15d6   : > { %9227 = vmatprep.subr.mxu0 %v8461_v45  ;;  %v8415_v45 = vld [vmem:[#allocation2 + $0xa0] sm:$0xff] }
0x15d7   : > { %9228 = vmatpush3.msra.mxu0 %v8445_v51  ;;  %v8208_v51 = vmul.f32 3.0, %v8193_v33 }
0x15d8   : > { %9229 = vmatprep.subr.mxu0 %v8460_v28  ;;  %v8420_v28 = vld [vmem:[#allocation2 + $0xc8] sm:$0xff] }
0x15d9   : > { %9230 = vmatpush3.msra.mxu0 %v8444_v4  ;;  %v6511_v4 = vld [vmem:[#allocation3] sm:$0x1] }
0x15da   : > { %9231 = vmatprep.subr.mxu0 %v8459_v11 }
0x15db   : > { %9232 = vmatpush3.msra.mxu0 %v8443_v36 }
0x15dc   : > { %9233 = vmatprep.subr.mxu0 %v8458_v15  ;;  %v8419_v15 = vld [vmem:[#allocation2 + $0xc0] sm:$0xff] }
0x15dd   : > { %9234 = vmatpush3.msra.mxu0 %v8442_v49 }
0x15de   : > { %9235 = vmatprep.subr.mxu0 %v8457_v48 }
0x15df   : > { %9236 = vmatpush3.msra.mxu0 %v8441_v17  ;;  %v8424_v17 = vld [vmem:[#allocation2 + $0xe8] sm:$0xff] }
0x15e0   : > { %9237 = vmatprep.subr.mxu0 %v8456_v62  ;;  %v6625_v62 = vld [vmem:[#allocation5] sm:$0x1] }
0x15e1   : > { %9238 = vmatpush3.msra.mxu0 %v8440_v52  ;;  %v8423_v52 = vld [vmem:[#allocation2 + $0xe0] sm:$0xff] }
0x15e2   : > { %9239 = vmatprep.subr.mxu0 %v8455_v13 }
0x15e3   : > { %9240 = vmatpush3.msra.mxu0 %v8439_v34  ;;  %v8428_v34 = vld [vmem:[#allocation2 + $0x108] sm:$0xff] }
0x15e4   : > { %9241 = vmatprep.subr.mxu0 %v8454_v25  ;;  %v8427_v25 = vld [vmem:[#allocation2 + $0x100] sm:$0xff] }
0x15e5   : > { %9242 = vmatpush3.msra.mxu0 %v8438_v27 }
0x15e6   : > { %9243 = vmatprep.subr.mxu0 %v8453_v26  ;;  %v8297_v26 = vmul.f32 1.442695, %v8296_v32 }
0x15e7   : > { %4855 = vperm.xlu0 %9946, %v14190_v2   ;;  %9244 = vmatpush3.msra.mxu0 %v8437_v23 }
0x15e8   : > { %9245 = vmatprep.subr.mxu0 %v8452_v37  ;;  %v8299_v37 = vld [vmem:[#allocation5] sm:$0x1] }
0x15e9   : > { %9246 = vmatpush3.msra.mxu0 %v8436_v41 }
0x15ea   : > { %v4955_v18 = vpop.xlane.xlu0 %4954  ;;  %9247 = vmatprep.subr.mxu0 %v8451_v20 }
0x15eb   : > { %v4956_v10 = vadd.f32 %v4955_v18, %v14200_v61  ;;  %9248 = vmatpush3.msra.mxu0 %v8435_v5  ;;  %v8403_v61 = vld [vmem:[#allocation2 + $0x40] sm:$0xff] }
0x15ec   : > { %8571 = vmatmul.mubr.f32.vlgmr.msra.gmra.mxu0 %v8395_v53 }
0x15ed   : > { %v5037_v2 = vmul.f32 3.0, %v4956_v10  ;;  %8575 = vmatprep.mubr.f32.mxu0 %v8400_v55 }
0x15ee   : > { %v6506_v56 = vpop.xlane.xlu0 %6505 }
0x15ef   : > { %10434 = vrcp.f32 %v5037_v2  ;;  %v6507_v50 = vmax.f32 %v6506_v56, %v14629_v19 }
0x15f0   : > { %8576 = vmatmul.mubr.f32.gmra.mxu0 %v8399_v21 }
0x15f1   : > { %v6508_v7 = vsub.f32 %v6506_v56, %v6507_v50  ;;  %v6513_v59 = vsub.f32 %v14629_v19, %v6507_v50  ;;  %8580 = vmatprep.mubr.f32.mxu0 %v8404_v12  ;;  %v4865_v56 = vpop.permute.xlu1 %4864  ;;  %v4846_v50 = vld [vmem:[#allocation2 + $0x128] ss:$0 sm:$0xff] }
0x15f2   : > { %v4852_v21 = vmul.f32 %v14208_v43, %v4846_v50 }
0x15f3   : > { %v6509_v40 = vmul.f32 1.442695, %v6508_v7  ;;  %v6514_v24 = vmul.f32 1.442695, %v6513_v59  ;;  %v14630_v59 = vld [vmem:[#allocation29_spill] sm:$0xff] }
0x15f4   : > { %8581 = vmatmul.mubr.f32.gmra.mxu0 %v8403_v61 }
0x15f5   : > { %10436 = vpow2.f32 %v6509_v40  ;;  %8585 = vmatprep.mubr.f32.mxu0 %v8408_v16  ;;  %v4961_v14 = vpop.permute.xlu1 %4960  ;;  %v8431_v16 = vld [vmem:[#allocation2 + $0x120] sm:$0x1] }
0x15f6   : > { %10438 = vpow2.f32 %v6514_v24  ;;  %v4963_v12 = vmul.f32 %v4961_v14, %v4828_v58 }
0x15f7   : > { %10440 = vpow2.f32 %v6623_v46 }
0x15f8   : > { %8586 = vmatmul.mubr.f32.gmra.mxu0 %v8407_v9  ;;  %10442 = vrcp.f32 %v8208_v51  ;;  %v5034_v61 = vadd.f32 %v14630_v59, %v4963_v12  ;;  %v14346_v51 = vld [vmem:[%s14387_s4] ss:$0 sm:$0xff] }
0x15f9   : > { %8590 = vmatprep.mubr.f32.mxu0 %v8412_v1 }
0x15fc   : > { %v10435_v60 = vpop.eup %10434  ;;  %8591 = vmatmul.mubr.f32.gmra.mxu0 %v8411_v44 }
0x15fd   : > { %5041 = vperm.xlu1 %9947, %v10435_v60   ;;  %8595 = vmatprep.mubr.f32.mxu0 %v8416_v0 }
0x1600   : > { %8596 = vmatmul.mubr.f32.gmra.mxu0 %v8415_v45 }
0x1601   : > { %8600 = vmatprep.mubr.f32.mxu0 %v8420_v28 }
0x1602   : > { %v10437_v11 = vpop.eup %10436 }
0x1603   : > { %v10439_v36 = vpop.eup %10438  ;;  %v6512_v35 = vmul.f32 %v10437_v11, %v6511_v4 }
0x1604   : > { %v10441_v49 = vpop.eup %10440  ;;  %8601 = vmatmul.mubr.f32.gmra.mxu0 %v8419_v15  ;;  %v6517_v48 = vmul.f32 %v10439_v36, %v6516_v57 }
0x1605   : > { %6523 = vperm.xlu0 %9946, %v6512_v35   ;;  %8605 = vmatprep.mubr.f32.mxu0 %v8424_v17  ;;  %v6626_v22 = vmul.f32 %v10441_v49, %v6625_v62  ;;  %v10443_v39 = vpop.eup %10442 }
0x1606   : > { %6529 = vperm.xlu1 %9947, %v6517_v48   ;;  %v6519_v30 = vadd.f32 %v6517_v48, %v6512_v35 }
0x1608   : > { %v6534_v13 = vmul.f32 3.0, %v6519_v30  ;;  %8606 = vmatmul.mubr.f32.gmra.mxu0 %v8423_v52 }
0x1609   : > { %6634 = vperm.xlu0 %9946, %v6626_v22   ;;  %8610 = vmatprep.mubr.f32.mxu0 %v8428_v34 }
0x160a   : > { %10444 = vrcp.f32 %v6534_v13 }
0x160b   : > { %10446 = vpow2.f32 %v8297_v26 }
0x160c   : > { %8611 = vmatmul.mubr.f32.gmra.mxu0 %v8427_v25 }
0x160d   : > { %8197 = vperm.xlu0 %9946, %v8186_v42   ;;  %v9312_v42 = vpop.f32.mrf.mxu1 }
0x160e   : > { %v9313_v36 = vadd.f32 %v9312_v42, %v9311_v38 }
0x160f   : > { %v9314_v43 = vpop.f32.mrf.mxu1 }
0x1611   : > { %8212 = vperm.xlu0 %9946, %v10443_v39  }
0x1617   : > { %v10445_v27 = vpop.eup %10444 }
0x1618   : > { %6538 = vperm.xlu1 %9947, %v10445_v27   ;;  %v10447_v23 = vpop.eup %10446 }
0x1619   : > { %v8300_v41 = vmul.f32 %v10447_v23, %v8299_v37 }
0x1656   : > { %v8303_v20 = vpop.xlane.xlu0 %8302 }
0x1657   : > { %v8304_v5 = vadd.f32 %v8303_v20, %v8300_v41 }
0x1659   : > { %v8385_v18 = vmul.f32 3.0, %v8304_v5 }
0x165a   : > { %v6629_v10 = vpop.xlane.xlu0 %6628 }
0x165b   : > { %10448 = vrcp.f32 %v8385_v18  ;;  %v6630_v53 = vadd.f32 %v6629_v10, %v6626_v22 }
0x165d   : > { %v6711_v55 = vmul.f32 3.0, %v6630_v53 }
0x165f   : > { %10450 = vrcp.f32 %v6711_v55 }
0x1662   : > { %v4856_v19 = vpop.permute.xlu0 %4855 }
0x1663   : > { %v4858_v63 = vmul.f32 %v4856_v19, %v4828_v58 }
0x1665   : > { %v4859_v7 = vadd.f32 %v4858_v63, %v4852_v21 }
0x1667   : > { %v4867_v46 = vmul.f32 %v4865_v56, %v4859_v7 }
0x1668   : > { %v10449_v2 = vpop.eup %10448 }
0x1669   : > { %8389 = vperm.xlu0 %9946, %v10449_v2  }
0x166c   : > { %v10451_v6 = vpop.eup %10450 }
0x166d   : > { %6715 = vperm.xlu1 %9947, %v10451_v6  }
0x1671   : > { %8203 = vperm.xlu1 %9947, %v14333_v29   ;;  %v9315_v29 = vpop.f32.mrf.mxu1 }
0x1672   : > { %v9316_v30 = vadd.f32 %v9315_v29, %v9314_v43 }
0x1673   : > { %v9317_v1 = vpop.f32.mrf.mxu1 }
0x1675   : > { %8308 = vperm.xlu1 %9947, %v8300_v41   ;;  %v9318_v44 = vpop.f32.mrf.mxu1 }
0x1676   : > { %v9319_v27 = vadd.f32 %v9318_v44, %v9317_v1 }
0x1677   : > { %v9320_v33 = vpop.f32.mrf.mxu1 }
0x1678   : > { %v5042_v47 = vpop.permute.xlu1 %5041 }
0x1679   : > { %v5044_v40 = vmul.f32 %v5042_v47, %v5034_v61  ;;  %v9321_v60 = vpop.f32.mrf.mxu1 }
0x167a   : > { %v9322_v5 = vadd.f32 %v9321_v60, %v9320_v33 }
0x167b   : > { %v5045_v24 = vadd.f32 %v5044_v40, %v4867_v46  ;;  %v9323_v0 = vpop.f32.mrf.mxu1 }
0x167d   : > { %5046 = vst [vmem:[#allocation2 + $0x128] sm:$0x1] %v5045_v24  ;;  %v9324_v57 = vpop.f32.mrf.mxu1 }
0x167e   : > { %v9325_v6 = vadd.f32 %v9324_v57, %v9323_v0 }
0x167f   : > { %v9326_v17 = vpop.f32.mrf.mxu1 }
0x1680   : > { %v6524_v57 = vpop.permute.xlu0 %6523 }
0x1681   : > { %v9327_v25 = vpop.f32.mrf.mxu1 }
0x1682   : > { %v9328_v12 = vadd.f32 %v9327_v25, %v9326_v17 }
0x1683   : > { %v9329_v41 = vpop.f32.mrf.mxu1 }
0x1684   : > { %v8432_v31 = vld [vmem:[#allocation2 + $0x128] sm:$0x1] }
0x1685   : > { %8615 = vmatprep.mubr.f32.mxu0 %v8432_v31  ;;  %v9330_v2 = vpop.f32.mrf.mxu1 }
0x1686   : > { %8616 = vmatmul.mubr.f32.gmra.mxu0 %v8431_v16  ;;  %v9331_v24 = vadd.f32 %v9330_v2, %v9329_v41 }
0x1687   : > { %v9332_v50 = vpop.f32.mrf.mxu1 }
0x1689   : > { %v9333_v46 = vpop.f32.mrf.mxu1 }
0x168a   : > { %v9334_v29 = vadd.f32 %v9333_v46, %v9332_v50 }
0x168b   : > { %v9335_v16 = vpop.f32.mrf.mxu1 }
0x168c   : > { %v14341_v54 = vpop.f32.mrf.mxu0 }
0x168d   : > { %v9336_v44 = vpop.f32.mrf.mxu1 }
0x168e   : > { %v9908_v9 = vpop.f32.mrf.mxu0 }
0x16ac   : > { %v9249_v45 = vpop.f32.mrf.mxu0 }
0x16ae   : > { %v9250_v28 = vpop.f32.mrf.mxu0 }
0x16af   : > { %v9251_v4 = vadd.f32 %v9250_v28, %v9249_v45  ;;  %v9337_v45 = vadd.f32 %v9336_v44, %v9335_v16 }
0x16b0   : > { %v9252_v11 = vpop.f32.mrf.mxu0 }
0x16b1   : > { %v8573_v15 = vadd.f32 %v9251_v4, %v14346_v51 }
0x16b2   : > { %v9253_v35 = vpop.f32.mrf.mxu0 }
0x16b3   : > { %v8688_v49 = vadd.f32 %v9313_v36, %v8573_v15  ;;  %v9254_v48 = vadd.f32 %v9253_v35, %v9252_v11  ;;  %v6530_v11 = vpop.permute.xlu1 %6529  ;;  %v6635_v36 = vpop.permute.xlu0 %6634  ;;  %v6502_v15 = vld [vmem:[#allocation2 + $0x10] ss:$0 sm:$0xff] }
0x16b4   : > { %v9255_v62 = vpop.f32.mrf.mxu0  ;;  %v6520_v35 = vld [vmem:[#allocation2 + $0x130] ss:$0 sm:$0xff]  ;;  %v6637_v17 = vmul.f32 %v6635_v36, %v6502_v15 }
0x16b5   : > { %8736 = vst [vmem:[%s14354_s25] sm:$0xff] %v8688_v49  ;;  %v8578_v52 = vadd.f32 %v9254_v48, %v14346_v51  ;;  %v6532_v49 = vmul.f32 %v6530_v11, %v6502_v15  ;;  %v6526_v48 = vmul.f32 %v6524_v57, %v6520_v35 }
0x16b6   : > { %v9256_v22 = vpop.f32.mrf.mxu0 }
0x16b7   : > { %v8693_v13 = vadd.f32 %v9316_v30, %v8578_v52  ;;  %v9257_v34 = vadd.f32 %v9256_v22, %v9255_v62  ;;  %v6539_v62 = vpop.permute.xlu1 %6538  ;;  %v6533_v30 = vadd.f32 %v6532_v49, %v6526_v48  ;;  %v14631_v52 = vld [vmem:[#allocation20_spill] sm:$0xff] }
0x16b8   : > { %v9258_v39 = vpop.f32.mrf.mxu0  ;;  %v6708_v22 = vadd.f32 %v14631_v52, %v6637_v17 }
0x16b9   : > { %8737 = vst [vmem:[%s14354_s25 + $0x8] sm:$0xff] %v8693_v13  ;;  %v8583_v32 = vadd.f32 %v9257_v34, %v14346_v51  ;;  %v6541_v34 = vmul.f32 %v6539_v62, %v6533_v30 }
0x16ba   : > { %v9259_v26 = vpop.f32.mrf.mxu0 }
0x16bb   : > { %v8698_v23 = vadd.f32 %v9319_v27, %v8583_v32  ;;  %v9260_v37 = vadd.f32 %v9259_v26, %v9258_v39  ;;  %v8198_v39 = vpop.permute.xlu0 %8197 }
0x16bc   : > { %v9261_v20 = vpop.f32.mrf.mxu0 }
0x16bd   : > { %8738 = vst [vmem:[%s14354_s25 + $0x10] sm:$0xff] %v8698_v23  ;;  %v8588_v18 = vadd.f32 %v9260_v37, %v14346_v51  ;;  %v8200_v23 = vmul.f32 %v8198_v39, %v14216_v3 }
0x16be   : > { %v9262_v10 = vpop.f32.mrf.mxu0 }
0x16bf   : > { %v8703_v53 = vadd.f32 %v9322_v5, %v8588_v18  ;;  %v9263_v55 = vadd.f32 %v9262_v10, %v9261_v20  ;;  %v8213_v37 = vpop.permute.xlu0 %8212 }
0x16c0   : > { %v9264_v56 = vpop.f32.mrf.mxu0 }
0x16c1   : > { %8739 = vst [vmem:[%s14354_s25 + $0x18] sm:$0xff] %v8703_v53  ;;  %v8593_v19 = vadd.f32 %v9263_v55, %v14346_v51 }
0x16c2   : > { %v9265_v58 = vpop.f32.mrf.mxu0 }
0x16c3   : > { %v8708_v14 = vadd.f32 %v9325_v6, %v8593_v19  ;;  %v9266_v63 = vadd.f32 %v9265_v58, %v9264_v56 }
0x16c4   : > { %v9267_v21 = vpop.f32.mrf.mxu0 }
0x16c5   : > { %8740 = vst [vmem:[%s14354_s25 + $0x20] sm:$0xff] %v8708_v14  ;;  %v8598_v7 = vadd.f32 %v9266_v63, %v14346_v51 }
0x16c6   : > { %v9268_v59 = vpop.f32.mrf.mxu0 }
0x16c7   : > { %v8713_v61 = vadd.f32 %v9328_v12, %v8598_v7  ;;  %v9269_v47 = vadd.f32 %v9268_v59, %v9267_v21 }
0x16c8   : > { %v9270_v40 = vpop.f32.mrf.mxu0 }
0x16c9   : > { %8741 = vst [vmem:[%s14354_s25 + $0x28] sm:$0xff] %v8713_v61  ;;  %v8603_v31 = vadd.f32 %v9269_v47, %v14346_v51 }
0x16ca   : > { %v9271_v38 = vpop.f32.mrf.mxu0 }
0x16cb   : > { %v8718_v9 = vadd.f32 %v9331_v24, %v8603_v31  ;;  %v9272_v42 = vadd.f32 %v9271_v38, %v9270_v40 }
0x16cc   : > { %v9273_v43 = vpop.f32.mrf.mxu0 }
0x16cd   : > { %8742 = vst [vmem:[%s14354_s25 + $0x30] sm:$0xff] %v8718_v9  ;;  %v8608_v1 = vadd.f32 %v9272_v42, %v14346_v51 }
0x16ce   : > { %v9274_v33 = vpop.f32.mrf.mxu0 }
0x16cf   : > { %v8723_v60 = vadd.f32 %v9334_v29, %v8608_v1  ;;  %v9275_v0 = vadd.f32 %v9274_v33, %v9273_v43 }
0x16d1   : > { %8743 = vst [vmem:[%s14354_s25 + $0x38] sm:$0xff] %v8723_v60  ;;  %v8613_v28 = vadd.f32 %v9275_v0, %v14346_v51 }
0x16d3   : > { %v8728_v4 = vadd.f32 %v9337_v45, %v8613_v28 }
0x16d5   : > { %8744 = vst [vmem:[%s14354_s25 + $0x40] sm:$0xff] %v8728_v4 }
0x16e4   : > { %v8390_v10 = vpop.permute.xlu0 %8389 }
0x16e8   : > { %v6716_v13 = vpop.permute.xlu1 %6715 }
0x16e9   : > { %v6718_v25 = vmul.f32 %v6716_v13, %v6708_v22 }
0x16eb   : > { %v6719_v27 = vadd.f32 %v6718_v25, %v6541_v34 }
0x16ec   : > { %v8204_v32 = vpop.permute.xlu1 %8203 }
0x16ed   : > { %6720 = vst [vmem:[#allocation2 + $0x130] sm:$0x1] %v6719_v27  ;;  %v8206_v26 = vmul.f32 %v8204_v32, %v14210_v8 }
0x16ef   : > { %v8207_v20 = vadd.f32 %v8206_v26, %v8200_v23 }
0x16f0   : > { %v8309_v41 = vpop.permute.xlu1 %8308 }
0x16f1   : > { %v8311_v5 = vmul.f32 %v8309_v41, %v14210_v8  ;;  %v8215_v53 = vmul.f32 %v8213_v37, %v8207_v20 }
0x16f3   : > { %v8382_v18 = vadd.f32 %v14341_v54, %v8311_v5 }
0x16f4   : > { %v8433_v6 = vld [vmem:[#allocation2 + $0x130] sm:$0x1] }
0x16f5   : > { %v8392_v55 = vmul.f32 %v8390_v10, %v8382_v18 }
0x16f7   : > { %v8393_v2 = vadd.f32 %v8392_v55, %v8215_v53 }
0x16f9   : > { %8394 = vst [vmem:[#allocation2 + $0x138] sm:$0x1] %v8393_v2 }
0x1700   : > { %v8434_v56 = vld [vmem:[#allocation2 + $0x138] sm:$0x1] }
0x1701   : > { %8730 = vmatprep.mubr.f32.mxu1 %v8434_v56 }
0x1702   : > { %8731 = vmatmul.mubr.f32.gmra.mxu1 %v8433_v6 }
0x1746   : > { %v9276_v19 = vpop.f32.mrf.mxu0 }
0x1748   : > { %v9277_v58 = vpop.f32.mrf.mxu0 }
0x1749   : > { %v9278_v3 = vadd.f32 %v9277_v58, %v9276_v19 }
0x174b   : > { %v8618_v50 = vadd.f32 %v9278_v3, %v14346_v51 }
0x17c2   : > { %v9338_v14 = vpop.f32.mrf.mxu1 }
0x17c4   : > { %v9339_v63 = vpop.f32.mrf.mxu1 }
0x17c5   : > { %v9340_v8 = vadd.f32 %v9339_v63, %v9338_v14 }
0x17c7   : > { %v8733_v21 = vadd.f32 %v9340_v8, %v8618_v50 }
0x17c9   : > { %8745 = vst [vmem:[%s14354_s25 + $0x48] sm:$0x1] %v8733_v21 }
0x17ca PF: > { %s37_s2 = sadd.s32 1, %s10534_s2  }
0x17cb   : > { %p34_p3 = scmp.ge.s32.totalorder %s37_s2, 4  }
0x17cd   :  { %36 = sbr.rel (!%p34_p3) target bundleno = 7 (0x7), region = 135 }
0x17d2   :  { %8767 = vsyncpa [#allocation7], 1 }
0x17d3   :  { %8769 = vsyncpa [#allocation7 + $0x1], 1 }
0x17d4   :  { %8770 = vsyncpa [#allocation9], 1 }

</bundles_post_ra>
